<compile_context>
chip_gen: v7x
topology: tpu7x:2x2x1
jax: 0.10.0
libtpu: 0.0.40
codegen_flags: <defaults>
</compile_context>

<pallas_src>
import jax
import jax.numpy as jnp
from jax import lax
from jax.experimental import pallas as pl
from jax.experimental.pallas import tpu as pltpu

PAD = 1
INF = 1e13        # matches the reference INF used by masked_fill
SAN_T = 5         # self.T in the reference


def _san_light_kernel(
    x_ref, mc_ref, mr_ref, pbm_ref, ptm_ref,
    sel_e12_ref, sel_o12_ref, sel_e3_ref, sel_o3_ref,
    wih1_ref, whh1_ref, b1_ref,
    wih2_ref, whh2_ref, b2_ref,
    wih3_ref, whh3_ref, b3_ref,
    gwih_ref, gwhh_ref, gbih_ref, gbhh_ref,
    th2_ref, th4_ref,
    out_ref,
):
    f32 = jnp.float32
    B, S = mc_ref.shape[0], mc_ref.shape[1]
    Bt = 2 * B                       # both sentences batched through the LSTMs
    E = x_ref.shape[1]

    # ------------------------------ helpers ------------------------------
    def softmax(x, axis):
        m = jnp.max(x, axis=axis, keepdims=True)
        e = jnp.exp(x - m)
        return e / jnp.sum(e, axis=axis, keepdims=True)

    def max_out2(x, sel_e, sel_o):   # torch max_out(x, 2): pairwise lane max
        return jnp.maximum(jnp.dot(x, sel_e, preferred_element_type=f32),
                           jnp.dot(x, sel_o, preferred_element_type=f32))

    # direction-placement masks for the fused (2*Bt)-row recurrence (built once)
    row = lax.broadcasted_iota(jnp.int32, (2 * Bt, 1), 0)
    m_fwd = (row < Bt).astype(f32)
    m_bwd = 1.0 - m_fwd

    def bilstm(x2d, wih_ref, whh_ref, b_ref):
        # x2d: (S*Bt, Din) time-major (row = t*Bt + bt).
        # wih: (Din, 8H) = [wih_f | wih_b]; whh: (2H, 4H) = [whh_f ; whh_b];
        # b: (1, 8H) = [b_f | b_b] (ih+hh biases combined).
        H = whh_ref.shape[1] // 4
        wih, whh, b = wih_ref[...], whh_ref[...], b_ref[...]
        # hoisted input projection for BOTH directions: one big matmul + bias
        xg = jnp.dot(x2d, wih, preferred_element_type=f32) + b       # (S*Bt, 8H)

        # fused fwd/bwd recurrence: fwd processes time t, bwd time S-1-t in the
        # same iteration; h lives lane-padded so one block-diag matmul serves
        # both directions.  2*Bt = 8 rows -> full sublane tile per step.
        h_pad = jnp.zeros((2 * Bt, 2 * H), f32)
        c = jnp.zeros((2 * Bt, H), f32)
        hist = []
        for t in range(S):           # S is small & static -> unrolled
            tb = S - 1 - t
            xg_t = jnp.concatenate(
                [xg[t * Bt:(t + 1) * Bt, 0:4 * H],          # fwd gates, time t
                 xg[tb * Bt:(tb + 1) * Bt, 4 * H:8 * H]],    # bwd gates, time tb
                axis=0)                                      # (2*Bt, 4H)
            g = xg_t + jnp.dot(h_pad, whh, preferred_element_type=f32)
            i_g = jax.nn.sigmoid(g[:, 0:H])
            f_g = jax.nn.sigmoid(g[:, H:2 * H])
            c_g = jnp.tanh(g[:, 2 * H:3 * H])
            o_g = jax.nn.sigmoid(g[:, 3 * H:4 * H])
            c = f_g * c + i_g * c_g
            h = o_g * jnp.tanh(c)                            # (2*Bt, H)
            # re-pad: fwd rows keep h in lanes [0:H], bwd rows in [H:2H]
            h_pad = jnp.concatenate([h * m_fwd, h * m_bwd], axis=-1)
            hist.append(h_pad)       # history stays in vregs; no VMEM stores
        # assemble time-major [h_fwd(t) | h_bwd(t)] rows; hist[t][:Bt] is
        # [h_f(t) | 0] and hist[S-1-t][Bt:] is [0 | h_b(t)] -> a single add.
        rows = [hist[t][0:Bt, :] + hist[S - 1 - t][Bt:2 * Bt, :]
                for t in range(S)]
        return jnp.concatenate(rows, axis=0)                 # (S*Bt, 2H)

    # ------------------ stages 1 & 2: shared biLSTMs + max_out -------------
    x2d = x_ref[...]                                          # (S*Bt, E)
    sel_e12, sel_o12 = sel_e12_ref[...], sel_o12_ref[...]     # 2E -> E
    sel_e3, sel_o3 = sel_e3_ref[...], sel_o3_ref[...]         # 8E -> 4E

    h1 = bilstm(x2d, wih1_ref, whh1_ref, b1_ref)              # (S*Bt, 2E)
    m1 = max_out2(h1, sel_e12, sel_o12)                       # cs1/rs1 (S*Bt, E)
    h2 = bilstm(m1, wih2_ref, whh2_ref, b2_ref)
    m2 = max_out2(h2, sel_e12, sel_o12)                       # cs2/rs2 (S*Bt, E)
    cr = jnp.concatenate([m1, m2], axis=-1)                   # cs/rs (S*Bt, 2E)

    # ------------------ masked co-attention (fully batched) ----------------
    pbm, ptm = pbm_ref[...], ptm_ref[...]        # time-major <-> batch-major
    cr_bm = jnp.dot(pbm, cr, preferred_element_type=f32)      # (Bt*S, 2E)
    cs = jnp.stack([cr_bm[b * S:(b + 1) * S, :] for b in range(B)], axis=0)
    rs = jnp.stack([cr_bm[(B + b) * S:(B + b + 1) * S, :] for b in range(B)],
                   axis=0)                                    # (B, S, 2E) each

    att = jnp.einsum('bmh,bnh->bmn', cs, rs, preferred_element_type=f32)
    pad = jnp.maximum(mc_ref[...], mr_ref[...])               # (B,S,1)|(B,1,S)
    att = jnp.where(pad > 0.5, -INF, att)                     # masked_fill
    c_att = softmax(att, axis=2)                              # softmax over N
    r_att = softmax(att, axis=1)                              # softmax over M
    c_hat = jnp.einsum('bmn,bnh->bmh', c_att, rs, preferred_element_type=f32)
    r_hat = jnp.einsum('bnm,bmh->bnh', jnp.swapaxes(r_att, 1, 2), cs,
                       preferred_element_type=f32)
    c_u = jnp.concatenate([cs, c_hat], axis=-1)               # (B, S, 4E)
    r_u = jnp.concatenate([rs, r_hat], axis=-1)               # (B, S, 4E)
    u_bm = jnp.concatenate([c_u[b] for b in range(B)]
                           + [r_u[b] for b in range(B)], axis=0)   # (Bt*S, 4E)
    u_tm = jnp.dot(ptm, u_bm, preferred_element_type=f32)     # time-major

    # ------------------ stage 3: shared biLSTM + max_out --------------------
    h3 = bilstm(u_tm, wih3_ref, whh3_ref, b3_ref)             # (S*Bt, 8E)
    m3 = max_out2(h3, sel_e3, sel_o3)                         # c_m/r_m (S*Bt, 4E)
    m3_bm = jnp.dot(pbm, m3, preferred_element_type=f32)      # (Bt*S, 4E)
    cm = jnp.stack([m3_bm[b * S:(b + 1) * S, :] for b in range(B)], axis=0)
    rm = jnp.stack([m3_bm[(B + b) * S:(B + b + 1) * S, :] for b in range(B)],
                   axis=0)                                    # (B, S, 4E) each

    # ------------------ SAN pointer loop (T steps, GRUCell, batched) --------
    th2 = th2_ref[...]                                        # (1, 4E)
    th4 = th4_ref[...]                                        # (1, 16E)
    gwih, gwhh = gwih_ref[...], gwhh_ref[...]                 # (4E, 12E)
    gbih, gbhh = gbih_ref[...], gbhh_ref[...]                 # (1, 12E)
    G = gwhh.shape[0]                                         # 4E

    # s_0[b] = sum_m softmax_m(theta2(c_m[b])) * c_m[b]   (theta2 on the VPU)
    w0 = softmax(jnp.sum(cm * th2, axis=-1), axis=-1)         # (B, S)
    s = jnp.sum(w0[:, :, None] * cm, axis=1)                  # (B, 4E)

    p_sum = jnp.zeros((B, 1), f32)
    for t in range(SAN_T):
        a = softmax(jnp.sum(s[:, None, :] * rm, axis=-1), axis=-1)   # (B, S)
        x_t = jnp.sum(a[:, :, None] * rm, axis=1)                    # (B, 4E)
        feat = jnp.concatenate([x_t, s, x_t - s, x_t * s], axis=-1)  # (B, 16E)
        p_sum = p_sum + jnp.sum(feat * th4, axis=-1, keepdims=True)  # theta4 (VPU)
        if t != SAN_T - 1:
            # torch.nn.GRUCell(x, s): gate order r, z, n
            gi = jnp.dot(x_t, gwih, preferred_element_type=f32) + gbih
            gh = jnp.dot(s, gwhh, preferred_element_type=f32) + gbhh
            r_g = jax.nn.sigmoid(gi[:, 0:G] + gh[:, 0:G])
            z_g = jax.nn.sigmoid(gi[:, G:2 * G] + gh[:, G:2 * G])
            n_g = jnp.tanh(gi[:, 2 * G:3 * G] + r_g * gh[:, 2 * G:3 * G])
            s = (1.0 - z_g) * n_g + z_g * s

    out_ref[...] = p_sum * (1.0 / SAN_T)                      # mean over T


def san_light_forward(params, x1, x2):
    B, M = x1.shape
    _, N = x2.shape
    # TODO(synk): the fused kernel batches both sentences through the shared
    # biLSTMs, so x1/x2 must be padded to a common length when M != N.
    assert M == N, "fused kernel expects x1 and x2 padded to the same length"
    S, Bt = M, 2 * B
    E = params["emb"].shape[1]
    f32 = jnp.float32

    # Embedding lookup + layout plumbing (tiny fused XLA ops outside the kernel).
    ids = jnp.concatenate([x1, x2], axis=0)                   # (2B, S)
    xx = jnp.take(params["emb"], ids, axis=0)                 # (2B, S, E)
    x2d = jnp.transpose(xx, (1, 0, 2)).reshape(S * Bt, E)     # time-major flat

    mask_c = (x1 == PAD).astype(f32)[:, :, None]              # (B, S, 1)
    mask_r = (x2 == PAD).astype(f32)[:, None, :]              # (B, 1, S)

    # constant permutation / selection matrices (constant-folded by XLA)
    r = jnp.arange(S * Bt)
    tm_of_bm = (r % S) * Bt + (r // S)
    pbm = (r[None, :] == tm_of_bm[:, None]).astype(f32)       # time- -> batch-major
    ptm = pbm.T                                               # batch- -> time-major

    def pair_sel(two_h):            # even/odd lane selection for max_out(·, 2)
        i = jnp.arange(two_h)[:, None]
        j = jnp.arange(two_h // 2)[None, :]
        return (i == 2 * j).astype(f32), (i == 2 * j + 1).astype(f32)

    sel_e12, sel_o12 = pair_sel(2 * E)
    sel_e3, sel_o3 = pair_sel(8 * E)

    def pack_bilstm(p):             # pack fwd/bwd weights for the fused recurrence
        wih = jnp.concatenate([p["wih_f"], p["wih_b"]], axis=1)    # (Din, 8H)
        whh = jnp.concatenate([p["whh_f"], p["whh_b"]], axis=0)    # (2H, 4H)
        b = jnp.concatenate([p["b_f"], p["b_b"]], axis=1)          # (1, 8H)
        return wih, whh, b

    wih1, whh1, b1 = pack_bilstm(params["rnn1"])
    wih2, whh2, b2 = pack_bilstm(params["rnn2"])
    wih3, whh3, b3 = pack_bilstm(params["rnn3"])
    g = params["gru"]

    out = pl.pallas_call(
        _san_light_kernel,
        out_shape=jax.ShapeDtypeStruct((B, 1), jnp.float32),
    )(x2d, mask_c, mask_r, pbm, ptm,
      sel_e12, sel_o12, sel_e3, sel_o3,
      wih1, whh1, b1, wih2, whh2, b2, wih3, whh3, b3,
      g["wih"], g["whh"], g["bih"], g["bhh"],
      params["theta2"], params["theta4"])
    return out[:, 0]                                          # .squeeze(-1)


def init_params(key, vocab, E):
    H3 = 4 * E
    ks = iter(jax.random.split(key, 32))

    def nrm(shape, scale=0.1):
        return scale * jax.random.normal(next(ks), shape, dtype=jnp.float32)

    def bilstm_params(din, H):
        return {
            "wih_f": nrm((din, 4 * H)), "whh_f": nrm((H, 4 * H)),
            "b_f": nrm((1, 4 * H)),     # b_ih + b_hh combined
            "wih_b": nrm((din, 4 * H)), "whh_b": nrm((H, 4 * H)),
            "b_b": nrm((1, 4 * H)),
        }

    # NOTE: the reference initializes the embedding table to zeros; random
    # values (with the padding row zeroed, as padding_idx=PAD does) give a
    # non-degenerate smoke test.
    emb = nrm((vocab, E), 1.0).at[PAD].set(0.0)
    return {
        "emb": emb,
        "rnn1": bilstm_params(E, E),            # LSTM(emb_dim, hidden_dim, bi)
        "rnn2": bilstm_params(E, E),            # LSTM(emb_dim, hidden_dim, bi)
        "rnn3": bilstm_params(4 * E, H3),       # LSTM(4H, 4H, bi)
        "gru": {"wih": nrm((H3, 3 * H3)), "whh": nrm((H3, 3 * H3)),
                "bih": nrm((1, 3 * H3)), "bhh": nrm((1, 3 * H3))},
        "theta2": nrm((1, H3)),                 # Linear(4H, 1, bias=False), row form
        "theta4": nrm((1, 4 * H3)),             # Linear(16H, 1), NUM_CLASS == 2
        # TODO(synk): theta3 is declared in the reference but never used in
        # forward(), so it is intentionally omitted.
    }


if __name__ == "__main__":
    E = 32          # EMBEDDING_DIM (= hidden_dim)
    VOCAB = 100     # VOCAB_LEN
    B, S = 2, 8     # batch, (padded) sequence length for both inputs

    key = jax.random.PRNGKey(0)
    kp, k1, k2 = jax.random.split(key, 3)
    params = init_params(kp, VOCAB, E)
    x1 = jax.random.randint(k1, (B, S), 0, VOCAB, dtype=jnp.int32)
    x2 = jax.random.randint(k2, (B, S), 0, VOCAB, dtype=jnp.int32)

    out = jax.jit(san_light_forward)(params, x1, x2)
    jax.block_until_ready(out)
    assert out.shape == (B,) and out.dtype == jnp.float32
    assert bool(jnp.all(jnp.isfinite(out)))
    print("KERNEL_OK")
</pallas_src>

<mosaic_0001>
module attributes {stable_mosaic.version = 11 : i64} {
  func.func @_san_light_kernel(%arg0: memref<32x32xf32, #tpu.memory_space<vmem>>, %arg1: memref<2x8x1xf32, #tpu.memory_space<vmem>>, %arg2: memref<2x1x8xf32, #tpu.memory_space<vmem>>, %arg3: memref<32x32xf32, #tpu.memory_space<vmem>>, %arg4: memref<32x32xf32, #tpu.memory_space<vmem>>, %arg5: memref<64x32xf32, #tpu.memory_space<vmem>>, %arg6: memref<64x32xf32, #tpu.memory_space<vmem>>, %arg7: memref<256x128xf32, #tpu.memory_space<vmem>>, %arg8: memref<256x128xf32, #tpu.memory_space<vmem>>, %arg9: memref<32x256xf32, #tpu.memory_space<vmem>>, %arg10: memref<64x128xf32, #tpu.memory_space<vmem>>, %arg11: memref<1x256xf32, #tpu.memory_space<vmem>>, %arg12: memref<32x256xf32, #tpu.memory_space<vmem>>, %arg13: memref<64x128xf32, #tpu.memory_space<vmem>>, %arg14: memref<1x256xf32, #tpu.memory_space<vmem>>, %arg15: memref<128x1024xf32, #tpu.memory_space<vmem>>, %arg16: memref<256x512xf32, #tpu.memory_space<vmem>>, %arg17: memref<1x1024xf32, #tpu.memory_space<vmem>>, %arg18: memref<128x384xf32, #tpu.memory_space<vmem>>, %arg19: memref<128x384xf32, #tpu.memory_space<vmem>>, %arg20: memref<1x384xf32, #tpu.memory_space<vmem>>, %arg21: memref<1x384xf32, #tpu.memory_space<vmem>>, %arg22: memref<1x128xf32, #tpu.memory_space<vmem>>, %arg23: memref<1x512xf32, #tpu.memory_space<vmem>>, %arg24: memref<2x1xf32, #tpu.memory_space<vmem>>) attributes {dimension_semantics = [], scalar_prefetch = 0 : i64, scratch_operands = 0 : i64, tpu.core_type = #tpu.core_type<tc>} {
    %0 = tpu.iota {dimensions = array<i32: 0>} : vector<8x1xi32>
    %c4_i32 = arith.constant 4 : i32
    %1 = vector.broadcast %c4_i32 : i32 to vector<8x1xi32>
    %2 = arith.cmpi slt, %0, %1 : vector<8x1xi32>
    %3 = arith.extui %2 : vector<8x1xi1> to vector<8x1xi32>
    %4 = arith.sitofp %3 : vector<8x1xi32> to vector<8x1xf32>
    %cst = arith.constant 1.000000e+00 : f32
    %5 = vector.broadcast %cst : f32 to vector<8x1xf32>
    %6 = arith.subf %5, %4 : vector<8x1xf32>
    %c0 = arith.constant 0 : index
    %c0_0 = arith.constant 0 : index
    %7 = vector.load %arg0[%c0, %c0_0] : memref<32x32xf32, #tpu.memory_space<vmem>>, vector<32x32xf32>
    %c0_1 = arith.constant 0 : index
    %c0_2 = arith.constant 0 : index
    %8 = vector.load %arg5[%c0_1, %c0_2] : memref<64x32xf32, #tpu.memory_space<vmem>>, vector<64x32xf32>
    %c0_3 = arith.constant 0 : index
    %c0_4 = arith.constant 0 : index
    %9 = vector.load %arg6[%c0_3, %c0_4] : memref<64x32xf32, #tpu.memory_space<vmem>>, vector<64x32xf32>
    %c0_5 = arith.constant 0 : index
    %c0_6 = arith.constant 0 : index
    %10 = vector.load %arg7[%c0_5, %c0_6] : memref<256x128xf32, #tpu.memory_space<vmem>>, vector<256x128xf32>
    %c0_7 = arith.constant 0 : index
    %c0_8 = arith.constant 0 : index
    %11 = vector.load %arg8[%c0_7, %c0_8] : memref<256x128xf32, #tpu.memory_space<vmem>>, vector<256x128xf32>
    %c0_9 = arith.constant 0 : index
    %c0_10 = arith.constant 0 : index
    %12 = vector.load %arg9[%c0_9, %c0_10] : memref<32x256xf32, #tpu.memory_space<vmem>>, vector<32x256xf32>
    %c0_11 = arith.constant 0 : index
    %c0_12 = arith.constant 0 : index
    %13 = vector.load %arg10[%c0_11, %c0_12] : memref<64x128xf32, #tpu.memory_space<vmem>>, vector<64x128xf32>
    %c0_13 = arith.constant 0 : index
    %c0_14 = arith.constant 0 : index
    %14 = vector.load %arg11[%c0_13, %c0_14] : memref<1x256xf32, #tpu.memory_space<vmem>>, vector<1x256xf32>
    %cst_15 = arith.constant dense<0.000000e+00> : vector<32x256xf32>
    %15 = tpu.matmul %7, %12, %cst_15 {dimension_numbers = #tpu.dot_dimension_numbers<[1], [0], [0], [1], [0, 0, 1, 1], [], []>} : vector<32x32xf32>, vector<32x256xf32>, vector<32x256xf32> -> vector<32x256xf32>
    %16 = vector.broadcast %14 : vector<1x256xf32> to vector<32x256xf32>
    %17 = arith.addf %15, %16 : vector<32x256xf32>
    %cst_16 = arith.constant 0.000000e+00 : f32
    %18 = vector.broadcast %cst_16 : f32 to vector<8x64xf32>
    %cst_17 = arith.constant 0.000000e+00 : f32
    %19 = vector.broadcast %cst_17 : f32 to vector<8x32xf32>
    %20 = vector.extract_strided_slice %17 {offsets = [0, 0], sizes = [4, 128], strides = [1, 1]} : vector<32x256xf32> to vector<4x128xf32>
    %21 = vector.extract_strided_slice %17 {offsets = [28, 128], sizes = [4, 128], strides = [1, 1]} : vector<32x256xf32> to vector<4x128xf32>
    %22 = tpu.concatenate %20, %21 in 0 : vector<4x128xf32>, vector<4x128xf32> -> vector<8x128xf32>
    %cst_18 = arith.constant dense<0.000000e+00> : vector<8x128xf32>
    %23 = tpu.matmul %18, %13, %cst_18 {dimension_numbers = #tpu.dot_dimension_numbers<[1], [0], [0], [1], [0, 0, 1, 1], [], []>} : vector<8x64xf32>, vector<64x128xf32>, vector<8x128xf32> -> vector<8x128xf32>
    %24 = arith.addf %22, %23 : vector<8x128xf32>
    %25 = vector.extract_strided_slice %24 {offsets = [0, 0], sizes = [8, 32], strides = [1, 1]} : vector<8x128xf32> to vector<8x32xf32>
    %26 = arith.negf %25 : vector<8x32xf32>
    %27 = math.exp %26 : vector<8x32xf32>
    %cst_19 = arith.constant 1.000000e+00 : f32
    %28 = vector.broadcast %cst_19 : f32 to vector<8x32xf32>
    %29 = arith.addf %28, %27 : vector<8x32xf32>
    %30 = arith.divf %28, %29 : vector<8x32xf32>
    %31 = vector.extract_strided_slice %24 {offsets = [0, 32], sizes = [8, 32], strides = [1, 1]} : vector<8x128xf32> to vector<8x32xf32>
    %32 = arith.negf %31 : vector<8x32xf32>
    %33 = math.exp %32 : vector<8x32xf32>
    %cst_20 = arith.constant 1.000000e+00 : f32
    %34 = vector.broadcast %cst_20 : f32 to vector<8x32xf32>
    %35 = arith.addf %34, %33 : vector<8x32xf32>
    %36 = arith.divf %34, %35 : vector<8x32xf32>
    %37 = vector.extract_strided_slice %24 {offsets = [0, 64], sizes = [8, 32], strides = [1, 1]} : vector<8x128xf32> to vector<8x32xf32>
    %38 = math.tanh %37 : vector<8x32xf32>
    %39 = vector.extract_strided_slice %24 {offsets = [0, 96], sizes = [8, 32], strides = [1, 1]} : vector<8x128xf32> to vector<8x32xf32>
    %40 = arith.negf %39 : vector<8x32xf32>
    %41 = math.exp %40 : vector<8x32xf32>
    %cst_21 = arith.constant 1.000000e+00 : f32
    %42 = vector.broadcast %cst_21 : f32 to vector<8x32xf32>
    %43 = arith.addf %42, %41 : vector<8x32xf32>
    %44 = arith.divf %42, %43 : vector<8x32xf32>
    %45 = arith.mulf %36, %19 : vector<8x32xf32>
    %46 = arith.mulf %30, %38 : vector<8x32xf32>
    %47 = arith.addf %45, %46 : vector<8x32xf32>
    %48 = math.tanh %47 : vector<8x32xf32>
    %49 = arith.mulf %44, %48 : vector<8x32xf32>
    %50 = vector.broadcast %4 : vector<8x1xf32> to vector<8x32xf32>
    %51 = arith.mulf %49, %50 : vector<8x32xf32>
    %52 = vector.broadcast %6 : vector<8x1xf32> to vector<8x32xf32>
    %53 = arith.mulf %49, %52 : vector<8x32xf32>
    %54 = tpu.concatenate %51, %53 in 1 : vector<8x32xf32>, vector<8x32xf32> -> vector<8x64xf32>
    %55 = vector.extract_strided_slice %17 {offsets = [4, 0], sizes = [4, 128], strides = [1, 1]} : vector<32x256xf32> to vector<4x128xf32>
    %56 = vector.extract_strided_slice %17 {offsets = [24, 128], sizes = [4, 128], strides = [1, 1]} : vector<32x256xf32> to vector<4x128xf32>
    %57 = tpu.concatenate %55, %56 in 0 : vector<4x128xf32>, vector<4x128xf32> -> vector<8x128xf32>
    %cst_22 = arith.constant dense<0.000000e+00> : vector<8x128xf32>
    %58 = tpu.matmul %54, %13, %cst_22 {dimension_numbers = #tpu.dot_dimension_numbers<[1], [0], [0], [1], [0, 0, 1, 1], [], []>} : vector<8x64xf32>, vector<64x128xf32>, vector<8x128xf32> -> vector<8x128xf32>
    %59 = arith.addf %57, %58 : vector<8x128xf32>
    %60 = vector.extract_strided_slice %59 {offsets = [0, 0], sizes = [8, 32], strides = [1, 1]} : vector<8x128xf32> to vector<8x32xf32>
    %61 = arith.negf %60 : vector<8x32xf32>
    %62 = math.exp %61 : vector<8x32xf32>
    %cst_23 = arith.constant 1.000000e+00 : f32
    %63 = vector.broadcast %cst_23 : f32 to vector<8x32xf32>
    %64 = arith.addf %63, %62 : vector<8x32xf32>
    %65 = arith.divf %63, %64 : vector<8x32xf32>
    %66 = vector.extract_strided_slice %59 {offsets = [0, 32], sizes = [8, 32], strides = [1, 1]} : vector<8x128xf32> to vector<8x32xf32>
    %67 = arith.negf %66 : vector<8x32xf32>
    %68 = math.exp %67 : vector<8x32xf32>
    %cst_24 = arith.constant 1.000000e+00 : f32
    %69 = vector.broadcast %cst_24 : f32 to vector<8x32xf32>
    %70 = arith.addf %69, %68 : vector<8x32xf32>
    %71 = arith.divf %69, %70 : vector<8x32xf32>
    %72 = vector.extract_strided_slice %59 {offsets = [0, 64], sizes = [8, 32], strides = [1, 1]} : vector<8x128xf32> to vector<8x32xf32>
    %73 = math.tanh %72 : vector<8x32xf32>
    %74 = vector.extract_strided_slice %59 {offsets = [0, 96], sizes = [8, 32], strides = [1, 1]} : vector<8x128xf32> to vector<8x32xf32>
    %75 = arith.negf %74 : vector<8x32xf32>
    %76 = math.exp %75 : vector<8x32xf32>
    %cst_25 = arith.constant 1.000000e+00 : f32
    %77 = vector.broadcast %cst_25 : f32 to vector<8x32xf32>
    %78 = arith.addf %77, %76 : vector<8x32xf32>
    %79 = arith.divf %77, %78 : vector<8x32xf32>
    %80 = arith.mulf %71, %47 : vector<8x32xf32>
    %81 = arith.mulf %65, %73 : vector<8x32xf32>
    %82 = arith.addf %80, %81 : vector<8x32xf32>
    %83 = math.tanh %82 : vector<8x32xf32>
    %84 = arith.mulf %79, %83 : vector<8x32xf32>
    %85 = vector.broadcast %4 : vector<8x1xf32> to vector<8x32xf32>
    %86 = arith.mulf %84, %85 : vector<8x32xf32>
    %87 = vector.broadcast %6 : vector<8x1xf32> to vector<8x32xf32>
    %88 = arith.mulf %84, %87 : vector<8x32xf32>
    %89 = tpu.concatenate %86, %88 in 1 : vector<8x32xf32>, vector<8x32xf32> -> vector<8x64xf32>
    %90 = vector.extract_strided_slice %17 {offsets = [8, 0], sizes = [4, 128], strides = [1, 1]} : vector<32x256xf32> to vector<4x128xf32>
    %91 = vector.extract_strided_slice %17 {offsets = [20, 128], sizes = [4, 128], strides = [1, 1]} : vector<32x256xf32> to vector<4x128xf32>
    %92 = tpu.concatenate %90, %91 in 0 : vector<4x128xf32>, vector<4x128xf32> -> vector<8x128xf32>
    %cst_26 = arith.constant dense<0.000000e+00> : vector<8x128xf32>
    %93 = tpu.matmul %89, %13, %cst_26 {dimension_numbers = #tpu.dot_dimension_numbers<[1], [0], [0], [1], [0, 0, 1, 1], [], []>} : vector<8x64xf32>, vector<64x128xf32>, vector<8x128xf32> -> vector<8x128xf32>
    %94 = arith.addf %92, %93 : vector<8x128xf32>
    %95 = vector.extract_strided_slice %94 {offsets = [0, 0], sizes = [8, 32], strides = [1, 1]} : vector<8x128xf32> to vector<8x32xf32>
    %96 = arith.negf %95 : vector<8x32xf32>
    %97 = math.exp %96 : vector<8x32xf32>
    %cst_27 = arith.constant 1.000000e+00 : f32
    %98 = vector.broadcast %cst_27 : f32 to vector<8x32xf32>
    %99 = arith.addf %98, %97 : vector<8x32xf32>
    %100 = arith.divf %98, %99 : vector<8x32xf32>
    %101 = vector.extract_strided_slice %94 {offsets = [0, 32], sizes = [8, 32], strides = [1, 1]} : vector<8x128xf32> to vector<8x32xf32>
    %102 = arith.negf %101 : vector<8x32xf32>
    %103 = math.exp %102 : vector<8x32xf32>
    %cst_28 = arith.constant 1.000000e+00 : f32
    %104 = vector.broadcast %cst_28 : f32 to vector<8x32xf32>
    %105 = arith.addf %104, %103 : vector<8x32xf32>
    %106 = arith.divf %104, %105 : vector<8x32xf32>
    %107 = vector.extract_strided_slice %94 {offsets = [0, 64], sizes = [8, 32], strides = [1, 1]} : vector<8x128xf32> to vector<8x32xf32>
    %108 = math.tanh %107 : vector<8x32xf32>
    %109 = vector.extract_strided_slice %94 {offsets = [0, 96], sizes = [8, 32], strides = [1, 1]} : vector<8x128xf32> to vector<8x32xf32>
    %110 = arith.negf %109 : vector<8x32xf32>
    %111 = math.exp %110 : vector<8x32xf32>
    %cst_29 = arith.constant 1.000000e+00 : f32
    %112 = vector.broadcast %cst_29 : f32 to vector<8x32xf32>
    %113 = arith.addf %112, %111 : vector<8x32xf32>
    %114 = arith.divf %112, %113 : vector<8x32xf32>
    %115 = arith.mulf %106, %82 : vector<8x32xf32>
    %116 = arith.mulf %100, %108 : vector<8x32xf32>
    %117 = arith.addf %115, %116 : vector<8x32xf32>
    %118 = math.tanh %117 : vector<8x32xf32>
    %119 = arith.mulf %114, %118 : vector<8x32xf32>
    %120 = vector.broadcast %4 : vector<8x1xf32> to vector<8x32xf32>
    %121 = arith.mulf %119, %120 : vector<8x32xf32>
    %122 = vector.broadcast %6 : vector<8x1xf32> to vector<8x32xf32>
    %123 = arith.mulf %119, %122 : vector<8x32xf32>
    %124 = tpu.concatenate %121, %123 in 1 : vector<8x32xf32>, vector<8x32xf32> -> vector<8x64xf32>
    %125 = vector.extract_strided_slice %17 {offsets = [12, 0], sizes = [4, 128], strides = [1, 1]} : vector<32x256xf32> to vector<4x128xf32>
    %126 = vector.extract_strided_slice %17 {offsets = [16, 128], sizes = [4, 128], strides = [1, 1]} : vector<32x256xf32> to vector<4x128xf32>
    %127 = tpu.concatenate %125, %126 in 0 : vector<4x128xf32>, vector<4x128xf32> -> vector<8x128xf32>
    %cst_30 = arith.constant dense<0.000000e+00> : vector<8x128xf32>
    %128 = tpu.matmul %124, %13, %cst_30 {dimension_numbers = #tpu.dot_dimension_numbers<[1], [0], [0], [1], [0, 0, 1, 1], [], []>} : vector<8x64xf32>, vector<64x128xf32>, vector<8x128xf32> -> vector<8x128xf32>
    %129 = arith.addf %127, %128 : vector<8x128xf32>
    %130 = vector.extract_strided_slice %129 {offsets = [0, 0], sizes = [8, 32], strides = [1, 1]} : vector<8x128xf32> to vector<8x32xf32>
    %131 = arith.negf %130 : vector<8x32xf32>
    %132 = math.exp %131 : vector<8x32xf32>
    %cst_31 = arith.constant 1.000000e+00 : f32
    %133 = vector.broadcast %cst_31 : f32 to vector<8x32xf32>
    %134 = arith.addf %133, %132 : vector<8x32xf32>
    %135 = arith.divf %133, %134 : vector<8x32xf32>
    %136 = vector.extract_strided_slice %129 {offsets = [0, 32], sizes = [8, 32], strides = [1, 1]} : vector<8x128xf32> to vector<8x32xf32>
    %137 = arith.negf %136 : vector<8x32xf32>
    %138 = math.exp %137 : vector<8x32xf32>
    %cst_32 = arith.constant 1.000000e+00 : f32
    %139 = vector.broadcast %cst_32 : f32 to vector<8x32xf32>
    %140 = arith.addf %139, %138 : vector<8x32xf32>
    %141 = arith.divf %139, %140 : vector<8x32xf32>
    %142 = vector.extract_strided_slice %129 {offsets = [0, 64], sizes = [8, 32], strides = [1, 1]} : vector<8x128xf32> to vector<8x32xf32>
    %143 = math.tanh %142 : vector<8x32xf32>
    %144 = vector.extract_strided_slice %129 {offsets = [0, 96], sizes = [8, 32], strides = [1, 1]} : vector<8x128xf32> to vector<8x32xf32>
    %145 = arith.negf %144 : vector<8x32xf32>
    %146 = math.exp %145 : vector<8x32xf32>
    %cst_33 = arith.constant 1.000000e+00 : f32
    %147 = vector.broadcast %cst_33 : f32 to vector<8x32xf32>
    %148 = arith.addf %147, %146 : vector<8x32xf32>
    %149 = arith.divf %147, %148 : vector<8x32xf32>
    %150 = arith.mulf %141, %117 : vector<8x32xf32>
    %151 = arith.mulf %135, %143 : vector<8x32xf32>
    %152 = arith.addf %150, %151 : vector<8x32xf32>
    %153 = math.tanh %152 : vector<8x32xf32>
    %154 = arith.mulf %149, %153 : vector<8x32xf32>
    %155 = vector.broadcast %4 : vector<8x1xf32> to vector<8x32xf32>
    %156 = arith.mulf %154, %155 : vector<8x32xf32>
    %157 = vector.broadcast %6 : vector<8x1xf32> to vector<8x32xf32>
    %158 = arith.mulf %154, %157 : vector<8x32xf32>
    %159 = tpu.concatenate %156, %158 in 1 : vector<8x32xf32>, vector<8x32xf32> -> vector<8x64xf32>
    %160 = vector.extract_strided_slice %17 {offsets = [16, 0], sizes = [4, 128], strides = [1, 1]} : vector<32x256xf32> to vector<4x128xf32>
    %161 = vector.extract_strided_slice %17 {offsets = [12, 128], sizes = [4, 128], strides = [1, 1]} : vector<32x256xf32> to vector<4x128xf32>
    %162 = tpu.concatenate %160, %161 in 0 : vector<4x128xf32>, vector<4x128xf32> -> vector<8x128xf32>
    %cst_34 = arith.constant dense<0.000000e+00> : vector<8x128xf32>
    %163 = tpu.matmul %159, %13, %cst_34 {dimension_numbers = #tpu.dot_dimension_numbers<[1], [0], [0], [1], [0, 0, 1, 1], [], []>} : vector<8x64xf32>, vector<64x128xf32>, vector<8x128xf32> -> vector<8x128xf32>
    %164 = arith.addf %162, %163 : vector<8x128xf32>
    %165 = vector.extract_strided_slice %164 {offsets = [0, 0], sizes = [8, 32], strides = [1, 1]} : vector<8x128xf32> to vector<8x32xf32>
    %166 = arith.negf %165 : vector<8x32xf32>
    %167 = math.exp %166 : vector<8x32xf32>
    %cst_35 = arith.constant 1.000000e+00 : f32
    %168 = vector.broadcast %cst_35 : f32 to vector<8x32xf32>
    %169 = arith.addf %168, %167 : vector<8x32xf32>
    %170 = arith.divf %168, %169 : vector<8x32xf32>
    %171 = vector.extract_strided_slice %164 {offsets = [0, 32], sizes = [8, 32], strides = [1, 1]} : vector<8x128xf32> to vector<8x32xf32>
    %172 = arith.negf %171 : vector<8x32xf32>
    %173 = math.exp %172 : vector<8x32xf32>
    %cst_36 = arith.constant 1.000000e+00 : f32
    %174 = vector.broadcast %cst_36 : f32 to vector<8x32xf32>
    %175 = arith.addf %174, %173 : vector<8x32xf32>
    %176 = arith.divf %174, %175 : vector<8x32xf32>
    %177 = vector.extract_strided_slice %164 {offsets = [0, 64], sizes = [8, 32], strides = [1, 1]} : vector<8x128xf32> to vector<8x32xf32>
    %178 = math.tanh %177 : vector<8x32xf32>
    %179 = vector.extract_strided_slice %164 {offsets = [0, 96], sizes = [8, 32], strides = [1, 1]} : vector<8x128xf32> to vector<8x32xf32>
    %180 = arith.negf %179 : vector<8x32xf32>
    %181 = math.exp %180 : vector<8x32xf32>
    %cst_37 = arith.constant 1.000000e+00 : f32
    %182 = vector.broadcast %cst_37 : f32 to vector<8x32xf32>
    %183 = arith.addf %182, %181 : vector<8x32xf32>
    %184 = arith.divf %182, %183 : vector<8x32xf32>
    %185 = arith.mulf %176, %152 : vector<8x32xf32>
    %186 = arith.mulf %170, %178 : vector<8x32xf32>
    %187 = arith.addf %185, %186 : vector<8x32xf32>
    %188 = math.tanh %187 : vector<8x32xf32>
    %189 = arith.mulf %184, %188 : vector<8x32xf32>
    %190 = vector.broadcast %4 : vector<8x1xf32> to vector<8x32xf32>
    %191 = arith.mulf %189, %190 : vector<8x32xf32>
    %192 = vector.broadcast %6 : vector<8x1xf32> to vector<8x32xf32>
    %193 = arith.mulf %189, %192 : vector<8x32xf32>
    %194 = tpu.concatenate %191, %193 in 1 : vector<8x32xf32>, vector<8x32xf32> -> vector<8x64xf32>
    %195 = vector.extract_strided_slice %17 {offsets = [20, 0], sizes = [4, 128], strides = [1, 1]} : vector<32x256xf32> to vector<4x128xf32>
    %196 = vector.extract_strided_slice %17 {offsets = [8, 128], sizes = [4, 128], strides = [1, 1]} : vector<32x256xf32> to vector<4x128xf32>
    %197 = tpu.concatenate %195, %196 in 0 : vector<4x128xf32>, vector<4x128xf32> -> vector<8x128xf32>
    %cst_38 = arith.constant dense<0.000000e+00> : vector<8x128xf32>
    %198 = tpu.matmul %194, %13, %cst_38 {dimension_numbers = #tpu.dot_dimension_numbers<[1], [0], [0], [1], [0, 0, 1, 1], [], []>} : vector<8x64xf32>, vector<64x128xf32>, vector<8x128xf32> -> vector<8x128xf32>
    %199 = arith.addf %197, %198 : vector<8x128xf32>
    %200 = vector.extract_strided_slice %199 {offsets = [0, 0], sizes = [8, 32], strides = [1, 1]} : vector<8x128xf32> to vector<8x32xf32>
    %201 = arith.negf %200 : vector<8x32xf32>
    %202 = math.exp %201 : vector<8x32xf32>
    %cst_39 = arith.constant 1.000000e+00 : f32
    %203 = vector.broadcast %cst_39 : f32 to vector<8x32xf32>
    %204 = arith.addf %203, %202 : vector<8x32xf32>
    %205 = arith.divf %203, %204 : vector<8x32xf32>
    %206 = vector.extract_strided_slice %199 {offsets = [0, 32], sizes = [8, 32], strides = [1, 1]} : vector<8x128xf32> to vector<8x32xf32>
    %207 = arith.negf %206 : vector<8x32xf32>
    %208 = math.exp %207 : vector<8x32xf32>
    %cst_40 = arith.constant 1.000000e+00 : f32
    %209 = vector.broadcast %cst_40 : f32 to vector<8x32xf32>
    %210 = arith.addf %209, %208 : vector<8x32xf32>
    %211 = arith.divf %209, %210 : vector<8x32xf32>
    %212 = vector.extract_strided_slice %199 {offsets = [0, 64], sizes = [8, 32], strides = [1, 1]} : vector<8x128xf32> to vector<8x32xf32>
    %213 = math.tanh %212 : vector<8x32xf32>
    %214 = vector.extract_strided_slice %199 {offsets = [0, 96], sizes = [8, 32], strides = [1, 1]} : vector<8x128xf32> to vector<8x32xf32>
    %215 = arith.negf %214 : vector<8x32xf32>
    %216 = math.exp %215 : vector<8x32xf32>
    %cst_41 = arith.constant 1.000000e+00 : f32
    %217 = vector.broadcast %cst_41 : f32 to vector<8x32xf32>
    %218 = arith.addf %217, %216 : vector<8x32xf32>
    %219 = arith.divf %217, %218 : vector<8x32xf32>
    %220 = arith.mulf %211, %187 : vector<8x32xf32>
    %221 = arith.mulf %205, %213 : vector<8x32xf32>
    %222 = arith.addf %220, %221 : vector<8x32xf32>
    %223 = math.tanh %222 : vector<8x32xf32>
    %224 = arith.mulf %219, %223 : vector<8x32xf32>
    %225 = vector.broadcast %4 : vector<8x1xf32> to vector<8x32xf32>
    %226 = arith.mulf %224, %225 : vector<8x32xf32>
    %227 = vector.broadcast %6 : vector<8x1xf32> to vector<8x32xf32>
    %228 = arith.mulf %224, %227 : vector<8x32xf32>
    %229 = tpu.concatenate %226, %228 in 1 : vector<8x32xf32>, vector<8x32xf32> -> vector<8x64xf32>
    %230 = vector.extract_strided_slice %17 {offsets = [24, 0], sizes = [4, 128], strides = [1, 1]} : vector<32x256xf32> to vector<4x128xf32>
    %231 = vector.extract_strided_slice %17 {offsets = [4, 128], sizes = [4, 128], strides = [1, 1]} : vector<32x256xf32> to vector<4x128xf32>
    %232 = tpu.concatenate %230, %231 in 0 : vector<4x128xf32>, vector<4x128xf32> -> vector<8x128xf32>
    %cst_42 = arith.constant dense<0.000000e+00> : vector<8x128xf32>
    %233 = tpu.matmul %229, %13, %cst_42 {dimension_numbers = #tpu.dot_dimension_numbers<[1], [0], [0], [1], [0, 0, 1, 1], [], []>} : vector<8x64xf32>, vector<64x128xf32>, vector<8x128xf32> -> vector<8x128xf32>
    %234 = arith.addf %232, %233 : vector<8x128xf32>
    %235 = vector.extract_strided_slice %234 {offsets = [0, 0], sizes = [8, 32], strides = [1, 1]} : vector<8x128xf32> to vector<8x32xf32>
    %236 = arith.negf %235 : vector<8x32xf32>
    %237 = math.exp %236 : vector<8x32xf32>
    %cst_43 = arith.constant 1.000000e+00 : f32
    %238 = vector.broadcast %cst_43 : f32 to vector<8x32xf32>
    %239 = arith.addf %238, %237 : vector<8x32xf32>
    %240 = arith.divf %238, %239 : vector<8x32xf32>
    %241 = vector.extract_strided_slice %234 {offsets = [0, 32], sizes = [8, 32], strides = [1, 1]} : vector<8x128xf32> to vector<8x32xf32>
    %242 = arith.negf %241 : vector<8x32xf32>
    %243 = math.exp %242 : vector<8x32xf32>
    %cst_44 = arith.constant 1.000000e+00 : f32
    %244 = vector.broadcast %cst_44 : f32 to vector<8x32xf32>
    %245 = arith.addf %244, %243 : vector<8x32xf32>
    %246 = arith.divf %244, %245 : vector<8x32xf32>
    %247 = vector.extract_strided_slice %234 {offsets = [0, 64], sizes = [8, 32], strides = [1, 1]} : vector<8x128xf32> to vector<8x32xf32>
    %248 = math.tanh %247 : vector<8x32xf32>
    %249 = vector.extract_strided_slice %234 {offsets = [0, 96], sizes = [8, 32], strides = [1, 1]} : vector<8x128xf32> to vector<8x32xf32>
    %250 = arith.negf %249 : vector<8x32xf32>
    %251 = math.exp %250 : vector<8x32xf32>
    %cst_45 = arith.constant 1.000000e+00 : f32
    %252 = vector.broadcast %cst_45 : f32 to vector<8x32xf32>
    %253 = arith.addf %252, %251 : vector<8x32xf32>
    %254 = arith.divf %252, %253 : vector<8x32xf32>
    %255 = arith.mulf %246, %222 : vector<8x32xf32>
    %256 = arith.mulf %240, %248 : vector<8x32xf32>
    %257 = arith.addf %255, %256 : vector<8x32xf32>
    %258 = math.tanh %257 : vector<8x32xf32>
    %259 = arith.mulf %254, %258 : vector<8x32xf32>
    %260 = vector.broadcast %4 : vector<8x1xf32> to vector<8x32xf32>
    %261 = arith.mulf %259, %260 : vector<8x32xf32>
    %262 = vector.broadcast %6 : vector<8x1xf32> to vector<8x32xf32>
    %263 = arith.mulf %259, %262 : vector<8x32xf32>
    %264 = tpu.concatenate %261, %263 in 1 : vector<8x32xf32>, vector<8x32xf32> -> vector<8x64xf32>
    %265 = vector.extract_strided_slice %17 {offsets = [28, 0], sizes = [4, 128], strides = [1, 1]} : vector<32x256xf32> to vector<4x128xf32>
    %266 = vector.extract_strided_slice %17 {offsets = [0, 128], sizes = [4, 128], strides = [1, 1]} : vector<32x256xf32> to vector<4x128xf32>
    %267 = tpu.concatenate %265, %266 in 0 : vector<4x128xf32>, vector<4x128xf32> -> vector<8x128xf32>
    %cst_46 = arith.constant dense<0.000000e+00> : vector<8x128xf32>
    %268 = tpu.matmul %264, %13, %cst_46 {dimension_numbers = #tpu.dot_dimension_numbers<[1], [0], [0], [1], [0, 0, 1, 1], [], []>} : vector<8x64xf32>, vector<64x128xf32>, vector<8x128xf32> -> vector<8x128xf32>
    %269 = arith.addf %267, %268 : vector<8x128xf32>
    %270 = vector.extract_strided_slice %269 {offsets = [0, 0], sizes = [8, 32], strides = [1, 1]} : vector<8x128xf32> to vector<8x32xf32>
    %271 = arith.negf %270 : vector<8x32xf32>
    %272 = math.exp %271 : vector<8x32xf32>
    %cst_47 = arith.constant 1.000000e+00 : f32
    %273 = vector.broadcast %cst_47 : f32 to vector<8x32xf32>
    %274 = arith.addf %273, %272 : vector<8x32xf32>
    %275 = arith.divf %273, %274 : vector<8x32xf32>
    %276 = vector.extract_strided_slice %269 {offsets = [0, 32], sizes = [8, 32], strides = [1, 1]} : vector<8x128xf32> to vector<8x32xf32>
    %277 = arith.negf %276 : vector<8x32xf32>
    %278 = math.exp %277 : vector<8x32xf32>
    %cst_48 = arith.constant 1.000000e+00 : f32
    %279 = vector.broadcast %cst_48 : f32 to vector<8x32xf32>
    %280 = arith.addf %279, %278 : vector<8x32xf32>
    %281 = arith.divf %279, %280 : vector<8x32xf32>
    %282 = vector.extract_strided_slice %269 {offsets = [0, 64], sizes = [8, 32], strides = [1, 1]} : vector<8x128xf32> to vector<8x32xf32>
    %283 = math.tanh %282 : vector<8x32xf32>
    %284 = vector.extract_strided_slice %269 {offsets = [0, 96], sizes = [8, 32], strides = [1, 1]} : vector<8x128xf32> to vector<8x32xf32>
    %285 = arith.negf %284 : vector<8x32xf32>
    %286 = math.exp %285 : vector<8x32xf32>
    %cst_49 = arith.constant 1.000000e+00 : f32
    %287 = vector.broadcast %cst_49 : f32 to vector<8x32xf32>
    %288 = arith.addf %287, %286 : vector<8x32xf32>
    %289 = arith.divf %287, %288 : vector<8x32xf32>
    %290 = arith.mulf %281, %257 : vector<8x32xf32>
    %291 = arith.mulf %275, %283 : vector<8x32xf32>
    %292 = arith.addf %290, %291 : vector<8x32xf32>
    %293 = math.tanh %292 : vector<8x32xf32>
    %294 = arith.mulf %289, %293 : vector<8x32xf32>
    %295 = vector.broadcast %4 : vector<8x1xf32> to vector<8x32xf32>
    %296 = arith.mulf %294, %295 : vector<8x32xf32>
    %297 = vector.broadcast %6 : vector<8x1xf32> to vector<8x32xf32>
    %298 = arith.mulf %294, %297 : vector<8x32xf32>
    %299 = tpu.concatenate %296, %298 in 1 : vector<8x32xf32>, vector<8x32xf32> -> vector<8x64xf32>
    %300 = vector.extract_strided_slice %54 {offsets = [0, 0], sizes = [4, 64], strides = [1, 1]} : vector<8x64xf32> to vector<4x64xf32>
    %301 = vector.extract_strided_slice %299 {offsets = [4, 0], sizes = [4, 64], strides = [1, 1]} : vector<8x64xf32> to vector<4x64xf32>
    %302 = arith.addf %300, %301 : vector<4x64xf32>
    %303 = vector.extract_strided_slice %89 {offsets = [0, 0], sizes = [4, 64], strides = [1, 1]} : vector<8x64xf32> to vector<4x64xf32>
    %304 = vector.extract_strided_slice %264 {offsets = [4, 0], sizes = [4, 64], strides = [1, 1]} : vector<8x64xf32> to vector<4x64xf32>
    %305 = arith.addf %303, %304 : vector<4x64xf32>
    %306 = vector.extract_strided_slice %124 {offsets = [0, 0], sizes = [4, 64], strides = [1, 1]} : vector<8x64xf32> to vector<4x64xf32>
    %307 = vector.extract_strided_slice %229 {offsets = [4, 0], sizes = [4, 64], strides = [1, 1]} : vector<8x64xf32> to vector<4x64xf32>
    %308 = arith.addf %306, %307 : vector<4x64xf32>
    %309 = vector.extract_strided_slice %159 {offsets = [0, 0], sizes = [4, 64], strides = [1, 1]} : vector<8x64xf32> to vector<4x64xf32>
    %310 = vector.extract_strided_slice %194 {offsets = [4, 0], sizes = [4, 64], strides = [1, 1]} : vector<8x64xf32> to vector<4x64xf32>
    %311 = arith.addf %309, %310 : vector<4x64xf32>
    %312 = vector.extract_strided_slice %194 {offsets = [0, 0], sizes = [4, 64], strides = [1, 1]} : vector<8x64xf32> to vector<4x64xf32>
    %313 = vector.extract_strided_slice %159 {offsets = [4, 0], sizes = [4, 64], strides = [1, 1]} : vector<8x64xf32> to vector<4x64xf32>
    %314 = arith.addf %312, %313 : vector<4x64xf32>
    %315 = vector.extract_strided_slice %229 {offsets = [0, 0], sizes = [4, 64], strides = [1, 1]} : vector<8x64xf32> to vector<4x64xf32>
    %316 = vector.extract_strided_slice %124 {offsets = [4, 0], sizes = [4, 64], strides = [1, 1]} : vector<8x64xf32> to vector<4x64xf32>
    %317 = arith.addf %315, %316 : vector<4x64xf32>
    %318 = vector.extract_strided_slice %264 {offsets = [0, 0], sizes = [4, 64], strides = [1, 1]} : vector<8x64xf32> to vector<4x64xf32>
    %319 = vector.extract_strided_slice %89 {offsets = [4, 0], sizes = [4, 64], strides = [1, 1]} : vector<8x64xf32> to vector<4x64xf32>
    %320 = arith.addf %318, %319 : vector<4x64xf32>
    %321 = vector.extract_strided_slice %299 {offsets = [0, 0], sizes = [4, 64], strides = [1, 1]} : vector<8x64xf32> to vector<4x64xf32>
    %322 = vector.extract_strided_slice %54 {offsets = [4, 0], sizes = [4, 64], strides = [1, 1]} : vector<8x64xf32> to vector<4x64xf32>
    %323 = arith.addf %321, %322 : vector<4x64xf32>
    %324 = tpu.concatenate %302, %305, %308, %311, %314, %317, %320, %323 in 0 : vector<4x64xf32>, vector<4x64xf32>, vector<4x64xf32>, vector<4x64xf32>, vector<4x64xf32>, vector<4x64xf32>, vector<4x64xf32>, vector<4x64xf32> -> vector<32x64xf32>
    %cst_50 = arith.constant dense<0.000000e+00> : vector<32x32xf32>
    %325 = tpu.matmul %324, %8, %cst_50 {dimension_numbers = #tpu.dot_dimension_numbers<[1], [0], [0], [1], [0, 0, 1, 1], [], []>} : vector<32x64xf32>, vector<64x32xf32>, vector<32x32xf32> -> vector<32x32xf32>
    %cst_51 = arith.constant dense<0.000000e+00> : vector<32x32xf32>
    %326 = tpu.matmul %324, %9, %cst_51 {dimension_numbers = #tpu.dot_dimension_numbers<[1], [0], [0], [1], [0, 0, 1, 1], [], []>} : vector<32x64xf32>, vector<64x32xf32>, vector<32x32xf32> -> vector<32x32xf32>
    %327 = arith.maximumf %325, %326 : vector<32x32xf32>
    %c0_52 = arith.constant 0 : index
    %c0_53 = arith.constant 0 : index
    %328 = vector.load %arg12[%c0_52, %c0_53] : memref<32x256xf32, #tpu.memory_space<vmem>>, vector<32x256xf32>
    %c0_54 = arith.constant 0 : index
    %c0_55 = arith.constant 0 : index
    %329 = vector.load %arg13[%c0_54, %c0_55] : memref<64x128xf32, #tpu.memory_space<vmem>>, vector<64x128xf32>
    %c0_56 = arith.constant 0 : index
    %c0_57 = arith.constant 0 : index
    %330 = vector.load %arg14[%c0_56, %c0_57] : memref<1x256xf32, #tpu.memory_space<vmem>>, vector<1x256xf32>
    %cst_58 = arith.constant dense<0.000000e+00> : vector<32x256xf32>
    %331 = tpu.matmul %327, %328, %cst_58 {dimension_numbers = #tpu.dot_dimension_numbers<[1], [0], [0], [1], [0, 0, 1, 1], [], []>} : vector<32x32xf32>, vector<32x256xf32>, vector<32x256xf32> -> vector<32x256xf32>
    %332 = vector.broadcast %330 : vector<1x256xf32> to vector<32x256xf32>
    %333 = arith.addf %331, %332 : vector<32x256xf32>
    %cst_59 = arith.constant 0.000000e+00 : f32
    %334 = vector.broadcast %cst_59 : f32 to vector<8x64xf32>
    %cst_60 = arith.constant 0.000000e+00 : f32
    %335 = vector.broadcast %cst_60 : f32 to vector<8x32xf32>
    %336 = vector.extract_strided_slice %333 {offsets = [0, 0], sizes = [4, 128], strides = [1, 1]} : vector<32x256xf32> to vector<4x128xf32>
    %337 = vector.extract_strided_slice %333 {offsets = [28, 128], sizes = [4, 128], strides = [1, 1]} : vector<32x256xf32> to vector<4x128xf32>
    %338 = tpu.concatenate %336, %337 in 0 : vector<4x128xf32>, vector<4x128xf32> -> vector<8x128xf32>
    %cst_61 = arith.constant dense<0.000000e+00> : vector<8x128xf32>
    %339 = tpu.matmul %334, %329, %cst_61 {dimension_numbers = #tpu.dot_dimension_numbers<[1], [0], [0], [1], [0, 0, 1, 1], [], []>} : vector<8x64xf32>, vector<64x128xf32>, vector<8x128xf32> -> vector<8x128xf32>
    %340 = arith.addf %338, %339 : vector<8x128xf32>
    %341 = vector.extract_strided_slice %340 {offsets = [0, 0], sizes = [8, 32], strides = [1, 1]} : vector<8x128xf32> to vector<8x32xf32>
    %342 = arith.negf %341 : vector<8x32xf32>
    %343 = math.exp %342 : vector<8x32xf32>
    %cst_62 = arith.constant 1.000000e+00 : f32
    %344 = vector.broadcast %cst_62 : f32 to vector<8x32xf32>
    %345 = arith.addf %344, %343 : vector<8x32xf32>
    %346 = arith.divf %344, %345 : vector<8x32xf32>
    %347 = vector.extract_strided_slice %340 {offsets = [0, 32], sizes = [8, 32], strides = [1, 1]} : vector<8x128xf32> to vector<8x32xf32>
    %348 = arith.negf %347 : vector<8x32xf32>
    %349 = math.exp %348 : vector<8x32xf32>
    %cst_63 = arith.constant 1.000000e+00 : f32
    %350 = vector.broadcast %cst_63 : f32 to vector<8x32xf32>
    %351 = arith.addf %350, %349 : vector<8x32xf32>
    %352 = arith.divf %350, %351 : vector<8x32xf32>
    %353 = vector.extract_strided_slice %340 {offsets = [0, 64], sizes = [8, 32], strides = [1, 1]} : vector<8x128xf32> to vector<8x32xf32>
    %354 = math.tanh %353 : vector<8x32xf32>
    %355 = vector.extract_strided_slice %340 {offsets = [0, 96], sizes = [8, 32], strides = [1, 1]} : vector<8x128xf32> to vector<8x32xf32>
    %356 = arith.negf %355 : vector<8x32xf32>
    %357 = math.exp %356 : vector<8x32xf32>
    %cst_64 = arith.constant 1.000000e+00 : f32
    %358 = vector.broadcast %cst_64 : f32 to vector<8x32xf32>
    %359 = arith.addf %358, %357 : vector<8x32xf32>
    %360 = arith.divf %358, %359 : vector<8x32xf32>
    %361 = arith.mulf %352, %335 : vector<8x32xf32>
    %362 = arith.mulf %346, %354 : vector<8x32xf32>
    %363 = arith.addf %361, %362 : vector<8x32xf32>
    %364 = math.tanh %363 : vector<8x32xf32>
    %365 = arith.mulf %360, %364 : vector<8x32xf32>
    %366 = vector.broadcast %4 : vector<8x1xf32> to vector<8x32xf32>
    %367 = arith.mulf %365, %366 : vector<8x32xf32>
    %368 = vector.broadcast %6 : vector<8x1xf32> to vector<8x32xf32>
    %369 = arith.mulf %365, %368 : vector<8x32xf32>
    %370 = tpu.concatenate %367, %369 in 1 : vector<8x32xf32>, vector<8x32xf32> -> vector<8x64xf32>
    %371 = vector.extract_strided_slice %333 {offsets = [4, 0], sizes = [4, 128], strides = [1, 1]} : vector<32x256xf32> to vector<4x128xf32>
    %372 = vector.extract_strided_slice %333 {offsets = [24, 128], sizes = [4, 128], strides = [1, 1]} : vector<32x256xf32> to vector<4x128xf32>
    %373 = tpu.concatenate %371, %372 in 0 : vector<4x128xf32>, vector<4x128xf32> -> vector<8x128xf32>
    %cst_65 = arith.constant dense<0.000000e+00> : vector<8x128xf32>
    %374 = tpu.matmul %370, %329, %cst_65 {dimension_numbers = #tpu.dot_dimension_numbers<[1], [0], [0], [1], [0, 0, 1, 1], [], []>} : vector<8x64xf32>, vector<64x128xf32>, vector<8x128xf32> -> vector<8x128xf32>
    %375 = arith.addf %373, %374 : vector<8x128xf32>
    %376 = vector.extract_strided_slice %375 {offsets = [0, 0], sizes = [8, 32], strides = [1, 1]} : vector<8x128xf32> to vector<8x32xf32>
    %377 = arith.negf %376 : vector<8x32xf32>
    %378 = math.exp %377 : vector<8x32xf32>
    %cst_66 = arith.constant 1.000000e+00 : f32
    %379 = vector.broadcast %cst_66 : f32 to vector<8x32xf32>
    %380 = arith.addf %379, %378 : vector<8x32xf32>
    %381 = arith.divf %379, %380 : vector<8x32xf32>
    %382 = vector.extract_strided_slice %375 {offsets = [0, 32], sizes = [8, 32], strides = [1, 1]} : vector<8x128xf32> to vector<8x32xf32>
    %383 = arith.negf %382 : vector<8x32xf32>
    %384 = math.exp %383 : vector<8x32xf32>
    %cst_67 = arith.constant 1.000000e+00 : f32
    %385 = vector.broadcast %cst_67 : f32 to vector<8x32xf32>
    %386 = arith.addf %385, %384 : vector<8x32xf32>
    %387 = arith.divf %385, %386 : vector<8x32xf32>
    %388 = vector.extract_strided_slice %375 {offsets = [0, 64], sizes = [8, 32], strides = [1, 1]} : vector<8x128xf32> to vector<8x32xf32>
    %389 = math.tanh %388 : vector<8x32xf32>
    %390 = vector.extract_strided_slice %375 {offsets = [0, 96], sizes = [8, 32], strides = [1, 1]} : vector<8x128xf32> to vector<8x32xf32>
    %391 = arith.negf %390 : vector<8x32xf32>
    %392 = math.exp %391 : vector<8x32xf32>
    %cst_68 = arith.constant 1.000000e+00 : f32
    %393 = vector.broadcast %cst_68 : f32 to vector<8x32xf32>
    %394 = arith.addf %393, %392 : vector<8x32xf32>
    %395 = arith.divf %393, %394 : vector<8x32xf32>
    %396 = arith.mulf %387, %363 : vector<8x32xf32>
    %397 = arith.mulf %381, %389 : vector<8x32xf32>
    %398 = arith.addf %396, %397 : vector<8x32xf32>
    %399 = math.tanh %398 : vector<8x32xf32>
    %400 = arith.mulf %395, %399 : vector<8x32xf32>
    %401 = vector.broadcast %4 : vector<8x1xf32> to vector<8x32xf32>
    %402 = arith.mulf %400, %401 : vector<8x32xf32>
    %403 = vector.broadcast %6 : vector<8x1xf32> to vector<8x32xf32>
    %404 = arith.mulf %400, %403 : vector<8x32xf32>
    %405 = tpu.concatenate %402, %404 in 1 : vector<8x32xf32>, vector<8x32xf32> -> vector<8x64xf32>
    %406 = vector.extract_strided_slice %333 {offsets = [8, 0], sizes = [4, 128], strides = [1, 1]} : vector<32x256xf32> to vector<4x128xf32>
    %407 = vector.extract_strided_slice %333 {offsets = [20, 128], sizes = [4, 128], strides = [1, 1]} : vector<32x256xf32> to vector<4x128xf32>
    %408 = tpu.concatenate %406, %407 in 0 : vector<4x128xf32>, vector<4x128xf32> -> vector<8x128xf32>
    %cst_69 = arith.constant dense<0.000000e+00> : vector<8x128xf32>
    %409 = tpu.matmul %405, %329, %cst_69 {dimension_numbers = #tpu.dot_dimension_numbers<[1], [0], [0], [1], [0, 0, 1, 1], [], []>} : vector<8x64xf32>, vector<64x128xf32>, vector<8x128xf32> -> vector<8x128xf32>
    %410 = arith.addf %408, %409 : vector<8x128xf32>
    %411 = vector.extract_strided_slice %410 {offsets = [0, 0], sizes = [8, 32], strides = [1, 1]} : vector<8x128xf32> to vector<8x32xf32>
    %412 = arith.negf %411 : vector<8x32xf32>
    %413 = math.exp %412 : vector<8x32xf32>
    %cst_70 = arith.constant 1.000000e+00 : f32
    %414 = vector.broadcast %cst_70 : f32 to vector<8x32xf32>
    %415 = arith.addf %414, %413 : vector<8x32xf32>
    %416 = arith.divf %414, %415 : vector<8x32xf32>
    %417 = vector.extract_strided_slice %410 {offsets = [0, 32], sizes = [8, 32], strides = [1, 1]} : vector<8x128xf32> to vector<8x32xf32>
    %418 = arith.negf %417 : vector<8x32xf32>
    %419 = math.exp %418 : vector<8x32xf32>
    %cst_71 = arith.constant 1.000000e+00 : f32
    %420 = vector.broadcast %cst_71 : f32 to vector<8x32xf32>
    %421 = arith.addf %420, %419 : vector<8x32xf32>
    %422 = arith.divf %420, %421 : vector<8x32xf32>
    %423 = vector.extract_strided_slice %410 {offsets = [0, 64], sizes = [8, 32], strides = [1, 1]} : vector<8x128xf32> to vector<8x32xf32>
    %424 = math.tanh %423 : vector<8x32xf32>
    %425 = vector.extract_strided_slice %410 {offsets = [0, 96], sizes = [8, 32], strides = [1, 1]} : vector<8x128xf32> to vector<8x32xf32>
    %426 = arith.negf %425 : vector<8x32xf32>
    %427 = math.exp %426 : vector<8x32xf32>
    %cst_72 = arith.constant 1.000000e+00 : f32
    %428 = vector.broadcast %cst_72 : f32 to vector<8x32xf32>
    %429 = arith.addf %428, %427 : vector<8x32xf32>
    %430 = arith.divf %428, %429 : vector<8x32xf32>
    %431 = arith.mulf %422, %398 : vector<8x32xf32>
    %432 = arith.mulf %416, %424 : vector<8x32xf32>
    %433 = arith.addf %431, %432 : vector<8x32xf32>
    %434 = math.tanh %433 : vector<8x32xf32>
    %435 = arith.mulf %430, %434 : vector<8x32xf32>
    %436 = vector.broadcast %4 : vector<8x1xf32> to vector<8x32xf32>
    %437 = arith.mulf %435, %436 : vector<8x32xf32>
    %438 = vector.broadcast %6 : vector<8x1xf32> to vector<8x32xf32>
    %439 = arith.mulf %435, %438 : vector<8x32xf32>
    %440 = tpu.concatenate %437, %439 in 1 : vector<8x32xf32>, vector<8x32xf32> -> vector<8x64xf32>
    %441 = vector.extract_strided_slice %333 {offsets = [12, 0], sizes = [4, 128], strides = [1, 1]} : vector<32x256xf32> to vector<4x128xf32>
    %442 = vector.extract_strided_slice %333 {offsets = [16, 128], sizes = [4, 128], strides = [1, 1]} : vector<32x256xf32> to vector<4x128xf32>
    %443 = tpu.concatenate %441, %442 in 0 : vector<4x128xf32>, vector<4x128xf32> -> vector<8x128xf32>
    %cst_73 = arith.constant dense<0.000000e+00> : vector<8x128xf32>
    %444 = tpu.matmul %440, %329, %cst_73 {dimension_numbers = #tpu.dot_dimension_numbers<[1], [0], [0], [1], [0, 0, 1, 1], [], []>} : vector<8x64xf32>, vector<64x128xf32>, vector<8x128xf32> -> vector<8x128xf32>
    %445 = arith.addf %443, %444 : vector<8x128xf32>
    %446 = vector.extract_strided_slice %445 {offsets = [0, 0], sizes = [8, 32], strides = [1, 1]} : vector<8x128xf32> to vector<8x32xf32>
    %447 = arith.negf %446 : vector<8x32xf32>
    %448 = math.exp %447 : vector<8x32xf32>
    %cst_74 = arith.constant 1.000000e+00 : f32
    %449 = vector.broadcast %cst_74 : f32 to vector<8x32xf32>
    %450 = arith.addf %449, %448 : vector<8x32xf32>
    %451 = arith.divf %449, %450 : vector<8x32xf32>
    %452 = vector.extract_strided_slice %445 {offsets = [0, 32], sizes = [8, 32], strides = [1, 1]} : vector<8x128xf32> to vector<8x32xf32>
    %453 = arith.negf %452 : vector<8x32xf32>
    %454 = math.exp %453 : vector<8x32xf32>
    %cst_75 = arith.constant 1.000000e+00 : f32
    %455 = vector.broadcast %cst_75 : f32 to vector<8x32xf32>
    %456 = arith.addf %455, %454 : vector<8x32xf32>
    %457 = arith.divf %455, %456 : vector<8x32xf32>
    %458 = vector.extract_strided_slice %445 {offsets = [0, 64], sizes = [8, 32], strides = [1, 1]} : vector<8x128xf32> to vector<8x32xf32>
    %459 = math.tanh %458 : vector<8x32xf32>
    %460 = vector.extract_strided_slice %445 {offsets = [0, 96], sizes = [8, 32], strides = [1, 1]} : vector<8x128xf32> to vector<8x32xf32>
    %461 = arith.negf %460 : vector<8x32xf32>
    %462 = math.exp %461 : vector<8x32xf32>
    %cst_76 = arith.constant 1.000000e+00 : f32
    %463 = vector.broadcast %cst_76 : f32 to vector<8x32xf32>
    %464 = arith.addf %463, %462 : vector<8x32xf32>
    %465 = arith.divf %463, %464 : vector<8x32xf32>
    %466 = arith.mulf %457, %433 : vector<8x32xf32>
    %467 = arith.mulf %451, %459 : vector<8x32xf32>
    %468 = arith.addf %466, %467 : vector<8x32xf32>
    %469 = math.tanh %468 : vector<8x32xf32>
    %470 = arith.mulf %465, %469 : vector<8x32xf32>
    %471 = vector.broadcast %4 : vector<8x1xf32> to vector<8x32xf32>
    %472 = arith.mulf %470, %471 : vector<8x32xf32>
    %473 = vector.broadcast %6 : vector<8x1xf32> to vector<8x32xf32>
    %474 = arith.mulf %470, %473 : vector<8x32xf32>
    %475 = tpu.concatenate %472, %474 in 1 : vector<8x32xf32>, vector<8x32xf32> -> vector<8x64xf32>
    %476 = vector.extract_strided_slice %333 {offsets = [16, 0], sizes = [4, 128], strides = [1, 1]} : vector<32x256xf32> to vector<4x128xf32>
    %477 = vector.extract_strided_slice %333 {offsets = [12, 128], sizes = [4, 128], strides = [1, 1]} : vector<32x256xf32> to vector<4x128xf32>
    %478 = tpu.concatenate %476, %477 in 0 : vector<4x128xf32>, vector<4x128xf32> -> vector<8x128xf32>
    %cst_77 = arith.constant dense<0.000000e+00> : vector<8x128xf32>
    %479 = tpu.matmul %475, %329, %cst_77 {dimension_numbers = #tpu.dot_dimension_numbers<[1], [0], [0], [1], [0, 0, 1, 1], [], []>} : vector<8x64xf32>, vector<64x128xf32>, vector<8x128xf32> -> vector<8x128xf32>
    %480 = arith.addf %478, %479 : vector<8x128xf32>
    %481 = vector.extract_strided_slice %480 {offsets = [0, 0], sizes = [8, 32], strides = [1, 1]} : vector<8x128xf32> to vector<8x32xf32>
    %482 = arith.negf %481 : vector<8x32xf32>
    %483 = math.exp %482 : vector<8x32xf32>
    %cst_78 = arith.constant 1.000000e+00 : f32
    %484 = vector.broadcast %cst_78 : f32 to vector<8x32xf32>
    %485 = arith.addf %484, %483 : vector<8x32xf32>
    %486 = arith.divf %484, %485 : vector<8x32xf32>
    %487 = vector.extract_strided_slice %480 {offsets = [0, 32], sizes = [8, 32], strides = [1, 1]} : vector<8x128xf32> to vector<8x32xf32>
    %488 = arith.negf %487 : vector<8x32xf32>
    %489 = math.exp %488 : vector<8x32xf32>
    %cst_79 = arith.constant 1.000000e+00 : f32
    %490 = vector.broadcast %cst_79 : f32 to vector<8x32xf32>
    %491 = arith.addf %490, %489 : vector<8x32xf32>
    %492 = arith.divf %490, %491 : vector<8x32xf32>
    %493 = vector.extract_strided_slice %480 {offsets = [0, 64], sizes = [8, 32], strides = [1, 1]} : vector<8x128xf32> to vector<8x32xf32>
    %494 = math.tanh %493 : vector<8x32xf32>
    %495 = vector.extract_strided_slice %480 {offsets = [0, 96], sizes = [8, 32], strides = [1, 1]} : vector<8x128xf32> to vector<8x32xf32>
    %496 = arith.negf %495 : vector<8x32xf32>
    %497 = math.exp %496 : vector<8x32xf32>
    %cst_80 = arith.constant 1.000000e+00 : f32
    %498 = vector.broadcast %cst_80 : f32 to vector<8x32xf32>
    %499 = arith.addf %498, %497 : vector<8x32xf32>
    %500 = arith.divf %498, %499 : vector<8x32xf32>
    %501 = arith.mulf %492, %468 : vector<8x32xf32>
    %502 = arith.mulf %486, %494 : vector<8x32xf32>
    %503 = arith.addf %501, %502 : vector<8x32xf32>
    %504 = math.tanh %503 : vector<8x32xf32>
    %505 = arith.mulf %500, %504 : vector<8x32xf32>
    %506 = vector.broadcast %4 : vector<8x1xf32> to vector<8x32xf32>
    %507 = arith.mulf %505, %506 : vector<8x32xf32>
    %508 = vector.broadcast %6 : vector<8x1xf32> to vector<8x32xf32>
    %509 = arith.mulf %505, %508 : vector<8x32xf32>
    %510 = tpu.concatenate %507, %509 in 1 : vector<8x32xf32>, vector<8x32xf32> -> vector<8x64xf32>
    %511 = vector.extract_strided_slice %333 {offsets = [20, 0], sizes = [4, 128], strides = [1, 1]} : vector<32x256xf32> to vector<4x128xf32>
    %512 = vector.extract_strided_slice %333 {offsets = [8, 128], sizes = [4, 128], strides = [1, 1]} : vector<32x256xf32> to vector<4x128xf32>
    %513 = tpu.concatenate %511, %512 in 0 : vector<4x128xf32>, vector<4x128xf32> -> vector<8x128xf32>
    %cst_81 = arith.constant dense<0.000000e+00> : vector<8x128xf32>
    %514 = tpu.matmul %510, %329, %cst_81 {dimension_numbers = #tpu.dot_dimension_numbers<[1], [0], [0], [1], [0, 0, 1, 1], [], []>} : vector<8x64xf32>, vector<64x128xf32>, vector<8x128xf32> -> vector<8x128xf32>
    %515 = arith.addf %513, %514 : vector<8x128xf32>
    %516 = vector.extract_strided_slice %515 {offsets = [0, 0], sizes = [8, 32], strides = [1, 1]} : vector<8x128xf32> to vector<8x32xf32>
    %517 = arith.negf %516 : vector<8x32xf32>
    %518 = math.exp %517 : vector<8x32xf32>
    %cst_82 = arith.constant 1.000000e+00 : f32
    %519 = vector.broadcast %cst_82 : f32 to vector<8x32xf32>
    %520 = arith.addf %519, %518 : vector<8x32xf32>
    %521 = arith.divf %519, %520 : vector<8x32xf32>
    %522 = vector.extract_strided_slice %515 {offsets = [0, 32], sizes = [8, 32], strides = [1, 1]} : vector<8x128xf32> to vector<8x32xf32>
    %523 = arith.negf %522 : vector<8x32xf32>
    %524 = math.exp %523 : vector<8x32xf32>
    %cst_83 = arith.constant 1.000000e+00 : f32
    %525 = vector.broadcast %cst_83 : f32 to vector<8x32xf32>
    %526 = arith.addf %525, %524 : vector<8x32xf32>
    %527 = arith.divf %525, %526 : vector<8x32xf32>
    %528 = vector.extract_strided_slice %515 {offsets = [0, 64], sizes = [8, 32], strides = [1, 1]} : vector<8x128xf32> to vector<8x32xf32>
    %529 = math.tanh %528 : vector<8x32xf32>
    %530 = vector.extract_strided_slice %515 {offsets = [0, 96], sizes = [8, 32], strides = [1, 1]} : vector<8x128xf32> to vector<8x32xf32>
    %531 = arith.negf %530 : vector<8x32xf32>
    %532 = math.exp %531 : vector<8x32xf32>
    %cst_84 = arith.constant 1.000000e+00 : f32
    %533 = vector.broadcast %cst_84 : f32 to vector<8x32xf32>
    %534 = arith.addf %533, %532 : vector<8x32xf32>
    %535 = arith.divf %533, %534 : vector<8x32xf32>
    %536 = arith.mulf %527, %503 : vector<8x32xf32>
    %537 = arith.mulf %521, %529 : vector<8x32xf32>
    %538 = arith.addf %536, %537 : vector<8x32xf32>
    %539 = math.tanh %538 : vector<8x32xf32>
    %540 = arith.mulf %535, %539 : vector<8x32xf32>
    %541 = vector.broadcast %4 : vector<8x1xf32> to vector<8x32xf32>
    %542 = arith.mulf %540, %541 : vector<8x32xf32>
    %543 = vector.broadcast %6 : vector<8x1xf32> to vector<8x32xf32>
    %544 = arith.mulf %540, %543 : vector<8x32xf32>
    %545 = tpu.concatenate %542, %544 in 1 : vector<8x32xf32>, vector<8x32xf32> -> vector<8x64xf32>
    %546 = vector.extract_strided_slice %333 {offsets = [24, 0], sizes = [4, 128], strides = [1, 1]} : vector<32x256xf32> to vector<4x128xf32>
    %547 = vector.extract_strided_slice %333 {offsets = [4, 128], sizes = [4, 128], strides = [1, 1]} : vector<32x256xf32> to vector<4x128xf32>
    %548 = tpu.concatenate %546, %547 in 0 : vector<4x128xf32>, vector<4x128xf32> -> vector<8x128xf32>
    %cst_85 = arith.constant dense<0.000000e+00> : vector<8x128xf32>
    %549 = tpu.matmul %545, %329, %cst_85 {dimension_numbers = #tpu.dot_dimension_numbers<[1], [0], [0], [1], [0, 0, 1, 1], [], []>} : vector<8x64xf32>, vector<64x128xf32>, vector<8x128xf32> -> vector<8x128xf32>
    %550 = arith.addf %548, %549 : vector<8x128xf32>
    %551 = vector.extract_strided_slice %550 {offsets = [0, 0], sizes = [8, 32], strides = [1, 1]} : vector<8x128xf32> to vector<8x32xf32>
    %552 = arith.negf %551 : vector<8x32xf32>
    %553 = math.exp %552 : vector<8x32xf32>
    %cst_86 = arith.constant 1.000000e+00 : f32
    %554 = vector.broadcast %cst_86 : f32 to vector<8x32xf32>
    %555 = arith.addf %554, %553 : vector<8x32xf32>
    %556 = arith.divf %554, %555 : vector<8x32xf32>
    %557 = vector.extract_strided_slice %550 {offsets = [0, 32], sizes = [8, 32], strides = [1, 1]} : vector<8x128xf32> to vector<8x32xf32>
    %558 = arith.negf %557 : vector<8x32xf32>
    %559 = math.exp %558 : vector<8x32xf32>
    %cst_87 = arith.constant 1.000000e+00 : f32
    %560 = vector.broadcast %cst_87 : f32 to vector<8x32xf32>
    %561 = arith.addf %560, %559 : vector<8x32xf32>
    %562 = arith.divf %560, %561 : vector<8x32xf32>
    %563 = vector.extract_strided_slice %550 {offsets = [0, 64], sizes = [8, 32], strides = [1, 1]} : vector<8x128xf32> to vector<8x32xf32>
    %564 = math.tanh %563 : vector<8x32xf32>
    %565 = vector.extract_strided_slice %550 {offsets = [0, 96], sizes = [8, 32], strides = [1, 1]} : vector<8x128xf32> to vector<8x32xf32>
    %566 = arith.negf %565 : vector<8x32xf32>
    %567 = math.exp %566 : vector<8x32xf32>
    %cst_88 = arith.constant 1.000000e+00 : f32
    %568 = vector.broadcast %cst_88 : f32 to vector<8x32xf32>
    %569 = arith.addf %568, %567 : vector<8x32xf32>
    %570 = arith.divf %568, %569 : vector<8x32xf32>
    %571 = arith.mulf %562, %538 : vector<8x32xf32>
    %572 = arith.mulf %556, %564 : vector<8x32xf32>
    %573 = arith.addf %571, %572 : vector<8x32xf32>
    %574 = math.tanh %573 : vector<8x32xf32>
    %575 = arith.mulf %570, %574 : vector<8x32xf32>
    %576 = vector.broadcast %4 : vector<8x1xf32> to vector<8x32xf32>
    %577 = arith.mulf %575, %576 : vector<8x32xf32>
    %578 = vector.broadcast %6 : vector<8x1xf32> to vector<8x32xf32>
    %579 = arith.mulf %575, %578 : vector<8x32xf32>
    %580 = tpu.concatenate %577, %579 in 1 : vector<8x32xf32>, vector<8x32xf32> -> vector<8x64xf32>
    %581 = vector.extract_strided_slice %333 {offsets = [28, 0], sizes = [4, 128], strides = [1, 1]} : vector<32x256xf32> to vector<4x128xf32>
    %582 = vector.extract_strided_slice %333 {offsets = [0, 128], sizes = [4, 128], strides = [1, 1]} : vector<32x256xf32> to vector<4x128xf32>
    %583 = tpu.concatenate %581, %582 in 0 : vector<4x128xf32>, vector<4x128xf32> -> vector<8x128xf32>
    %cst_89 = arith.constant dense<0.000000e+00> : vector<8x128xf32>
    %584 = tpu.matmul %580, %329, %cst_89 {dimension_numbers = #tpu.dot_dimension_numbers<[1], [0], [0], [1], [0, 0, 1, 1], [], []>} : vector<8x64xf32>, vector<64x128xf32>, vector<8x128xf32> -> vector<8x128xf32>
    %585 = arith.addf %583, %584 : vector<8x128xf32>
    %586 = vector.extract_strided_slice %585 {offsets = [0, 0], sizes = [8, 32], strides = [1, 1]} : vector<8x128xf32> to vector<8x32xf32>
    %587 = arith.negf %586 : vector<8x32xf32>
    %588 = math.exp %587 : vector<8x32xf32>
    %cst_90 = arith.constant 1.000000e+00 : f32
    %589 = vector.broadcast %cst_90 : f32 to vector<8x32xf32>
    %590 = arith.addf %589, %588 : vector<8x32xf32>
    %591 = arith.divf %589, %590 : vector<8x32xf32>
    %592 = vector.extract_strided_slice %585 {offsets = [0, 32], sizes = [8, 32], strides = [1, 1]} : vector<8x128xf32> to vector<8x32xf32>
    %593 = arith.negf %592 : vector<8x32xf32>
    %594 = math.exp %593 : vector<8x32xf32>
    %cst_91 = arith.constant 1.000000e+00 : f32
    %595 = vector.broadcast %cst_91 : f32 to vector<8x32xf32>
    %596 = arith.addf %595, %594 : vector<8x32xf32>
    %597 = arith.divf %595, %596 : vector<8x32xf32>
    %598 = vector.extract_strided_slice %585 {offsets = [0, 64], sizes = [8, 32], strides = [1, 1]} : vector<8x128xf32> to vector<8x32xf32>
    %599 = math.tanh %598 : vector<8x32xf32>
    %600 = vector.extract_strided_slice %585 {offsets = [0, 96], sizes = [8, 32], strides = [1, 1]} : vector<8x128xf32> to vector<8x32xf32>
    %601 = arith.negf %600 : vector<8x32xf32>
    %602 = math.exp %601 : vector<8x32xf32>
    %cst_92 = arith.constant 1.000000e+00 : f32
    %603 = vector.broadcast %cst_92 : f32 to vector<8x32xf32>
    %604 = arith.addf %603, %602 : vector<8x32xf32>
    %605 = arith.divf %603, %604 : vector<8x32xf32>
    %606 = arith.mulf %597, %573 : vector<8x32xf32>
    %607 = arith.mulf %591, %599 : vector<8x32xf32>
    %608 = arith.addf %606, %607 : vector<8x32xf32>
    %609 = math.tanh %608 : vector<8x32xf32>
    %610 = arith.mulf %605, %609 : vector<8x32xf32>
    %611 = vector.broadcast %4 : vector<8x1xf32> to vector<8x32xf32>
    %612 = arith.mulf %610, %611 : vector<8x32xf32>
    %613 = vector.broadcast %6 : vector<8x1xf32> to vector<8x32xf32>
    %614 = arith.mulf %610, %613 : vector<8x32xf32>
    %615 = tpu.concatenate %612, %614 in 1 : vector<8x32xf32>, vector<8x32xf32> -> vector<8x64xf32>
    %616 = vector.extract_strided_slice %370 {offsets = [0, 0], sizes = [4, 64], strides = [1, 1]} : vector<8x64xf32> to vector<4x64xf32>
    %617 = vector.extract_strided_slice %615 {offsets = [4, 0], sizes = [4, 64], strides = [1, 1]} : vector<8x64xf32> to vector<4x64xf32>
    %618 = arith.addf %616, %617 : vector<4x64xf32>
    %619 = vector.extract_strided_slice %405 {offsets = [0, 0], sizes = [4, 64], strides = [1, 1]} : vector<8x64xf32> to vector<4x64xf32>
    %620 = vector.extract_strided_slice %580 {offsets = [4, 0], sizes = [4, 64], strides = [1, 1]} : vector<8x64xf32> to vector<4x64xf32>
    %621 = arith.addf %619, %620 : vector<4x64xf32>
    %622 = vector.extract_strided_slice %440 {offsets = [0, 0], sizes = [4, 64], strides = [1, 1]} : vector<8x64xf32> to vector<4x64xf32>
    %623 = vector.extract_strided_slice %545 {offsets = [4, 0], sizes = [4, 64], strides = [1, 1]} : vector<8x64xf32> to vector<4x64xf32>
    %624 = arith.addf %622, %623 : vector<4x64xf32>
    %625 = vector.extract_strided_slice %475 {offsets = [0, 0], sizes = [4, 64], strides = [1, 1]} : vector<8x64xf32> to vector<4x64xf32>
    %626 = vector.extract_strided_slice %510 {offsets = [4, 0], sizes = [4, 64], strides = [1, 1]} : vector<8x64xf32> to vector<4x64xf32>
    %627 = arith.addf %625, %626 : vector<4x64xf32>
    %628 = vector.extract_strided_slice %510 {offsets = [0, 0], sizes = [4, 64], strides = [1, 1]} : vector<8x64xf32> to vector<4x64xf32>
    %629 = vector.extract_strided_slice %475 {offsets = [4, 0], sizes = [4, 64], strides = [1, 1]} : vector<8x64xf32> to vector<4x64xf32>
    %630 = arith.addf %628, %629 : vector<4x64xf32>
    %631 = vector.extract_strided_slice %545 {offsets = [0, 0], sizes = [4, 64], strides = [1, 1]} : vector<8x64xf32> to vector<4x64xf32>
    %632 = vector.extract_strided_slice %440 {offsets = [4, 0], sizes = [4, 64], strides = [1, 1]} : vector<8x64xf32> to vector<4x64xf32>
    %633 = arith.addf %631, %632 : vector<4x64xf32>
    %634 = vector.extract_strided_slice %580 {offsets = [0, 0], sizes = [4, 64], strides = [1, 1]} : vector<8x64xf32> to vector<4x64xf32>
    %635 = vector.extract_strided_slice %405 {offsets = [4, 0], sizes = [4, 64], strides = [1, 1]} : vector<8x64xf32> to vector<4x64xf32>
    %636 = arith.addf %634, %635 : vector<4x64xf32>
    %637 = vector.extract_strided_slice %615 {offsets = [0, 0], sizes = [4, 64], strides = [1, 1]} : vector<8x64xf32> to vector<4x64xf32>
    %638 = vector.extract_strided_slice %370 {offsets = [4, 0], sizes = [4, 64], strides = [1, 1]} : vector<8x64xf32> to vector<4x64xf32>
    %639 = arith.addf %637, %638 : vector<4x64xf32>
    %640 = tpu.concatenate %618, %621, %624, %627, %630, %633, %636, %639 in 0 : vector<4x64xf32>, vector<4x64xf32>, vector<4x64xf32>, vector<4x64xf32>, vector<4x64xf32>, vector<4x64xf32>, vector<4x64xf32>, vector<4x64xf32> -> vector<32x64xf32>
    %cst_93 = arith.constant dense<0.000000e+00> : vector<32x32xf32>
    %641 = tpu.matmul %640, %8, %cst_93 {dimension_numbers = #tpu.dot_dimension_numbers<[1], [0], [0], [1], [0, 0, 1, 1], [], []>} : vector<32x64xf32>, vector<64x32xf32>, vector<32x32xf32> -> vector<32x32xf32>
    %cst_94 = arith.constant dense<0.000000e+00> : vector<32x32xf32>
    %642 = tpu.matmul %640, %9, %cst_94 {dimension_numbers = #tpu.dot_dimension_numbers<[1], [0], [0], [1], [0, 0, 1, 1], [], []>} : vector<32x64xf32>, vector<64x32xf32>, vector<32x32xf32> -> vector<32x32xf32>
    %643 = arith.maximumf %641, %642 : vector<32x32xf32>
    %644 = tpu.concatenate %327, %643 in 1 : vector<32x32xf32>, vector<32x32xf32> -> vector<32x64xf32>
    %c0_95 = arith.constant 0 : index
    %c0_96 = arith.constant 0 : index
    %645 = vector.load %arg3[%c0_95, %c0_96] : memref<32x32xf32, #tpu.memory_space<vmem>>, vector<32x32xf32>
    %c0_97 = arith.constant 0 : index
    %c0_98 = arith.constant 0 : index
    %646 = vector.load %arg4[%c0_97, %c0_98] : memref<32x32xf32, #tpu.memory_space<vmem>>, vector<32x32xf32>
    %cst_99 = arith.constant dense<0.000000e+00> : vector<32x64xf32>
    %647 = tpu.matmul %645, %644, %cst_99 {dimension_numbers = #tpu.dot_dimension_numbers<[1], [0], [0], [1], [0, 0, 1, 1], [], []>} : vector<32x32xf32>, vector<32x64xf32>, vector<32x64xf32> -> vector<32x64xf32>
    %648 = vector.extract_strided_slice %647 {offsets = [0, 0], sizes = [8, 64], strides = [1, 1]} : vector<32x64xf32> to vector<8x64xf32>
    %649 = vector.extract_strided_slice %647 {offsets = [8, 0], sizes = [8, 64], strides = [1, 1]} : vector<32x64xf32> to vector<8x64xf32>
    %650 = vector.shape_cast %648 : vector<8x64xf32> to vector<1x8x64xf32>
    %651 = vector.shape_cast %649 : vector<8x64xf32> to vector<1x8x64xf32>
    %652 = tpu.concatenate %650, %651 in 0 : vector<1x8x64xf32>, vector<1x8x64xf32> -> vector<2x8x64xf32>
    %653 = vector.extract_strided_slice %647 {offsets = [16, 0], sizes = [8, 64], strides = [1, 1]} : vector<32x64xf32> to vector<8x64xf32>
    %654 = vector.extract_strided_slice %647 {offsets = [24, 0], sizes = [8, 64], strides = [1, 1]} : vector<32x64xf32> to vector<8x64xf32>
    %655 = vector.shape_cast %653 : vector<8x64xf32> to vector<1x8x64xf32>
    %656 = vector.shape_cast %654 : vector<8x64xf32> to vector<1x8x64xf32>
    %657 = tpu.concatenate %655, %656 in 0 : vector<1x8x64xf32>, vector<1x8x64xf32> -> vector<2x8x64xf32>
    "tpu.trace_start"() <{level = 10 : i32, message = "bmh,bnh->bmn"}> : () -> ()
    %cst_100 = arith.constant dense<0.000000e+00> : vector<2x8x8xf32>
    %658 = tpu.matmul %652, %657, %cst_100 {dimension_numbers = #tpu.dot_dimension_numbers<[2], [2], [1], [1], [0, 0, 0, 1, 1, 1], [0], [0]>} : vector<2x8x64xf32>, vector<2x8x64xf32>, vector<2x8x8xf32> -> vector<2x8x8xf32>
    "tpu.trace_stop"() : () -> ()
    %c0_101 = arith.constant 0 : index
    %c0_102 = arith.constant 0 : index
    %c0_103 = arith.constant 0 : index
    %659 = vector.load %arg1[%c0_101, %c0_102, %c0_103] : memref<2x8x1xf32, #tpu.memory_space<vmem>>, vector<2x8x1xf32>
    %c0_104 = arith.constant 0 : index
    %c0_105 = arith.constant 0 : index
    %c0_106 = arith.constant 0 : index
    %660 = vector.load %arg2[%c0_104, %c0_105, %c0_106] : memref<2x1x8xf32, #tpu.memory_space<vmem>>, vector<2x1x8xf32>
    %661 = vector.broadcast %659 : vector<2x8x1xf32> to vector<2x8x8xf32>
    %662 = vector.broadcast %660 : vector<2x1x8xf32> to vector<2x8x8xf32>
    %663 = arith.maximumf %661, %662 : vector<2x8x8xf32>
    %cst_107 = arith.constant 5.000000e-01 : f32
    %664 = vector.broadcast %cst_107 : f32 to vector<2x8x8xf32>
    %665 = arith.cmpf ogt, %663, %664 : vector<2x8x8xf32>
    %cst_108 = arith.constant -9.99999982E+12 : f32
    %666 = vector.broadcast %cst_108 : f32 to vector<2x8x8xf32>
    %667 = arith.select %665, %666, %658 : vector<2x8x8xi1>, vector<2x8x8xf32>
    %cst_109 = arith.constant dense<0xFF800000> : vector<2x8xf32>
    %668 = vector.multi_reduction <maximumf>, %667, %cst_109 [2] : vector<2x8x8xf32> to vector<2x8xf32>
    %669 = vector.shape_cast %668 : vector<2x8xf32> to vector<2x8x1xf32>
    %670 = vector.broadcast %669 : vector<2x8x1xf32> to vector<2x8x8xf32>
    %671 = arith.subf %667, %670 : vector<2x8x8xf32>
    %672 = math.exp %671 : vector<2x8x8xf32>
    %cst_110 = arith.constant dense<0.000000e+00> : vector<2x8xf32>
    %673 = vector.multi_reduction <add>, %672, %cst_110 [2] : vector<2x8x8xf32> to vector<2x8xf32>
    %674 = vector.shape_cast %673 : vector<2x8xf32> to vector<2x8x1xf32>
    %675 = vector.broadcast %674 : vector<2x8x1xf32> to vector<2x8x8xf32>
    %676 = arith.divf %672, %675 : vector<2x8x8xf32>
    %cst_111 = arith.constant dense<0xFF800000> : vector<2x8xf32>
    %677 = vector.multi_reduction <maximumf>, %667, %cst_111 [1] : vector<2x8x8xf32> to vector<2x8xf32>
    %678 = vector.shape_cast %677 : vector<2x8xf32> to vector<2x1x8xf32>
    %679 = vector.broadcast %678 : vector<2x1x8xf32> to vector<2x8x8xf32>
    %680 = arith.subf %667, %679 : vector<2x8x8xf32>
    %681 = math.exp %680 : vector<2x8x8xf32>
    %cst_112 = arith.constant dense<0.000000e+00> : vector<2x8xf32>
    %682 = vector.multi_reduction <add>, %681, %cst_112 [1] : vector<2x8x8xf32> to vector<2x8xf32>
    %683 = vector.shape_cast %682 : vector<2x8xf32> to vector<2x1x8xf32>
    %684 = vector.broadcast %683 : vector<2x1x8xf32> to vector<2x8x8xf32>
    %685 = arith.divf %681, %684 : vector<2x8x8xf32>
    "tpu.trace_start"() <{level = 10 : i32, message = "bmn,bnh->bmh"}> : () -> ()
    %cst_113 = arith.constant dense<0.000000e+00> : vector<2x8x64xf32>
    %686 = tpu.matmul %676, %657, %cst_113 {dimension_numbers = #tpu.dot_dimension_numbers<[2], [1], [1], [2], [0, 0, 0, 1, 1, 2], [0], [0]>} : vector<2x8x8xf32>, vector<2x8x64xf32>, vector<2x8x64xf32> -> vector<2x8x64xf32>
    "tpu.trace_stop"() : () -> ()
    %687 = tpu.transpose %685, [0, 2, 1] : vector<2x8x8xf32> -> vector<2x8x8xf32>
    "tpu.trace_start"() <{level = 10 : i32, message = "bnm,bmh->bnh"}> : () -> ()
    %cst_114 = arith.constant dense<0.000000e+00> : vector<2x8x64xf32>
    %688 = tpu.matmul %687, %652, %cst_114 {dimension_numbers = #tpu.dot_dimension_numbers<[2], [1], [1], [2], [0, 0, 0, 1, 1, 2], [0], [0]>} : vector<2x8x8xf32>, vector<2x8x64xf32>, vector<2x8x64xf32> -> vector<2x8x64xf32>
    "tpu.trace_stop"() : () -> ()
    %689 = tpu.concatenate %652, %686 in 2 : vector<2x8x64xf32>, vector<2x8x64xf32> -> vector<2x8x128xf32>
    %690 = tpu.concatenate %657, %688 in 2 : vector<2x8x64xf32>, vector<2x8x64xf32> -> vector<2x8x128xf32>
    %691 = vector.extract_strided_slice %689 {offsets = [0, 0, 0], sizes = [1, 8, 128], strides = [1, 1, 1]} : vector<2x8x128xf32> to vector<1x8x128xf32>
    %692 = vector.shape_cast %691 : vector<1x8x128xf32> to vector<8x128xf32>
    %693 = vector.extract_strided_slice %689 {offsets = [1, 0, 0], sizes = [1, 8, 128], strides = [1, 1, 1]} : vector<2x8x128xf32> to vector<1x8x128xf32>
    %694 = vector.shape_cast %693 : vector<1x8x128xf32> to vector<8x128xf32>
    %695 = vector.extract_strided_slice %690 {offsets = [0, 0, 0], sizes = [1, 8, 128], strides = [1, 1, 1]} : vector<2x8x128xf32> to vector<1x8x128xf32>
    %696 = vector.shape_cast %695 : vector<1x8x128xf32> to vector<8x128xf32>
    %697 = vector.extract_strided_slice %690 {offsets = [1, 0, 0], sizes = [1, 8, 128], strides = [1, 1, 1]} : vector<2x8x128xf32> to vector<1x8x128xf32>
    %698 = vector.shape_cast %697 : vector<1x8x128xf32> to vector<8x128xf32>
    %699 = tpu.concatenate %692, %694, %696, %698 in 0 : vector<8x128xf32>, vector<8x128xf32>, vector<8x128xf32>, vector<8x128xf32> -> vector<32x128xf32>
    %cst_115 = arith.constant dense<0.000000e+00> : vector<32x128xf32>
    %700 = tpu.matmul %646, %699, %cst_115 {dimension_numbers = #tpu.dot_dimension_numbers<[1], [0], [0], [1], [0, 0, 1, 1], [], []>} : vector<32x32xf32>, vector<32x128xf32>, vector<32x128xf32> -> vector<32x128xf32>
    %c0_116 = arith.constant 0 : index
    %c0_117 = arith.constant 0 : index
    %701 = vector.load %arg15[%c0_116, %c0_117] : memref<128x1024xf32, #tpu.memory_space<vmem>>, vector<128x1024xf32>
    %c0_118 = arith.constant 0 : index
    %c0_119 = arith.constant 0 : index
    %702 = vector.load %arg16[%c0_118, %c0_119] : memref<256x512xf32, #tpu.memory_space<vmem>>, vector<256x512xf32>
    %c0_120 = arith.constant 0 : index
    %c0_121 = arith.constant 0 : index
    %703 = vector.load %arg17[%c0_120, %c0_121] : memref<1x1024xf32, #tpu.memory_space<vmem>>, vector<1x1024xf32>
    %cst_122 = arith.constant dense<0.000000e+00> : vector<32x1024xf32>
    %704 = tpu.matmul %700, %701, %cst_122 {dimension_numbers = #tpu.dot_dimension_numbers<[1], [0], [0], [1], [0, 0, 1, 1], [], []>} : vector<32x128xf32>, vector<128x1024xf32>, vector<32x1024xf32> -> vector<32x1024xf32>
    %705 = vector.broadcast %703 : vector<1x1024xf32> to vector<32x1024xf32>
    %706 = arith.addf %704, %705 : vector<32x1024xf32>
    %cst_123 = arith.constant 0.000000e+00 : f32
    %707 = vector.broadcast %cst_123 : f32 to vector<8x256xf32>
    %cst_124 = arith.constant 0.000000e+00 : f32
    %708 = vector.broadcast %cst_124 : f32 to vector<8x128xf32>
    %709 = vector.extract_strided_slice %706 {offsets = [0, 0], sizes = [4, 512], strides = [1, 1]} : vector<32x1024xf32> to vector<4x512xf32>
    %710 = vector.extract_strided_slice %706 {offsets = [28, 512], sizes = [4, 512], strides = [1, 1]} : vector<32x1024xf32> to vector<4x512xf32>
    %711 = tpu.concatenate %709, %710 in 0 : vector<4x512xf32>, vector<4x512xf32> -> vector<8x512xf32>
    %cst_125 = arith.constant dense<0.000000e+00> : vector<8x512xf32>
    %712 = tpu.matmul %707, %702, %cst_125 {dimension_numbers = #tpu.dot_dimension_numbers<[1], [0], [0], [1], [0, 0, 1, 1], [], []>} : vector<8x256xf32>, vector<256x512xf32>, vector<8x512xf32> -> vector<8x512xf32>
    %713 = arith.addf %711, %712 : vector<8x512xf32>
    %714 = vector.extract_strided_slice %713 {offsets = [0, 0], sizes = [8, 128], strides = [1, 1]} : vector<8x512xf32> to vector<8x128xf32>
    %715 = arith.negf %714 : vector<8x128xf32>
    %716 = math.exp %715 : vector<8x128xf32>
    %cst_126 = arith.constant 1.000000e+00 : f32
    %717 = vector.broadcast %cst_126 : f32 to vector<8x128xf32>
    %718 = arith.addf %717, %716 : vector<8x128xf32>
    %719 = arith.divf %717, %718 : vector<8x128xf32>
    %720 = vector.extract_strided_slice %713 {offsets = [0, 128], sizes = [8, 128], strides = [1, 1]} : vector<8x512xf32> to vector<8x128xf32>
    %721 = arith.negf %720 : vector<8x128xf32>
    %722 = math.exp %721 : vector<8x128xf32>
    %cst_127 = arith.constant 1.000000e+00 : f32
    %723 = vector.broadcast %cst_127 : f32 to vector<8x128xf32>
    %724 = arith.addf %723, %722 : vector<8x128xf32>
    %725 = arith.divf %723, %724 : vector<8x128xf32>
    %726 = vector.extract_strided_slice %713 {offsets = [0, 256], sizes = [8, 128], strides = [1, 1]} : vector<8x512xf32> to vector<8x128xf32>
    %727 = math.tanh %726 : vector<8x128xf32>
    %728 = vector.extract_strided_slice %713 {offsets = [0, 384], sizes = [8, 128], strides = [1, 1]} : vector<8x512xf32> to vector<8x128xf32>
    %729 = arith.negf %728 : vector<8x128xf32>
    %730 = math.exp %729 : vector<8x128xf32>
    %cst_128 = arith.constant 1.000000e+00 : f32
    %731 = vector.broadcast %cst_128 : f32 to vector<8x128xf32>
    %732 = arith.addf %731, %730 : vector<8x128xf32>
    %733 = arith.divf %731, %732 : vector<8x128xf32>
    %734 = arith.mulf %725, %708 : vector<8x128xf32>
    %735 = arith.mulf %719, %727 : vector<8x128xf32>
    %736 = arith.addf %734, %735 : vector<8x128xf32>
    %737 = math.tanh %736 : vector<8x128xf32>
    %738 = arith.mulf %733, %737 : vector<8x128xf32>
    %739 = vector.broadcast %4 : vector<8x1xf32> to vector<8x128xf32>
    %740 = arith.mulf %738, %739 : vector<8x128xf32>
    %741 = vector.broadcast %6 : vector<8x1xf32> to vector<8x128xf32>
    %742 = arith.mulf %738, %741 : vector<8x128xf32>
    %743 = tpu.concatenate %740, %742 in 1 : vector<8x128xf32>, vector<8x128xf32> -> vector<8x256xf32>
    %744 = vector.extract_strided_slice %706 {offsets = [4, 0], sizes = [4, 512], strides = [1, 1]} : vector<32x1024xf32> to vector<4x512xf32>
    %745 = vector.extract_strided_slice %706 {offsets = [24, 512], sizes = [4, 512], strides = [1, 1]} : vector<32x1024xf32> to vector<4x512xf32>
    %746 = tpu.concatenate %744, %745 in 0 : vector<4x512xf32>, vector<4x512xf32> -> vector<8x512xf32>
    %cst_129 = arith.constant dense<0.000000e+00> : vector<8x512xf32>
    %747 = tpu.matmul %743, %702, %cst_129 {dimension_numbers = #tpu.dot_dimension_numbers<[1], [0], [0], [1], [0, 0, 1, 1], [], []>} : vector<8x256xf32>, vector<256x512xf32>, vector<8x512xf32> -> vector<8x512xf32>
    %748 = arith.addf %746, %747 : vector<8x512xf32>
    %749 = vector.extract_strided_slice %748 {offsets = [0, 0], sizes = [8, 128], strides = [1, 1]} : vector<8x512xf32> to vector<8x128xf32>
    %750 = arith.negf %749 : vector<8x128xf32>
    %751 = math.exp %750 : vector<8x128xf32>
    %cst_130 = arith.constant 1.000000e+00 : f32
    %752 = vector.broadcast %cst_130 : f32 to vector<8x128xf32>
    %753 = arith.addf %752, %751 : vector<8x128xf32>
    %754 = arith.divf %752, %753 : vector<8x128xf32>
    %755 = vector.extract_strided_slice %748 {offsets = [0, 128], sizes = [8, 128], strides = [1, 1]} : vector<8x512xf32> to vector<8x128xf32>
    %756 = arith.negf %755 : vector<8x128xf32>
    %757 = math.exp %756 : vector<8x128xf32>
    %cst_131 = arith.constant 1.000000e+00 : f32
    %758 = vector.broadcast %cst_131 : f32 to vector<8x128xf32>
    %759 = arith.addf %758, %757 : vector<8x128xf32>
    %760 = arith.divf %758, %759 : vector<8x128xf32>
    %761 = vector.extract_strided_slice %748 {offsets = [0, 256], sizes = [8, 128], strides = [1, 1]} : vector<8x512xf32> to vector<8x128xf32>
    %762 = math.tanh %761 : vector<8x128xf32>
    %763 = vector.extract_strided_slice %748 {offsets = [0, 384], sizes = [8, 128], strides = [1, 1]} : vector<8x512xf32> to vector<8x128xf32>
    %764 = arith.negf %763 : vector<8x128xf32>
    %765 = math.exp %764 : vector<8x128xf32>
    %cst_132 = arith.constant 1.000000e+00 : f32
    %766 = vector.broadcast %cst_132 : f32 to vector<8x128xf32>
    %767 = arith.addf %766, %765 : vector<8x128xf32>
    %768 = arith.divf %766, %767 : vector<8x128xf32>
    %769 = arith.mulf %760, %736 : vector<8x128xf32>
    %770 = arith.mulf %754, %762 : vector<8x128xf32>
    %771 = arith.addf %769, %770 : vector<8x128xf32>
    %772 = math.tanh %771 : vector<8x128xf32>
    %773 = arith.mulf %768, %772 : vector<8x128xf32>
    %774 = vector.broadcast %4 : vector<8x1xf32> to vector<8x128xf32>
    %775 = arith.mulf %773, %774 : vector<8x128xf32>
    %776 = vector.broadcast %6 : vector<8x1xf32> to vector<8x128xf32>
    %777 = arith.mulf %773, %776 : vector<8x128xf32>
    %778 = tpu.concatenate %775, %777 in 1 : vector<8x128xf32>, vector<8x128xf32> -> vector<8x256xf32>
    %779 = vector.extract_strided_slice %706 {offsets = [8, 0], sizes = [4, 512], strides = [1, 1]} : vector<32x1024xf32> to vector<4x512xf32>
    %780 = vector.extract_strided_slice %706 {offsets = [20, 512], sizes = [4, 512], strides = [1, 1]} : vector<32x1024xf32> to vector<4x512xf32>
    %781 = tpu.concatenate %779, %780 in 0 : vector<4x512xf32>, vector<4x512xf32> -> vector<8x512xf32>
    %cst_133 = arith.constant dense<0.000000e+00> : vector<8x512xf32>
    %782 = tpu.matmul %778, %702, %cst_133 {dimension_numbers = #tpu.dot_dimension_numbers<[1], [0], [0], [1], [0, 0, 1, 1], [], []>} : vector<8x256xf32>, vector<256x512xf32>, vector<8x512xf32> -> vector<8x512xf32>
    %783 = arith.addf %781, %782 : vector<8x512xf32>
    %784 = vector.extract_strided_slice %783 {offsets = [0, 0], sizes = [8, 128], strides = [1, 1]} : vector<8x512xf32> to vector<8x128xf32>
    %785 = arith.negf %784 : vector<8x128xf32>
    %786 = math.exp %785 : vector<8x128xf32>
    %cst_134 = arith.constant 1.000000e+00 : f32
    %787 = vector.broadcast %cst_134 : f32 to vector<8x128xf32>
    %788 = arith.addf %787, %786 : vector<8x128xf32>
    %789 = arith.divf %787, %788 : vector<8x128xf32>
    %790 = vector.extract_strided_slice %783 {offsets = [0, 128], sizes = [8, 128], strides = [1, 1]} : vector<8x512xf32> to vector<8x128xf32>
    %791 = arith.negf %790 : vector<8x128xf32>
    %792 = math.exp %791 : vector<8x128xf32>
    %cst_135 = arith.constant 1.000000e+00 : f32
    %793 = vector.broadcast %cst_135 : f32 to vector<8x128xf32>
    %794 = arith.addf %793, %792 : vector<8x128xf32>
    %795 = arith.divf %793, %794 : vector<8x128xf32>
    %796 = vector.extract_strided_slice %783 {offsets = [0, 256], sizes = [8, 128], strides = [1, 1]} : vector<8x512xf32> to vector<8x128xf32>
    %797 = math.tanh %796 : vector<8x128xf32>
    %798 = vector.extract_strided_slice %783 {offsets = [0, 384], sizes = [8, 128], strides = [1, 1]} : vector<8x512xf32> to vector<8x128xf32>
    %799 = arith.negf %798 : vector<8x128xf32>
    %800 = math.exp %799 : vector<8x128xf32>
    %cst_136 = arith.constant 1.000000e+00 : f32
    %801 = vector.broadcast %cst_136 : f32 to vector<8x128xf32>
    %802 = arith.addf %801, %800 : vector<8x128xf32>
    %803 = arith.divf %801, %802 : vector<8x128xf32>
    %804 = arith.mulf %795, %771 : vector<8x128xf32>
    %805 = arith.mulf %789, %797 : vector<8x128xf32>
    %806 = arith.addf %804, %805 : vector<8x128xf32>
    %807 = math.tanh %806 : vector<8x128xf32>
    %808 = arith.mulf %803, %807 : vector<8x128xf32>
    %809 = vector.broadcast %4 : vector<8x1xf32> to vector<8x128xf32>
    %810 = arith.mulf %808, %809 : vector<8x128xf32>
    %811 = vector.broadcast %6 : vector<8x1xf32> to vector<8x128xf32>
    %812 = arith.mulf %808, %811 : vector<8x128xf32>
    %813 = tpu.concatenate %810, %812 in 1 : vector<8x128xf32>, vector<8x128xf32> -> vector<8x256xf32>
    %814 = vector.extract_strided_slice %706 {offsets = [12, 0], sizes = [4, 512], strides = [1, 1]} : vector<32x1024xf32> to vector<4x512xf32>
    %815 = vector.extract_strided_slice %706 {offsets = [16, 512], sizes = [4, 512], strides = [1, 1]} : vector<32x1024xf32> to vector<4x512xf32>
    %816 = tpu.concatenate %814, %815 in 0 : vector<4x512xf32>, vector<4x512xf32> -> vector<8x512xf32>
    %cst_137 = arith.constant dense<0.000000e+00> : vector<8x512xf32>
    %817 = tpu.matmul %813, %702, %cst_137 {dimension_numbers = #tpu.dot_dimension_numbers<[1], [0], [0], [1], [0, 0, 1, 1], [], []>} : vector<8x256xf32>, vector<256x512xf32>, vector<8x512xf32> -> vector<8x512xf32>
    %818 = arith.addf %816, %817 : vector<8x512xf32>
    %819 = vector.extract_strided_slice %818 {offsets = [0, 0], sizes = [8, 128], strides = [1, 1]} : vector<8x512xf32> to vector<8x128xf32>
    %820 = arith.negf %819 : vector<8x128xf32>
    %821 = math.exp %820 : vector<8x128xf32>
    %cst_138 = arith.constant 1.000000e+00 : f32
    %822 = vector.broadcast %cst_138 : f32 to vector<8x128xf32>
    %823 = arith.addf %822, %821 : vector<8x128xf32>
    %824 = arith.divf %822, %823 : vector<8x128xf32>
    %825 = vector.extract_strided_slice %818 {offsets = [0, 128], sizes = [8, 128], strides = [1, 1]} : vector<8x512xf32> to vector<8x128xf32>
    %826 = arith.negf %825 : vector<8x128xf32>
    %827 = math.exp %826 : vector<8x128xf32>
    %cst_139 = arith.constant 1.000000e+00 : f32
    %828 = vector.broadcast %cst_139 : f32 to vector<8x128xf32>
    %829 = arith.addf %828, %827 : vector<8x128xf32>
    %830 = arith.divf %828, %829 : vector<8x128xf32>
    %831 = vector.extract_strided_slice %818 {offsets = [0, 256], sizes = [8, 128], strides = [1, 1]} : vector<8x512xf32> to vector<8x128xf32>
    %832 = math.tanh %831 : vector<8x128xf32>
    %833 = vector.extract_strided_slice %818 {offsets = [0, 384], sizes = [8, 128], strides = [1, 1]} : vector<8x512xf32> to vector<8x128xf32>
    %834 = arith.negf %833 : vector<8x128xf32>
    %835 = math.exp %834 : vector<8x128xf32>
    %cst_140 = arith.constant 1.000000e+00 : f32
    %836 = vector.broadcast %cst_140 : f32 to vector<8x128xf32>
    %837 = arith.addf %836, %835 : vector<8x128xf32>
    %838 = arith.divf %836, %837 : vector<8x128xf32>
    %839 = arith.mulf %830, %806 : vector<8x128xf32>
    %840 = arith.mulf %824, %832 : vector<8x128xf32>
    %841 = arith.addf %839, %840 : vector<8x128xf32>
    %842 = math.tanh %841 : vector<8x128xf32>
    %843 = arith.mulf %838, %842 : vector<8x128xf32>
    %844 = vector.broadcast %4 : vector<8x1xf32> to vector<8x128xf32>
    %845 = arith.mulf %843, %844 : vector<8x128xf32>
    %846 = vector.broadcast %6 : vector<8x1xf32> to vector<8x128xf32>
    %847 = arith.mulf %843, %846 : vector<8x128xf32>
    %848 = tpu.concatenate %845, %847 in 1 : vector<8x128xf32>, vector<8x128xf32> -> vector<8x256xf32>
    %849 = vector.extract_strided_slice %706 {offsets = [16, 0], sizes = [4, 512], strides = [1, 1]} : vector<32x1024xf32> to vector<4x512xf32>
    %850 = vector.extract_strided_slice %706 {offsets = [12, 512], sizes = [4, 512], strides = [1, 1]} : vector<32x1024xf32> to vector<4x512xf32>
    %851 = tpu.concatenate %849, %850 in 0 : vector<4x512xf32>, vector<4x512xf32> -> vector<8x512xf32>
    %cst_141 = arith.constant dense<0.000000e+00> : vector<8x512xf32>
    %852 = tpu.matmul %848, %702, %cst_141 {dimension_numbers = #tpu.dot_dimension_numbers<[1], [0], [0], [1], [0, 0, 1, 1], [], []>} : vector<8x256xf32>, vector<256x512xf32>, vector<8x512xf32> -> vector<8x512xf32>
    %853 = arith.addf %851, %852 : vector<8x512xf32>
    %854 = vector.extract_strided_slice %853 {offsets = [0, 0], sizes = [8, 128], strides = [1, 1]} : vector<8x512xf32> to vector<8x128xf32>
    %855 = arith.negf %854 : vector<8x128xf32>
    %856 = math.exp %855 : vector<8x128xf32>
    %cst_142 = arith.constant 1.000000e+00 : f32
    %857 = vector.broadcast %cst_142 : f32 to vector<8x128xf32>
    %858 = arith.addf %857, %856 : vector<8x128xf32>
    %859 = arith.divf %857, %858 : vector<8x128xf32>
    %860 = vector.extract_strided_slice %853 {offsets = [0, 128], sizes = [8, 128], strides = [1, 1]} : vector<8x512xf32> to vector<8x128xf32>
    %861 = arith.negf %860 : vector<8x128xf32>
    %862 = math.exp %861 : vector<8x128xf32>
    %cst_143 = arith.constant 1.000000e+00 : f32
    %863 = vector.broadcast %cst_143 : f32 to vector<8x128xf32>
    %864 = arith.addf %863, %862 : vector<8x128xf32>
    %865 = arith.divf %863, %864 : vector<8x128xf32>
    %866 = vector.extract_strided_slice %853 {offsets = [0, 256], sizes = [8, 128], strides = [1, 1]} : vector<8x512xf32> to vector<8x128xf32>
    %867 = math.tanh %866 : vector<8x128xf32>
    %868 = vector.extract_strided_slice %853 {offsets = [0, 384], sizes = [8, 128], strides = [1, 1]} : vector<8x512xf32> to vector<8x128xf32>
    %869 = arith.negf %868 : vector<8x128xf32>
    %870 = math.exp %869 : vector<8x128xf32>
    %cst_144 = arith.constant 1.000000e+00 : f32
    %871 = vector.broadcast %cst_144 : f32 to vector<8x128xf32>
    %872 = arith.addf %871, %870 : vector<8x128xf32>
    %873 = arith.divf %871, %872 : vector<8x128xf32>
    %874 = arith.mulf %865, %841 : vector<8x128xf32>
    %875 = arith.mulf %859, %867 : vector<8x128xf32>
    %876 = arith.addf %874, %875 : vector<8x128xf32>
    %877 = math.tanh %876 : vector<8x128xf32>
    %878 = arith.mulf %873, %877 : vector<8x128xf32>
    %879 = vector.broadcast %4 : vector<8x1xf32> to vector<8x128xf32>
    %880 = arith.mulf %878, %879 : vector<8x128xf32>
    %881 = vector.broadcast %6 : vector<8x1xf32> to vector<8x128xf32>
    %882 = arith.mulf %878, %881 : vector<8x128xf32>
    %883 = tpu.concatenate %880, %882 in 1 : vector<8x128xf32>, vector<8x128xf32> -> vector<8x256xf32>
    %884 = vector.extract_strided_slice %706 {offsets = [20, 0], sizes = [4, 512], strides = [1, 1]} : vector<32x1024xf32> to vector<4x512xf32>
    %885 = vector.extract_strided_slice %706 {offsets = [8, 512], sizes = [4, 512], strides = [1, 1]} : vector<32x1024xf32> to vector<4x512xf32>
    %886 = tpu.concatenate %884, %885 in 0 : vector<4x512xf32>, vector<4x512xf32> -> vector<8x512xf32>
    %cst_145 = arith.constant dense<0.000000e+00> : vector<8x512xf32>
    %887 = tpu.matmul %883, %702, %cst_145 {dimension_numbers = #tpu.dot_dimension_numbers<[1], [0], [0], [1], [0, 0, 1, 1], [], []>} : vector<8x256xf32>, vector<256x512xf32>, vector<8x512xf32> -> vector<8x512xf32>
    %888 = arith.addf %886, %887 : vector<8x512xf32>
    %889 = vector.extract_strided_slice %888 {offsets = [0, 0], sizes = [8, 128], strides = [1, 1]} : vector<8x512xf32> to vector<8x128xf32>
    %890 = arith.negf %889 : vector<8x128xf32>
    %891 = math.exp %890 : vector<8x128xf32>
    %cst_146 = arith.constant 1.000000e+00 : f32
    %892 = vector.broadcast %cst_146 : f32 to vector<8x128xf32>
    %893 = arith.addf %892, %891 : vector<8x128xf32>
    %894 = arith.divf %892, %893 : vector<8x128xf32>
    %895 = vector.extract_strided_slice %888 {offsets = [0, 128], sizes = [8, 128], strides = [1, 1]} : vector<8x512xf32> to vector<8x128xf32>
    %896 = arith.negf %895 : vector<8x128xf32>
    %897 = math.exp %896 : vector<8x128xf32>
    %cst_147 = arith.constant 1.000000e+00 : f32
    %898 = vector.broadcast %cst_147 : f32 to vector<8x128xf32>
    %899 = arith.addf %898, %897 : vector<8x128xf32>
    %900 = arith.divf %898, %899 : vector<8x128xf32>
    %901 = vector.extract_strided_slice %888 {offsets = [0, 256], sizes = [8, 128], strides = [1, 1]} : vector<8x512xf32> to vector<8x128xf32>
    %902 = math.tanh %901 : vector<8x128xf32>
    %903 = vector.extract_strided_slice %888 {offsets = [0, 384], sizes = [8, 128], strides = [1, 1]} : vector<8x512xf32> to vector<8x128xf32>
    %904 = arith.negf %903 : vector<8x128xf32>
    %905 = math.exp %904 : vector<8x128xf32>
    %cst_148 = arith.constant 1.000000e+00 : f32
    %906 = vector.broadcast %cst_148 : f32 to vector<8x128xf32>
    %907 = arith.addf %906, %905 : vector<8x128xf32>
    %908 = arith.divf %906, %907 : vector<8x128xf32>
    %909 = arith.mulf %900, %876 : vector<8x128xf32>
    %910 = arith.mulf %894, %902 : vector<8x128xf32>
    %911 = arith.addf %909, %910 : vector<8x128xf32>
    %912 = math.tanh %911 : vector<8x128xf32>
    %913 = arith.mulf %908, %912 : vector<8x128xf32>
    %914 = vector.broadcast %4 : vector<8x1xf32> to vector<8x128xf32>
    %915 = arith.mulf %913, %914 : vector<8x128xf32>
    %916 = vector.broadcast %6 : vector<8x1xf32> to vector<8x128xf32>
    %917 = arith.mulf %913, %916 : vector<8x128xf32>
    %918 = tpu.concatenate %915, %917 in 1 : vector<8x128xf32>, vector<8x128xf32> -> vector<8x256xf32>
    %919 = vector.extract_strided_slice %706 {offsets = [24, 0], sizes = [4, 512], strides = [1, 1]} : vector<32x1024xf32> to vector<4x512xf32>
    %920 = vector.extract_strided_slice %706 {offsets = [4, 512], sizes = [4, 512], strides = [1, 1]} : vector<32x1024xf32> to vector<4x512xf32>
    %921 = tpu.concatenate %919, %920 in 0 : vector<4x512xf32>, vector<4x512xf32> -> vector<8x512xf32>
    %cst_149 = arith.constant dense<0.000000e+00> : vector<8x512xf32>
    %922 = tpu.matmul %918, %702, %cst_149 {dimension_numbers = #tpu.dot_dimension_numbers<[1], [0], [0], [1], [0, 0, 1, 1], [], []>} : vector<8x256xf32>, vector<256x512xf32>, vector<8x512xf32> -> vector<8x512xf32>
    %923 = arith.addf %921, %922 : vector<8x512xf32>
    %924 = vector.extract_strided_slice %923 {offsets = [0, 0], sizes = [8, 128], strides = [1, 1]} : vector<8x512xf32> to vector<8x128xf32>
    %925 = arith.negf %924 : vector<8x128xf32>
    %926 = math.exp %925 : vector<8x128xf32>
    %cst_150 = arith.constant 1.000000e+00 : f32
    %927 = vector.broadcast %cst_150 : f32 to vector<8x128xf32>
    %928 = arith.addf %927, %926 : vector<8x128xf32>
    %929 = arith.divf %927, %928 : vector<8x128xf32>
    %930 = vector.extract_strided_slice %923 {offsets = [0, 128], sizes = [8, 128], strides = [1, 1]} : vector<8x512xf32> to vector<8x128xf32>
    %931 = arith.negf %930 : vector<8x128xf32>
    %932 = math.exp %931 : vector<8x128xf32>
    %cst_151 = arith.constant 1.000000e+00 : f32
    %933 = vector.broadcast %cst_151 : f32 to vector<8x128xf32>
    %934 = arith.addf %933, %932 : vector<8x128xf32>
    %935 = arith.divf %933, %934 : vector<8x128xf32>
    %936 = vector.extract_strided_slice %923 {offsets = [0, 256], sizes = [8, 128], strides = [1, 1]} : vector<8x512xf32> to vector<8x128xf32>
    %937 = math.tanh %936 : vector<8x128xf32>
    %938 = vector.extract_strided_slice %923 {offsets = [0, 384], sizes = [8, 128], strides = [1, 1]} : vector<8x512xf32> to vector<8x128xf32>
    %939 = arith.negf %938 : vector<8x128xf32>
    %940 = math.exp %939 : vector<8x128xf32>
    %cst_152 = arith.constant 1.000000e+00 : f32
    %941 = vector.broadcast %cst_152 : f32 to vector<8x128xf32>
    %942 = arith.addf %941, %940 : vector<8x128xf32>
    %943 = arith.divf %941, %942 : vector<8x128xf32>
    %944 = arith.mulf %935, %911 : vector<8x128xf32>
    %945 = arith.mulf %929, %937 : vector<8x128xf32>
    %946 = arith.addf %944, %945 : vector<8x128xf32>
    %947 = math.tanh %946 : vector<8x128xf32>
    %948 = arith.mulf %943, %947 : vector<8x128xf32>
    %949 = vector.broadcast %4 : vector<8x1xf32> to vector<8x128xf32>
    %950 = arith.mulf %948, %949 : vector<8x128xf32>
    %951 = vector.broadcast %6 : vector<8x1xf32> to vector<8x128xf32>
    %952 = arith.mulf %948, %951 : vector<8x128xf32>
    %953 = tpu.concatenate %950, %952 in 1 : vector<8x128xf32>, vector<8x128xf32> -> vector<8x256xf32>
    %954 = vector.extract_strided_slice %706 {offsets = [28, 0], sizes = [4, 512], strides = [1, 1]} : vector<32x1024xf32> to vector<4x512xf32>
    %955 = vector.extract_strided_slice %706 {offsets = [0, 512], sizes = [4, 512], strides = [1, 1]} : vector<32x1024xf32> to vector<4x512xf32>
    %956 = tpu.concatenate %954, %955 in 0 : vector<4x512xf32>, vector<4x512xf32> -> vector<8x512xf32>
    %cst_153 = arith.constant dense<0.000000e+00> : vector<8x512xf32>
    %957 = tpu.matmul %953, %702, %cst_153 {dimension_numbers = #tpu.dot_dimension_numbers<[1], [0], [0], [1], [0, 0, 1, 1], [], []>} : vector<8x256xf32>, vector<256x512xf32>, vector<8x512xf32> -> vector<8x512xf32>
    %958 = arith.addf %956, %957 : vector<8x512xf32>
    %959 = vector.extract_strided_slice %958 {offsets = [0, 0], sizes = [8, 128], strides = [1, 1]} : vector<8x512xf32> to vector<8x128xf32>
    %960 = arith.negf %959 : vector<8x128xf32>
    %961 = math.exp %960 : vector<8x128xf32>
    %cst_154 = arith.constant 1.000000e+00 : f32
    %962 = vector.broadcast %cst_154 : f32 to vector<8x128xf32>
    %963 = arith.addf %962, %961 : vector<8x128xf32>
    %964 = arith.divf %962, %963 : vector<8x128xf32>
    %965 = vector.extract_strided_slice %958 {offsets = [0, 128], sizes = [8, 128], strides = [1, 1]} : vector<8x512xf32> to vector<8x128xf32>
    %966 = arith.negf %965 : vector<8x128xf32>
    %967 = math.exp %966 : vector<8x128xf32>
    %cst_155 = arith.constant 1.000000e+00 : f32
    %968 = vector.broadcast %cst_155 : f32 to vector<8x128xf32>
    %969 = arith.addf %968, %967 : vector<8x128xf32>
    %970 = arith.divf %968, %969 : vector<8x128xf32>
    %971 = vector.extract_strided_slice %958 {offsets = [0, 256], sizes = [8, 128], strides = [1, 1]} : vector<8x512xf32> to vector<8x128xf32>
    %972 = math.tanh %971 : vector<8x128xf32>
    %973 = vector.extract_strided_slice %958 {offsets = [0, 384], sizes = [8, 128], strides = [1, 1]} : vector<8x512xf32> to vector<8x128xf32>
    %974 = arith.negf %973 : vector<8x128xf32>
    %975 = math.exp %974 : vector<8x128xf32>
    %cst_156 = arith.constant 1.000000e+00 : f32
    %976 = vector.broadcast %cst_156 : f32 to vector<8x128xf32>
    %977 = arith.addf %976, %975 : vector<8x128xf32>
    %978 = arith.divf %976, %977 : vector<8x128xf32>
    %979 = arith.mulf %970, %946 : vector<8x128xf32>
    %980 = arith.mulf %964, %972 : vector<8x128xf32>
    %981 = arith.addf %979, %980 : vector<8x128xf32>
    %982 = math.tanh %981 : vector<8x128xf32>
    %983 = arith.mulf %978, %982 : vector<8x128xf32>
    %984 = vector.broadcast %4 : vector<8x1xf32> to vector<8x128xf32>
    %985 = arith.mulf %983, %984 : vector<8x128xf32>
    %986 = vector.broadcast %6 : vector<8x1xf32> to vector<8x128xf32>
    %987 = arith.mulf %983, %986 : vector<8x128xf32>
    %988 = tpu.concatenate %985, %987 in 1 : vector<8x128xf32>, vector<8x128xf32> -> vector<8x256xf32>
    %989 = vector.extract_strided_slice %743 {offsets = [0, 0], sizes = [4, 256], strides = [1, 1]} : vector<8x256xf32> to vector<4x256xf32>
    %990 = vector.extract_strided_slice %988 {offsets = [4, 0], sizes = [4, 256], strides = [1, 1]} : vector<8x256xf32> to vector<4x256xf32>
    %991 = arith.addf %989, %990 : vector<4x256xf32>
    %992 = vector.extract_strided_slice %778 {offsets = [0, 0], sizes = [4, 256], strides = [1, 1]} : vector<8x256xf32> to vector<4x256xf32>
    %993 = vector.extract_strided_slice %953 {offsets = [4, 0], sizes = [4, 256], strides = [1, 1]} : vector<8x256xf32> to vector<4x256xf32>
    %994 = arith.addf %992, %993 : vector<4x256xf32>
    %995 = vector.extract_strided_slice %813 {offsets = [0, 0], sizes = [4, 256], strides = [1, 1]} : vector<8x256xf32> to vector<4x256xf32>
    %996 = vector.extract_strided_slice %918 {offsets = [4, 0], sizes = [4, 256], strides = [1, 1]} : vector<8x256xf32> to vector<4x256xf32>
    %997 = arith.addf %995, %996 : vector<4x256xf32>
    %998 = vector.extract_strided_slice %848 {offsets = [0, 0], sizes = [4, 256], strides = [1, 1]} : vector<8x256xf32> to vector<4x256xf32>
    %999 = vector.extract_strided_slice %883 {offsets = [4, 0], sizes = [4, 256], strides = [1, 1]} : vector<8x256xf32> to vector<4x256xf32>
    %1000 = arith.addf %998, %999 : vector<4x256xf32>
    %1001 = vector.extract_strided_slice %883 {offsets = [0, 0], sizes = [4, 256], strides = [1, 1]} : vector<8x256xf32> to vector<4x256xf32>
    %1002 = vector.extract_strided_slice %848 {offsets = [4, 0], sizes = [4, 256], strides = [1, 1]} : vector<8x256xf32> to vector<4x256xf32>
    %1003 = arith.addf %1001, %1002 : vector<4x256xf32>
    %1004 = vector.extract_strided_slice %918 {offsets = [0, 0], sizes = [4, 256], strides = [1, 1]} : vector<8x256xf32> to vector<4x256xf32>
    %1005 = vector.extract_strided_slice %813 {offsets = [4, 0], sizes = [4, 256], strides = [1, 1]} : vector<8x256xf32> to vector<4x256xf32>
    %1006 = arith.addf %1004, %1005 : vector<4x256xf32>
    %1007 = vector.extract_strided_slice %953 {offsets = [0, 0], sizes = [4, 256], strides = [1, 1]} : vector<8x256xf32> to vector<4x256xf32>
    %1008 = vector.extract_strided_slice %778 {offsets = [4, 0], sizes = [4, 256], strides = [1, 1]} : vector<8x256xf32> to vector<4x256xf32>
    %1009 = arith.addf %1007, %1008 : vector<4x256xf32>
    %1010 = vector.extract_strided_slice %988 {offsets = [0, 0], sizes = [4, 256], strides = [1, 1]} : vector<8x256xf32> to vector<4x256xf32>
    %1011 = vector.extract_strided_slice %743 {offsets = [4, 0], sizes = [4, 256], strides = [1, 1]} : vector<8x256xf32> to vector<4x256xf32>
    %1012 = arith.addf %1010, %1011 : vector<4x256xf32>
    %1013 = tpu.concatenate %991, %994, %997, %1000, %1003, %1006, %1009, %1012 in 0 : vector<4x256xf32>, vector<4x256xf32>, vector<4x256xf32>, vector<4x256xf32>, vector<4x256xf32>, vector<4x256xf32>, vector<4x256xf32>, vector<4x256xf32> -> vector<32x256xf32>
    %cst_157 = arith.constant dense<0.000000e+00> : vector<32x128xf32>
    %1014 = tpu.matmul %1013, %10, %cst_157 {dimension_numbers = #tpu.dot_dimension_numbers<[1], [0], [0], [1], [0, 0, 1, 1], [], []>} : vector<32x256xf32>, vector<256x128xf32>, vector<32x128xf32> -> vector<32x128xf32>
    %cst_158 = arith.constant dense<0.000000e+00> : vector<32x128xf32>
    %1015 = tpu.matmul %1013, %11, %cst_158 {dimension_numbers = #tpu.dot_dimension_numbers<[1], [0], [0], [1], [0, 0, 1, 1], [], []>} : vector<32x256xf32>, vector<256x128xf32>, vector<32x128xf32> -> vector<32x128xf32>
    %1016 = arith.maximumf %1014, %1015 : vector<32x128xf32>
    %cst_159 = arith.constant dense<0.000000e+00> : vector<32x128xf32>
    %1017 = tpu.matmul %645, %1016, %cst_159 {dimension_numbers = #tpu.dot_dimension_numbers<[1], [0], [0], [1], [0, 0, 1, 1], [], []>} : vector<32x32xf32>, vector<32x128xf32>, vector<32x128xf32> -> vector<32x128xf32>
    %1018 = vector.extract_strided_slice %1017 {offsets = [0, 0], sizes = [8, 128], strides = [1, 1]} : vector<32x128xf32> to vector<8x128xf32>
    %1019 = vector.extract_strided_slice %1017 {offsets = [8, 0], sizes = [8, 128], strides = [1, 1]} : vector<32x128xf32> to vector<8x128xf32>
    %1020 = vector.shape_cast %1018 : vector<8x128xf32> to vector<1x8x128xf32>
    %1021 = vector.shape_cast %1019 : vector<8x128xf32> to vector<1x8x128xf32>
    %1022 = tpu.concatenate %1020, %1021 in 0 : vector<1x8x128xf32>, vector<1x8x128xf32> -> vector<2x8x128xf32>
    %1023 = vector.extract_strided_slice %1017 {offsets = [16, 0], sizes = [8, 128], strides = [1, 1]} : vector<32x128xf32> to vector<8x128xf32>
    %1024 = vector.extract_strided_slice %1017 {offsets = [24, 0], sizes = [8, 128], strides = [1, 1]} : vector<32x128xf32> to vector<8x128xf32>
    %1025 = vector.shape_cast %1023 : vector<8x128xf32> to vector<1x8x128xf32>
    %1026 = vector.shape_cast %1024 : vector<8x128xf32> to vector<1x8x128xf32>
    %1027 = tpu.concatenate %1025, %1026 in 0 : vector<1x8x128xf32>, vector<1x8x128xf32> -> vector<2x8x128xf32>
    %c0_160 = arith.constant 0 : index
    %c0_161 = arith.constant 0 : index
    %1028 = vector.load %arg22[%c0_160, %c0_161] : memref<1x128xf32, #tpu.memory_space<vmem>>, vector<1x128xf32>
    %c0_162 = arith.constant 0 : index
    %c0_163 = arith.constant 0 : index
    %1029 = vector.load %arg23[%c0_162, %c0_163] : memref<1x512xf32, #tpu.memory_space<vmem>>, vector<1x512xf32>
    %c0_164 = arith.constant 0 : index
    %c0_165 = arith.constant 0 : index
    %1030 = vector.load %arg18[%c0_164, %c0_165] : memref<128x384xf32, #tpu.memory_space<vmem>>, vector<128x384xf32>
    %c0_166 = arith.constant 0 : index
    %c0_167 = arith.constant 0 : index
    %1031 = vector.load %arg19[%c0_166, %c0_167] : memref<128x384xf32, #tpu.memory_space<vmem>>, vector<128x384xf32>
    %c0_168 = arith.constant 0 : index
    %c0_169 = arith.constant 0 : index
    %1032 = vector.load %arg20[%c0_168, %c0_169] : memref<1x384xf32, #tpu.memory_space<vmem>>, vector<1x384xf32>
    %c0_170 = arith.constant 0 : index
    %c0_171 = arith.constant 0 : index
    %1033 = vector.load %arg21[%c0_170, %c0_171] : memref<1x384xf32, #tpu.memory_space<vmem>>, vector<1x384xf32>
    %1034 = vector.shape_cast %1028 : vector<1x128xf32> to vector<1x1x128xf32>
    %1035 = vector.broadcast %1034 : vector<1x1x128xf32> to vector<2x8x128xf32>
    %1036 = arith.mulf %1022, %1035 : vector<2x8x128xf32>
    %cst_172 = arith.constant dense<0.000000e+00> : vector<2x8xf32>
    %1037 = vector.multi_reduction <add>, %1036, %cst_172 [2] : vector<2x8x128xf32> to vector<2x8xf32>
    %cst_173 = arith.constant dense<0xFF800000> : vector<2xf32>
    %1038 = vector.multi_reduction <maximumf>, %1037, %cst_173 [1] : vector<2x8xf32> to vector<2xf32>
    %1039 = vector.shape_cast %1038 : vector<2xf32> to vector<2x1xf32>
    %1040 = vector.broadcast %1039 : vector<2x1xf32> to vector<2x8xf32>
    %1041 = arith.subf %1037, %1040 : vector<2x8xf32>
    %1042 = math.exp %1041 : vector<2x8xf32>
    %cst_174 = arith.constant dense<0.000000e+00> : vector<2xf32>
    %1043 = vector.multi_reduction <add>, %1042, %cst_174 [1] : vector<2x8xf32> to vector<2xf32>
    %1044 = vector.shape_cast %1043 : vector<2xf32> to vector<2x1xf32>
    %1045 = vector.broadcast %1044 : vector<2x1xf32> to vector<2x8xf32>
    %1046 = arith.divf %1042, %1045 : vector<2x8xf32>
    %1047 = vector.shape_cast %1046 : vector<2x8xf32> to vector<2x8x1xf32>
    %1048 = vector.broadcast %1047 : vector<2x8x1xf32> to vector<2x8x128xf32>
    %1049 = arith.mulf %1048, %1022 : vector<2x8x128xf32>
    %cst_175 = arith.constant dense<0.000000e+00> : vector<2x128xf32>
    %1050 = vector.multi_reduction <add>, %1049, %cst_175 [1] : vector<2x8x128xf32> to vector<2x128xf32>
    %cst_176 = arith.constant 0.000000e+00 : f32
    %1051 = vector.broadcast %cst_176 : f32 to vector<2x1xf32>
    %1052 = vector.shape_cast %1050 : vector<2x128xf32> to vector<2x1x128xf32>
    %1053 = vector.broadcast %1052 : vector<2x1x128xf32> to vector<2x8x128xf32>
    %1054 = arith.mulf %1053, %1027 : vector<2x8x128xf32>
    %cst_177 = arith.constant dense<0.000000e+00> : vector<2x8xf32>
    %1055 = vector.multi_reduction <add>, %1054, %cst_177 [2] : vector<2x8x128xf32> to vector<2x8xf32>
    %cst_178 = arith.constant dense<0xFF800000> : vector<2xf32>
    %1056 = vector.multi_reduction <maximumf>, %1055, %cst_178 [1] : vector<2x8xf32> to vector<2xf32>
    %1057 = vector.shape_cast %1056 : vector<2xf32> to vector<2x1xf32>
    %1058 = vector.broadcast %1057 : vector<2x1xf32> to vector<2x8xf32>
    %1059 = arith.subf %1055, %1058 : vector<2x8xf32>
    %1060 = math.exp %1059 : vector<2x8xf32>
    %cst_179 = arith.constant dense<0.000000e+00> : vector<2xf32>
    %1061 = vector.multi_reduction <add>, %1060, %cst_179 [1] : vector<2x8xf32> to vector<2xf32>
    %1062 = vector.shape_cast %1061 : vector<2xf32> to vector<2x1xf32>
    %1063 = vector.broadcast %1062 : vector<2x1xf32> to vector<2x8xf32>
    %1064 = arith.divf %1060, %1063 : vector<2x8xf32>
    %1065 = vector.shape_cast %1064 : vector<2x8xf32> to vector<2x8x1xf32>
    %1066 = vector.broadcast %1065 : vector<2x8x1xf32> to vector<2x8x128xf32>
    %1067 = arith.mulf %1066, %1027 : vector<2x8x128xf32>
    %cst_180 = arith.constant dense<0.000000e+00> : vector<2x128xf32>
    %1068 = vector.multi_reduction <add>, %1067, %cst_180 [1] : vector<2x8x128xf32> to vector<2x128xf32>
    %1069 = arith.subf %1068, %1050 : vector<2x128xf32>
    %1070 = arith.mulf %1068, %1050 : vector<2x128xf32>
    %1071 = tpu.concatenate %1068, %1050, %1069, %1070 in 1 : vector<2x128xf32>, vector<2x128xf32>, vector<2x128xf32>, vector<2x128xf32> -> vector<2x512xf32>
    %1072 = vector.broadcast %1029 : vector<1x512xf32> to vector<2x512xf32>
    %1073 = arith.mulf %1071, %1072 : vector<2x512xf32>
    %cst_181 = arith.constant dense<0.000000e+00> : vector<2xf32>
    %1074 = vector.multi_reduction <add>, %1073, %cst_181 [1] : vector<2x512xf32> to vector<2xf32>
    %1075 = vector.shape_cast %1074 : vector<2xf32> to vector<2x1xf32>
    %1076 = arith.addf %1051, %1075 : vector<2x1xf32>
    %cst_182 = arith.constant dense<0.000000e+00> : vector<2x384xf32>
    %1077 = tpu.matmul %1068, %1030, %cst_182 {dimension_numbers = #tpu.dot_dimension_numbers<[1], [0], [0], [1], [0, 0, 1, 1], [], []>} : vector<2x128xf32>, vector<128x384xf32>, vector<2x384xf32> -> vector<2x384xf32>
    %1078 = vector.broadcast %1032 : vector<1x384xf32> to vector<2x384xf32>
    %1079 = arith.addf %1077, %1078 : vector<2x384xf32>
    %cst_183 = arith.constant dense<0.000000e+00> : vector<2x384xf32>
    %1080 = tpu.matmul %1050, %1031, %cst_183 {dimension_numbers = #tpu.dot_dimension_numbers<[1], [0], [0], [1], [0, 0, 1, 1], [], []>} : vector<2x128xf32>, vector<128x384xf32>, vector<2x384xf32> -> vector<2x384xf32>
    %1081 = vector.broadcast %1033 : vector<1x384xf32> to vector<2x384xf32>
    %1082 = arith.addf %1080, %1081 : vector<2x384xf32>
    %1083 = vector.extract_strided_slice %1079 {offsets = [0, 0], sizes = [2, 128], strides = [1, 1]} : vector<2x384xf32> to vector<2x128xf32>
    %1084 = vector.extract_strided_slice %1082 {offsets = [0, 0], sizes = [2, 128], strides = [1, 1]} : vector<2x384xf32> to vector<2x128xf32>
    %1085 = arith.addf %1083, %1084 : vector<2x128xf32>
    %1086 = arith.negf %1085 : vector<2x128xf32>
    %1087 = math.exp %1086 : vector<2x128xf32>
    %cst_184 = arith.constant 1.000000e+00 : f32
    %1088 = vector.broadcast %cst_184 : f32 to vector<2x128xf32>
    %1089 = arith.addf %1088, %1087 : vector<2x128xf32>
    %1090 = arith.divf %1088, %1089 : vector<2x128xf32>
    %1091 = vector.extract_strided_slice %1079 {offsets = [0, 128], sizes = [2, 128], strides = [1, 1]} : vector<2x384xf32> to vector<2x128xf32>
    %1092 = vector.extract_strided_slice %1082 {offsets = [0, 128], sizes = [2, 128], strides = [1, 1]} : vector<2x384xf32> to vector<2x128xf32>
    %1093 = arith.addf %1091, %1092 : vector<2x128xf32>
    %1094 = arith.negf %1093 : vector<2x128xf32>
    %1095 = math.exp %1094 : vector<2x128xf32>
    %cst_185 = arith.constant 1.000000e+00 : f32
    %1096 = vector.broadcast %cst_185 : f32 to vector<2x128xf32>
    %1097 = arith.addf %1096, %1095 : vector<2x128xf32>
    %1098 = arith.divf %1096, %1097 : vector<2x128xf32>
    %1099 = vector.extract_strided_slice %1079 {offsets = [0, 256], sizes = [2, 128], strides = [1, 1]} : vector<2x384xf32> to vector<2x128xf32>
    %1100 = vector.extract_strided_slice %1082 {offsets = [0, 256], sizes = [2, 128], strides = [1, 1]} : vector<2x384xf32> to vector<2x128xf32>
    %1101 = arith.mulf %1090, %1100 : vector<2x128xf32>
    %1102 = arith.addf %1099, %1101 : vector<2x128xf32>
    %1103 = math.tanh %1102 : vector<2x128xf32>
    %cst_186 = arith.constant 1.000000e+00 : f32
    %1104 = vector.broadcast %cst_186 : f32 to vector<2x128xf32>
    %1105 = arith.subf %1104, %1098 : vector<2x128xf32>
    %1106 = arith.mulf %1105, %1103 : vector<2x128xf32>
    %1107 = arith.mulf %1098, %1050 : vector<2x128xf32>
    %1108 = arith.addf %1106, %1107 : vector<2x128xf32>
    %1109 = vector.shape_cast %1108 : vector<2x128xf32> to vector<2x1x128xf32>
    %1110 = vector.broadcast %1109 : vector<2x1x128xf32> to vector<2x8x128xf32>
    %1111 = arith.mulf %1110, %1027 : vector<2x8x128xf32>
    %cst_187 = arith.constant dense<0.000000e+00> : vector<2x8xf32>
    %1112 = vector.multi_reduction <add>, %1111, %cst_187 [2] : vector<2x8x128xf32> to vector<2x8xf32>
    %cst_188 = arith.constant dense<0xFF800000> : vector<2xf32>
    %1113 = vector.multi_reduction <maximumf>, %1112, %cst_188 [1] : vector<2x8xf32> to vector<2xf32>
    %1114 = vector.shape_cast %1113 : vector<2xf32> to vector<2x1xf32>
    %1115 = vector.broadcast %1114 : vector<2x1xf32> to vector<2x8xf32>
    %1116 = arith.subf %1112, %1115 : vector<2x8xf32>
    %1117 = math.exp %1116 : vector<2x8xf32>
    %cst_189 = arith.constant dense<0.000000e+00> : vector<2xf32>
    %1118 = vector.multi_reduction <add>, %1117, %cst_189 [1] : vector<2x8xf32> to vector<2xf32>
    %1119 = vector.shape_cast %1118 : vector<2xf32> to vector<2x1xf32>
    %1120 = vector.broadcast %1119 : vector<2x1xf32> to vector<2x8xf32>
    %1121 = arith.divf %1117, %1120 : vector<2x8xf32>
    %1122 = vector.shape_cast %1121 : vector<2x8xf32> to vector<2x8x1xf32>
    %1123 = vector.broadcast %1122 : vector<2x8x1xf32> to vector<2x8x128xf32>
    %1124 = arith.mulf %1123, %1027 : vector<2x8x128xf32>
    %cst_190 = arith.constant dense<0.000000e+00> : vector<2x128xf32>
    %1125 = vector.multi_reduction <add>, %1124, %cst_190 [1] : vector<2x8x128xf32> to vector<2x128xf32>
    %1126 = arith.subf %1125, %1108 : vector<2x128xf32>
    %1127 = arith.mulf %1125, %1108 : vector<2x128xf32>
    %1128 = tpu.concatenate %1125, %1108, %1126, %1127 in 1 : vector<2x128xf32>, vector<2x128xf32>, vector<2x128xf32>, vector<2x128xf32> -> vector<2x512xf32>
    %1129 = vector.broadcast %1029 : vector<1x512xf32> to vector<2x512xf32>
    %1130 = arith.mulf %1128, %1129 : vector<2x512xf32>
    %cst_191 = arith.constant dense<0.000000e+00> : vector<2xf32>
    %1131 = vector.multi_reduction <add>, %1130, %cst_191 [1] : vector<2x512xf32> to vector<2xf32>
    %1132 = vector.shape_cast %1131 : vector<2xf32> to vector<2x1xf32>
    %1133 = arith.addf %1076, %1132 : vector<2x1xf32>
    %cst_192 = arith.constant dense<0.000000e+00> : vector<2x384xf32>
    %1134 = tpu.matmul %1125, %1030, %cst_192 {dimension_numbers = #tpu.dot_dimension_numbers<[1], [0], [0], [1], [0, 0, 1, 1], [], []>} : vector<2x128xf32>, vector<128x384xf32>, vector<2x384xf32> -> vector<2x384xf32>
    %1135 = vector.broadcast %1032 : vector<1x384xf32> to vector<2x384xf32>
    %1136 = arith.addf %1134, %1135 : vector<2x384xf32>
    %cst_193 = arith.constant dense<0.000000e+00> : vector<2x384xf32>
    %1137 = tpu.matmul %1108, %1031, %cst_193 {dimension_numbers = #tpu.dot_dimension_numbers<[1], [0], [0], [1], [0, 0, 1, 1], [], []>} : vector<2x128xf32>, vector<128x384xf32>, vector<2x384xf32> -> vector<2x384xf32>
    %1138 = vector.broadcast %1033 : vector<1x384xf32> to vector<2x384xf32>
    %1139 = arith.addf %1137, %1138 : vector<2x384xf32>
    %1140 = vector.extract_strided_slice %1136 {offsets = [0, 0], sizes = [2, 128], strides = [1, 1]} : vector<2x384xf32> to vector<2x128xf32>
    %1141 = vector.extract_strided_slice %1139 {offsets = [0, 0], sizes = [2, 128], strides = [1, 1]} : vector<2x384xf32> to vector<2x128xf32>
    %1142 = arith.addf %1140, %1141 : vector<2x128xf32>
    %1143 = arith.negf %1142 : vector<2x128xf32>
    %1144 = math.exp %1143 : vector<2x128xf32>
    %cst_194 = arith.constant 1.000000e+00 : f32
    %1145 = vector.broadcast %cst_194 : f32 to vector<2x128xf32>
    %1146 = arith.addf %1145, %1144 : vector<2x128xf32>
    %1147 = arith.divf %1145, %1146 : vector<2x128xf32>
    %1148 = vector.extract_strided_slice %1136 {offsets = [0, 128], sizes = [2, 128], strides = [1, 1]} : vector<2x384xf32> to vector<2x128xf32>
    %1149 = vector.extract_strided_slice %1139 {offsets = [0, 128], sizes = [2, 128], strides = [1, 1]} : vector<2x384xf32> to vector<2x128xf32>
    %1150 = arith.addf %1148, %1149 : vector<2x128xf32>
    %1151 = arith.negf %1150 : vector<2x128xf32>
    %1152 = math.exp %1151 : vector<2x128xf32>
    %cst_195 = arith.constant 1.000000e+00 : f32
    %1153 = vector.broadcast %cst_195 : f32 to vector<2x128xf32>
    %1154 = arith.addf %1153, %1152 : vector<2x128xf32>
    %1155 = arith.divf %1153, %1154 : vector<2x128xf32>
    %1156 = vector.extract_strided_slice %1136 {offsets = [0, 256], sizes = [2, 128], strides = [1, 1]} : vector<2x384xf32> to vector<2x128xf32>
    %1157 = vector.extract_strided_slice %1139 {offsets = [0, 256], sizes = [2, 128], strides = [1, 1]} : vector<2x384xf32> to vector<2x128xf32>
    %1158 = arith.mulf %1147, %1157 : vector<2x128xf32>
    %1159 = arith.addf %1156, %1158 : vector<2x128xf32>
    %1160 = math.tanh %1159 : vector<2x128xf32>
    %cst_196 = arith.constant 1.000000e+00 : f32
    %1161 = vector.broadcast %cst_196 : f32 to vector<2x128xf32>
    %1162 = arith.subf %1161, %1155 : vector<2x128xf32>
    %1163 = arith.mulf %1162, %1160 : vector<2x128xf32>
    %1164 = arith.mulf %1155, %1108 : vector<2x128xf32>
    %1165 = arith.addf %1163, %1164 : vector<2x128xf32>
    %1166 = vector.shape_cast %1165 : vector<2x128xf32> to vector<2x1x128xf32>
    %1167 = vector.broadcast %1166 : vector<2x1x128xf32> to vector<2x8x128xf32>
    %1168 = arith.mulf %1167, %1027 : vector<2x8x128xf32>
    %cst_197 = arith.constant dense<0.000000e+00> : vector<2x8xf32>
    %1169 = vector.multi_reduction <add>, %1168, %cst_197 [2] : vector<2x8x128xf32> to vector<2x8xf32>
    %cst_198 = arith.constant dense<0xFF800000> : vector<2xf32>
    %1170 = vector.multi_reduction <maximumf>, %1169, %cst_198 [1] : vector<2x8xf32> to vector<2xf32>
    %1171 = vector.shape_cast %1170 : vector<2xf32> to vector<2x1xf32>
    %1172 = vector.broadcast %1171 : vector<2x1xf32> to vector<2x8xf32>
    %1173 = arith.subf %1169, %1172 : vector<2x8xf32>
    %1174 = math.exp %1173 : vector<2x8xf32>
    %cst_199 = arith.constant dense<0.000000e+00> : vector<2xf32>
    %1175 = vector.multi_reduction <add>, %1174, %cst_199 [1] : vector<2x8xf32> to vector<2xf32>
    %1176 = vector.shape_cast %1175 : vector<2xf32> to vector<2x1xf32>
    %1177 = vector.broadcast %1176 : vector<2x1xf32> to vector<2x8xf32>
    %1178 = arith.divf %1174, %1177 : vector<2x8xf32>
    %1179 = vector.shape_cast %1178 : vector<2x8xf32> to vector<2x8x1xf32>
    %1180 = vector.broadcast %1179 : vector<2x8x1xf32> to vector<2x8x128xf32>
    %1181 = arith.mulf %1180, %1027 : vector<2x8x128xf32>
    %cst_200 = arith.constant dense<0.000000e+00> : vector<2x128xf32>
    %1182 = vector.multi_reduction <add>, %1181, %cst_200 [1] : vector<2x8x128xf32> to vector<2x128xf32>
    %1183 = arith.subf %1182, %1165 : vector<2x128xf32>
    %1184 = arith.mulf %1182, %1165 : vector<2x128xf32>
    %1185 = tpu.concatenate %1182, %1165, %1183, %1184 in 1 : vector<2x128xf32>, vector<2x128xf32>, vector<2x128xf32>, vector<2x128xf32> -> vector<2x512xf32>
    %1186 = vector.broadcast %1029 : vector<1x512xf32> to vector<2x512xf32>
    %1187 = arith.mulf %1185, %1186 : vector<2x512xf32>
    %cst_201 = arith.constant dense<0.000000e+00> : vector<2xf32>
    %1188 = vector.multi_reduction <add>, %1187, %cst_201 [1] : vector<2x512xf32> to vector<2xf32>
    %1189 = vector.shape_cast %1188 : vector<2xf32> to vector<2x1xf32>
    %1190 = arith.addf %1133, %1189 : vector<2x1xf32>
    %cst_202 = arith.constant dense<0.000000e+00> : vector<2x384xf32>
    %1191 = tpu.matmul %1182, %1030, %cst_202 {dimension_numbers = #tpu.dot_dimension_numbers<[1], [0], [0], [1], [0, 0, 1, 1], [], []>} : vector<2x128xf32>, vector<128x384xf32>, vector<2x384xf32> -> vector<2x384xf32>
    %1192 = vector.broadcast %1032 : vector<1x384xf32> to vector<2x384xf32>
    %1193 = arith.addf %1191, %1192 : vector<2x384xf32>
    %cst_203 = arith.constant dense<0.000000e+00> : vector<2x384xf32>
    %1194 = tpu.matmul %1165, %1031, %cst_203 {dimension_numbers = #tpu.dot_dimension_numbers<[1], [0], [0], [1], [0, 0, 1, 1], [], []>} : vector<2x128xf32>, vector<128x384xf32>, vector<2x384xf32> -> vector<2x384xf32>
    %1195 = vector.broadcast %1033 : vector<1x384xf32> to vector<2x384xf32>
    %1196 = arith.addf %1194, %1195 : vector<2x384xf32>
    %1197 = vector.extract_strided_slice %1193 {offsets = [0, 0], sizes = [2, 128], strides = [1, 1]} : vector<2x384xf32> to vector<2x128xf32>
    %1198 = vector.extract_strided_slice %1196 {offsets = [0, 0], sizes = [2, 128], strides = [1, 1]} : vector<2x384xf32> to vector<2x128xf32>
    %1199 = arith.addf %1197, %1198 : vector<2x128xf32>
    %1200 = arith.negf %1199 : vector<2x128xf32>
    %1201 = math.exp %1200 : vector<2x128xf32>
    %cst_204 = arith.constant 1.000000e+00 : f32
    %1202 = vector.broadcast %cst_204 : f32 to vector<2x128xf32>
    %1203 = arith.addf %1202, %1201 : vector<2x128xf32>
    %1204 = arith.divf %1202, %1203 : vector<2x128xf32>
    %1205 = vector.extract_strided_slice %1193 {offsets = [0, 128], sizes = [2, 128], strides = [1, 1]} : vector<2x384xf32> to vector<2x128xf32>
    %1206 = vector.extract_strided_slice %1196 {offsets = [0, 128], sizes = [2, 128], strides = [1, 1]} : vector<2x384xf32> to vector<2x128xf32>
    %1207 = arith.addf %1205, %1206 : vector<2x128xf32>
    %1208 = arith.negf %1207 : vector<2x128xf32>
    %1209 = math.exp %1208 : vector<2x128xf32>
    %cst_205 = arith.constant 1.000000e+00 : f32
    %1210 = vector.broadcast %cst_205 : f32 to vector<2x128xf32>
    %1211 = arith.addf %1210, %1209 : vector<2x128xf32>
    %1212 = arith.divf %1210, %1211 : vector<2x128xf32>
    %1213 = vector.extract_strided_slice %1193 {offsets = [0, 256], sizes = [2, 128], strides = [1, 1]} : vector<2x384xf32> to vector<2x128xf32>
    %1214 = vector.extract_strided_slice %1196 {offsets = [0, 256], sizes = [2, 128], strides = [1, 1]} : vector<2x384xf32> to vector<2x128xf32>
    %1215 = arith.mulf %1204, %1214 : vector<2x128xf32>
    %1216 = arith.addf %1213, %1215 : vector<2x128xf32>
    %1217 = math.tanh %1216 : vector<2x128xf32>
    %cst_206 = arith.constant 1.000000e+00 : f32
    %1218 = vector.broadcast %cst_206 : f32 to vector<2x128xf32>
    %1219 = arith.subf %1218, %1212 : vector<2x128xf32>
    %1220 = arith.mulf %1219, %1217 : vector<2x128xf32>
    %1221 = arith.mulf %1212, %1165 : vector<2x128xf32>
    %1222 = arith.addf %1220, %1221 : vector<2x128xf32>
    %1223 = vector.shape_cast %1222 : vector<2x128xf32> to vector<2x1x128xf32>
    %1224 = vector.broadcast %1223 : vector<2x1x128xf32> to vector<2x8x128xf32>
    %1225 = arith.mulf %1224, %1027 : vector<2x8x128xf32>
    %cst_207 = arith.constant dense<0.000000e+00> : vector<2x8xf32>
    %1226 = vector.multi_reduction <add>, %1225, %cst_207 [2] : vector<2x8x128xf32> to vector<2x8xf32>
    %cst_208 = arith.constant dense<0xFF800000> : vector<2xf32>
    %1227 = vector.multi_reduction <maximumf>, %1226, %cst_208 [1] : vector<2x8xf32> to vector<2xf32>
    %1228 = vector.shape_cast %1227 : vector<2xf32> to vector<2x1xf32>
    %1229 = vector.broadcast %1228 : vector<2x1xf32> to vector<2x8xf32>
    %1230 = arith.subf %1226, %1229 : vector<2x8xf32>
    %1231 = math.exp %1230 : vector<2x8xf32>
    %cst_209 = arith.constant dense<0.000000e+00> : vector<2xf32>
    %1232 = vector.multi_reduction <add>, %1231, %cst_209 [1] : vector<2x8xf32> to vector<2xf32>
    %1233 = vector.shape_cast %1232 : vector<2xf32> to vector<2x1xf32>
    %1234 = vector.broadcast %1233 : vector<2x1xf32> to vector<2x8xf32>
    %1235 = arith.divf %1231, %1234 : vector<2x8xf32>
    %1236 = vector.shape_cast %1235 : vector<2x8xf32> to vector<2x8x1xf32>
    %1237 = vector.broadcast %1236 : vector<2x8x1xf32> to vector<2x8x128xf32>
    %1238 = arith.mulf %1237, %1027 : vector<2x8x128xf32>
    %cst_210 = arith.constant dense<0.000000e+00> : vector<2x128xf32>
    %1239 = vector.multi_reduction <add>, %1238, %cst_210 [1] : vector<2x8x128xf32> to vector<2x128xf32>
    %1240 = arith.subf %1239, %1222 : vector<2x128xf32>
    %1241 = arith.mulf %1239, %1222 : vector<2x128xf32>
    %1242 = tpu.concatenate %1239, %1222, %1240, %1241 in 1 : vector<2x128xf32>, vector<2x128xf32>, vector<2x128xf32>, vector<2x128xf32> -> vector<2x512xf32>
    %1243 = vector.broadcast %1029 : vector<1x512xf32> to vector<2x512xf32>
    %1244 = arith.mulf %1242, %1243 : vector<2x512xf32>
    %cst_211 = arith.constant dense<0.000000e+00> : vector<2xf32>
    %1245 = vector.multi_reduction <add>, %1244, %cst_211 [1] : vector<2x512xf32> to vector<2xf32>
    %1246 = vector.shape_cast %1245 : vector<2xf32> to vector<2x1xf32>
    %1247 = arith.addf %1190, %1246 : vector<2x1xf32>
    %cst_212 = arith.constant dense<0.000000e+00> : vector<2x384xf32>
    %1248 = tpu.matmul %1239, %1030, %cst_212 {dimension_numbers = #tpu.dot_dimension_numbers<[1], [0], [0], [1], [0, 0, 1, 1], [], []>} : vector<2x128xf32>, vector<128x384xf32>, vector<2x384xf32> -> vector<2x384xf32>
    %1249 = vector.broadcast %1032 : vector<1x384xf32> to vector<2x384xf32>
    %1250 = arith.addf %1248, %1249 : vector<2x384xf32>
    %cst_213 = arith.constant dense<0.000000e+00> : vector<2x384xf32>
    %1251 = tpu.matmul %1222, %1031, %cst_213 {dimension_numbers = #tpu.dot_dimension_numbers<[1], [0], [0], [1], [0, 0, 1, 1], [], []>} : vector<2x128xf32>, vector<128x384xf32>, vector<2x384xf32> -> vector<2x384xf32>
    %1252 = vector.broadcast %1033 : vector<1x384xf32> to vector<2x384xf32>
    %1253 = arith.addf %1251, %1252 : vector<2x384xf32>
    %1254 = vector.extract_strided_slice %1250 {offsets = [0, 0], sizes = [2, 128], strides = [1, 1]} : vector<2x384xf32> to vector<2x128xf32>
    %1255 = vector.extract_strided_slice %1253 {offsets = [0, 0], sizes = [2, 128], strides = [1, 1]} : vector<2x384xf32> to vector<2x128xf32>
    %1256 = arith.addf %1254, %1255 : vector<2x128xf32>
    %1257 = arith.negf %1256 : vector<2x128xf32>
    %1258 = math.exp %1257 : vector<2x128xf32>
    %cst_214 = arith.constant 1.000000e+00 : f32
    %1259 = vector.broadcast %cst_214 : f32 to vector<2x128xf32>
    %1260 = arith.addf %1259, %1258 : vector<2x128xf32>
    %1261 = arith.divf %1259, %1260 : vector<2x128xf32>
    %1262 = vector.extract_strided_slice %1250 {offsets = [0, 128], sizes = [2, 128], strides = [1, 1]} : vector<2x384xf32> to vector<2x128xf32>
    %1263 = vector.extract_strided_slice %1253 {offsets = [0, 128], sizes = [2, 128], strides = [1, 1]} : vector<2x384xf32> to vector<2x128xf32>
    %1264 = arith.addf %1262, %1263 : vector<2x128xf32>
    %1265 = arith.negf %1264 : vector<2x128xf32>
    %1266 = math.exp %1265 : vector<2x128xf32>
    %cst_215 = arith.constant 1.000000e+00 : f32
    %1267 = vector.broadcast %cst_215 : f32 to vector<2x128xf32>
    %1268 = arith.addf %1267, %1266 : vector<2x128xf32>
    %1269 = arith.divf %1267, %1268 : vector<2x128xf32>
    %1270 = vector.extract_strided_slice %1250 {offsets = [0, 256], sizes = [2, 128], strides = [1, 1]} : vector<2x384xf32> to vector<2x128xf32>
    %1271 = vector.extract_strided_slice %1253 {offsets = [0, 256], sizes = [2, 128], strides = [1, 1]} : vector<2x384xf32> to vector<2x128xf32>
    %1272 = arith.mulf %1261, %1271 : vector<2x128xf32>
    %1273 = arith.addf %1270, %1272 : vector<2x128xf32>
    %1274 = math.tanh %1273 : vector<2x128xf32>
    %cst_216 = arith.constant 1.000000e+00 : f32
    %1275 = vector.broadcast %cst_216 : f32 to vector<2x128xf32>
    %1276 = arith.subf %1275, %1269 : vector<2x128xf32>
    %1277 = arith.mulf %1276, %1274 : vector<2x128xf32>
    %1278 = arith.mulf %1269, %1222 : vector<2x128xf32>
    %1279 = arith.addf %1277, %1278 : vector<2x128xf32>
    %1280 = vector.shape_cast %1279 : vector<2x128xf32> to vector<2x1x128xf32>
    %1281 = vector.broadcast %1280 : vector<2x1x128xf32> to vector<2x8x128xf32>
    %1282 = arith.mulf %1281, %1027 : vector<2x8x128xf32>
    %cst_217 = arith.constant dense<0.000000e+00> : vector<2x8xf32>
    %1283 = vector.multi_reduction <add>, %1282, %cst_217 [2] : vector<2x8x128xf32> to vector<2x8xf32>
    %cst_218 = arith.constant dense<0xFF800000> : vector<2xf32>
    %1284 = vector.multi_reduction <maximumf>, %1283, %cst_218 [1] : vector<2x8xf32> to vector<2xf32>
    %1285 = vector.shape_cast %1284 : vector<2xf32> to vector<2x1xf32>
    %1286 = vector.broadcast %1285 : vector<2x1xf32> to vector<2x8xf32>
    %1287 = arith.subf %1283, %1286 : vector<2x8xf32>
    %1288 = math.exp %1287 : vector<2x8xf32>
    %cst_219 = arith.constant dense<0.000000e+00> : vector<2xf32>
    %1289 = vector.multi_reduction <add>, %1288, %cst_219 [1] : vector<2x8xf32> to vector<2xf32>
    %1290 = vector.shape_cast %1289 : vector<2xf32> to vector<2x1xf32>
    %1291 = vector.broadcast %1290 : vector<2x1xf32> to vector<2x8xf32>
    %1292 = arith.divf %1288, %1291 : vector<2x8xf32>
    %1293 = vector.shape_cast %1292 : vector<2x8xf32> to vector<2x8x1xf32>
    %1294 = vector.broadcast %1293 : vector<2x8x1xf32> to vector<2x8x128xf32>
    %1295 = arith.mulf %1294, %1027 : vector<2x8x128xf32>
    %cst_220 = arith.constant dense<0.000000e+00> : vector<2x128xf32>
    %1296 = vector.multi_reduction <add>, %1295, %cst_220 [1] : vector<2x8x128xf32> to vector<2x128xf32>
    %1297 = arith.subf %1296, %1279 : vector<2x128xf32>
    %1298 = arith.mulf %1296, %1279 : vector<2x128xf32>
    %1299 = tpu.concatenate %1296, %1279, %1297, %1298 in 1 : vector<2x128xf32>, vector<2x128xf32>, vector<2x128xf32>, vector<2x128xf32> -> vector<2x512xf32>
    %1300 = vector.broadcast %1029 : vector<1x512xf32> to vector<2x512xf32>
    %1301 = arith.mulf %1299, %1300 : vector<2x512xf32>
    %cst_221 = arith.constant dense<0.000000e+00> : vector<2xf32>
    %1302 = vector.multi_reduction <add>, %1301, %cst_221 [1] : vector<2x512xf32> to vector<2xf32>
    %1303 = vector.shape_cast %1302 : vector<2xf32> to vector<2x1xf32>
    %1304 = arith.addf %1247, %1303 : vector<2x1xf32>
    %cst_222 = arith.constant 2.000000e-01 : f32
    %1305 = vector.broadcast %cst_222 : f32 to vector<2x1xf32>
    %1306 = arith.mulf %1304, %1305 : vector<2x1xf32>
    %c0_223 = arith.constant 0 : index
    %c0_224 = arith.constant 0 : index
    %1307 = vector.load %arg24[%c0_223, %c0_224] : memref<2x1xf32, #tpu.memory_space<vmem>>, vector<2x1xf32>
    tpu.vector_store %arg24[%c0_223, %c0_224], %1306 {strides = array<i32>} : memref<2x1xf32, #tpu.memory_space<vmem>>, vector<2x1xf32>,
    return
  }
}

</mosaic_0001>

<bundles_post_ra>
// kernel: san_light_forward.1
= control target key start
LH: loop header
LB: loop body
LE: loop exit
PB: predicated region body
PF: predicated region fallthrough
CT: control target
= control target key end

     0   :  { %v15991_v3 = vmov 0.0   ;;  %v15989_v4 = vmov 0.0|0.0   ;;  %vm12003_vm0 = vmmov 0   ;;  %vm195_vm1 = vcmask 261120   ;;  %s12004_s26 = smov 64   ;;  %s15956_s9 = inlined_call_operand.vmem [shape: f32[32,256], index: 9, kind: input, shape index: {}]   ;;  %s15957_s10 = inlined_call_operand.vmem [shape: f32[64,128], index: 10, kind: input, shape index: {}]   ;;  %s15958_s0 = inlined_call_operand.vmem [shape: f32[32,32], index: 0, kind: input, shape index: {}]   ;;  %s15959_s11 = inlined_call_operand.vmem [shape: f32[1,256], index: 11, kind: input, shape index: {}]   ;;  %s15960_s5 = inlined_call_operand.vmem [shape: f32[64,32], index: 5, kind: input, shape index: {}]   ;;  %s15961_s6 = inlined_call_operand.vmem [shape: f32[64,32], index: 6, kind: input, shape index: {}]   ;;  %s15962_s12 = inlined_call_operand.vmem [shape: f32[32,256], index: 12, kind: input, shape index: {}]   ;;  %s15963_s13 = inlined_call_operand.vmem [shape: f32[64,128], index: 13, kind: input, shape index: {}]   ;;  %s15964_s14 = inlined_call_operand.vmem [shape: f32[1,256], index: 14, kind: input, shape index: {}]   ;;  %s15965_s3 = inlined_call_operand.vmem [shape: f32[32,32], index: 3, kind: input, shape index: {}]   ;;  %s15966_s1 = inlined_call_operand.vmem [shape: f32[2,8,1], index: 1, kind: input, shape index: {}]   ;;  %s15967_s2 = inlined_call_operand.vmem [shape: f32[2,1,8], index: 2, kind: input, shape index: {}]   ;;  %s15968_s4 = inlined_call_operand.vmem [shape: f32[32,32], index: 4, kind: input, shape index: {}]   ;;  %s15969_s15 = inlined_call_operand.vmem [shape: f32[128,1024], index: 15, kind: input, shape index: {}]   ;;  %s15970_s16 = inlined_call_operand.vmem [shape: f32[256,512], index: 16, kind: input, shape index: {}]   ;;  %s15971_s17 = inlined_call_operand.vmem [shape: f32[1,1024], index: 17, kind: input, shape index: {}]   ;;  %s15972_s7 = inlined_call_operand.vmem [shape: f32[256,128], index: 7, kind: input, shape index: {}]   ;;  %s15973_s8 = inlined_call_operand.vmem [shape: f32[256,128], index: 8, kind: input, shape index: {}]   ;;  %s15974_s22 = inlined_call_operand.vmem [shape: f32[1,128], index: 22, kind: input, shape index: {}]   ;;  %s15975_s18 = inlined_call_operand.vmem [shape: f32[128,384], index: 18, kind: input, shape index: {}]   ;;  %s15976_s19 = inlined_call_operand.vmem [shape: f32[128,384], index: 19, kind: input, shape index: {}]   ;;  %s15977_s23 = inlined_call_operand.vmem [shape: f32[1,512], index: 23, kind: input, shape index: {}]   ;;  %s15978_s21 = inlined_call_operand.vmem [shape: f32[1,384], index: 21, kind: input, shape index: {}]   ;;  %s15979_s20 = inlined_call_operand.vmem [shape: f32[1,384], index: 20, kind: input, shape index: {}]   ;;  %s15980_s24 = inlined_call_operand.vmem [shape: f32[2,1], index: 24, kind: output, shape index: {}]  }
   0x1   :  { %16165 = sst [smem:[#allocation79_spill]] %s15956_s9  ;;  %272 = vmatprep.mubr.f32.mxu0 %v15991_v3  ;;  %9632 = vmatprep.subr.bf16.mxu1 %v15989_v4  ;;  %v15988_v30 = vlaneseq  ;;  %vm297_vm2 = vcmask 1043456   ;;  %vm299_vm4 = vcmask 523264   ;;  %vm2996_vm7 = vcmask 64512  }
   0x2   :  { %16166 = sst [smem:[#allocation80_spill]] %s15957_s10  ;;  %s16174_s27 = sld [smem:[#allocation79_spill]]  ;;  %8896 = vmatprep.mubr.msk.f32.mxu1 %vm12003_vm0, %v15991_v3  ;;  %vm6165_vm8 = vcmask 1041409   ;;  %vm6168_vm9 = vcmask 58368   ;;  %vm6392_vm10 = vcmask 1041408   ;;  %vm8312_vm11 = vcmask 1024  }
   0x3   :  { %16167 = sst [smem:[#allocation81_spill]] %s15958_s0  ;;  %s16175_s0 = sld [smem:[#allocation80_spill]]  ;;  %v12243_v31 = vshrl.u32 %v15988_v30, 7  ;;  %v3752_v30 = vld [vmem:[%s15970_s16 + $0x300] sm:$0xff] }
   0x4   :  { %16168 = sst [smem:[#allocation82_spill]] %s15959_s11  ;;  %s16176_s28 = sld [smem:[#allocation81_spill]] }
   0x5   :  { %16169 = sst [smem:[#allocation83_spill]] %s15960_s5  ;;  %16177 = vst [vmem:[#allocation2_spill] sm:$0xff] %v12243_v31  ;;  %v12246_v32 = vsub.s32 1, %v12243_v31  ;;  %v12253_v35 = vsub.s32 0, %v12243_v31  ;;  %vm79_vm3 = vcmp.lt.s32.totalorder %v12243_v31, 4 }
   0x6   :  { %16170 = sst [smem:[#allocation84_spill]] %s15961_s6  ;;  %s16179_s6 = sld [smem:[#allocation82_spill]] }
   0x7   :  { %16171 = sst [smem:[#allocation85_spill]] %s15962_s12  ;;  %16178 = vst [vmem:[#allocation3_spill] sm:$0xff] %v12246_v32  ;;  %16180 = vst [vmem:[#allocation4_spill] sm:$0xff] %v12253_v35  ;;  %s16183_s9 = sld [smem:[#allocation83_spill]] }
   0x8   :  { %16172 = sst [smem:[#allocation86_spill]] %s15963_s13  ;;  %v168_v0 = vld [vmem:[%s16174_s27 + $0x8] sm:$0xff]  ;;  %v170_v1 = vld [vmem:[%s16174_s27 + $0x18] sm:$0xff]  ;;  %v167_v2 = vld [vmem:[%s16174_s27] sm:$0xff]  ;;  %s16184_s25 = sld [smem:[#allocation84_spill]] }
   0x9   :  { %16173 = sst [smem:[#allocation87_spill]] %s15964_s14  ;;  %v9624_v5 = vpack.c.bf16 %v170_v1, %v168_v0  ;;  %v169_v6 = vld [vmem:[%s16174_s27 + $0x10] sm:$0xff]  ;;  %v172_v7 = vld [vmem:[%s16174_s27 + $0x28] sm:$0xff]  ;;  %v174_v8 = vld [vmem:[%s16174_s27 + $0x38] sm:$0xff]  ;;  %s16186_s11 = sld [smem:[#allocation86_spill]] }
   0xa   :  { %v9626_v9 = vpack.c.bf16 %v169_v6, %v167_v2  ;;  %v9628_v10 = vpack.c.bf16 %v174_v8, %v172_v7  ;;  %v171_v11 = vld [vmem:[%s16174_s27 + $0x20] sm:$0xff]  ;;  %v173_v12 = vld [vmem:[%s16174_s27 + $0x30] sm:$0xff]  ;;  %v176_v14 = vld [vmem:[%s16175_s0 + $0x8] sm:$0xff]  ;;  %s16187_s14 = sld [smem:[#allocation87_spill]] }
   0xb   :  { %9625 = vmatprep.subr.bf16.mxu0 %v9624_v5  ;;  %v175_v13 = vld [vmem:[%s16175_s0] sm:$0xff]  ;;  %v9630_v15 = vpack.c.bf16 %v173_v12, %v171_v11  ;;  %v177_v17 = vld [vmem:[%s16175_s0 + $0x10] sm:$0xff]  ;;  %v178_v18 = vld [vmem:[%s16175_s0 + $0x18] sm:$0xff] }
   0xc   :  { %9627 = vmatpush1.bf16.msra.mxu0 %v9626_v9  ;;  %v12167_v16 = vpack.c.bf16 %v176_v14, %v175_v13  ;;  %v12176_v19 = vpack.c.bf16 %v178_v18, %v177_v17  ;;  %v179_v20 = vld [vmem:[%s16175_s0 + $0x20] sm:$0xff]  ;;  %v180_v21 = vld [vmem:[%s16175_s0 + $0x28] sm:$0xff]  ;;  %v181_v24 = vld [vmem:[%s16175_s0 + $0x30] sm:$0xff] }
   0xd   :  { %9629 = vmatprep.subr.bf16.mxu0 %v9628_v10  ;;  %v83_v22 = vld [vmem:[%s16176_s28] sm:$0xff]  ;;  %v12190_v23 = vpack.c.bf16 %v180_v21, %v179_v20  ;;  %v182_v25 = vld [vmem:[%s16175_s0 + $0x38] sm:$0xff]  ;;  %v84_v26 = vld [vmem:[%s16176_s28 + $0x8] sm:$0xff] }
   0xe   :  { %9634 = vmatpush3.bf16.msra.mxu1 %v12167_v16  ;;  %v12207_v27 = vpack.c.bf16 %v182_v25, %v181_v24  ;;  %v85_v28 = vld [vmem:[%s16176_s28 + $0x10] sm:$0xff]  ;;  %v86_v29 = vld [vmem:[%s16176_s28 + $0x18] sm:$0xff]  ;;  %v183_v33 = vld [vmem:[%s16179_s6] sm:$0x3]  ;;  %s12005_s28 = smov 32   ;;  %v12281_v24 = vsel %vm79_vm3, 1.0, %v15991_v3 }
   0xf   :  { %9635 = vmatprep.subr.bf16.mxu1 %v15989_v4  ;;  %v192_v34 = vrot.slane %v183_v33, %v12246_v32  ;;  %v188_v39 = vrot.slane %v183_v33, %v12253_v35  ;;  %16181 = vst [vmem:[#allocation5_spill] sm:$0xff] %v12281_v24  ;;  %v12284_v25 = vsub.f32 1.0, %v12281_v24  ;;  %s16185_s6 = sld [smem:[#allocation85_spill]] }
  0x10   :  { %9631 = vmatpush1.bf16.msra.mxu0 %v9630_v15 }
  0x11   :  { %9644 = vmatprep.subr.bf16.mxu0 %v15989_v4  ;;  %16182 = vst [vmem:[#allocation6_spill] sm:$0xff] %v12284_v25 }
  0x12   :  { %9637 = vmatpush3.bf16.msra.mxu1 %v12176_v19 }
  0x13   :  { %8319 = vmatmul.mubr.msk.f32.vlgmr.msra.gmra.mrb[0].mxu0 %vm195_vm1, %v83_v22  ;;  %9638 = vmatprep.subr.bf16.mxu1 %v15989_v4 }
  0x14   :  { %278 = vmatprep.mubr.f32.mxu0 %v15991_v3  ;;  %9646 = vmatpush3.bf16.msra.mxu0 %v12167_v16 }
  0x15   :  { %9647 = vmatprep.subr.bf16.mxu0 %v15989_v4 }
  0x16   :  { %9640 = vmatpush3.bf16.msra.mxu1 %v12190_v23 }
  0x17   :  { %8320 = vmatmul.mubr.msk.f32.gmra.mrb[2].mxu0 %vm195_vm1, %v84_v26  ;;  %9641 = vmatprep.subr.bf16.mxu1 %v15989_v4 }
  0x18   :  { %284 = vmatprep.mubr.f32.mxu0 %v15991_v3  ;;  %9649 = vmatpush3.bf16.msra.mxu0 %v12176_v19 }
  0x19   :  { %9650 = vmatprep.subr.bf16.mxu0 %v15989_v4 }
  0x1a   :  { %9643 = vmatpush3.bf16.msra.mxu1 %v12207_v27 }
  0x1b   :  { %8321 = vmatmul.mubr.msk.f32.gmra.mrb[4].mxu0 %vm195_vm1, %v85_v28  ;;  %9656 = vmatprep.subr.bf16.mxu1 %v15989_v4 }
  0x1c   :  { %290 = vmatprep.mubr.f32.mxu0 %v15991_v3  ;;  %9652 = vmatpush3.bf16.msra.mxu0 %v12190_v23 }
  0x1d   :  { %8897 = vmatmul.mubr.f32.vlgmr.msra.gmra.mrb[0].mxu1 %v15991_v3  ;;  %9653 = vmatprep.subr.bf16.mxu0 %v15989_v4 }
  0x1e   :  { %9658 = vmatpush3.bf16.msra.mxu1 %v12167_v16  ;;  %8934 = vmatprep.mubr.msk.f32.mxu1 %vm12003_vm0, %v15991_v3 }
  0x1f   :  { %8322 = vmatmul.mubr.msk.f32.gmra.mrb[6].mxu0 %vm195_vm1, %v86_v29  ;;  %9659 = vmatprep.subr.bf16.mxu1 %v15989_v4 }
  0x20   :  { %9655 = vmatpush3.bf16.msra.mxu0 %v12207_v27  ;;  %8915 = vmatprep.mubr.msk.f32.mxu0 %vm12003_vm0, %v15991_v3 }
  0x21   :  { %9668 = vmatprep.subr.bf16.mxu0 %v15989_v4 }
  0x22   :  { %9661 = vmatpush3.bf16.msra.mxu1 %v12176_v19 }
  0x23   :  { %9662 = vmatprep.subr.bf16.mxu1 %v15989_v4 }
  0x26   :  { %9664 = vmatpush3.bf16.msra.mxu1 %v12190_v23 }
  0x27   :  { %9665 = vmatprep.subr.bf16.mxu1 %v15989_v4 }
  0x2a   :  { %9667 = vmatpush3.bf16.msra.mxu1 %v12207_v27 }
  0x2b   :  { %9680 = vmatprep.subr.bf16.mxu1 %v15989_v4 }
  0xe6   :  { %v274_v36 = vpop.f32.mrb[0].mxu0 }
  0xe7   :  { %v276_v37 = vpop.f32.mrb[1].mxu0  ;;  %v275_v53 = vadd.f32 %v274_v36, %v188_v39 }
  0xe8   :  { %v277_v38 = vadd.f32 %v276_v37, %v192_v34 }
  0xe9   :  { %v410_v2 = vrot.slane %v275_v53, 4 }
  0xea   :  { %v280_v40 = vpop.f32.mrb[2].mxu0  ;;  %v1091_v63 = vrot.slane %v277_v38, 4 }
  0xeb   :  { %v281_v41 = vadd.f32 %v280_v40, %v188_v39  ;;  %v282_v42 = vpop.f32.mrb[3].mxu0 }
  0xec   :  { %v283_v43 = vadd.f32 %v282_v42, %v192_v34 }
  0xed   :  { %v636_v54 = vrot.slane %v281_v41, 4 }
  0xee   :  { %v286_v44 = vpop.f32.mrb[4].mxu0  ;;  %v865_v49 = vrot.slane %v283_v43, 4 }
  0xef   :  { %v287_v45 = vadd.f32 %v286_v44, %v188_v39  ;;  %v288_v46 = vpop.f32.mrb[5].mxu0 }
  0xf0   :  { %v289_v47 = vadd.f32 %v288_v46, %v192_v34  ;;  %v369_v48 = vpop.f32.mrb[0].mxu1 }
  0xf1   :  { %v862_v50 = vrot.slane %v287_v45, 4  ;;  %v8898_v51 = vpop.f32.mrb[1].mxu1  ;;  %v12257_v52 = vsel %vm297_vm2, %v287_v45, %v283_v43 }
  0xf2   :  { %v639_v55 = vrot.slane %v289_v47, 4  ;;  %v292_v56 = vpop.f32.mrb[6].mxu0  ;;  %v12260_v57 = vsel %vm297_vm2, %v281_v41, %v289_v47 }
  0xf3   :  { %v293_v58 = vadd.f32 %v292_v56, %v188_v39  ;;  %v294_v59 = vpop.f32.mrb[7].mxu0  ;;  %v12263_v60 = vsel %vm297_vm2, %v862_v50, %v865_v49 }
  0xf4   :  { %v295_v61 = vadd.f32 %v294_v59, %v192_v34  ;;  %v12266_v62 = vsel %vm297_vm2, %v636_v54, %v639_v55 }
  0xf5   :  { %v1088_v0 = vrot.slane %v293_v58, 4  ;;  %v12269_v1 = vsel %vm297_vm2, %v293_v58, %v277_v38 }
  0xf6   :  { %v413_v5 = vrot.slane %v295_v61, 4  ;;  %v298_v6 = vsel %vm297_vm2, %v275_v53, %v295_v61 }
  0xf7   :  { %v373_v7 = vadd.f32 %v369_v48, %v298_v6  ;;  %v12273_v8 = vsel %vm297_vm2, %v1088_v0, %v1091_v63 }
  0xf8   :  { %v415_v9 = vsel %vm297_vm2, %v410_v2, %v413_v5 }
  0xf9   :  { %11637 = vtanh.f32 %v373_v7  ;;  %v8323_v11 = vmul.f32 -1.442695, %v373_v7 }
  0xfb   :  { %11639 = vpow2.f32 %v8323_v11 }
 0x103   :  { %v11638_v10 = vpop.eup %11637 }
 0x104   :  { %383 = vrot.lane.b32.xlu0 %v11638_v10, %s12004_s26 }
 0x105   :  { %v11640_v12 = vpop.eup %11639 }
 0x106   :  { %v377_v13 = vadd.f32 1.0, %v11640_v12 }
 0x108   :  { %11641 = vrcp.f32 %v377_v13 }
 0x112   :  { %v11642_v14 = vpop.eup %11641 }
 0x113   :  { %v381_v18 = vmul.f32 0.0, %v11642_v14 }
 0x176   :  { %v384_v15 = vpop.permute.xlu0 %383 }
 0x177   :  { %v386_v17 = vmul.f32 %v11642_v14, %v384_v15 }
 0x179   :  { %388 = vrot.lane.b32.xlu0 %v386_v17, %s12005_s28 }
 0x1eb   :  { %v389_v20 = vpop.permute.xlu0 %388 }
 0x1ec   :  { %v391_v21 = vadd.f32 %v389_v20, %v381_v18 }
 0x1ee   :  { %11643 = vtanh.f32 %v391_v21 }
 0x1f8   :  { %v11644_v22 = vpop.eup %11643 }
 0x1f9   :  { %394 = vrot.lane.b32.xlu1 %v11644_v22, %s12004_s26 }
 0x26b   :  { %v395_v26 = vpop.permute.xlu1 %394 }
 0x26c   :  { %v397_v28 = vmul.f32 %v11642_v14, %v395_v26 }
 0x26e   :  { %v398_v29 = vmul.f32 %v12281_v24, %v397_v28  ;;  %v399_v33 = vmul.f32 %v397_v28, %v12284_v25 }
 0x270   :  { %405 = vrot.lane.b32.xlu0 %v399_v33, %s12004_s26  ;;  %401 = vrot.lane.b32.xlu1 %v398_v29, %s12005_s28 }
 0x2e2   :  { %v406_v34 = vpop.permute.xlu0 %405  ;;  %v402_v36 = vpop.permute.xlu1 %401 }
 0x2e3   :  { %v12291_v37 = vsel %vm195_vm1, %v402_v36, %v406_v34 }
 0x2e4   :  { %8916 = vmatmul.mubr.msk.f32.vlgmr.msra.gmra.mrb[8].mxu0 %vm299_vm4, %v12291_v37 }
 0x2e5   :  { %9670 = vmatpush3.bf16.msra.mxu0 %v12167_v16  ;;  %8953 = vmatprep.mubr.msk.f32.mxu0 %vm12003_vm0, %v15991_v3 }
 0x2e6   :  { %9671 = vmatprep.subr.bf16.mxu0 %v15989_v4 }
 0x2e9   :  { %9673 = vmatpush3.bf16.msra.mxu0 %v12176_v19 }
 0x2ea   :  { %9674 = vmatprep.subr.bf16.mxu0 %v15989_v4 }
 0x2ed   :  { %9676 = vmatpush3.bf16.msra.mxu0 %v12190_v23 }
 0x2ee   :  { %9677 = vmatprep.subr.bf16.mxu0 %v15989_v4 }
 0x2f1   :  { %9679 = vmatpush3.bf16.msra.mxu0 %v12207_v27 }
 0x2f2   :  { %9692 = vmatprep.subr.bf16.mxu0 %v15989_v4 }
 0x3b7   :  { %v485_v38 = vpop.f32.mrb[8].mxu0 }
 0x3b8   :  { %v489_v39 = vadd.f32 %v485_v38, %v415_v9  ;;  %v8917_v40 = vpop.f32.mrb[9].mxu0 }
 0x3ba   :  { %11645 = vtanh.f32 %v489_v39  ;;  %v8325_v42 = vmul.f32 -1.442695, %v489_v39 }
 0x3bc   :  { %11647 = vpow2.f32 %v8325_v42 }
 0x3c4   :  { %v11646_v41 = vpop.eup %11645 }
 0x3c5   :  { %499 = vrot.lane.b32.xlu1 %v11646_v41, %s12004_s26 }
 0x3c6   :  { %v11648_v43 = vpop.eup %11647 }
 0x3c7   :  { %v493_v44 = vadd.f32 1.0, %v11648_v43 }
 0x3c9   :  { %11649 = vrcp.f32 %v493_v44 }
 0x3d3   :  { %v11650_v45 = vpop.eup %11649 }
 0x3d4   :  { %v497_v48 = vmul.f32 %v11650_v45, %v391_v21 }
 0x437   :  { %v500_v46 = vpop.permute.xlu1 %499 }
 0x438   :  { %v502_v47 = vmul.f32 %v11650_v45, %v500_v46 }
 0x43a   :  { %504 = vrot.lane.b32.xlu0 %v502_v47, %s12005_s28 }
 0x4ac   :  { %v505_v49 = vpop.permute.xlu0 %504 }
 0x4ad   :  { %v507_v50 = vadd.f32 %v505_v49, %v497_v48 }
 0x4af   :  { %11651 = vtanh.f32 %v507_v50 }
 0x4b9   :  { %v11652_v51 = vpop.eup %11651 }
 0x4ba   :  { %510 = vrot.lane.b32.xlu1 %v11652_v51, %s12004_s26 }
 0x52c   :  { %v511_v53 = vpop.permute.xlu1 %510 }
 0x52d   :  { %v513_v54 = vmul.f32 %v11650_v45, %v511_v53 }
 0x52f   :  { %v514_v55 = vmul.f32 %v12281_v24, %v513_v54  ;;  %v515_v56 = vmul.f32 %v513_v54, %v12284_v25 }
 0x531   :  { %521 = vrot.lane.b32.xlu1 %v515_v56, %s12004_s26  ;;  %517 = vrot.lane.b32.xlu0 %v514_v55, %s12005_s28 }
 0x5a3   :  { %v522_v58 = vpop.permute.xlu1 %521  ;;  %v518_v59 = vpop.permute.xlu0 %517 }
 0x5a4   :  { %v12313_v61 = vsel %vm195_vm1, %v518_v59, %v522_v58 }
 0x5a5   :  { %8935 = vmatmul.mubr.msk.f32.vlgmr.msra.gmra.mrb[2].mxu1 %vm299_vm4, %v12313_v61 }
 0x5a6   :  { %9682 = vmatpush3.bf16.msra.mxu1 %v12167_v16  ;;  %8972 = vmatprep.mubr.msk.f32.mxu1 %vm12003_vm0, %v15991_v3 }
 0x5a7   :  { %9683 = vmatprep.subr.bf16.mxu1 %v15989_v4 }
 0x5aa   :  { %9685 = vmatpush3.bf16.msra.mxu1 %v12176_v19 }
 0x5ab   :  { %9686 = vmatprep.subr.bf16.mxu1 %v15989_v4 }
 0x5ae   :  { %9688 = vmatpush3.bf16.msra.mxu1 %v12190_v23 }
 0x5af   :  { %9689 = vmatprep.subr.bf16.mxu1 %v15989_v4 }
 0x5b2   :  { %9691 = vmatpush3.bf16.msra.mxu1 %v12207_v27 }
 0x5b3   :  { %9704 = vmatprep.subr.bf16.mxu1 %v15989_v4 }
 0x678   :  { %v595_v63 = vpop.f32.mrb[2].mxu1 }
 0x679   :  { %v599_v0 = vadd.f32 %v595_v63, %v12260_v57  ;;  %v8936_v2 = vpop.f32.mrb[3].mxu1 }
 0x67b   :  { %11653 = vtanh.f32 %v599_v0  ;;  %v8327_v6 = vmul.f32 -1.442695, %v599_v0 }
 0x67d   :  { %11655 = vpow2.f32 %v8327_v6 }
 0x685   :  { %v11654_v5 = vpop.eup %11653 }
 0x686   :  { %609 = vrot.lane.b32.xlu0 %v11654_v5, %s12004_s26 }
 0x687   :  { %v11656_v7 = vpop.eup %11655 }
 0x688   :  { %v603_v9 = vadd.f32 1.0, %v11656_v7 }
 0x68a   :  { %11657 = vrcp.f32 %v603_v9 }
 0x694   :  { %v11658_v10 = vpop.eup %11657 }
 0x695   :  { %v607_v13 = vmul.f32 %v11658_v10, %v507_v50 }
 0x6f8   :  { %v610_v11 = vpop.permute.xlu0 %609 }
 0x6f9   :  { %v612_v12 = vmul.f32 %v11658_v10, %v610_v11 }
 0x6fb   :  { %614 = vrot.lane.b32.xlu1 %v612_v12, %s12005_s28 }
 0x76d   :  { %v615_v14 = vpop.permute.xlu1 %614 }
 0x76e   :  { %v617_v15 = vadd.f32 %v615_v14, %v607_v13 }
 0x770   :  { %11659 = vtanh.f32 %v617_v15 }
 0x77a   :  { %v11660_v57 = vpop.eup %11659 }
 0x77b   :  { %620 = vrot.lane.b32.xlu0 %v11660_v57, %s12004_s26 }
 0x7ed   :  { %v621_v17 = vpop.permute.xlu0 %620 }
 0x7ee   :  { %v623_v18 = vmul.f32 %v11658_v10, %v621_v17 }
 0x7f0   :  { %v624_v20 = vmul.f32 %v12281_v24, %v623_v18  ;;  %v625_v21 = vmul.f32 %v623_v18, %v12284_v25 }
 0x7f2   :  { %631 = vrot.lane.b32.xlu0 %v625_v21, %s12004_s26  ;;  %627 = vrot.lane.b32.xlu1 %v624_v20, %s12005_s28 }
 0x864   :  { %v632_v22 = vpop.permute.xlu0 %631  ;;  %v628_v26 = vpop.permute.xlu1 %627 }
 0x865   :  { %v12336_v28 = vsel %vm195_vm1, %v628_v26, %v632_v22 }
 0x866   :  { %8954 = vmatmul.mubr.msk.f32.vlgmr.msra.gmra.mrb[10].mxu0 %vm299_vm4, %v12336_v28 }
 0x867   :  { %9694 = vmatpush3.bf16.msra.mxu0 %v12167_v16  ;;  %8991 = vmatprep.mubr.msk.f32.mxu0 %vm12003_vm0, %v15991_v3 }
 0x868   :  { %9695 = vmatprep.subr.bf16.mxu0 %v15989_v4 }
 0x86b   :  { %9697 = vmatpush3.bf16.msra.mxu0 %v12176_v19 }
 0x86c   :  { %9698 = vmatprep.subr.bf16.mxu0 %v15989_v4 }
 0x86f   :  { %9700 = vmatpush3.bf16.msra.mxu0 %v12190_v23 }
 0x870   :  { %9701 = vmatprep.subr.bf16.mxu0 %v15989_v4 }
 0x873   :  { %9703 = vmatpush3.bf16.msra.mxu0 %v12207_v27 }
 0x874   :  { %9716 = vmatprep.subr.bf16.mxu0 %v15989_v4 }
 0x939   :  { %v711_v29 = vpop.f32.mrb[10].mxu0 }
 0x93a   :  { %v715_v33 = vadd.f32 %v711_v29, %v12266_v62  ;;  %v8955_v34 = vpop.f32.mrb[11].mxu0 }
 0x93c   :  { %11661 = vtanh.f32 %v715_v33  ;;  %v8329_v38 = vmul.f32 -1.442695, %v715_v33 }
 0x93e   :  { %11663 = vpow2.f32 %v8329_v38 }
 0x946   :  { %v11662_v36 = vpop.eup %11661 }
 0x947   :  { %725 = vrot.lane.b32.xlu1 %v11662_v36, %s12004_s26 }
 0x948   :  { %v11664_v39 = vpop.eup %11663 }
 0x949   :  { %v719_v40 = vadd.f32 1.0, %v11664_v39 }
 0x94b   :  { %11665 = vrcp.f32 %v719_v40 }
 0x955   :  { %v11666_v41 = vpop.eup %11665 }
 0x956   :  { %v723_v44 = vmul.f32 %v11666_v41, %v617_v15 }
 0x9b9   :  { %v726_v42 = vpop.permute.xlu1 %725 }
 0x9ba   :  { %v728_v43 = vmul.f32 %v11666_v41, %v726_v42 }
 0x9bc   :  { %730 = vrot.lane.b32.xlu0 %v728_v43, %s12005_s28 }
 0xa2e   :  { %v731_v45 = vpop.permute.xlu0 %730 }
 0xa2f   :  { %v733_v46 = vadd.f32 %v731_v45, %v723_v44  ;;  %v1219_v44 = vrot.slane %v12336_v28, 4 }
 0xa31   :  { %11667 = vtanh.f32 %v733_v46 }
 0xa3b   :  { %v11668_v62 = vpop.eup %11667 }
 0xa3c   :  { %736 = vrot.lane.b32.xlu1 %v11668_v62, %s12004_s26 }
 0xaae   :  { %v737_v47 = vpop.permute.xlu1 %736 }
 0xaaf   :  { %v739_v48 = vmul.f32 %v11666_v41, %v737_v47 }
 0xab1   :  { %v740_v49 = vmul.f32 %v12281_v24, %v739_v48  ;;  %v741_v50 = vmul.f32 %v739_v48, %v12284_v25 }
 0xab3   :  { %747 = vrot.lane.b32.xlu1 %v741_v50, %s12004_s26  ;;  %743 = vrot.lane.b32.xlu0 %v740_v49, %s12005_s28 }
 0xb25   :  { %v748_v51 = vpop.permute.xlu1 %747  ;;  %v744_v53 = vpop.permute.xlu0 %743 }
 0xb26   :  { %v12359_v54 = vsel %vm195_vm1, %v744_v53, %v748_v51 }
 0xb27   :  { %8973 = vmatmul.mubr.msk.f32.vlgmr.msra.gmra.mrb[4].mxu1 %vm299_vm4, %v12359_v54  ;;  %v1216_v48 = vrot.slane %v12359_v54, 4 }
 0xb28   :  { %9706 = vmatpush3.bf16.msra.mxu1 %v12167_v16  ;;  %9010 = vmatprep.mubr.msk.f32.mxu1 %vm12003_vm0, %v15991_v3 }
 0xb29   :  { %9707 = vmatprep.subr.bf16.mxu1 %v15989_v4 }
 0xb2c   :  { %9709 = vmatpush3.bf16.msra.mxu1 %v12176_v19 }
 0xb2d   :  { %9710 = vmatprep.subr.bf16.mxu1 %v15989_v4 }
 0xb30   :  { %9712 = vmatpush3.bf16.msra.mxu1 %v12190_v23 }
 0xb31   :  { %9713 = vmatprep.subr.bf16.mxu1 %v15989_v4 }
 0xb34   :  { %9715 = vmatpush3.bf16.msra.mxu1 %v12207_v27 }
 0xbfa   :  { %v821_v55 = vpop.f32.mrb[4].mxu1 }
 0xbfb   :  { %v825_v56 = vadd.f32 %v821_v55, %v12257_v52  ;;  %v8974_v58 = vpop.f32.mrb[5].mxu1 }
 0xbfd   :  { %11669 = vtanh.f32 %v825_v56  ;;  %v8331_v63 = vmul.f32 -1.442695, %v825_v56 }
 0xbff   :  { %11671 = vpow2.f32 %v8331_v63 }
 0xc07   :  { %v11670_v59 = vpop.eup %11669 }
 0xc08   :  { %835 = vrot.lane.b32.xlu0 %v11670_v59, %s12004_s26 }
 0xc09   :  { %v11672_v0 = vpop.eup %11671 }
 0xc0a   :  { %v829_v2 = vadd.f32 1.0, %v11672_v0 }
 0xc0c   :  { %11673 = vrcp.f32 %v829_v2 }
 0xc16   :  { %v11674_v5 = vpop.eup %11673 }
 0xc17   :  { %v833_v9 = vmul.f32 %v11674_v5, %v733_v46 }
 0xc7a   :  { %v836_v6 = vpop.permute.xlu0 %835 }
 0xc7b   :  { %v838_v7 = vmul.f32 %v11674_v5, %v836_v6 }
 0xc7d   :  { %840 = vrot.lane.b32.xlu1 %v838_v7, %s12005_s28 }
 0xcef   :  { %v841_v10 = vpop.permute.xlu1 %840 }
 0xcf0   :  { %v843_v11 = vadd.f32 %v841_v10, %v833_v9 }
 0xcf2   :  { %11675 = vtanh.f32 %v843_v11 }
 0xcfc   :  { %v11676_v52 = vpop.eup %11675 }
 0xcfd   :  { %846 = vrot.lane.b32.xlu0 %v11676_v52, %s12004_s26 }
 0xd6f   :  { %v847_v12 = vpop.permute.xlu0 %846 }
 0xd70   :  { %v849_v13 = vmul.f32 %v11674_v5, %v847_v12 }
 0xd72   :  { %v850_v14 = vmul.f32 %v12281_v24, %v849_v13  ;;  %v851_v15 = vmul.f32 %v849_v13, %v12284_v25 }
 0xd74   :  { %857 = vrot.lane.b32.xlu0 %v851_v15, %s12004_s26  ;;  %853 = vrot.lane.b32.xlu1 %v850_v14, %s12005_s28 }
 0xde6   :  { %v858_v57 = vpop.permute.xlu0 %857  ;;  %v854_v17 = vpop.permute.xlu1 %853 }
 0xde7   :  { %v860_v18 = vsel %vm195_vm1, %v854_v17, %v858_v57 }
 0xde8   :  { %8992 = vmatmul.mubr.msk.f32.vlgmr.msra.gmra.mrb[12].mxu0 %vm299_vm4, %v860_v18  ;;  %v1213_v43 = vrot.slane %v860_v18, 4  ;;  %v1218_v51 = vadd.f32 %v1216_v48, %v860_v18  ;;  %v91_v48 = vld [vmem:[%s16183_s9 + $0x20] sm:$0xff] }
 0xde9   :  { %9718 = vmatpush3.bf16.msra.mxu0 %v12167_v16  ;;  %9029 = vmatprep.mubr.msk.f32.mxu0 %vm12003_vm0, %v15991_v3 }
 0xdea   :  { %9719 = vmatprep.subr.bf16.mxu0 %v15989_v4  ;;  %v1215_v45 = vadd.f32 %v1213_v43, %v12359_v54  ;;  %v89_v43 = vld [vmem:[%s16183_s9 + $0x10] sm:$0xff] }
 0xdec   :  { %v1232_v53 = vrot.slane %v1215_v45, 4 }
 0xded   :  { %9721 = vmatpush3.bf16.msra.mxu0 %v12176_v19 }
 0xdee   :  { %9722 = vmatprep.subr.bf16.mxu0 %v15989_v4 }
 0xdf1   :  { %9724 = vmatpush3.bf16.msra.mxu0 %v12190_v23 }
 0xdf2   :  { %9725 = vmatprep.subr.bf16.mxu0 %v15989_v4 }
 0xdf5   :  { %9727 = vmatpush3.bf16.msra.mxu0 %v12207_v27 }
 0xebb   :  { %v937_v20 = vpop.f32.mrb[12].mxu0 }
 0xebc   :  { %v941_v21 = vadd.f32 %v937_v20, %v12263_v60  ;;  %v8993_v22 = vpop.f32.mrb[13].mxu0 }
 0xebe   :  { %11677 = vtanh.f32 %v941_v21  ;;  %v8333_v26 = vmul.f32 -1.442695, %v941_v21 }
 0xec0   :  { %11679 = vpow2.f32 %v8333_v26 }
 0xec8   :  { %v11678_v16 = vpop.eup %11677 }
 0xec9   :  { %951 = vrot.lane.b32.xlu1 %v11678_v16, %s12004_s26 }
 0xeca   :  { %v11680_v29 = vpop.eup %11679 }
 0xecb   :  { %v945_v19 = vadd.f32 1.0, %v11680_v29 }
 0xecd   :  { %11681 = vrcp.f32 %v945_v19 }
 0xed7   :  { %v11682_v33 = vpop.eup %11681 }
 0xed8   :  { %v949_v36 = vmul.f32 %v11682_v33, %v843_v11 }
 0xf3b   :  { %v952_v34 = vpop.permute.xlu1 %951 }
 0xf3c   :  { %v954_v23 = vmul.f32 %v11682_v33, %v952_v34 }
 0xf3e   :  { %956 = vrot.lane.b32.xlu0 %v954_v23, %s12005_s28 }
 0xfb0   :  { %v957_v27 = vpop.permute.xlu0 %956 }
 0xfb1   :  { %v959_v38 = vadd.f32 %v957_v27, %v949_v36 }
 0xfb3   :  { %11683 = vtanh.f32 %v959_v38 }
 0xfbd   :  { %v11684_v60 = vpop.eup %11683 }
 0xfbe   :  { %962 = vrot.lane.b32.xlu1 %v11684_v60, %s12004_s26 }
0x1030   :  { %v963_v39 = vpop.permute.xlu1 %962 }
0x1031   :  { %v965_v40 = vmul.f32 %v11682_v33, %v963_v39  ;;  %v88_v39 = vld [vmem:[%s16183_s9 + $0x8] sm:$0xff] }
0x1033   :  { %v966_v41 = vmul.f32 %v12281_v24, %v965_v40  ;;  %v967_v42 = vmul.f32 %v965_v40, %v12284_v25  ;;  %v95_v40 = vld [vmem:[%s16184_s25] sm:$0xff] }
0x1035   :  { %973 = vrot.lane.b32.xlu1 %v967_v42, %s12004_s26  ;;  %969 = vrot.lane.b32.xlu0 %v966_v41, %s12005_s28  ;;  %v96_v42 = vld [vmem:[%s16184_s25 + $0x8] sm:$0xff] }
0x1036   :  { %v12447_v45 = vpack.c.bf16 %v96_v42, %v95_v40  ;;  %v1440_v42 = vld [vmem:[%s16186_s11 + $0x10] sm:$0xff] }
0x1038   :  { %9745 = vmatprep.subr.bf16.mxu0 %v12447_v45 }
0x10a7   :  { %v974_v46 = vpop.permute.xlu1 %973  ;;  %v970_v62 = vpop.permute.xlu0 %969 }
0x10a8   :  { %v976_v47 = vsel %vm195_vm1, %v970_v62, %v974_v46  ;;  %v97_v62 = vld [vmem:[%s16184_s25 + $0x10] sm:$0xff] }
0x10a9   :  { %v1210_v49 = vrot.slane %v976_v47, 4  ;;  %v1221_v50 = vadd.f32 %v1219_v44, %v976_v47  ;;  %9011 = vmatmul.mubr.msk.f32.vlgmr.msra.gmra.mrb[6].mxu1 %vm299_vm4, %v976_v47  ;;  %v90_v44 = vld [vmem:[%s16183_s9 + $0x18] sm:$0xff] }
0x10aa   :  { %v12449_v46 = vpack.c.bf16 %v90_v44, %v89_v43  ;;  %v98_v47 = vld [vmem:[%s16184_s25 + $0x18] sm:$0xff] }
0x10ab   :  { %v1212_v55 = vadd.f32 %v1210_v49, %v12336_v28  ;;  %v1235_v56 = vrot.slane %v1221_v50, 4  ;;  %v12461_v49 = vpack.c.bf16 %v98_v47, %v97_v62  ;;  %v92_v50 = vld [vmem:[%s16183_s9 + $0x28] sm:$0xff]  ;;  %v1441_v43 = vld [vmem:[%s16186_s11 + $0x18] sm:$0xff]  ;;  %v1442_v62 = vld [vmem:[%s16186_s11 + $0x20] sm:$0xff] }
0x10ac   :  { %v12578_v44 = vpack.c.bf16 %v1441_v43, %v1440_v42  ;;  %v1443_v47 = vld [vmem:[%s16186_s11 + $0x28] sm:$0xff] }
0x10ad   :  { %v12406_v58 = vsel %vm297_vm2, %v1212_v55, %v1232_v53  ;;  %v12409_v59 = vsel %vm297_vm2, %v1218_v51, %v1235_v56  ;;  %v99_v51 = vld [vmem:[%s16184_s25 + $0x20] sm:$0xff]  ;;  %v100_v53 = vld [vmem:[%s16184_s25 + $0x28] sm:$0xff]  ;;  %v12476_v55 = vpack.c.bf16 %v92_v50, %v91_v48  ;;  %v12588_v48 = vpack.c.bf16 %v1443_v47, %v1442_v62  ;;  %v1444_v50 = vld [vmem:[%s16186_s11 + $0x30] sm:$0xff] }
0x10ae   :  { %v12479_v56 = vpack.c.bf16 %v100_v53, %v99_v51  ;;  %v1445_v51 = vld [vmem:[%s16186_s11 + $0x38] sm:$0xff] }
0x10af   :  { %v12598_v53 = vpack.c.bf16 %v1445_v51, %v1444_v50 }
0x117c   :  { %v1047_v63 = vpop.f32.mrb[6].mxu1 }
0x117d   :  { %v1051_v0 = vadd.f32 %v1047_v63, %v12269_v1  ;;  %v9012_v2 = vpop.f32.mrb[7].mxu1 }
0x117e   :  { %v94_v2 = vld [vmem:[%s16183_s9 + $0x38] sm:$0xff] }
0x117f   :  { %11685 = vtanh.f32 %v1051_v0  ;;  %v8335_v5 = vmul.f32 -1.442695, %v1051_v0  ;;  %v93_v0 = vld [vmem:[%s16183_s9 + $0x30] sm:$0xff] }
0x1181   :  { %11687 = vpow2.f32 %v8335_v5  ;;  %v12497_v5 = vpack.c.bf16 %v94_v2, %v93_v0 }
0x1189   :  { %v11686_v54 = vpop.eup %11685 }
0x118a   :  { %1061 = vrot.lane.b32.xlu0 %v11686_v54, %s12004_s26  ;;  %v101_v54 = vld [vmem:[%s16184_s25 + $0x30] sm:$0xff] }
0x118b   :  { %v11688_v6 = vpop.eup %11687 }
0x118c   :  { %v1055_v7 = vadd.f32 1.0, %v11688_v6  ;;  %v102_v6 = vld [vmem:[%s16184_s25 + $0x38] sm:$0xff] }
0x118e   :  { %11689 = vrcp.f32 %v1055_v7  ;;  %v12502_v7 = vpack.c.bf16 %v102_v6, %v101_v54 }
0x1198   :  { %v11690_v28 = vpop.eup %11689 }
0x1199   :  { %v1059_v11 = vmul.f32 %v11690_v28, %v959_v38 }
0x11fc   :  { %v1062_v9 = vpop.permute.xlu0 %1061 }
0x11fd   :  { %v1064_v10 = vmul.f32 %v11690_v28, %v1062_v9 }
0x11ff   :  { %1066 = vrot.lane.b32.xlu1 %v1064_v10, %s12005_s28 }
0x1271   :  { %v1067_v52 = vpop.permute.xlu1 %1066 }
0x1272   :  { %v1069_v12 = vadd.f32 %v1067_v52, %v1059_v11  ;;  %v1431_v52 = vld [vmem:[%s16185_s6 + $0x8] sm:$0xff] }
0x1274   :  { %11691 = vtanh.f32 %v1069_v12 }
0x127e   :  { %v11692_v1 = vpop.eup %11691 }
0x127f   :  { %1072 = vrot.lane.b32.xlu0 %v11692_v1, %s12004_s26 }
0x12f1   :  { %v1073_v13 = vpop.permute.xlu0 %1072 }
0x12f2   :  { %v1075_v14 = vmul.f32 %v11690_v28, %v1073_v13 }
0x12f4   :  { %v1076_v15 = vmul.f32 %v12281_v24, %v1075_v14  ;;  %v1077_v57 = vmul.f32 %v1075_v14, %v12284_v25 }
0x12f6   :  { %1083 = vrot.lane.b32.xlu0 %v1077_v57, %s12004_s26  ;;  %1079 = vrot.lane.b32.xlu1 %v1076_v15, %s12005_s28 }
0x1368   :  { %v1084_v17 = vpop.permute.xlu0 %1083  ;;  %v1080_v18 = vpop.permute.xlu1 %1079 }
0x1369   :  { %v12420_v20 = vsel %vm195_vm1, %v1080_v18, %v1084_v17  ;;  %v1225_v17 = vrot.slane %v12291_v37, 4 }
0x136a   :  { %9030 = vmatmul.mubr.msk.f32.vlgmr.msra.gmra.mrb[14].mxu0 %vm299_vm4, %v12420_v20  ;;  %v1207_v13 = vrot.slane %v12420_v20, 4 }
0x136b   :  { %9747 = vmatpush3.bf16.msra.mxu0 %v12447_v45 }
0x136c   :  { %9749 = vmatprep.subr.bf16.mxu0 %v12461_v49  ;;  %v1209_v14 = vadd.f32 %v1207_v13, %v12313_v61 }
0x136f   :  { %9751 = vmatpush3.bf16.msra.mxu0 %v12461_v49 }
0x1370   :  { %9753 = vmatprep.subr.bf16.mxu0 %v12479_v56 }
0x1373   :  { %9755 = vmatpush3.bf16.msra.mxu0 %v12479_v56 }
0x1374   :  { %9757 = vmatprep.subr.bf16.mxu0 %v12502_v7 }
0x1377   :  { %9759 = vmatpush3.bf16.msra.mxu0 %v12502_v7 }
0x1378   :  { %9768 = vmatprep.subr.bf16.mxu0 %v15989_v4 }
0x143d   :  { %v1163_v21 = vpop.f32.mrb[14].mxu0 }
0x143e   :  { %v1167_v22 = vadd.f32 %v1163_v21, %v12273_v8  ;;  %v9031_v16 = vpop.f32.mrb[15].mxu0  ;;  %v87_v8 = vld [vmem:[%s16183_s9] sm:$0xff] }
0x143f   :  { %v12436_v41 = vpack.c.bf16 %v88_v39, %v87_v8  ;;  %v1430_v16 = vld [vmem:[%s16185_s6] sm:$0xff]  ;;  %v1439_v39 = vld [vmem:[%s16186_s11 + $0x8] sm:$0xff] }
0x1440   :  { %11693 = vtanh.f32 %v1167_v22  ;;  %v8337_v29 = vmul.f32 -1.442695, %v1167_v22  ;;  %v1438_v8 = vld [vmem:[%s16186_s11] sm:$0xff] }
0x1441   :  { %9729 = vmatprep.subr.bf16.mxu1 %v12436_v41  ;;  %v12567_v40 = vpack.c.bf16 %v1439_v39, %v1438_v8 }
0x1442   :  { %11695 = vpow2.f32 %v8337_v29  ;;  %9731 = vmatpush3.bf16.msra.mxu1 %v12436_v41  ;;  %v1229_v29 = vrot.slane %v1209_v14, 4 }
0x1443   :  { %9733 = vmatprep.subr.bf16.mxu1 %v12449_v46 }
0x1446   :  { %9735 = vmatpush3.bf16.msra.mxu1 %v12449_v46 }
0x1447   :  { %9737 = vmatprep.subr.bf16.mxu1 %v12476_v55 }
0x144a   :  { %v11694_v26 = vpop.eup %11693  ;;  %9739 = vmatpush3.bf16.msra.mxu1 %v12476_v55 }
0x144b   :  { %1177 = vrot.lane.b32.xlu1 %v11694_v26, %s12004_s26  ;;  %9741 = vmatprep.subr.bf16.mxu1 %v12497_v5  ;;  %v1432_v26 = vld [vmem:[%s16185_s6 + $0x10] sm:$0xff] }
0x144c   :  { %v11696_v19 = vpop.eup %11695 }
0x144d   :  { %v1171_v33 = vadd.f32 1.0, %v11696_v19 }
0x144e   :  { %9743 = vmatpush3.bf16.msra.mxu1 %v12497_v5 }
0x144f   :  { %11697 = vrcp.f32 %v1171_v33 }
0x1459   :  { %v11698_v34 = vpop.eup %11697 }
0x145a   :  { %v1175_v27 = vmul.f32 %v11698_v34, %v1069_v12  ;;  %v1433_v12 = vld [vmem:[%s16185_s6 + $0x18] sm:$0xff] }
0x145b   :  { %v9760_v1 = vpack.c.bf16 %v1433_v12, %v1431_v52 }
0x145d   :  { %9761 = vmatprep.subr.bf16.mxu1 %v9760_v1 }
0x14bd   :  { %v1178_v23 = vpop.permute.xlu1 %1177 }
0x14be   :  { %v1180_v36 = vmul.f32 %v11698_v34, %v1178_v23  ;;  %v1222_v23 = vrot.slane %v12313_v61, 4  ;;  %v1435_v61 = vld [vmem:[%s16185_s6 + $0x28] sm:$0xff] }
0x14c0   :  { %1182 = vrot.lane.b32.xlu0 %v1180_v36, %s12005_s28 }
0x1532   :  { %v1183_v38 = vpop.permute.xlu0 %1182 }
0x1533   :  { %v1185_v60 = vadd.f32 %v1183_v38, %v1175_v27  ;;  %v1224_v27 = vadd.f32 %v1222_v23, %v12420_v20  ;;  %v1434_v20 = vld [vmem:[%s16185_s6 + $0x20] sm:$0xff]  ;;  %v1436_v38 = vld [vmem:[%s16185_s6 + $0x30] sm:$0xff] }
0x1535   :  { %11699 = vtanh.f32 %v1185_v60  ;;  %v9766_v60 = vpack.c.bf16 %v1436_v38, %v1434_v20 }
0x153f   :  { %v11700_v63 = vpop.eup %11699 }
0x1540   :  { %1188 = vrot.lane.b32.xlu1 %v11700_v63, %s12004_s26 }
0x15b2   :  { %v1189_v28 = vpop.permute.xlu1 %1188 }
0x15b3   :  { %v1191_v9 = vmul.f32 %v11698_v34, %v1189_v28  ;;  %v9762_v34 = vpack.c.bf16 %v1432_v26, %v1430_v16 }
0x15b5   :  { %v1192_v10 = vmul.f32 %v12281_v24, %v1191_v9  ;;  %v1193_v11 = vmul.f32 %v1191_v9, %v12284_v25 }
0x15b7   :  { %1199 = vrot.lane.b32.xlu1 %v1193_v11, %s12004_s26  ;;  %1195 = vrot.lane.b32.xlu0 %v1192_v10, %s12005_s28 }
0x1629   :  { %v1200_v15 = vpop.permute.xlu1 %1199  ;;  %v1196_v57 = vpop.permute.xlu0 %1195 }
0x162a   :  { %v1202_v18 = vsel %vm195_vm1, %v1196_v57, %v1200_v15  ;;  %v1446_v15 = vld [vmem:[%s16187_s14] sm:$0x3] }
0x162b   :  { %v1204_v21 = vrot.slane %v1202_v18, 4  ;;  %v1227_v22 = vadd.f32 %v1225_v17, %v1202_v18  ;;  %v1455_v57 = vrot.slane %v1446_v15, %v12246_v32  ;;  %v3764_v32 = vld [vmem:[%s15970_s16 + $0x360] sm:$0xff] }
0x162d   :  { %v1206_v19 = vadd.f32 %v1204_v21, %v12291_v37  ;;  %v1238_v36 = vrot.slane %v1227_v22, 4  ;;  %v1451_v22 = vrot.slane %v1446_v15, %v12253_v35 }
0x162f   :  { %v1240_v33 = vsel %vm297_vm2, %v1206_v19, %v1229_v29  ;;  %v1243_v37 = vsel %vm297_vm2, %v1224_v27, %v1238_v36 }
0x1630   :  { %9048 = vmatprep.mubr.msk.f32.mxu1 %vm299_vm4, %v1240_v33  ;;  %9070 = vmatprep.mubr.msk.f32.mxu0 %vm299_vm4, %v1240_v33 }
0x1631   :  { %9049 = vmatmul.mubr.msk.f32.vlgmr.msra.gmra.mrb[8].mxu1 %vm299_vm4, %v12406_v58  ;;  %9071 = vmatmul.mubr.msk.f32.vlgmr.msra.gmra.mrb[16].mxu0 %vm299_vm4, %v12406_v58  ;;  %v1437_v58 = vld [vmem:[%s16185_s6 + $0x38] sm:$0xff] }
0x1632   :  { %9051 = vmatprep.mubr.msk.f32.mxu1 %vm299_vm4, %v12409_v59  ;;  %9073 = vmatprep.mubr.msk.f32.mxu0 %vm299_vm4, %v12409_v59  ;;  %v9764_v59 = vpack.c.bf16 %v1437_v58, %v1435_v61 }
0x1633   :  { %9763 = vmatpush1.bf16.msra.mxu1 %v9762_v34  ;;  %9770 = vmatpush3.bf16.msra.mxu0 %v12567_v40 }
0x1634   :  { %9765 = vmatprep.subr.bf16.mxu1 %v9764_v59  ;;  %9771 = vmatprep.subr.bf16.mxu0 %v15989_v4 }
0x1635   :  { %9052 = vmatmul.mubr.msk.f32.gmra.mrb[10].mxu1 %vm299_vm4, %v1243_v37  ;;  %9074 = vmatmul.mubr.msk.f32.gmra.mrb[18].mxu0 %vm299_vm4, %v1243_v37 }
0x1636   :  { %1534 = vmatprep.mubr.f32.mxu1 %v15991_v3  ;;  %9092 = vmatprep.mubr.msk.f32.mxu0 %vm12003_vm0, %v15991_v3 }
0x1637   :  { %9767 = vmatpush1.bf16.msra.mxu1 %v9766_v60  ;;  %9773 = vmatpush3.bf16.msra.mxu0 %v12578_v44 }
0x1638   :  { %9780 = vmatprep.subr.bf16.mxu1 %v15989_v4  ;;  %9774 = vmatprep.subr.bf16.mxu0 %v15989_v4 }
0x163b   :  { %9776 = vmatpush3.bf16.msra.mxu0 %v12588_v48 }
0x163c   :  { %9777 = vmatprep.subr.bf16.mxu0 %v15989_v4 }
0x163f   :  { %9779 = vmatpush3.bf16.msra.mxu0 %v12598_v53 }
0x1640   :  { %9792 = vmatprep.subr.bf16.mxu0 %v15989_v4 }
0x1642   :  { %9093 = vmatmul.mubr.f32.vlgmr.msra.gmra.mrb[20].mxu0 %v15991_v3 }
0x1643   :  { %9794 = vmatpush3.bf16.msra.mxu0 %v12567_v40  ;;  %9130 = vmatprep.mubr.msk.f32.mxu0 %vm12003_vm0, %v15991_v3 }
0x1644   :  { %9795 = vmatprep.subr.bf16.mxu0 %v15989_v4 }
0x1647   :  { %9797 = vmatpush3.bf16.msra.mxu0 %v12578_v44 }
0x1648   :  { %9798 = vmatprep.subr.bf16.mxu0 %v15989_v4 }
0x164b   :  { %9800 = vmatpush3.bf16.msra.mxu0 %v12588_v48 }
0x164c   :  { %9801 = vmatprep.subr.bf16.mxu0 %v15989_v4 }
0x164f   :  { %9803 = vmatpush3.bf16.msra.mxu0 %v12598_v53 }
0x1650   :  { %9816 = vmatprep.subr.bf16.mxu0 %v15989_v4 }
0x1704   :  { %v9050_v63 = vpop.f32.mrb[8].mxu1  ;;  %v9072_v0 = vpop.f32.mrb[16].mxu0 }
0x1705   :  { %v12613_v2 = vmax.f32 %v9050_v63, %v9072_v0  ;;  %v1322_v54 = vpop.f32.mrb[9].mxu1  ;;  %v1407_v6 = vpop.f32.mrb[17].mxu0 }
0x1706   :  { %v12615_v28 = vmax.f32 %v1322_v54, %v1407_v6 }
0x1708   :  { %v9053_v9 = vpop.f32.mrb[10].mxu1  ;;  %v9075_v10 = vpop.f32.mrb[18].mxu0  ;;  %8346 = vmatmul.mubr.msk.f32.vlgmr.msra.gmra.mrb[12].mxu1 %vm195_vm1, %v12615_v28 }
0x1709   :  { %v12619_v11 = vmax.f32 %v9053_v9, %v9075_v10  ;;  %v1332_v52 = vpop.f32.mrb[11].mxu1  ;;  %v1417_v12 = vpop.f32.mrb[19].mxu0  ;;  %1540 = vmatprep.mubr.f32.mxu1 %v15991_v3  ;;  %9782 = vmatpush3.bf16.msra.mxu1 %v12567_v40 }
0x170a   :  { %v12623_v1 = vmax.f32 %v1332_v52, %v1417_v12  ;;  %9783 = vmatprep.subr.bf16.mxu1 %v15989_v4 }
0x170c   :  { %8347 = vmatmul.mubr.msk.f32.gmra.mrb[14].mxu1 %vm195_vm1, %v12613_v2 }
0x170d   :  { %1546 = vmatprep.mubr.f32.mxu1 %v15991_v3  ;;  %9785 = vmatpush3.bf16.msra.mxu1 %v12578_v44 }
0x170e   :  { %9786 = vmatprep.subr.bf16.mxu1 %v15989_v4 }
0x1710   :  { %8348 = vmatmul.mubr.msk.f32.gmra.mrb[16].mxu1 %vm195_vm1, %v12623_v1 }
0x1711   :  { %1552 = vmatprep.mubr.f32.mxu1 %v15991_v3  ;;  %9788 = vmatpush3.bf16.msra.mxu1 %v12588_v48 }
0x1712   :  { %9789 = vmatprep.subr.bf16.mxu1 %v15989_v4 }
0x1714   :  { %8349 = vmatmul.mubr.msk.f32.gmra.mrb[18].mxu1 %vm195_vm1, %v12619_v11 }
0x1715   :  { %9791 = vmatpush3.bf16.msra.mxu1 %v12598_v53  ;;  %9111 = vmatprep.mubr.msk.f32.mxu1 %vm12003_vm0, %v15991_v3  ;;  %v1626_v13 = vpop.f32.mrb[20].mxu0 }
0x1716   :  { %9804 = vmatprep.subr.bf16.mxu1 %v15989_v4  ;;  %v9094_v14 = vpop.f32.mrb[21].mxu0 }
0x17db   :  { %v1536_v17 = vpop.f32.mrb[12].mxu1 }
0x17dc   :  { %v1538_v18 = vpop.f32.mrb[13].mxu1  ;;  %v1537_v58 = vadd.f32 %v1536_v17, %v1451_v22 }
0x17dd   :  { %v1539_v21 = vadd.f32 %v1538_v18, %v1455_v57 }
0x17de   :  { %v1667_v63 = vrot.slane %v1537_v58, 4 }
0x17df   :  { %v1542_v16 = vpop.f32.mrb[14].mxu1  ;;  %v2348_v47 = vrot.slane %v1539_v21, 4 }
0x17e0   :  { %v1543_v26 = vadd.f32 %v1542_v16, %v1451_v22  ;;  %v1544_v29 = vpop.f32.mrb[15].mxu1 }
0x17e1   :  { %v1545_v19 = vadd.f32 %v1544_v29, %v1455_v57 }
0x17e2   :  { %v1893_v59 = vrot.slane %v1543_v26, 4 }
0x17e3   :  { %v1548_v33 = vpop.f32.mrb[16].mxu1  ;;  %v2122_v27 = vrot.slane %v1545_v19, 4 }
0x17e4   :  { %v1549_v34 = vadd.f32 %v1548_v33, %v1451_v22  ;;  %v1550_v23 = vpop.f32.mrb[17].mxu1 }
0x17e5   :  { %v1551_v36 = vadd.f32 %v1550_v23, %v1455_v57 }
0x17e6   :  { %v2119_v37 = vrot.slane %v1549_v34, 4  ;;  %v12648_v61 = vsel %vm297_vm2, %v1549_v34, %v1545_v19 }
0x17e7   :  { %v1896_v20 = vrot.slane %v1551_v36, 4  ;;  %v1554_v38 = vpop.f32.mrb[18].mxu1  ;;  %v12651_v60 = vsel %vm297_vm2, %v1543_v26, %v1551_v36 }
0x17e8   :  { %v1555_v8 = vadd.f32 %v1554_v38, %v1451_v22  ;;  %v1556_v39 = vpop.f32.mrb[19].mxu1  ;;  %v12654_v42 = vsel %vm297_vm2, %v2119_v37, %v2122_v27 }
0x17e9   :  { %v1557_v43 = vadd.f32 %v1556_v39, %v1455_v57  ;;  %v12657_v62 = vsel %vm297_vm2, %v1893_v59, %v1896_v20 }
0x17ea   :  { %v2345_v50 = vrot.slane %v1555_v8, 4  ;;  %v12660_v51 = vsel %vm297_vm2, %v1555_v8, %v1539_v21 }
0x17eb   :  { %v1670_v0 = vrot.slane %v1557_v43, 4  ;;  %v1559_v54 = vsel %vm297_vm2, %v1537_v58, %v1557_v43 }
0x17ec   :  { %v1630_v6 = vadd.f32 %v1626_v13, %v1559_v54  ;;  %v12664_v9 = vsel %vm297_vm2, %v2345_v50, %v2348_v47 }
0x17ed   :  { %v1672_v10 = vsel %vm297_vm2, %v1667_v63, %v1670_v0 }
0x17ee   :  { %11701 = vtanh.f32 %v1630_v6  ;;  %v8350_v12 = vmul.f32 -1.442695, %v1630_v6 }
0x17f0   :  { %11703 = vpow2.f32 %v8350_v12 }
0x17f8   :  { %v11702_v52 = vpop.eup %11701 }
0x17f9   :  { %1640 = vrot.lane.b32.xlu0 %v11702_v52, %s12004_s26 }
0x17fa   :  { %v11704_v14 = vpop.eup %11703 }
0x17fb   :  { %v1634_v15 = vadd.f32 1.0, %v11704_v14 }
0x17fd   :  { %11705 = vrcp.f32 %v1634_v15 }
0x1807   :  { %v11706_v57 = vpop.eup %11705 }
0x1808   :  { %v1638_v13 = vmul.f32 0.0, %v11706_v57 }
0x186b   :  { %v1641_v17 = vpop.permute.xlu0 %1640 }
0x186c   :  { %v1643_v18 = vmul.f32 %v11706_v57, %v1641_v17 }
0x186e   :  { %1645 = vrot.lane.b32.xlu1 %v1643_v18, %s12005_s28 }
0x18e0   :  { %v1646_v21 = vpop.permute.xlu1 %1645 }
0x18e1   :  { %v1648_v22 = vadd.f32 %v1646_v21, %v1638_v13 }
0x18e3   :  { %11707 = vtanh.f32 %v1648_v22 }
0x18ed   :  { %v11708_v16 = vpop.eup %11707 }
0x18ee   :  { %1651 = vrot.lane.b32.xlu0 %v11708_v16, %s12004_s26 }
0x1960   :  { %v1652_v26 = vpop.permute.xlu0 %1651 }
0x1961   :  { %v1654_v29 = vmul.f32 %v11706_v57, %v1652_v26 }
0x1963   :  { %v1655_v19 = vmul.f32 %v12281_v24, %v1654_v29  ;;  %v1656_v33 = vmul.f32 %v1654_v29, %v12284_v25 }
0x1965   :  { %1662 = vrot.lane.b32.xlu0 %v1656_v33, %s12004_s26  ;;  %1658 = vrot.lane.b32.xlu1 %v1655_v19, %s12005_s28 }
0x19d7   :  { %v1663_v34 = vpop.permute.xlu0 %1662  ;;  %v1659_v23 = vpop.permute.xlu1 %1658 }
0x19d8   :  { %v12675_v36 = vsel %vm195_vm1, %v1659_v23, %v1663_v34 }
0x19d9   :  { %9112 = vmatmul.mubr.msk.f32.vlgmr.msra.gmra.mrb[20].mxu1 %vm299_vm4, %v12675_v36 }
0x19da   :  { %9806 = vmatpush3.bf16.msra.mxu1 %v12567_v40  ;;  %9149 = vmatprep.mubr.msk.f32.mxu1 %vm12003_vm0, %v15991_v3 }
0x19db   :  { %9807 = vmatprep.subr.bf16.mxu1 %v15989_v4 }
0x19de   :  { %9809 = vmatpush3.bf16.msra.mxu1 %v12578_v44 }
0x19df   :  { %9810 = vmatprep.subr.bf16.mxu1 %v15989_v4 }
0x19e2   :  { %9812 = vmatpush3.bf16.msra.mxu1 %v12588_v48 }
0x19e3   :  { %9813 = vmatprep.subr.bf16.mxu1 %v15989_v4 }
0x19e6   :  { %9815 = vmatpush3.bf16.msra.mxu1 %v12598_v53 }
0x19e7   :  { %9828 = vmatprep.subr.bf16.mxu1 %v15989_v4 }
0x1aac   :  { %v1742_v27 = vpop.f32.mrb[20].mxu1 }
0x1aad   :  { %v1746_v37 = vadd.f32 %v1742_v27, %v1672_v10  ;;  %v9113_v58 = vpop.f32.mrb[21].mxu1 }
0x1aaf   :  { %11709 = vtanh.f32 %v1746_v37  ;;  %v8352_v20 = vmul.f32 -1.442695, %v1746_v37 }
0x1ab1   :  { %11711 = vpow2.f32 %v8352_v20 }
0x1ab9   :  { %v11710_v59 = vpop.eup %11709 }
0x1aba   :  { %1756 = vrot.lane.b32.xlu1 %v11710_v59, %s12004_s26 }
0x1abb   :  { %v11712_v38 = vpop.eup %11711 }
0x1abc   :  { %v1750_v8 = vadd.f32 1.0, %v11712_v38 }
0x1abe   :  { %11713 = vrcp.f32 %v1750_v8 }
0x1ac8   :  { %v11714_v39 = vpop.eup %11713 }
0x1ac9   :  { %v1754_v50 = vmul.f32 %v11714_v39, %v1648_v22 }
0x1b2c   :  { %v1757_v43 = vpop.permute.xlu1 %1756 }
0x1b2d   :  { %v1759_v47 = vmul.f32 %v11714_v39, %v1757_v43 }
0x1b2f   :  { %1761 = vrot.lane.b32.xlu0 %v1759_v47, %s12005_s28 }
0x1ba1   :  { %v1762_v63 = vpop.permute.xlu0 %1761 }
0x1ba2   :  { %v1764_v0 = vadd.f32 %v1762_v63, %v1754_v50 }
0x1ba4   :  { %11715 = vtanh.f32 %v1764_v0 }
0x1bae   :  { %v11716_v54 = vpop.eup %11715 }
0x1baf   :  { %1767 = vrot.lane.b32.xlu1 %v11716_v54, %s12004_s26 }
0x1c21   :  { %v1768_v6 = vpop.permute.xlu1 %1767 }
0x1c22   :  { %v1770_v10 = vmul.f32 %v11714_v39, %v1768_v6 }
0x1c24   :  { %v1771_v52 = vmul.f32 %v12281_v24, %v1770_v10  ;;  %v1772_v12 = vmul.f32 %v1770_v10, %v12284_v25 }
0x1c26   :  { %1778 = vrot.lane.b32.xlu1 %v1772_v12, %s12004_s26  ;;  %1774 = vrot.lane.b32.xlu0 %v1771_v52, %s12005_s28 }
0x1c98   :  { %v1779_v14 = vpop.permute.xlu1 %1778  ;;  %v1775_v15 = vpop.permute.xlu0 %1774 }
0x1c99   :  { %v12697_v57 = vsel %vm195_vm1, %v1775_v15, %v1779_v14 }
0x1c9a   :  { %9131 = vmatmul.mubr.msk.f32.vlgmr.msra.gmra.mrb[22].mxu0 %vm299_vm4, %v12697_v57 }
0x1c9b   :  { %9818 = vmatpush3.bf16.msra.mxu0 %v12567_v40  ;;  %9168 = vmatprep.mubr.msk.f32.mxu0 %vm12003_vm0, %v15991_v3 }
0x1c9c   :  { %9819 = vmatprep.subr.bf16.mxu0 %v15989_v4 }
0x1c9f   :  { %9821 = vmatpush3.bf16.msra.mxu0 %v12578_v44 }
0x1ca0   :  { %9822 = vmatprep.subr.bf16.mxu0 %v15989_v4 }
0x1ca3   :  { %9824 = vmatpush3.bf16.msra.mxu0 %v12588_v48 }
0x1ca4   :  { %9825 = vmatprep.subr.bf16.mxu0 %v15989_v4 }
0x1ca7   :  { %9827 = vmatpush3.bf16.msra.mxu0 %v12598_v53 }
0x1ca8   :  { %9840 = vmatprep.subr.bf16.mxu0 %v15989_v4 }
0x1d6d   :  { %v1852_v17 = vpop.f32.mrb[22].mxu0 }
0x1d6e   :  { %v1856_v18 = vadd.f32 %v1852_v17, %v12651_v60  ;;  %v9132_v13 = vpop.f32.mrb[23].mxu0 }
0x1d70   :  { %11717 = vtanh.f32 %v1856_v18  ;;  %v8354_v22 = vmul.f32 -1.442695, %v1856_v18 }
0x1d72   :  { %11719 = vpow2.f32 %v8354_v22 }
0x1d7a   :  { %v11718_v21 = vpop.eup %11717 }
0x1d7b   :  { %1866 = vrot.lane.b32.xlu0 %v11718_v21, %s12004_s26 }
0x1d7c   :  { %v11720_v16 = vpop.eup %11719 }
0x1d7d   :  { %v1860_v26 = vadd.f32 1.0, %v11720_v16 }
0x1d7f   :  { %11721 = vrcp.f32 %v1860_v26 }
0x1d89   :  { %v11722_v29 = vpop.eup %11721 }
0x1d8a   :  { %v1864_v34 = vmul.f32 %v11722_v29, %v1764_v0 }
0x1ded   :  { %v1867_v19 = vpop.permute.xlu0 %1866 }
0x1dee   :  { %v1869_v33 = vmul.f32 %v11722_v29, %v1867_v19 }
0x1df0   :  { %1871 = vrot.lane.b32.xlu1 %v1869_v33, %s12005_s28 }
0x1e62   :  { %v1872_v23 = vpop.permute.xlu1 %1871 }
0x1e63   :  { %v1874_v27 = vadd.f32 %v1872_v23, %v1864_v34 }
0x1e65   :  { %11723 = vtanh.f32 %v1874_v27 }
0x1e6f   :  { %v11724_v60 = vpop.eup %11723 }
0x1e70   :  { %1877 = vrot.lane.b32.xlu0 %v11724_v60, %s12004_s26 }
0x1ee2   :  { %v1878_v37 = vpop.permute.xlu0 %1877 }
0x1ee3   :  { %v1880_v58 = vmul.f32 %v11722_v29, %v1878_v37 }
0x1ee5   :  { %v1881_v59 = vmul.f32 %v12281_v24, %v1880_v58  ;;  %v1882_v20 = vmul.f32 %v1880_v58, %v12284_v25 }
0x1ee7   :  { %1888 = vrot.lane.b32.xlu0 %v1882_v20, %s12004_s26  ;;  %1884 = vrot.lane.b32.xlu1 %v1881_v59, %s12005_s28 }
0x1f59   :  { %v1889_v38 = vpop.permute.xlu0 %1888  ;;  %v1885_v8 = vpop.permute.xlu1 %1884 }
0x1f5a   :  { %v12720_v39 = vsel %vm195_vm1, %v1885_v8, %v1889_v38 }
0x1f5b   :  { %9150 = vmatmul.mubr.msk.f32.vlgmr.msra.gmra.mrb[22].mxu1 %vm299_vm4, %v12720_v39 }
0x1f5c   :  { %9830 = vmatpush3.bf16.msra.mxu1 %v12567_v40  ;;  %9187 = vmatprep.mubr.msk.f32.mxu1 %vm12003_vm0, %v15991_v3 }
0x1f5d   :  { %9831 = vmatprep.subr.bf16.mxu1 %v15989_v4 }
0x1f60   :  { %9833 = vmatpush3.bf16.msra.mxu1 %v12578_v44 }
0x1f61   :  { %9834 = vmatprep.subr.bf16.mxu1 %v15989_v4 }
0x1f64   :  { %9836 = vmatpush3.bf16.msra.mxu1 %v12588_v48 }
0x1f65   :  { %9837 = vmatprep.subr.bf16.mxu1 %v15989_v4 }
0x1f68   :  { %9839 = vmatpush3.bf16.msra.mxu1 %v12598_v53 }
0x1f69   :  { %9852 = vmatprep.subr.bf16.mxu1 %v15989_v4 }
0x202e   :  { %v1968_v43 = vpop.f32.mrb[22].mxu1 }
0x202f   :  { %v1972_v47 = vadd.f32 %v1968_v43, %v12657_v62  ;;  %v9151_v50 = vpop.f32.mrb[23].mxu1 }
0x2031   :  { %11725 = vtanh.f32 %v1972_v47  ;;  %v8356_v0 = vmul.f32 -1.442695, %v1972_v47 }
0x2033   :  { %11727 = vpow2.f32 %v8356_v0 }
0x203b   :  { %v11726_v63 = vpop.eup %11725 }
0x203c   :  { %1982 = vrot.lane.b32.xlu1 %v11726_v63, %s12004_s26 }
0x203d   :  { %v11728_v54 = vpop.eup %11727 }
0x203e   :  { %v1976_v6 = vadd.f32 1.0, %v11728_v54 }
0x2040   :  { %11729 = vrcp.f32 %v1976_v6 }
0x204a   :  { %v11730_v10 = vpop.eup %11729 }
0x204b   :  { %v1980_v14 = vmul.f32 %v11730_v10, %v1874_v27 }
0x20ae   :  { %v1983_v52 = vpop.permute.xlu1 %1982 }
0x20af   :  { %v1985_v12 = vmul.f32 %v11730_v10, %v1983_v52 }
0x20b1   :  { %1987 = vrot.lane.b32.xlu0 %v1985_v12, %s12005_s28 }
0x2123   :  { %v1988_v15 = vpop.permute.xlu0 %1987 }
0x2124   :  { %v1990_v17 = vadd.f32 %v1988_v15, %v1980_v14 }
0x2126   :  { %11731 = vtanh.f32 %v1990_v17 }
0x2130   :  { %v11732_v62 = vpop.eup %11731 }
0x2131   :  { %1993 = vrot.lane.b32.xlu1 %v11732_v62, %s12004_s26 }
0x21a3   :  { %v1994_v18 = vpop.permute.xlu1 %1993 }
0x21a4   :  { %v1996_v13 = vmul.f32 %v11730_v10, %v1994_v18 }
0x21a6   :  { %v1997_v21 = vmul.f32 %v12281_v24, %v1996_v13  ;;  %v1998_v22 = vmul.f32 %v1996_v13, %v12284_v25 }
0x21a8   :  { %2004 = vrot.lane.b32.xlu1 %v1998_v22, %s12004_s26  ;;  %2000 = vrot.lane.b32.xlu0 %v1997_v21, %s12005_s28 }
0x221a   :  { %v2005_v16 = vpop.permute.xlu1 %2004  ;;  %v2001_v26 = vpop.permute.xlu0 %2000 }
0x221b   :  { %v12743_v29 = vsel %vm195_vm1, %v2001_v26, %v2005_v16 }
0x221c   :  { %9169 = vmatmul.mubr.msk.f32.vlgmr.msra.gmra.mrb[24].mxu0 %vm299_vm4, %v12743_v29 }
0x221d   :  { %9842 = vmatpush3.bf16.msra.mxu0 %v12567_v40  ;;  %9206 = vmatprep.mubr.msk.f32.mxu0 %vm12003_vm0, %v15991_v3 }
0x221e   :  { %9843 = vmatprep.subr.bf16.mxu0 %v15989_v4 }
0x2221   :  { %9845 = vmatpush3.bf16.msra.mxu0 %v12578_v44 }
0x2222   :  { %9846 = vmatprep.subr.bf16.mxu0 %v15989_v4 }
0x2225   :  { %9848 = vmatpush3.bf16.msra.mxu0 %v12588_v48 }
0x2226   :  { %9849 = vmatprep.subr.bf16.mxu0 %v15989_v4 }
0x2229   :  { %9851 = vmatpush3.bf16.msra.mxu0 %v12598_v53 }
0x222a   :  { %9865 = vmatprep.subr.bf16.mxu0 %v12436_v41 }
0x22ef   :  { %v2078_v19 = vpop.f32.mrb[24].mxu0 }
0x22f0   :  { %v2082_v33 = vadd.f32 %v2078_v19, %v12648_v61  ;;  %v9170_v34 = vpop.f32.mrb[25].mxu0 }
0x22f1   :  { %v2476_v34 = vrot.slane %v12720_v39, 4 }
0x22f2   :  { %11733 = vtanh.f32 %v2082_v33  ;;  %v8358_v27 = vmul.f32 -1.442695, %v2082_v33 }
0x22f4   :  { %11735 = vpow2.f32 %v8358_v27 }
0x22fc   :  { %v11734_v23 = vpop.eup %11733 }
0x22fd   :  { %2092 = vrot.lane.b32.xlu0 %v11734_v23, %s12004_s26 }
0x22fe   :  { %v11736_v60 = vpop.eup %11735 }
0x22ff   :  { %v2086_v37 = vadd.f32 1.0, %v11736_v60 }
0x2301   :  { %11737 = vrcp.f32 %v2086_v37 }
0x230b   :  { %v11738_v58 = vpop.eup %11737 }
0x230c   :  { %v2090_v38 = vmul.f32 %v11738_v58, %v1990_v17 }
0x236f   :  { %v2093_v59 = vpop.permute.xlu0 %2092 }
0x2370   :  { %v2095_v20 = vmul.f32 %v11738_v58, %v2093_v59 }
0x2372   :  { %2097 = vrot.lane.b32.xlu1 %v2095_v20, %s12005_s28 }
0x23e4   :  { %v2098_v8 = vpop.permute.xlu1 %2097 }
0x23e5   :  { %v2100_v43 = vadd.f32 %v2098_v8, %v2090_v38 }
0x23e7   :  { %11739 = vtanh.f32 %v2100_v43 }
0x23f1   :  { %v11740_v61 = vpop.eup %11739 }
0x23f2   :  { %2103 = vrot.lane.b32.xlu0 %v11740_v61, %s12004_s26 }
0x2464   :  { %v2104_v47 = vpop.permute.xlu0 %2103 }
0x2465   :  { %v2106_v50 = vmul.f32 %v11738_v58, %v2104_v47  ;;  %v2473_v58 = vrot.slane %v12743_v29, 4 }
0x2467   :  { %v2107_v63 = vmul.f32 %v12281_v24, %v2106_v50  ;;  %v2108_v0 = vmul.f32 %v2106_v50, %v12284_v25 }
0x2469   :  { %2114 = vrot.lane.b32.xlu0 %v2108_v0, %s12004_s26  ;;  %2110 = vrot.lane.b32.xlu1 %v2107_v63, %s12005_s28 }
0x24db   :  { %v2115_v54 = vpop.permute.xlu0 %2114  ;;  %v2111_v6 = vpop.permute.xlu1 %2110 }
0x24dc   :  { %v2117_v10 = vsel %vm195_vm1, %v2111_v6, %v2115_v54 }
0x24dd   :  { %9188 = vmatmul.mubr.msk.f32.vlgmr.msra.gmra.mrb[24].mxu1 %vm299_vm4, %v2117_v10  ;;  %v2470_v33 = vrot.slane %v2117_v10, 4  ;;  %v2475_v38 = vadd.f32 %v2473_v58, %v2117_v10 }
0x24de   :  { %9854 = vmatpush3.bf16.msra.mxu1 %v12567_v40  ;;  %9225 = vmatprep.mubr.msk.f32.mxu1 %vm12003_vm0, %v15991_v3 }
0x24df   :  { %9855 = vmatprep.subr.bf16.mxu1 %v15989_v4  ;;  %v2472_v23 = vadd.f32 %v2470_v33, %v12743_v29 }
0x24e1   :  { %v2489_v8 = vrot.slane %v2472_v23, 4 }
0x24e2   :  { %9857 = vmatpush3.bf16.msra.mxu1 %v12578_v44 }
0x24e3   :  { %9858 = vmatprep.subr.bf16.mxu1 %v15989_v4 }
0x24e6   :  { %9860 = vmatpush3.bf16.msra.mxu1 %v12588_v48 }
0x24e7   :  { %9861 = vmatprep.subr.bf16.mxu1 %v15989_v4  ;;  %v3756_v4 = vld [vmem:[%s15970_s16 + $0x320] sm:$0xff] }
0x24ea   :  { %9863 = vmatpush3.bf16.msra.mxu1 %v12598_v53 }
0x24eb   :  { %9881 = vmatprep.subr.bf16.mxu1 %v12447_v45 }
0x25b0   :  { %v2194_v52 = vpop.f32.mrb[24].mxu1 }
0x25b1   :  { %v2198_v40 = vadd.f32 %v2194_v52, %v12654_v42  ;;  %v9189_v12 = vpop.f32.mrb[25].mxu1 }
0x25b3   :  { %11741 = vtanh.f32 %v2198_v40  ;;  %v8360_v15 = vmul.f32 -1.442695, %v2198_v40 }
0x25b5   :  { %11743 = vpow2.f32 %v8360_v15 }
0x25bd   :  { %v11742_v14 = vpop.eup %11741 }
0x25be   :  { %2208 = vrot.lane.b32.xlu1 %v11742_v14, %s12004_s26 }
0x25bf   :  { %v11744_v44 = vpop.eup %11743 }
0x25c0   :  { %v2202_v17 = vadd.f32 1.0, %v11744_v44 }
0x25c2   :  { %11745 = vrcp.f32 %v2202_v17 }
0x25cc   :  { %v11746_v48 = vpop.eup %11745 }
0x25cd   :  { %v2206_v53 = vmul.f32 %v11746_v48, %v2100_v43 }
0x2630   :  { %v2209_v62 = vpop.permute.xlu1 %2208 }
0x2631   :  { %v2211_v18 = vmul.f32 %v11746_v48, %v2209_v62 }
0x2633   :  { %2213 = vrot.lane.b32.xlu0 %v2211_v18, %s12005_s28 }
0x26a5   :  { %v2214_v13 = vpop.permute.xlu0 %2213 }
0x26a6   :  { %v2216_v21 = vadd.f32 %v2214_v13, %v2206_v53 }
0x26a8   :  { %11747 = vtanh.f32 %v2216_v21 }
0x26b2   :  { %v11748_v42 = vpop.eup %11747 }
0x26b3   :  { %2219 = vrot.lane.b32.xlu1 %v11748_v42, %s12004_s26 }
0x2725   :  { %v2220_v22 = vpop.permute.xlu1 %2219 }
0x2726   :  { %v2222_v16 = vmul.f32 %v11746_v48, %v2220_v22 }
0x2728   :  { %v2223_v26 = vmul.f32 %v12281_v24, %v2222_v16  ;;  %v2224_v19 = vmul.f32 %v2222_v16, %v12284_v25 }
0x272a   :  { %2230 = vrot.lane.b32.xlu1 %v2224_v19, %s12004_s26  ;;  %2226 = vrot.lane.b32.xlu0 %v2223_v26, %s12005_s28 }
0x279c   :  { %v2231_v27 = vpop.permute.xlu1 %2230  ;;  %v2227_v60 = vpop.permute.xlu0 %2226 }
0x279d   :  { %v2233_v37 = vsel %vm195_vm1, %v2227_v60, %v2231_v27 }
0x279e   :  { %v2467_v59 = vrot.slane %v2233_v37, 4  ;;  %v2478_v20 = vadd.f32 %v2476_v34, %v2233_v37  ;;  %9207 = vmatmul.mubr.msk.f32.vlgmr.msra.gmra.mrb[26].mxu0 %vm299_vm4, %v2233_v37 }
0x279f   :  { %9867 = vmatpush3.bf16.msra.mxu0 %v12436_v41 }
0x27a0   :  { %v2469_v43 = vadd.f32 %v2467_v59, %v12720_v39  ;;  %v2492_v61 = vrot.slane %v2478_v20, 4  ;;  %9869 = vmatprep.subr.bf16.mxu0 %v12449_v46  ;;  %v2482_v20 = vrot.slane %v12675_v36, 4 }
0x27a2   :  { %v12794_v47 = vsel %vm297_vm2, %v2469_v43, %v2489_v8  ;;  %v12797_v50 = vsel %vm297_vm2, %v2475_v38, %v2492_v61 }
0x27a3   :  { %9871 = vmatpush3.bf16.msra.mxu0 %v12449_v46 }
0x27a4   :  { %9873 = vmatprep.subr.bf16.mxu0 %v12476_v55 }
0x27a7   :  { %9875 = vmatpush3.bf16.msra.mxu0 %v12476_v55 }
0x27a8   :  { %9877 = vmatprep.subr.bf16.mxu0 %v12497_v5 }
0x27ab   :  { %9879 = vmatpush3.bf16.msra.mxu0 %v12497_v5 }
0x2871   :  { %v2304_v41 = vpop.f32.mrb[26].mxu0 }
0x2872   :  { %v2308_v39 = vadd.f32 %v2304_v41, %v12660_v51  ;;  %v9208_v29 = vpop.f32.mrb[27].mxu0 }
0x2873   :  { %v2479_v29 = vrot.slane %v12697_v57, 4 }
0x2874   :  { %11749 = vtanh.f32 %v2308_v39  ;;  %v8362_v0 = vmul.f32 -1.442695, %v2308_v39 }
0x2876   :  { %11751 = vpow2.f32 %v8362_v0 }
0x287e   :  { %v11750_v63 = vpop.eup %11749 }
0x287f   :  { %2318 = vrot.lane.b32.xlu0 %v11750_v63, %s12004_s26 }
0x2880   :  { %v11752_v54 = vpop.eup %11751 }
0x2881   :  { %v2312_v46 = vadd.f32 1.0, %v11752_v54 }
0x2883   :  { %11753 = vrcp.f32 %v2312_v46 }
0x288d   :  { %v11754_v6 = vpop.eup %11753 }
0x288e   :  { %v2316_v52 = vmul.f32 %v11754_v6, %v2216_v21 }
0x28f1   :  { %v2319_v10 = vpop.permute.xlu0 %2318 }
0x28f2   :  { %v2321_v55 = vmul.f32 %v11754_v6, %v2319_v10 }
0x28f4   :  { %2323 = vrot.lane.b32.xlu1 %v2321_v55, %s12005_s28 }
0x2966   :  { %v2324_v5 = vpop.permute.xlu1 %2323 }
0x2967   :  { %v2326_v40 = vadd.f32 %v2324_v5, %v2316_v52 }
0x2969   :  { %11755 = vtanh.f32 %v2326_v40 }
0x2973   :  { %v11756_v51 = vpop.eup %11755 }
0x2974   :  { %2329 = vrot.lane.b32.xlu0 %v11756_v51, %s12004_s26 }
0x29e6   :  { %v2330_v12 = vpop.permute.xlu0 %2329 }
0x29e7   :  { %v2332_v14 = vmul.f32 %v11754_v6, %v2330_v12 }
0x29e9   :  { %v2333_v15 = vmul.f32 %v12281_v24, %v2332_v14  ;;  %v2334_v44 = vmul.f32 %v2332_v14, %v12284_v25 }
0x29eb   :  { %2340 = vrot.lane.b32.xlu0 %v2334_v44, %s12004_s26  ;;  %2336 = vrot.lane.b32.xlu1 %v2333_v15, %s12005_s28 }
0x2a5d   :  { %v2341_v17 = vpop.permute.xlu0 %2340  ;;  %v2337_v48 = vpop.permute.xlu1 %2336 }
0x2a5e   :  { %v2343_v62 = vsel %vm195_vm1, %v2337_v48, %v2341_v17 }
0x2a5f   :  { %9226 = vmatmul.mubr.msk.f32.vlgmr.msra.gmra.mrb[26].mxu1 %vm299_vm4, %v2343_v62  ;;  %v2464_v60 = vrot.slane %v2343_v62, 4  ;;  %v2481_v0 = vadd.f32 %v2479_v29, %v2343_v62 }
0x2a60   :  { %9883 = vmatpush3.bf16.msra.mxu1 %v12447_v45 }
0x2a61   :  { %9885 = vmatprep.subr.bf16.mxu1 %v12461_v49  ;;  %v2466_v37 = vadd.f32 %v2464_v60, %v12697_v57 }
0x2a63   :  { %v2486_v61 = vrot.slane %v2466_v37, 4 }
0x2a64   :  { %9887 = vmatpush3.bf16.msra.mxu1 %v12461_v49 }
0x2a65   :  { %9889 = vmatprep.subr.bf16.mxu1 %v12479_v56 }
0x2a68   :  { %9891 = vmatpush3.bf16.msra.mxu1 %v12479_v56 }
0x2a69   :  { %9893 = vmatprep.subr.bf16.mxu1 %v12502_v7 }
0x2a6c   :  { %9895 = vmatpush3.bf16.msra.mxu1 %v12502_v7 }
0x2a6d   :  { %9291 = vmatprep.subr.mxu1 %v15991_v3 }
0x2b32   :  { %v2420_v18 = vpop.f32.mrb[26].mxu1 }
0x2b33   :  { %v2424_v53 = vadd.f32 %v2420_v18, %v12664_v9  ;;  %v9227_v13 = vpop.f32.mrb[27].mxu1 }
0x2b35   :  { %11757 = vtanh.f32 %v2424_v53  ;;  %v8364_v21 = vmul.f32 -1.442695, %v2424_v53 }
0x2b37   :  { %11759 = vpow2.f32 %v8364_v21 }
0x2b3f   :  { %v11758_v45 = vpop.eup %11757 }
0x2b40   :  { %2434 = vrot.lane.b32.xlu1 %v11758_v45, %s12004_s26 }
0x2b41   :  { %v11760_v49 = vpop.eup %11759 }
0x2b42   :  { %v2428_v42 = vadd.f32 1.0, %v11760_v49 }
0x2b44   :  { %11761 = vrcp.f32 %v2428_v42 }
0x2b4e   :  { %v11762_v56 = vpop.eup %11761 }
0x2b4f   :  { %v2432_v7 = vmul.f32 %v11762_v56, %v2326_v40 }
0x2bb2   :  { %v2435_v22 = vpop.permute.xlu1 %2434 }
0x2bb3   :  { %v2437_v16 = vmul.f32 %v11762_v56, %v2435_v22  ;;  %v2965_v22 = vld [vmem:[%s15966_s1 + $0x8] sm:$0xff] }
0x2bb5   :  { %2439 = vrot.lane.b32.xlu0 %v2437_v16, %s12005_s28  ;;  %v2964_v16 = vld [vmem:[%s15966_s1] sm:$0xff] }
0x2c27   :  { %v2440_v26 = vpop.permute.xlu0 %2439 }
0x2c28   :  { %v2442_v19 = vadd.f32 %v2440_v26, %v2432_v7 }
0x2c2a   :  { %11763 = vtanh.f32 %v2442_v19 }
0x2c34   :  { %v11764_v9 = vpop.eup %11763 }
0x2c35   :  { %2445 = vrot.lane.b32.xlu1 %v11764_v9, %s12004_s26 }
0x2ca7   :  { %v2446_v33 = vpop.permute.xlu1 %2445 }
0x2ca8   :  { %v2448_v34 = vmul.f32 %v11762_v56, %v2446_v33  ;;  %v8382_v33 = vld [vmem:[%s15967_s2 + $0x1] ss:$0 sm:$0xff] }
0x2caa   :  { %v2449_v23 = vmul.f32 %v12281_v24, %v2448_v34  ;;  %v2450_v27 = vmul.f32 %v2448_v34, %v12284_v25  ;;  %v3760_v25 = vld [vmem:[%s15970_s16 + $0x340] sm:$0xff] }
0x2cac   :  { %2456 = vrot.lane.b32.xlu1 %v2450_v27, %s12004_s26  ;;  %2452 = vrot.lane.b32.xlu0 %v2449_v23, %s12005_s28  ;;  %v8381_v23 = vld [vmem:[%s15967_s2] ss:$0 sm:$0xff] }
0x2d1e   :  { %v2457_v58 = vpop.permute.xlu1 %2456  ;;  %v2453_v59 = vpop.permute.xlu0 %2452 }
0x2d1f   :  { %v2459_v38 = vsel %vm195_vm1, %v2453_v59, %v2457_v58 }
0x2d20   :  { %v2461_v8 = vrot.slane %v2459_v38, 4  ;;  %v2484_v43 = vadd.f32 %v2482_v20, %v2459_v38 }
0x2d22   :  { %v2463_v41 = vadd.f32 %v2461_v8, %v12675_v36  ;;  %v2495_v63 = vrot.slane %v2484_v43, 4 }
0x2d24   :  { %v2497_v39 = vsel %vm297_vm2, %v2463_v41, %v2486_v61  ;;  %v2500_v36 = vsel %vm297_vm2, %v2481_v0, %v2495_v63 }
0x2d25   :  { %9244 = vmatprep.mubr.msk.f32.mxu0 %vm299_vm4, %v2497_v39  ;;  %9266 = vmatprep.mubr.msk.f32.mxu1 %vm299_vm4, %v2497_v39 }
0x2d26   :  { %9245 = vmatmul.mubr.msk.f32.vlgmr.msra.gmra.mrb[28].mxu0 %vm299_vm4, %v12794_v47  ;;  %9267 = vmatmul.mubr.msk.f32.vlgmr.msra.gmra.mrb[28].mxu1 %vm299_vm4, %v12794_v47 }
0x2d27   :  { %9247 = vmatprep.mubr.msk.f32.mxu0 %vm299_vm4, %v12797_v50  ;;  %9269 = vmatprep.mubr.msk.f32.mxu1 %vm299_vm4, %v12797_v50  ;;  %v2707_v50 = vld [vmem:[%s15965_s3] sm:$0xff] }
0x2d2a   :  { %9248 = vmatmul.mubr.msk.f32.gmra.mrb[30].mxu0 %vm299_vm4, %v2500_v36  ;;  %9270 = vmatmul.mubr.msk.f32.gmra.mrb[30].mxu1 %vm299_vm4, %v2500_v36 }
0x2d2b   :  { %9293 = vmatprep.mubr.msk.f32.mxu1 %vm12003_vm0, %v15991_v3  ;;  %9280 = vmatprep.mubr.msk.f32.mxu0 %vm195_vm1, %v2707_v50 }
0x2df9   :  { %v9246_v57 = vpop.f32.mrb[28].mxu0  ;;  %v9268_v54 = vpop.f32.mrb[28].mxu1 }
0x2dfa   :  { %v2684_v46 = vmax.f32 %v9246_v57, %v9268_v54  ;;  %v2579_v47 = vpop.f32.mrb[29].mxu0  ;;  %v2664_v6 = vpop.f32.mrb[29].mxu1 }
0x2dfb   :  { %v2683_v10 = vmax.f32 %v2579_v47, %v2664_v6 }
0x2dfd   :  { %v11615_v55 = vpack.i.bf16 %v2684_v46, %v2683_v10  ;;  %v9249_v52 = vpop.f32.mrb[30].mxu0  ;;  %v9271_v5 = vpop.f32.mrb[30].mxu1 }
0x2dfe   :  { %v2686_v40 = vmax.f32 %v9249_v52, %v9271_v5  ;;  %v2589_v51 = vpop.f32.mrb[31].mxu0  ;;  %v2674_v12 = vpop.f32.mrb[31].mxu1 }
0x2dff   :  { %v2685_v14 = vmax.f32 %v2589_v51, %v2674_v12  ;;  %11616 = vrot.lane.b32.xlu0 %v11615_v55, %s12005_s28 }
0x2e01   :  { %v11620_v15 = vpack.i.bf16 %v2686_v40, %v2685_v14 }
0x2e03   :  { %11621 = vrot.lane.b32.xlu1 %v11620_v15, %s12005_s28 }
0x2e71   :  { %v11617_v44 = vpop.permute.xlu0 %11616 }
0x2e72   :  { %v11619_v17 = vunpack.i.h.bf16 %v11617_v44  ;;  %v11618_v48 = vunpack.i.l.bf16 %v11617_v44 }
0x2e74   :  { %v2703_v62 = vsel %vm195_vm1, %v12615_v28, %v11618_v48  ;;  %v2704_v18 = vsel %vm195_vm1, %v12613_v2, %v11619_v17  ;;  %v2708_v28 = vld [vmem:[%s15965_s3 + $0x8] sm:$0xff]  ;;  %v2709_v2 = vld [vmem:[%s15965_s3 + $0x10] sm:$0xff] }
0x2e75   :  { %v11622_v53 = vpop.permute.xlu1 %11621  ;;  %v9896_v13 = vpack.c.bf16 %v2704_v18, %v2703_v62 }
0x2e76   :  { %v11624_v45 = vunpack.i.h.bf16 %v11622_v53  ;;  %v11623_v21 = vunpack.i.l.bf16 %v11622_v53 }
0x2e77   :  { %9897 = vmatprep.subr.bf16.mxu0 %v9896_v13 }
0x2e78   :  { %9899 = vmatpush3.bf16.msra.mxu0 %v9896_v13  ;;  %v2705_v49 = vsel %vm195_vm1, %v12623_v1, %v11623_v21  ;;  %v2706_v42 = vsel %vm195_vm1, %v12619_v11, %v11624_v45  ;;  %v2710_v11 = vld [vmem:[%s15965_s3 + $0x18] sm:$0xff]  ;;  %v12006_v1 = vmov 0  }
0x2e79   :  { %v9900_v56 = vpack.c.bf16 %v2706_v42, %v2705_v49  ;;  %11626 = vset.pattern.permute.xlu1 %v12006_v1  ;;  %11625 = vset.pattern.permute.xlu0 %v12006_v1 }
0x2e7a   :  { %2975 = vperm.xlu1 %11626, %v2965_v22   ;;  %2970 = vperm.xlu0 %11625, %v2964_v16  }
0x2e7b   :  { %9901 = vmatprep.subr.bf16.mxu0 %v9900_v56 }
0x2e7c   :  { %9903 = vmatpush3.bf16.msra.mxu0 %v9900_v56 }
0x2e7d   :  { %9286 = vmatprep.subr.mxu0 %v15991_v3 }
0x2e7f   :  { %9281 = vmatmul.mubr.msk.f32.vlgmr.msra.gmra.mrb[32].mxu0 %vm195_vm1, %v2708_v28 }
0x2e80   :  { %9283 = vmatprep.mubr.msk.f32.mxu0 %vm195_vm1, %v2709_v2 }
0x2e83   :  { %9284 = vmatmul.mubr.msk.f32.gmra.mrb[34].mxu0 %vm195_vm1, %v2710_v11 }
0x2e84   :  { %9288 = vmatprep.mubr.msk.f32.mxu0 %vm12003_vm0, %v15991_v3 }
0x2ef9   :  { %v2976_v34 = vpop.permute.xlu1 %2975  ;;  %v2971_v27 = vpop.permute.xlu0 %2970 }
0x2efa   :  { %v2991_v60 = vmax.f32 %v2976_v34, %v8382_v33  ;;  %v2990_v37 = vmax.f32 %v2971_v27, %v8381_v23 }
0x2efc   :  { %vm2993_vm5 = vcmp.gt.f32.partialorder %v2991_v60, 0.5  ;;  %vm2992_vm6 = vcmp.gt.f32.partialorder %v2990_v37, 0.5 }
0x2f52   :  { %v12886_v7 = vpop.f32.mrb[32].mxu0 }
0x2f53   :  { %v12888_v26 = vpop.f32.mrb[33].mxu0 }
0x2f56   :  { %v12890_v19 = vpop.f32.mrb[34].mxu0 }
0x2f57   :  { %v12892_v9 = vpop.f32.mrb[35].mxu0  ;;  %9292 = vmatpush3.xpose.msk.msra.mxu1 %vm299_vm4, %v12890_v19 }
0x2f58   :  { %9287 = vmatpush3.xpose.msk.msra.mxu0 %vm299_vm4, %v12892_v9  ;;  %9301 = vmatprep.subr.mxu1 %v15991_v3 }
0x2f59   :  { %9296 = vmatprep.subr.mxu0 %v15991_v3 }
0x2f5a   :  { %9294 = vmatmul.mubr.msk.f32.vlgmr.msra.gmra.mrb[32].mxu1 %vm299_vm4, %v12886_v7 }
0x2f5b   :  { %9289 = vmatmul.mubr.msk.f32.vlgmr.msra.gmra.mrb[36].mxu0 %vm299_vm4, %v12888_v26  ;;  %9302 = vmatpush3.msra.mxu1 %v12890_v19 }
0x2f5c   :  { %9297 = vmatpush3.msra.mxu0 %v12892_v9  ;;  %9303 = vmatprep.mubr.msk.f32.mxu1 %vm12003_vm0, %v15991_v3 }
0x2f5d   :  { %9311 = vmatprep.subr.mxu1 %v15991_v3  ;;  %9298 = vmatprep.mubr.msk.f32.mxu0 %vm12003_vm0, %v15991_v3 }
0x2f5e   :  { %9306 = vmatprep.subr.mxu0 %v15991_v3 }
0x302d   :  { %v2960_v58 = vpop.f32.mrb[32].mxu1 }
0x302e   :  { %v2995_v59 = vsel %vm2993_vm5, -1e+13, %v2960_v58  ;;  %v2884_v20 = vpop.f32.mrb[36].mxu0  ;;  %v9295_v38 = vpop.f32.mrb[33].mxu1 }
0x302f   :  { %v2994_v8 = vsel %vm2992_vm6, -1e+13, %v2884_v20  ;;  %v9290_v43 = vpop.f32.mrb[37].mxu0  ;;  %v3000_v61 = vsel %vm2996_vm7, %v2995_v59, -inf }
0x3030   :  { %3001 = vmax.xlane.f32.xlu0 %v3000_v61  ;;  %v2997_v41 = vsel %vm2996_vm7, %v2994_v8, -inf  ;;  %v3025_v63 = vrot.slane %v3000_v61, 4 }
0x3031   :  { %2998 = vmax.xlane.f32.xlu1 %v2997_v41  ;;  %v3019_v39 = vrot.slane %v2997_v41, 4 }
0x3032   :  { %v3026_v36 = vmax.f32 %v3000_v61, %v3025_v63 }
0x3033   :  { %v3020_v29 = vmax.f32 %v2997_v41, %v3019_v39 }
0x3034   :  { %v3027_v54 = vrot.slane %v3026_v36, 2 }
0x3035   :  { %v3021_v0 = vrot.slane %v3020_v29, 2 }
0x3036   :  { %v3028_v47 = vmax.f32 %v3026_v36, %v3027_v54 }
0x3037   :  { %v3022_v57 = vmax.f32 %v3020_v29, %v3021_v0 }
0x3038   :  { %v3029_v10 = vrot.slane %v3028_v47, 1 }
0x3039   :  { %v3023_v46 = vrot.slane %v3022_v57, 1 }
0x303a   :  { %v3030_v5 = vmax.f32 %v3028_v47, %v3029_v10 }
0x303b   :  { %v3024_v6 = vmax.f32 %v3022_v57, %v3023_v46 }
0x303c   :  { %v3032_v44 = vsub.f32 %v2995_v59, %v3030_v5  ;;  %v3529_v5 = vld [vmem:[%s15969_s15 + $0x8] sm:$0xff] }
0x303d   :  { %v3031_v55 = vsub.f32 %v2994_v8, %v3024_v6  ;;  %v2711_v6 = vld [vmem:[%s15968_s4] sm:$0xff] }
0x303e   :  { %v3035_v17 = vmul.f32 1.442695, %v3032_v44  ;;  %v3553_v44 = vld [vmem:[%s15969_s15 + $0xc8] sm:$0xff] }
0x303f   :  { %v3033_v14 = vmul.f32 1.442695, %v3031_v55 }
0x30bd   :  { %v3002_v52 = vpop.xlane.xlu0 %3001 }
0x30be   :  { %v3004_v50 = vsub.f32 %v2995_v59, %v3002_v52  ;;  %v2999_v40 = vpop.xlane.xlu1 %2998 }
0x30bf   :  { %v3003_v51 = vsub.f32 %v2994_v8, %v2999_v40 }
0x30c0   :  { %v3007_v12 = vmul.f32 1.442695, %v3004_v50  ;;  %v3537_v50 = vld [vmem:[%s15969_s15 + $0x48] sm:$0xff] }
0x30c1   :  { %v3005_v15 = vmul.f32 1.442695, %v3003_v51  ;;  %v9912_v40 = vpack.c.bf16 %v3537_v50, %v3529_v5  ;;  %v3528_v51 = vld [vmem:[%s15969_s15] sm:$0xff] }
0x30c2   :  { %11765 = vpow2.f32 %v3007_v12  ;;  %v3536_v12 = vld [vmem:[%s15969_s15 + $0x40] sm:$0xff] }
0x30c3   :  { %11767 = vpow2.f32 %v3005_v15  ;;  %v3545_v15 = vld [vmem:[%s15969_s15 + $0x88] sm:$0xff] }
0x30c4   :  { %11769 = vpow2.f32 %v3033_v14  ;;  %v9914_v14 = vpack.c.bf16 %v3536_v12, %v3528_v51 }
0x30c5   :  { %11771 = vpow2.f32 %v3035_v17  ;;  %v9916_v17 = vpack.c.bf16 %v3553_v44, %v3545_v15  ;;  %v3539_v15 = vld [vmem:[%s15969_s15 + $0x58] sm:$0xff] }
0x30cc   :  { %v11766_v48 = vpop.eup %11765 }
0x30cd   :  { %v11768_v62 = vpop.eup %11767  ;;  %v3012_v18 = vsel %vm2996_vm7, %v11766_v48, 0.0 }
0x30ce   :  { %3013 = vadd.xlane.f32.xlu1 %v3012_v18  ;;  %v3009_v53 = vsel %vm2996_vm7, %v11768_v62, 0.0  ;;  %v11770_v13 = vpop.eup %11769 }
0x30cf   :  { %3010 = vadd.xlane.f32.xlu0 %v3009_v53  ;;  %v3037_v45 = vsel %vm2996_vm7, %v11770_v13, 0.0  ;;  %v11772_v21 = vpop.eup %11771  ;;  %v3561_v53 = vld [vmem:[%s15969_s15 + $0x108] sm:$0xff] }
0x30d0   :  { %v3038_v49 = vrot.slane %v3037_v45, 4  ;;  %v3044_v42 = vsel %vm2996_vm7, %v11772_v21, 0.0 }
0x30d1   :  { %v3045_v28 = vrot.slane %v3044_v42, 4 }
0x30d2   :  { %v3039_v56 = vadd.f32 %v3038_v49, %v3037_v45  ;;  %v3568_v49 = vld [vmem:[%s15969_s15 + $0x140] sm:$0xff] }
0x30d3   :  { %v3046_v11 = vadd.f32 %v3045_v28, %v3044_v42  ;;  %v3585_v28 = vld [vmem:[%s15969_s15 + $0x1c8] sm:$0xff] }
0x30d4   :  { %v3040_v2 = vrot.slane %v3039_v56, 2 }
0x30d5   :  { %v3047_v22 = vrot.slane %v3046_v11, 2 }
0x30d6   :  { %v3041_v1 = vadd.f32 %v3040_v2, %v3039_v56  ;;  %v3577_v56 = vld [vmem:[%s15969_s15 + $0x188] sm:$0xff] }
0x30d7   :  { %v3048_v33 = vadd.f32 %v3047_v22, %v3046_v11  ;;  %v9924_v2 = vpack.c.bf16 %v3585_v28, %v3577_v56  ;;  %v3576_v11 = vld [vmem:[%s15969_s15 + $0x180] sm:$0xff]  ;;  %v3593_v22 = vld [vmem:[%s15969_s15 + $0x208] sm:$0xff]  ;;  %v3571_v56 = vld [vmem:[%s15969_s15 + $0x158] sm:$0xff] }
0x30d8   :  { %v3042_v16 = vrot.slane %v3041_v1, 1  ;;  %v2714_v28 = vld [vmem:[%s15968_s4 + $0x18] sm:$0xff] }
0x30d9   :  { %v3049_v23 = vrot.slane %v3048_v33, 1 }
0x30da   :  { %v3043_v34 = vadd.f32 %v3042_v16, %v3041_v1  ;;  %v3584_v1 = vld [vmem:[%s15969_s15 + $0x1c0] sm:$0xff]  ;;  %v3601_v16 = vld [vmem:[%s15969_s15 + $0x248] sm:$0xff] }
0x30db   :  { %v3050_v27 = vadd.f32 %v3049_v23, %v3048_v33  ;;  %v9926_v33 = vpack.c.bf16 %v3584_v1, %v3576_v11  ;;  %v3592_v23 = vld [vmem:[%s15969_s15 + $0x200] sm:$0xff]  ;;  %v3562_v1 = vld [vmem:[%s15969_s15 + $0x110] sm:$0xff] }
0x30dc   :  { %11773 = vrcp.f32 %v3043_v34  ;;  %v9928_v34 = vpack.c.bf16 %v3601_v16, %v3593_v22  ;;  %v3570_v22 = vld [vmem:[%s15969_s15 + $0x150] sm:$0xff]  ;;  %v3579_v16 = vld [vmem:[%s15969_s15 + $0x198] sm:$0xff] }
0x30dd   :  { %11775 = vrcp.f32 %v3050_v27  ;;  %v3600_v27 = vld [vmem:[%s15969_s15 + $0x240] sm:$0xff] }
0x30e6   :  { %v11774_v60 = vpop.eup %11773 }
0x30e7   :  { %v3052_v37 = vmul.f32 %v11774_v60, %v11770_v13  ;;  %v11776_v58 = vpop.eup %11775  ;;  %v3569_v13 = vld [vmem:[%s15969_s15 + $0x148] sm:$0xff] }
0x30e8   :  { %v3054_v59 = vmul.f32 %v11776_v58, %v11772_v21  ;;  %v9920_v45 = vpack.c.bf16 %v3569_v13, %v3561_v53  ;;  %v3560_v21 = vld [vmem:[%s15969_s15 + $0x100] sm:$0xff]  ;;  %v3609_v60 = vld [vmem:[%s15969_s15 + $0x288] sm:$0xff]  ;;  %v9930_v58 = vpack.c.bf16 %v3600_v27, %v3592_v23  ;;  %v2713_v13 = vld [vmem:[%s15968_s4 + $0x10] sm:$0xff] }
0x30e9   :  { %v9922_v42 = vpack.c.bf16 %v3568_v49, %v3560_v21  ;;  %v3546_v21 = vld [vmem:[%s15969_s15 + $0x90] sm:$0xff] }
0x30ea   :  { %v3554_v49 = vld [vmem:[%s15969_s15 + $0xd0] sm:$0xff] }
0x30eb   :  { %v3578_v27 = vld [vmem:[%s15969_s15 + $0x190] sm:$0xff] }
0x30fc   :  { %3201 = vxpose.xlu0.b32.start.end [1/1] (short) (narrow) %v3052_v37, 8  ;;  %v3617_v37 = vld [vmem:[%s15969_s15 + $0x2c8] sm:$0xff] }
0x3101   :  { %3233 = vxpose.xlu1.b32.start.end [1/1] (short) (narrow) %v3054_v59, 8  ;;  %v9932_v59 = vpack.c.bf16 %v3617_v37, %v3609_v60  ;;  %v3586_v60 = vld [vmem:[%s15969_s15 + $0x1d0] sm:$0xff]  ;;  %v3595_v37 = vld [vmem:[%s15969_s15 + $0x218] sm:$0xff] }
0x315b   :  { %v3014_v20 = vpop.xlane.xlu1 %3013 }
0x315c   :  { %11777 = vrcp.f32 %v3014_v20  ;;  %v3011_v38 = vpop.xlane.xlu0 %3010  ;;  %v3608_v20 = vld [vmem:[%s15969_s15 + $0x280] sm:$0xff] }
0x315d   :  { %11779 = vrcp.f32 %v3011_v38  ;;  %v3616_v38 = vld [vmem:[%s15969_s15 + $0x2c0] sm:$0xff] }
0x3166   :  { %v11778_v8 = vpop.eup %11777 }
0x3167   :  { %v11780_v43 = vpop.eup %11779  ;;  %v3018_v61 = vmul.f32 %v11778_v8, %v11766_v48  ;;  %v3544_v48 = vld [vmem:[%s15969_s15 + $0x80] sm:$0xff]  ;;  %v3625_v8 = vld [vmem:[%s15969_s15 + $0x308] sm:$0xff] }
0x3168   :  { %v3016_v41 = vmul.f32 %v11780_v43, %v11768_v62  ;;  %v3552_v62 = vld [vmem:[%s15969_s15 + $0xc0] sm:$0xff]  ;;  %v3633_v43 = vld [vmem:[%s15969_s15 + $0x348] sm:$0xff] }
0x3169   :  { %9304 = vmatmul.mubr.msk.f32.vlgmr.msra.gmra.mrb[34].mxu1 %vm2996_vm7, %v3018_v61  ;;  %v9918_v18 = vpack.c.bf16 %v3552_v62, %v3544_v48  ;;  %v9934_v61 = vpack.c.bf16 %v3616_v38, %v3608_v20  ;;  %v3530_v48 = vld [vmem:[%s15969_s15 + $0x10] sm:$0xff] }
0x316a   :  { %9312 = vmatpush3.msra.mxu1 %v12886_v7  ;;  %9299 = vmatmul.mubr.msk.f32.vlgmr.msra.gmra.mrb[38].mxu0 %vm2996_vm7, %v3016_v41  ;;  %v9936_v41 = vpack.c.bf16 %v3633_v43, %v3625_v8  ;;  %v3538_v62 = vld [vmem:[%s15969_s15 + $0x50] sm:$0xff]  ;;  %v3611_v43 = vld [vmem:[%s15969_s15 + $0x298] sm:$0xff] }
0x316b   :  { %9307 = vmatpush3.msra.mxu0 %v12888_v26  ;;  %9308 = vmatprep.mubr.msk.f32.mxu0 %vm12003_vm0, %v15991_v3  ;;  %v9946_v53 = vpack.c.bf16 %v3538_v62, %v3530_v48  ;;  %v3594_v38 = vld [vmem:[%s15969_s15 + $0x210] sm:$0xff] }
0x316c   :  { %9313 = vmatprep.mubr.msk.f32.mxu1 %vm12003_vm0, %v15991_v3  ;;  %9913 = vmatprep.subr.bf16.mxu1 %v9912_v40  ;;  %v3602_v8 = vld [vmem:[%s15969_s15 + $0x250] sm:$0xff] }
0x316d   :  { %v3534_v48 = vld [vmem:[%s15969_s15 + $0x30] sm:$0xff] }
0x316e   :  { %v3542_v62 = vld [vmem:[%s15969_s15 + $0x70] sm:$0xff] }
0x317c   :  { %v3217_v39 = vpop.trf.xlu0 }
0x317d   :  { %9309 = vmatmul.mubr.msk.f32.vlgmr.msra.gmra.mrb[40].mxu0 %vm2996_vm7, %v3217_v39  ;;  %v3624_v39 = vld [vmem:[%s15969_s15 + $0x300] sm:$0xff] }
0x317e   :  { %9324 = vmatprep.mubr.msk.f32.mxu0 %vm195_vm1, %v2711_v6 }
0x3181   :  { %v3249_v29 = vpop.trf.xlu1 }
0x3182   :  { %9314 = vmatmul.mubr.msk.f32.vlgmr.msra.gmra.mrb[36].mxu1 %vm2996_vm7, %v3249_v29  ;;  %v3632_v29 = vld [vmem:[%s15969_s15 + $0x340] sm:$0xff] }
0x3183   :  { %3890 = vmatprep.mubr.f32.mxu1 %v15991_v3  ;;  %9915 = vmatpush1.bf16.msra.mxu1 %v9914_v14  ;;  %v3531_v14 = vld [vmem:[%s15969_s15 + $0x18] sm:$0xff] }
0x3184   :  { %9917 = vmatprep.subr.bf16.mxu1 %v9916_v17  ;;  %v9944_v17 = vpack.c.bf16 %v3539_v15, %v3531_v14  ;;  %v3535_v14 = vld [vmem:[%s15969_s15 + $0x38] sm:$0xff] }
0x3187   :  { %9919 = vmatpush1.bf16.msra.mxu1 %v9918_v18  ;;  %v3547_v18 = vld [vmem:[%s15969_s15 + $0x98] sm:$0xff] }
0x3188   :  { %9921 = vmatprep.subr.bf16.mxu1 %v9920_v45 }
0x318b   :  { %9923 = vmatpush1.bf16.msra.mxu1 %v9922_v42  ;;  %v3563_v42 = vld [vmem:[%s15969_s15 + $0x118] sm:$0xff] }
0x318c   :  { %9925 = vmatprep.subr.bf16.mxu1 %v9924_v2  ;;  %v9950_v2 = vpack.c.bf16 %v3554_v49, %v3546_v21  ;;  %v9952_v11 = vpack.c.bf16 %v3571_v56, %v3563_v42  ;;  %v3548_v21 = vld [vmem:[%s15969_s15 + $0xa0] sm:$0xff]  ;;  %v3550_v56 = vld [vmem:[%s15969_s15 + $0xb0] sm:$0xff] }
0x318d   :  { %v3556_v49 = vld [vmem:[%s15969_s15 + $0xe0] sm:$0xff] }
0x318f   :  { %9927 = vmatpush1.bf16.msra.mxu1 %v9926_v33  ;;  %v3587_v33 = vld [vmem:[%s15969_s15 + $0x1d8] sm:$0xff] }
0x3190   :  { %9929 = vmatprep.subr.bf16.mxu1 %v9928_v34  ;;  %v9954_v34 = vpack.c.bf16 %v3570_v22, %v3562_v1  ;;  %v9956_v23 = vpack.c.bf16 %v3587_v33, %v3579_v16  ;;  %v3573_v16 = vld [vmem:[%s15969_s15 + $0x168] sm:$0xff]  ;;  %v3567_v33 = vld [vmem:[%s15969_s15 + $0x138] sm:$0xff] }
0x3193   :  { %9931 = vmatpush1.bf16.msra.mxu1 %v9930_v58  ;;  %v3603_v58 = vld [vmem:[%s15969_s15 + $0x258] sm:$0xff] }
0x3194   :  { %9933 = vmatprep.subr.bf16.mxu1 %v9932_v59  ;;  %v9958_v59 = vpack.c.bf16 %v3586_v60, %v3578_v27  ;;  %v9960_v20 = vpack.c.bf16 %v3603_v58, %v3595_v37  ;;  %v3564_v60 = vld [vmem:[%s15969_s15 + $0x120] sm:$0xff] }
0x3195   :  { %v3572_v37 = vld [vmem:[%s15969_s15 + $0x160] sm:$0xff] }
0x3197   :  { %9935 = vmatpush1.bf16.msra.mxu1 %v9934_v61  ;;  %v3619_v61 = vld [vmem:[%s15969_s15 + $0x2d8] sm:$0xff] }
0x3198   :  { %9937 = vmatprep.subr.bf16.mxu1 %v9936_v41  ;;  %v9962_v41 = vpack.c.bf16 %v3602_v8, %v3594_v38  ;;  %v3574_v38 = vld [vmem:[%s15969_s15 + $0x170] sm:$0xff]  ;;  %v3581_v8 = vld [vmem:[%s15969_s15 + $0x1a8] sm:$0xff] }
0x323c   :  { %v3197_v63 = vpop.f32.mrb[34].mxu1 }
0x323d   :  { %v3124_v0 = vpop.f32.mrb[38].mxu0  ;;  %v9305_v36 = vpop.f32.mrb[35].mxu1 }
0x323e   :  { %v11627_v57 = vpack.i.bf16 %v3197_v63, %v3124_v0  ;;  %v9300_v54 = vpop.f32.mrb[39].mxu0  ;;  %v3641_v63 = vld [vmem:[%s15969_s15 + $0x388] sm:$0xff]  ;;  %v9938_v36 = vpack.c.bf16 %v3632_v29, %v3624_v39  ;;  %v9964_v39 = vpack.c.bf16 %v3619_v61, %v3611_v43  ;;  %v3610_v29 = vld [vmem:[%s15969_s15 + $0x290] sm:$0xff] }
0x323f   :  { %v3649_v0 = vld [vmem:[%s15969_s15 + $0x3c8] sm:$0xff]  ;;  %v3640_v54 = vld [vmem:[%s15969_s15 + $0x380] sm:$0xff] }
0x3240   :  { %11628 = vrot.lane.b32.xlu0 %v11627_v57, %s12004_s26  ;;  %v9940_v57 = vpack.c.bf16 %v3649_v0, %v3641_v63  ;;  %9939 = vmatpush1.bf16.msra.mxu1 %v9938_v36  ;;  %v3618_v63 = vld [vmem:[%s15969_s15 + $0x2d0] sm:$0xff]  ;;  %v3627_v0 = vld [vmem:[%s15969_s15 + $0x318] sm:$0xff]  ;;  %v3589_v61 = vld [vmem:[%s15969_s15 + $0x1e8] sm:$0xff] }
0x3241   :  { %v3635_v36 = vld [vmem:[%s15969_s15 + $0x358] sm:$0xff] }
0x3242   :  { %9941 = vmatprep.subr.bf16.mxu1 %v9940_v57  ;;  %v9966_v57 = vpack.c.bf16 %v3618_v63, %v3610_v29  ;;  %v9986_v63 = vpack.c.bf16 %v3572_v37, %v3564_v60  ;;  %v3630_v60 = vld [vmem:[%s15969_s15 + $0x330] sm:$0xff] }
0x3243   :  { %v3638_v37 = vld [vmem:[%s15969_s15 + $0x370] sm:$0xff] }
0x3250   :  { %v3334_v46 = vpop.f32.mrb[40].mxu0 }
0x3251   :  { %v9310_v47 = vpop.f32.mrb[41].mxu0 }
0x3255   :  { %v3407_v10 = vpop.f32.mrb[36].mxu1 }
0x3256   :  { %v11632_v55 = vpack.i.bf16 %v3407_v10, %v3334_v46  ;;  %v9315_v52 = vpop.f32.mrb[37].mxu1  ;;  %v3648_v46 = vld [vmem:[%s15969_s15 + $0x3c0] sm:$0xff] }
0x3257   :  { %v9942_v47 = vpack.c.bf16 %v3648_v46, %v3640_v54  ;;  %v9968_v54 = vpack.c.bf16 %v3635_v36, %v3627_v0  ;;  %v3626_v46 = vld [vmem:[%s15969_s15 + $0x310] sm:$0xff]  ;;  %v3580_v36 = vld [vmem:[%s15969_s15 + $0x1a0] sm:$0xff] }
0x3258   :  { %11633 = vrot.lane.b32.xlu1 %v11632_v55, %s12004_s26 }
0x3259   :  { %9943 = vmatpush1.bf16.msra.mxu1 %v9942_v47  ;;  %v3634_v47 = vld [vmem:[%s15969_s15 + $0x350] sm:$0xff] }
0x32b2   :  { %v11629_v6 = vpop.permute.xlu0 %11628 }
0x32b3   :  { %v11631_v10 = vunpack.i.h.bf16 %v11629_v6  ;;  %v11630_v55 = vunpack.i.l.bf16 %v11629_v6  ;;  %v3643_v6 = vld [vmem:[%s15969_s15 + $0x398] sm:$0xff] }
0x32b5   :  { %v3419_v52 = vsel %vm299_vm4, %v12888_v26, %v11630_v55  ;;  %v3420_v5 = vsel %vm299_vm4, %v12886_v7, %v11631_v10  ;;  %v3651_v10 = vld [vmem:[%s15969_s15 + $0x3d8] sm:$0xff]  ;;  %v9970_v55 = vpack.c.bf16 %v3634_v47, %v3626_v46  ;;  %v3582_v47 = vld [vmem:[%s15969_s15 + $0x1b0] sm:$0xff] }
0x32b6   :  { %v9904_v50 = vpack.c.bf16 %v3420_v5, %v3419_v52  ;;  %v9972_v52 = vpack.c.bf16 %v3651_v10, %v3643_v6  ;;  %v3642_v5 = vld [vmem:[%s15969_s15 + $0x390] sm:$0xff]  ;;  %v3597_v10 = vld [vmem:[%s15969_s15 + $0x228] sm:$0xff] }
0x32b7   :  { %v3590_v6 = vld [vmem:[%s15969_s15 + $0x1f0] sm:$0xff] }
0x32b8   :  { %9905 = vmatprep.subr.bf16.mxu0 %v9904_v50 }
0x32b9   :  { %9907 = vmatpush3.bf16.msra.mxu0 %v9904_v50  ;;  %v3650_v50 = vld [vmem:[%s15969_s15 + $0x3d0] sm:$0xff] }
0x32ca   :  { %v11634_v40 = vpop.permute.xlu1 %11633 }
0x32cb   :  { %v11636_v51 = vunpack.i.h.bf16 %v11634_v40  ;;  %v11635_v12 = vunpack.i.l.bf16 %v11634_v40  ;;  %v9974_v40 = vpack.c.bf16 %v3650_v50, %v3642_v5  ;;  %v3607_v5 = vld [vmem:[%s15969_s15 + $0x278] sm:$0xff] }
0x32cd   :  { %v3429_v26 = vsel %vm299_vm4, %v12892_v9, %v11635_v12  ;;  %v3430_v7 = vsel %vm299_vm4, %v12890_v19, %v11636_v51  ;;  %v3555_v9 = vld [vmem:[%s15969_s15 + $0xd8] sm:$0xff]  ;;  %v2712_v19 = vld [vmem:[%s15968_s4 + $0x8] sm:$0xff] }
0x32ce   :  { %v9908_v44 = vpack.c.bf16 %v3430_v7, %v3429_v26  ;;  %v9948_v45 = vpack.c.bf16 %v3555_v9, %v3547_v18  ;;  %v3533_v51 = vld [vmem:[%s15969_s15 + $0x28] sm:$0xff]  ;;  %v3543_v26 = vld [vmem:[%s15969_s15 + $0x78] sm:$0xff] }
0x32cf   :  { %v3541_v12 = vld [vmem:[%s15969_s15 + $0x68] sm:$0xff]  ;;  %v10008_v7 = vpack.c.bf16 %v3543_v26, %v3535_v14  ;;  %v3598_v26 = vld [vmem:[%s15969_s15 + $0x230] sm:$0xff] }
0x32d0   :  { %9909 = vmatprep.subr.bf16.mxu0 %v9908_v44  ;;  %v9976_v15 = vpack.c.bf16 %v3541_v12, %v3533_v51  ;;  %v3549_v18 = vld [vmem:[%s15969_s15 + $0xa8] sm:$0xff]  ;;  %v3596_v51 = vld [vmem:[%s15969_s15 + $0x220] sm:$0xff] }
0x32d1   :  { %9911 = vmatpush3.bf16.msra.mxu0 %v9908_v44  ;;  %v3532_v44 = vld [vmem:[%s15969_s15 + $0x20] sm:$0xff]  ;;  %v3557_v9 = vld [vmem:[%s15969_s15 + $0xe8] sm:$0xff] }
0x32d2   :  { %9945 = vmatprep.subr.bf16.mxu0 %v9944_v17  ;;  %9977 = vmatprep.subr.bf16.mxu1 %v9976_v15  ;;  %v3540_v17 = vld [vmem:[%s15969_s15 + $0x60] sm:$0xff]  ;;  %v9980_v1 = vpack.c.bf16 %v3557_v9, %v3549_v18 }
0x32d3   :  { %v3604_v12 = vld [vmem:[%s15969_s15 + $0x260] sm:$0xff] }
0x32d4   :  { %9325 = vmatmul.mubr.msk.f32.vlgmr.msra.gmra.mrb[42].mxu0 %vm195_vm1, %v2712_v19  ;;  %v3551_v19 = vld [vmem:[%s15969_s15 + $0xb8] sm:$0xff]  ;;  %v9994_v18 = vpack.c.bf16 %v3604_v12, %v3596_v51  ;;  %v3658_v51 = vld [vmem:[%s15970_s16 + $0x10] sm:$0xff] }
0x32d5   :  { %9327 = vmatprep.mubr.msk.f32.mxu0 %vm195_vm1, %v2713_v13  ;;  %9947 = vmatpush1.bf16.msra.mxu0 %v9946_v53  ;;  %v3559_v53 = vld [vmem:[%s15969_s15 + $0xf8] sm:$0xff]  ;;  %v9978_v13 = vpack.c.bf16 %v3540_v17, %v3532_v44  ;;  %v3613_v44 = vld [vmem:[%s15969_s15 + $0x2a8] sm:$0xff]  ;;  %v3662_v12 = vld [vmem:[%s15970_s16 + $0x30] sm:$0xff] }
0x32d6   :  { %9949 = vmatprep.subr.bf16.mxu0 %v9948_v45  ;;  %v10010_v45 = vpack.c.bf16 %v3542_v62, %v3534_v48  ;;  %v10012_v22 = vpack.c.bf16 %v3559_v53, %v3551_v19  ;;  %v3621_v17 = vld [vmem:[%s15969_s15 + $0x2e8] sm:$0xff]  ;;  %v3615_v48 = vld [vmem:[%s15969_s15 + $0x2b8] sm:$0xff]  ;;  %v3612_v19 = vld [vmem:[%s15969_s15 + $0x2a0] sm:$0xff] }
0x32d7   :  { %v3623_v62 = vld [vmem:[%s15969_s15 + $0x2f8] sm:$0xff]  ;;  %v3620_v53 = vld [vmem:[%s15969_s15 + $0x2e0] sm:$0xff] }
0x32d8   :  { %9328 = vmatmul.mubr.msk.f32.gmra.mrb[44].mxu0 %vm195_vm1, %v2714_v28  ;;  %v3558_v28 = vld [vmem:[%s15969_s15 + $0xf0] sm:$0xff] }
0x32d9   :  { %9951 = vmatpush1.bf16.msra.mxu0 %v9950_v2  ;;  %3979 = vmatprep.mubr.f32.mxu0 %v15991_v3  ;;  %v3565_v2 = vld [vmem:[%s15969_s15 + $0x128] sm:$0xff]  ;;  %v10014_v27 = vpack.c.bf16 %v3558_v28, %v3550_v56 }
0x32da   :  { %9953 = vmatprep.subr.bf16.mxu0 %v9952_v11  ;;  %v9984_v58 = vpack.c.bf16 %v3573_v16, %v3565_v2  ;;  %v3629_v56 = vld [vmem:[%s15969_s15 + $0x328] sm:$0xff]  ;;  %v3631_v2 = vld [vmem:[%s15969_s15 + $0x338] sm:$0xff] }
0x32db   :  { %v3637_v28 = vld [vmem:[%s15969_s15 + $0x368] sm:$0xff] }
0x32dd   :  { %9955 = vmatpush1.bf16.msra.mxu0 %v9954_v34  ;;  %v3575_v34 = vld [vmem:[%s15969_s15 + $0x178] sm:$0xff] }
0x32de   :  { %9957 = vmatprep.subr.bf16.mxu0 %v9956_v23  ;;  %v9982_v23 = vpack.c.bf16 %v3556_v49, %v3548_v21  ;;  %v3614_v21 = vld [vmem:[%s15969_s15 + $0x2b0] sm:$0xff] }
0x32df   :  { %v3622_v49 = vld [vmem:[%s15969_s15 + $0x2f0] sm:$0xff] }
0x32e0   :  { %v10030_v16 = vpack.c.bf16 %v3622_v49, %v3614_v21  ;;  %v3675_v21 = vld [vmem:[%s15970_s16 + $0x98] sm:$0xff] }
0x32e1   :  { %9959 = vmatpush1.bf16.msra.mxu0 %v9958_v59  ;;  %v10016_v59 = vpack.c.bf16 %v3575_v34, %v3567_v33  ;;  %v3628_v33 = vld [vmem:[%s15969_s15 + $0x320] sm:$0xff]  ;;  %v3679_v49 = vld [vmem:[%s15970_s16 + $0xb8] sm:$0xff] }
0x32e2   :  { %9961 = vmatprep.subr.bf16.mxu0 %v9960_v20  ;;  %v3566_v20 = vld [vmem:[%s15969_s15 + $0x130] sm:$0xff]  ;;  %v3636_v34 = vld [vmem:[%s15969_s15 + $0x360] sm:$0xff] }
0x32e3   :  { %v10018_v0 = vpack.c.bf16 %v3574_v38, %v3566_v20  ;;  %v3647_v20 = vld [vmem:[%s15969_s15 + $0x3b8] sm:$0xff] }
0x32e4   :  { %v3655_v38 = vld [vmem:[%s15969_s15 + $0x3f8] sm:$0xff] }
0x32e5   :  { %9963 = vmatpush1.bf16.msra.mxu0 %v9962_v41  ;;  %v3583_v41 = vld [vmem:[%s15969_s15 + $0x1b8] sm:$0xff] }
0x32e6   :  { %9965 = vmatprep.subr.bf16.mxu0 %v9964_v39  ;;  %v3591_v39 = vld [vmem:[%s15969_s15 + $0x1f8] sm:$0xff] }
0x32e7   :  { %v10020_v46 = vpack.c.bf16 %v3591_v39, %v3583_v41  ;;  %v3644_v41 = vld [vmem:[%s15969_s15 + $0x3a0] sm:$0xff] }
0x32e8   :  { %v3652_v39 = vld [vmem:[%s15969_s15 + $0x3e0] sm:$0xff] }
0x32e9   :  { %9967 = vmatpush1.bf16.msra.mxu0 %v9966_v57  ;;  %v3588_v57 = vld [vmem:[%s15969_s15 + $0x1e0] sm:$0xff] }
0x32ea   :  { %9969 = vmatprep.subr.bf16.mxu0 %v9968_v54  ;;  %v9988_v54 = vpack.c.bf16 %v3589_v61, %v3581_v8  ;;  %v9990_v50 = vpack.c.bf16 %v3588_v57, %v3580_v36  ;;  %v10002_v8 = vpack.c.bf16 %v3636_v34, %v3628_v33  ;;  %v10034_v61 = vpack.c.bf16 %v3638_v37, %v3630_v60  ;;  %v3646_v36 = vld [vmem:[%s15969_s15 + $0x3b0] sm:$0xff]  ;;  %v3681_v34 = vld [vmem:[%s15970_s16 + $0xc8] sm:$0xff]  ;;  %v3687_v60 = vld [vmem:[%s15970_s16 + $0xf8] sm:$0xff] }
0x32eb   :  { %v3654_v57 = vld [vmem:[%s15969_s15 + $0x3f0] sm:$0xff]  ;;  %v13470_v33 = vpack.c.bf16 %v3679_v49, %v3675_v21 }
0x32ed   :  { %9971 = vmatpush1.bf16.msra.mxu0 %v9970_v55  ;;  %v3605_v55 = vld [vmem:[%s15969_s15 + $0x268] sm:$0xff] }
0x32ee   :  { %9973 = vmatprep.subr.bf16.mxu0 %v9972_v52  ;;  %v3599_v52 = vld [vmem:[%s15969_s15 + $0x238] sm:$0xff]  ;;  %v9992_v14 = vpack.c.bf16 %v3605_v55, %v3597_v10  ;;  %v10006_v10 = vpack.c.bf16 %v3652_v39, %v3644_v41  ;;  %v10038_v55 = vpack.c.bf16 %v3654_v57, %v3646_v36  ;;  %v3693_v39 = vld [vmem:[%s15970_s16 + $0x128] sm:$0xff] }
0x32ef   :  { %v10024_v15 = vpack.c.bf16 %v3607_v5, %v3599_v52  ;;  %v3656_v52 = vld [vmem:[%s15970_s16] sm:$0xff] }
0x32f1   :  { %9975 = vmatpush1.bf16.msra.mxu0 %v9974_v40  ;;  %v10022_v40 = vpack.c.bf16 %v3590_v6, %v3582_v47  ;;  %v3659_v47 = vld [vmem:[%s15970_s16 + $0x18] sm:$0xff] }
0x32f2   :  { %10009 = vmatprep.subr.bf16.mxu0 %v10008_v7  ;;  %v3606_v7 = vld [vmem:[%s15969_s15 + $0x270] sm:$0xff]  ;;  %v3663_v6 = vld [vmem:[%s15970_s16 + $0x38] sm:$0xff] }
0x32f3   :  { %v10026_v9 = vpack.c.bf16 %v3606_v7, %v3598_v26  ;;  %v3667_v26 = vld [vmem:[%s15970_s16 + $0x58] sm:$0xff] }
0x32f4   :  { %v3671_v7 = vld [vmem:[%s15970_s16 + $0x78] sm:$0xff] }
0x33a7   :  { %v13196_v42 = vpop.f32.mrb[42].mxu0 }
0x33a8   :  { %v13207_v11 = vpop.f32.mrb[43].mxu0 }
0x33a9   :  { %3891 = vmatmul.mubr.f32.vlgmr.msra.gmra.mrb[38].mxu1 %v13207_v11  ;;  %3980 = vmatmul.mubr.f32.vlgmr.msra.gmra.mrb[46].mxu0 %v13207_v11 }
0x33aa   :  { %9979 = vmatpush1.bf16.msra.mxu1 %v9978_v13  ;;  %10011 = vmatpush1.bf16.msra.mxu0 %v10010_v45  ;;  %v9996_v13 = vpack.c.bf16 %v3621_v17, %v3613_v44  ;;  %v10028_v45 = vpack.c.bf16 %v3623_v62, %v3615_v48  ;;  %v13412_v17 = vpack.c.bf16 %v3662_v12, %v3658_v51  ;;  %v3664_v48 = vld [vmem:[%s15970_s16 + $0x40] sm:$0xff]  ;;  %v3703_v51 = vld [vmem:[%s15970_s16 + $0x178] sm:$0xff] }
0x33ab   :  { %3896 = vmatprep.mubr.f32.mxu1 %v15991_v3  ;;  %3985 = vmatprep.mubr.f32.mxu0 %v15991_v3  ;;  %v13237_v43 = vpop.f32.mrb[44].mxu0  ;;  %v3668_v62 = vld [vmem:[%s15970_s16 + $0x60] sm:$0xff] }
0x33ac   :  { %9981 = vmatprep.subr.bf16.mxu1 %v9980_v1  ;;  %10013 = vmatprep.subr.bf16.mxu0 %v10012_v22  ;;  %v13248_v29 = vpop.f32.mrb[45].mxu0  ;;  %v3639_v1 = vld [vmem:[%s15969_s15 + $0x378] sm:$0xff]  ;;  %v9998_v22 = vpack.c.bf16 %v3620_v53, %v3612_v19  ;;  %v13430_v53 = vpack.c.bf16 %v3671_v7, %v3667_v26  ;;  %v3700_v26 = vld [vmem:[%s15970_s16 + $0x160] sm:$0xff] }
0x33ad   :  { %3897 = vmatmul.mubr.f32.gmra.mrb[40].mxu1 %v13196_v42  ;;  %3986 = vmatmul.mubr.f32.gmra.mrb[48].mxu0 %v13196_v42 }
0x33ae   :  { %9983 = vmatpush1.bf16.msra.mxu1 %v9982_v23  ;;  %10015 = vmatpush1.bf16.msra.mxu0 %v10014_v27  ;;  %v10000_v23 = vpack.c.bf16 %v3637_v28, %v3629_v56  ;;  %v10032_v27 = vpack.c.bf16 %v3639_v1, %v3631_v2  ;;  %v13448_v56 = vpack.c.bf16 %v3668_v62, %v3664_v48  ;;  %v3676_v2 = vld [vmem:[%s15970_s16 + $0xa0] sm:$0xff]  ;;  %v3674_v1 = vld [vmem:[%s15970_s16 + $0x90] sm:$0xff] }
0x33af   :  { %9985 = vmatprep.subr.bf16.mxu1 %v9984_v58  ;;  %10017 = vmatprep.subr.bf16.mxu0 %v10016_v59  ;;  %v3645_v58 = vld [vmem:[%s15969_s15 + $0x3a8] sm:$0xff]  ;;  %v3698_v48 = vld [vmem:[%s15970_s16 + $0x150] sm:$0xff] }
0x33b0   :  { %3902 = vmatprep.mubr.f32.mxu1 %v15991_v3  ;;  %3991 = vmatprep.mubr.f32.mxu0 %v15991_v3  ;;  %v3653_v59 = vld [vmem:[%s15969_s15 + $0x3e8] sm:$0xff]  ;;  %v3702_v62 = vld [vmem:[%s15970_s16 + $0x170] sm:$0xff] }
0x33b1   :  { %3903 = vmatmul.mubr.f32.gmra.mrb[42].mxu1 %v13248_v29  ;;  %3992 = vmatmul.mubr.f32.gmra.mrb[50].mxu0 %v13248_v29  ;;  %v13608_v49 = vpack.c.bf16 %v3702_v62, %v3698_v48 }
0x33b2   :  { %9987 = vmatpush1.bf16.msra.mxu1 %v9986_v63  ;;  %10019 = vmatpush1.bf16.msra.mxu0 %v10018_v0  ;;  %v10004_v63 = vpack.c.bf16 %v3653_v59, %v3645_v58  ;;  %v10036_v0 = vpack.c.bf16 %v3655_v38, %v3647_v20  ;;  %v3684_v59 = vld [vmem:[%s15970_s16 + $0xe0] sm:$0xff]  ;;  %v3682_v20 = vld [vmem:[%s15970_s16 + $0xd0] sm:$0xff] }
0x33b3   :  { %9989 = vmatprep.subr.bf16.mxu1 %v9988_v54  ;;  %10021 = vmatprep.subr.bf16.mxu0 %v10020_v46  ;;  %v3657_v54 = vld [vmem:[%s15970_s16 + $0x8] sm:$0xff]  ;;  %v3686_v38 = vld [vmem:[%s15970_s16 + $0xf0] sm:$0xff]  ;;  %16192 = vst [vmem:[#allocation11_spill] sm:$0xff] %v13608_v49 }
0x33b4   :  { %3908 = vmatprep.mubr.f32.mxu1 %v15991_v3  ;;  %3997 = vmatprep.mubr.f32.mxu0 %v15991_v3  ;;  %v3661_v46 = vld [vmem:[%s15970_s16 + $0x28] sm:$0xff]  ;;  %v13530_v57 = vpack.c.bf16 %v3686_v38, %v3682_v20 }
0x33b5   :  { %3909 = vmatmul.mubr.f32.gmra.mrb[44].mxu1 %v13237_v43  ;;  %3998 = vmatmul.mubr.f32.gmra.mrb[52].mxu0 %v13237_v43  ;;  %v13385_v5 = vpack.c.bf16 %v3661_v46, %v3657_v54  ;;  %v3688_v54 = vld [vmem:[%s15970_s16 + $0x100] sm:$0xff] }
0x33b6   :  { %9991 = vmatpush1.bf16.msra.mxu1 %v9990_v50  ;;  %10023 = vmatpush1.bf16.msra.mxu0 %v10022_v40  ;;  %v13387_v50 = vpack.c.bf16 %v3663_v6, %v3659_v47  ;;  %v3660_v40 = vld [vmem:[%s15970_s16 + $0x20] sm:$0xff]  ;;  %v3690_v6 = vld [vmem:[%s15970_s16 + $0x110] sm:$0xff] }
0x33b7   :  { %9993 = vmatprep.subr.bf16.mxu1 %v9992_v14  ;;  %10025 = vmatprep.subr.bf16.mxu0 %v10024_v15  ;;  %16188 = vst [vmem:[#allocation7_spill] sm:$0xff] %v13385_v5  ;;  %v3665_v14 = vld [vmem:[%s15970_s16 + $0x48] sm:$0xff]  ;;  %v13410_v44 = vpack.c.bf16 %v3660_v40, %v3656_v52  ;;  %v3692_v46 = vld [vmem:[%s15970_s16 + $0x120] sm:$0xff]  ;;  %v3699_v40 = vld [vmem:[%s15970_s16 + $0x158] sm:$0xff] }
0x33b8   :  { %4068 = vmatprep.mubr.f32.mxu1 %v15991_v3  ;;  %4157 = vmatprep.mubr.f32.mxu0 %v15991_v3  ;;  %16189 = vst [vmem:[#allocation8_spill] sm:$0xff] %v13387_v50  ;;  %v3669_v15 = vld [vmem:[%s15970_s16 + $0x68] sm:$0xff]  ;;  %v13568_v12 = vpack.c.bf16 %v3692_v46, %v3688_v54  ;;  %v13582_v7 = vpack.c.bf16 %v3703_v51, %v3699_v40  ;;  %v3714_v54 = vld [vmem:[%s15970_s16 + $0x1d0] sm:$0xff] }
0x33b9   :  { %v13428_v19 = vpack.c.bf16 %v3669_v15, %v3665_v14  ;;  %v3701_v52 = vld [vmem:[%s15970_s16 + $0x168] sm:$0xff]  ;;  %v3696_v15 = vld [vmem:[%s15970_s16 + $0x140] sm:$0xff]  ;;  %v3718_v46 = vld [vmem:[%s15970_s16 + $0x1f0] sm:$0xff] }
0x33ba   :  { %9995 = vmatpush1.bf16.msra.mxu1 %v9994_v18  ;;  %10027 = vmatpush1.bf16.msra.mxu0 %v10026_v9  ;;  %v3666_v18 = vld [vmem:[%s15970_s16 + $0x50] sm:$0xff]  ;;  %16190 = vst [vmem:[#allocation9_spill] sm:$0xff] %v13582_v7  ;;  %v13606_v21 = vpack.c.bf16 %v3700_v26, %v3696_v15  ;;  %v13680_v51 = vpack.c.bf16 %v3718_v46, %v3714_v54  ;;  %v3720_v15 = vld [vmem:[%s15970_s16 + $0x200] sm:$0xff]  ;;  %v3737_v54 = vld [vmem:[%s15970_s16 + $0x288] sm:$0xff] }
0x33bb   :  { %9997 = vmatprep.subr.bf16.mxu1 %v9996_v13  ;;  %10029 = vmatprep.subr.bf16.mxu0 %v10028_v45  ;;  %v3670_v9 = vld [vmem:[%s15970_s16 + $0x70] sm:$0xff]  ;;  %v3673_v13 = vld [vmem:[%s15970_s16 + $0x88] sm:$0xff]  ;;  %v3724_v26 = vld [vmem:[%s15970_s16 + $0x220] sm:$0xff] }
0x33bc   :  { %v3677_v45 = vld [vmem:[%s15970_s16 + $0xa8] sm:$0xff]  ;;  %v13450_v28 = vpack.c.bf16 %v3670_v9, %v3666_v18  ;;  %16191 = vst [vmem:[#allocation10_spill] sm:$0xff] %v13606_v21  ;;  %16200 = vst [vmem:[#allocation19_spill] sm:$0xff] %v13680_v51 }
0x33bd   :  { %v3705_v18 = vld [vmem:[%s15970_s16 + $0x188] sm:$0xff] }
0x33be   :  { %9999 = vmatpush1.bf16.msra.mxu1 %v9998_v22  ;;  %10031 = vmatpush1.bf16.msra.mxu0 %v10030_v16  ;;  %v3678_v22 = vld [vmem:[%s15970_s16 + $0xb0] sm:$0xff]  ;;  %v13468_v16 = vpack.c.bf16 %v3677_v45, %v3673_v13  ;;  %v3709_v9 = vld [vmem:[%s15970_s16 + $0x1a8] sm:$0xff]  ;;  %v3707_v13 = vld [vmem:[%s15970_s16 + $0x198] sm:$0xff] }
0x33bf   :  { %10001 = vmatprep.subr.bf16.mxu1 %v10000_v23  ;;  %10033 = vmatprep.subr.bf16.mxu0 %v10032_v27  ;;  %v3685_v23 = vld [vmem:[%s15970_s16 + $0xe8] sm:$0xff]  ;;  %v3683_v27 = vld [vmem:[%s15970_s16 + $0xd8] sm:$0xff]  ;;  %v13490_v58 = vpack.c.bf16 %v3678_v22, %v3674_v1  ;;  %v13618_v1 = vpack.c.bf16 %v3709_v9, %v3705_v18  ;;  %v3722_v18 = vld [vmem:[%s15970_s16 + $0x210] sm:$0xff] }
0x33c0   :  { %v13513_v41 = vpack.c.bf16 %v3687_v60, %v3683_v27  ;;  %v3711_v45 = vld [vmem:[%s15970_s16 + $0x1b8] sm:$0xff]  ;;  %v3713_v27 = vld [vmem:[%s15970_s16 + $0x1c8] sm:$0xff]  ;;  %v3726_v9 = vld [vmem:[%s15970_s16 + $0x230] sm:$0xff] }
0x33c1   :  { %16193 = vst [vmem:[#allocation12_spill] sm:$0xff] %v13618_v1  ;;  %v13620_v22 = vpack.c.bf16 %v3711_v45, %v3707_v13  ;;  %v3717_v60 = vld [vmem:[%s15970_s16 + $0x1e8] sm:$0xff] }
0x33c2   :  { %10003 = vmatpush1.bf16.msra.mxu1 %v10002_v8  ;;  %10035 = vmatpush1.bf16.msra.mxu0 %v10034_v61  ;;  %v3689_v8 = vld [vmem:[%s15970_s16 + $0x108] sm:$0xff]  ;;  %v13511_v61 = vpack.c.bf16 %v3685_v23, %v3681_v34  ;;  %v3706_v34 = vld [vmem:[%s15970_s16 + $0x190] sm:$0xff] }
0x33c3   :  { %10005 = vmatprep.subr.bf16.mxu1 %v10004_v63  ;;  %10037 = vmatprep.subr.bf16.mxu0 %v10036_v0  ;;  %v3691_v63 = vld [vmem:[%s15970_s16 + $0x118] sm:$0xff]  ;;  %16194 = vst [vmem:[#allocation13_spill] sm:$0xff] %v13620_v22  ;;  %v3710_v23 = vld [vmem:[%s15970_s16 + $0x1b0] sm:$0xff]  ;;  %v3729_v13 = vld [vmem:[%s15970_s16 + $0x248] sm:$0xff] }
0x33c4   :  { %v3695_v0 = vld [vmem:[%s15970_s16 + $0x138] sm:$0xff]  ;;  %v13644_v38 = vpack.c.bf16 %v3710_v23, %v3706_v34  ;;  %v3733_v45 = vld [vmem:[%s15970_s16 + $0x268] sm:$0xff]  ;;  %v13714_v34 = vpack.c.bf16 %v3724_v26, %v3720_v15  ;;  %v13716_v23 = vpack.c.bf16 %v3726_v9, %v3722_v18  ;;  %v3736_v15 = vld [vmem:[%s15970_s16 + $0x280] sm:$0xff] }
0x33c5   :  { %v13542_v47 = vpack.c.bf16 %v3695_v0, %v3691_v63  ;;  %v13654_v63 = vpack.c.bf16 %v3717_v60, %v3713_v27  ;;  %v3728_v27 = vld [vmem:[%s15970_s16 + $0x240] sm:$0xff]  ;;  %v3741_v46 = vld [vmem:[%s15970_s16 + $0x2a8] sm:$0xff] }
0x33c6   :  { %10007 = vmatpush1.bf16.msra.mxu1 %v10006_v10  ;;  %10039 = vmatpush1.bf16.msra.mxu0 %v10038_v55  ;;  %v3694_v10 = vld [vmem:[%s15970_s16 + $0x130] sm:$0xff]  ;;  %v3697_v55 = vld [vmem:[%s15970_s16 + $0x148] sm:$0xff]  ;;  %16196 = vst [vmem:[#allocation15_spill] sm:$0xff] %v13644_v38  ;;  %16203 = vst [vmem:[#allocation22_spill] sm:$0xff] %v13714_v34  ;;  %v13762_v18 = vpack.c.bf16 %v3741_v46, %v3737_v54 }
0x33c7   :  { %10041 = vmatprep.subr.bf16.mxu1 %v13385_v5  ;;  %10105 = vmatprep.subr.bf16.mxu0 %v13387_v50  ;;  %v13570_v14 = vpack.c.bf16 %v3694_v10, %v3690_v6  ;;  %16197 = vst [vmem:[#allocation16_spill] sm:$0xff] %v13654_v63  ;;  %v3721_v6 = vld [vmem:[%s15970_s16 + $0x208] sm:$0xff]  ;;  %16204 = vst [vmem:[#allocation23_spill] sm:$0xff] %v13716_v23  ;;  %v3732_v60 = vld [vmem:[%s15970_s16 + $0x260] sm:$0xff] }
0x33c8   :  { %v3725_v10 = vld [vmem:[%s15970_s16 + $0x228] sm:$0xff]  ;;  %v3740_v26 = vld [vmem:[%s15970_s16 + $0x2a0] sm:$0xff]  ;;  %16209 = vst [vmem:[#allocation28_spill] sm:$0xff] %v13762_v18 }
0x33c9   :  { %4069 = vmatmul.mubr.f32.vlgmr.msra.gmra.mrb[46].mxu1 %v13207_v11  ;;  %4158 = vmatmul.mubr.f32.vlgmr.msra.gmra.mrb[54].mxu0 %v13207_v11  ;;  %v3672_v11 = vld [vmem:[%s15970_s16 + $0x80] sm:$0xff]  ;;  %v13690_v48 = vpack.c.bf16 %v3725_v10, %v3721_v6  ;;  %v3739_v6 = vld [vmem:[%s15970_s16 + $0x298] sm:$0xff] }
0x33ca   :  { %10043 = vmatpush1.bf16.msra.mxu1 %v13410_v44  ;;  %10107 = vmatpush1.bf16.msra.mxu0 %v13412_v17  ;;  %v13488_v37 = vpack.c.bf16 %v3676_v2, %v3672_v11  ;;  %v3704_v11 = vld [vmem:[%s15970_s16 + $0x180] sm:$0xff]  ;;  %v3743_v10 = vld [vmem:[%s15970_s16 + $0x2b8] sm:$0xff] }
0x33cb   :  { %4074 = vmatprep.mubr.f32.mxu1 %v15991_v3  ;;  %4163 = vmatprep.mubr.f32.mxu0 %v15991_v3  ;;  %v3708_v2 = vld [vmem:[%s15970_s16 + $0x1a0] sm:$0xff]  ;;  %16201 = vst [vmem:[#allocation20_spill] sm:$0xff] %v13690_v48  ;;  %v13764_v9 = vpack.c.bf16 %v3743_v10, %v3739_v6 }
0x33cc   :  { %10045 = vmatprep.subr.bf16.mxu1 %v13428_v19  ;;  %10109 = vmatprep.subr.bf16.mxu0 %v13430_v53  ;;  %v13642_v20 = vpack.c.bf16 %v3708_v2, %v3704_v11  ;;  %v3731_v11 = vld [vmem:[%s15970_s16 + $0x258] sm:$0xff]  ;;  %v3744_v54 = vld [vmem:[%s15970_s16 + $0x2c0] sm:$0xff] }
0x33cd   :  { %4075 = vmatmul.mubr.f32.gmra.mrb[48].mxu1 %v13196_v42  ;;  %4164 = vmatmul.mubr.f32.gmra.mrb[56].mxu0 %v13196_v42  ;;  %v3680_v42 = vld [vmem:[%s15970_s16 + $0xc0] sm:$0xff]  ;;  %v3735_v2 = vld [vmem:[%s15970_s16 + $0x278] sm:$0xff]  ;;  %16210 = vst [vmem:[#allocation29_spill] sm:$0xff] %v13764_v9 }
0x33ce   :  { %10047 = vmatpush1.bf16.msra.mxu1 %v13448_v56  ;;  %10111 = vmatpush1.bf16.msra.mxu0 %v13450_v28  ;;  %v13528_v36 = vpack.c.bf16 %v3684_v59, %v3680_v42  ;;  %v3715_v42 = vld [vmem:[%s15970_s16 + $0x1d8] sm:$0xff]  ;;  %16195 = vst [vmem:[#allocation14_spill] sm:$0xff] %v13642_v20  ;;  %v3748_v46 = vld [vmem:[%s15970_s16 + $0x2e0] sm:$0xff] }
0x33cf   :  { %4080 = vmatprep.mubr.f32.mxu1 %v15991_v3  ;;  %4169 = vmatprep.mubr.f32.mxu0 %v15991_v3  ;;  %v3719_v59 = vld [vmem:[%s15970_s16 + $0x1f8] sm:$0xff] }
0x33d0   :  { %10049 = vmatprep.subr.bf16.mxu1 %v13468_v16  ;;  %10113 = vmatprep.subr.bf16.mxu0 %v13470_v33  ;;  %v13656_v0 = vpack.c.bf16 %v3719_v59, %v3715_v42  ;;  %v13726_v42 = vpack.c.bf16 %v3733_v45, %v3729_v13  ;;  %v13728_v59 = vpack.c.bf16 %v3735_v2, %v3731_v11  ;;  %v3738_v13 = vld [vmem:[%s15970_s16 + $0x290] sm:$0xff]  ;;  %v3745_v11 = vld [vmem:[%s15970_s16 + $0x2c8] sm:$0xff] }
0x33d1   :  { %4081 = vmatmul.mubr.f32.gmra.mrb[50].mxu1 %v13248_v29  ;;  %4170 = vmatmul.mubr.f32.gmra.mrb[58].mxu0 %v13248_v29  ;;  %v13540_v29 = vpack.c.bf16 %v3693_v39, %v3689_v8  ;;  %v3712_v8 = vld [vmem:[%s15970_s16 + $0x1c0] sm:$0xff]  ;;  %v3742_v45 = vld [vmem:[%s15970_s16 + $0x2b0] sm:$0xff]  ;;  %v3749_v2 = vld [vmem:[%s15970_s16 + $0x2e8] sm:$0xff] }
0x33d2   :  { %10051 = vmatpush1.bf16.msra.mxu1 %v13488_v37  ;;  %10115 = vmatpush1.bf16.msra.mxu0 %v13490_v58  ;;  %v3716_v39 = vld [vmem:[%s15970_s16 + $0x1e0] sm:$0xff]  ;;  %16198 = vst [vmem:[#allocation17_spill] sm:$0xff] %v13656_v0  ;;  %16205 = vst [vmem:[#allocation24_spill] sm:$0xff] %v13726_v42  ;;  %v13798_v6 = vpack.c.bf16 %v3749_v2, %v3745_v11  ;;  %v3755_v11 = vld [vmem:[%s15970_s16 + $0x318] sm:$0xff] }
0x33d3   :  { %4086 = vmatprep.mubr.f32.mxu1 %v15991_v3  ;;  %4175 = vmatprep.mubr.f32.mxu0 %v15991_v3  ;;  %v13678_v40 = vpack.c.bf16 %v3716_v39, %v3712_v8  ;;  %16206 = vst [vmem:[#allocation25_spill] sm:$0xff] %v13728_v59  ;;  %v3730_v8 = vld [vmem:[%s15970_s16 + $0x250] sm:$0xff]  ;;  %v3759_v2 = vld [vmem:[%s15970_s16 + $0x338] sm:$0xff] }
0x33d4   :  { %10053 = vmatprep.subr.bf16.mxu1 %v13511_v61  ;;  %10117 = vmatprep.subr.bf16.mxu0 %v13513_v41  ;;  %v3734_v39 = vld [vmem:[%s15970_s16 + $0x270] sm:$0xff]  ;;  %16213 = vst [vmem:[#allocation32_spill] sm:$0xff] %v13798_v6  ;;  %v13836_v24 = vpack.c.bf16 %v3759_v2, %v3755_v11  ;;  %v13858_v11 = vpack.c.bf16 %v3756_v4, %v3752_v30 }
0x33d5   :  { %4087 = vmatmul.mubr.f32.gmra.mrb[52].mxu1 %v13237_v43  ;;  %4176 = vmatmul.mubr.f32.gmra.mrb[60].mxu0 %v13237_v43  ;;  %v13580_v43 = vpack.c.bf16 %v3701_v52, %v3697_v55  ;;  %v3723_v55 = vld [vmem:[%s15970_s16 + $0x218] sm:$0xff]  ;;  %16199 = vst [vmem:[#allocation18_spill] sm:$0xff] %v13678_v40  ;;  %v3762_v4 = vld [vmem:[%s15970_s16 + $0x350] sm:$0xff] }
0x33d6   :  { %10055 = vmatpush1.bf16.msra.mxu1 %v13528_v36  ;;  %10119 = vmatpush1.bf16.msra.mxu0 %v13530_v57  ;;  %v3727_v52 = vld [vmem:[%s15970_s16 + $0x238] sm:$0xff]  ;;  %16218 = vst [vmem:[#allocation37_spill] sm:$0xff] %v13836_v24  ;;  %16219 = vst [vmem:[#allocation38_spill] sm:$0xff] %v13858_v11  ;;  %v3766_v30 = vld [vmem:[%s15970_s16 + $0x370] sm:$0xff] }
0x33d7   :  { %10057 = vmatprep.subr.bf16.mxu1 %v13540_v29  ;;  %10121 = vmatprep.subr.bf16.mxu0 %v13542_v47  ;;  %v13692_v62 = vpack.c.bf16 %v3727_v52, %v3723_v55  ;;  %v13750_v55 = vpack.c.bf16 %v3732_v60, %v3728_v27  ;;  %v13752_v52 = vpack.c.bf16 %v3734_v39, %v3730_v8  ;;  %v3747_v27 = vld [vmem:[%s15970_s16 + $0x2d8] sm:$0xff] }
0x33d8   :  { %4250 = vmatprep.mubr.f32.mxu1 %v15991_v3  ;;  %4321 = vmatprep.mubr.f32.mxu0 %v15991_v3  ;;  %v3751_v60 = vld [vmem:[%s15970_s16 + $0x2f8] sm:$0xff]  ;;  %v13786_v8 = vpack.c.bf16 %v3740_v26, %v3736_v15  ;;  %v13788_v39 = vpack.c.bf16 %v3742_v45, %v3738_v13  ;;  %v3746_v15 = vld [vmem:[%s15970_s16 + $0x2d0] sm:$0xff]  ;;  %v3753_v13 = vld [vmem:[%s15970_s16 + $0x308] sm:$0xff] }
0x33d9   :  { %16202 = vst [vmem:[#allocation21_spill] sm:$0xff] %v13692_v62  ;;  %16207 = vst [vmem:[#allocation26_spill] sm:$0xff] %v13750_v55  ;;  %v13800_v10 = vpack.c.bf16 %v3751_v60, %v3747_v27  ;;  %v3750_v26 = vld [vmem:[%s15970_s16 + $0x2f0] sm:$0xff]  ;;  %v3757_v45 = vld [vmem:[%s15970_s16 + $0x328] sm:$0xff]  ;;  %v13822_v27 = vpack.c.bf16 %v3748_v46, %v3744_v54 }
0x33da   :  { %10059 = vmatpush1.bf16.msra.mxu1 %v13568_v12  ;;  %10123 = vmatpush1.bf16.msra.mxu0 %v13570_v14  ;;  %16208 = vst [vmem:[#allocation27_spill] sm:$0xff] %v13752_v52  ;;  %16211 = vst [vmem:[#allocation30_spill] sm:$0xff] %v13786_v8  ;;  %v13824_v60 = vpack.c.bf16 %v3750_v26, %v3746_v15  ;;  %v13834_v3 = vpack.c.bf16 %v3757_v45, %v3753_v13  ;;  %v3754_v54 = vld [vmem:[%s15970_s16 + $0x310] sm:$0xff]  ;;  %v3761_v15 = vld [vmem:[%s15970_s16 + $0x348] sm:$0xff] }
0x33db   :  { %10061 = vmatprep.subr.bf16.mxu1 %v13580_v43  ;;  %10125 = vmatprep.subr.bf16.mxu0 %v13582_v7  ;;  %16212 = vst [vmem:[#allocation31_spill] sm:$0xff] %v13788_v39  ;;  %16214 = vst [vmem:[#allocation33_spill] sm:$0xff] %v13800_v10  ;;  %v3758_v46 = vld [vmem:[%s15970_s16 + $0x330] sm:$0xff]  ;;  %v3765_v26 = vld [vmem:[%s15970_s16 + $0x368] sm:$0xff] }
0x33dc   :  { %16215 = vst [vmem:[#allocation34_spill] sm:$0xff] %v13822_v27  ;;  %16216 = vst [vmem:[#allocation35_spill] sm:$0xff] %v13824_v60  ;;  %v3763_v13 = vld [vmem:[%s15970_s16 + $0x358] sm:$0xff]  ;;  %v13860_v2 = vpack.c.bf16 %v3758_v46, %v3754_v54  ;;  %v13870_v35 = vpack.c.bf16 %v3765_v26, %v3761_v15  ;;  %v3769_v54 = vld [vmem:[%s15970_s16 + $0x388] sm:$0xff] }
0x33dd   :  { %16217 = vst [vmem:[#allocation36_spill] sm:$0xff] %v13834_v3  ;;  %v3767_v45 = vld [vmem:[%s15970_s16 + $0x378] sm:$0xff]  ;;  %v3773_v46 = vld [vmem:[%s15970_s16 + $0x3a8] sm:$0xff] }
0x33de   :  { %10063 = vmatpush1.bf16.msra.mxu1 %v13606_v21  ;;  %10127 = vmatpush1.bf16.msra.mxu0 %v13608_v49  ;;  %16220 = vst [vmem:[#allocation39_spill] sm:$0xff] %v13860_v2  ;;  %16221 = vst [vmem:[#allocation40_spill] sm:$0xff] %v13870_v35  ;;  %v13872_v31 = vpack.c.bf16 %v3767_v45, %v3763_v13  ;;  %v3771_v15 = vld [vmem:[%s15970_s16 + $0x398] sm:$0xff]  ;;  %v13894_v13 = vpack.c.bf16 %v3764_v32, %v3760_v25  ;;  %v3770_v32 = vld [vmem:[%s15970_s16 + $0x390] sm:$0xff] }
0x33df   :  { %10065 = vmatprep.subr.bf16.mxu1 %v13618_v1  ;;  %10129 = vmatprep.subr.bf16.mxu0 %v13620_v22  ;;  %v3775_v26 = vld [vmem:[%s15970_s16 + $0x3b8] sm:$0xff]  ;;  %v13896_v45 = vpack.c.bf16 %v3766_v30, %v3762_v4  ;;  %v3774_v25 = vld [vmem:[%s15970_s16 + $0x3b0] sm:$0xff]  ;;  %v3777_v4 = vld [vmem:[%s15970_s16 + $0x3c8] sm:$0xff] }
0x33e0   :  { %16222 = vst [vmem:[#allocation41_spill] sm:$0xff] %v13872_v31  ;;  %16223 = vst [vmem:[#allocation42_spill] sm:$0xff] %v13894_v13  ;;  %v3781_v30 = vld [vmem:[%s15970_s16 + $0x3e8] sm:$0xff] }
0x33e1   :  { %16224 = vst [vmem:[#allocation43_spill] sm:$0xff] %v13896_v45 }
0x33e2   :  { %10067 = vmatpush1.bf16.msra.mxu1 %v13642_v20  ;;  %10131 = vmatpush1.bf16.msra.mxu0 %v13644_v38 }
0x33e3   :  { %10069 = vmatprep.subr.bf16.mxu1 %v13654_v63  ;;  %10133 = vmatprep.subr.bf16.mxu0 %v13656_v0 }
0x33e6   :  { %10071 = vmatpush1.bf16.msra.mxu1 %v13678_v40  ;;  %10135 = vmatpush1.bf16.msra.mxu0 %v13680_v51 }
0x33e7   :  { %10073 = vmatprep.subr.bf16.mxu1 %v13690_v48  ;;  %10137 = vmatprep.subr.bf16.mxu0 %v13692_v62 }
0x33ea   :  { %10075 = vmatpush1.bf16.msra.mxu1 %v13714_v34  ;;  %10139 = vmatpush1.bf16.msra.mxu0 %v13716_v23 }
0x33eb   :  { %10077 = vmatprep.subr.bf16.mxu1 %v13726_v42  ;;  %10141 = vmatprep.subr.bf16.mxu0 %v13728_v59 }
0x33ee   :  { %10079 = vmatpush1.bf16.msra.mxu1 %v13750_v55  ;;  %10143 = vmatpush1.bf16.msra.mxu0 %v13752_v52 }
0x33ef   :  { %10081 = vmatprep.subr.bf16.mxu1 %v13762_v18  ;;  %10145 = vmatprep.subr.bf16.mxu0 %v13764_v9 }
0x33f2   :  { %10083 = vmatpush1.bf16.msra.mxu1 %v13786_v8  ;;  %10147 = vmatpush1.bf16.msra.mxu0 %v13788_v39 }
0x33f3   :  { %10085 = vmatprep.subr.bf16.mxu1 %v13798_v6  ;;  %10149 = vmatprep.subr.bf16.mxu0 %v13800_v10 }
0x33f6   :  { %10087 = vmatpush1.bf16.msra.mxu1 %v13822_v27  ;;  %10151 = vmatpush1.bf16.msra.mxu0 %v13824_v60  ;;  %v13906_v60 = vpack.c.bf16 %v3773_v46, %v3769_v54  ;;  %v3779_v54 = vld [vmem:[%s15970_s16 + $0x3d8] sm:$0xff] }
0x33f7   :  { %10089 = vmatprep.subr.bf16.mxu1 %v13834_v3  ;;  %10153 = vmatprep.subr.bf16.mxu0 %v13836_v24  ;;  %v3768_v24 = vld [vmem:[%s15970_s16 + $0x380] sm:$0xff]  ;;  %v3783_v46 = vld [vmem:[%s15970_s16 + $0x3f8] sm:$0xff] }
0x33f8   :  { %v3772_v3 = vld [vmem:[%s15970_s16 + $0x3a0] sm:$0xff]  ;;  %16225 = vst [vmem:[#allocation44_spill] sm:$0xff] %v13906_v60 }
0x33fa   :  { %10091 = vmatpush1.bf16.msra.mxu1 %v13858_v11  ;;  %10155 = vmatpush1.bf16.msra.mxu0 %v13860_v2  ;;  %v13908_v11 = vpack.c.bf16 %v3775_v26, %v3771_v15  ;;  %v13930_v15 = vpack.c.bf16 %v3772_v3, %v3768_v24  ;;  %v13932_v26 = vpack.c.bf16 %v3774_v25, %v3770_v32  ;;  %v3778_v3 = vld [vmem:[%s15970_s16 + $0x3d0] sm:$0xff] }
0x33fb   :  { %10093 = vmatprep.subr.bf16.mxu1 %v13870_v35  ;;  %10157 = vmatprep.subr.bf16.mxu0 %v13872_v31  ;;  %v3776_v31 = vld [vmem:[%s15970_s16 + $0x3c0] sm:$0xff]  ;;  %v13939_v35 = vpack.c.bf16 %v3781_v30, %v3777_v4  ;;  %v13941_v2 = vpack.c.bf16 %v3783_v46, %v3779_v54  ;;  %v3782_v24 = vld [vmem:[%s15970_s16 + $0x3f0] sm:$0xff]  ;;  %v16233_v4 = vmov 0.0   ;;  %v16236_v30 = vld [vmem:[#allocation37_spill] sm:$0xff] }
0x33fc   :  { %16226 = vst [vmem:[#allocation45_spill] sm:$0xff] %v13908_v11  ;;  %16227 = vst [vmem:[#allocation46_spill] sm:$0xff] %v13930_v15  ;;  %v13956_v25 = vpack.c.bf16 %v3782_v24, %v3778_v3  ;;  %v16237_v54 = vld [vmem:[#allocation38_spill] sm:$0xff]  ;;  %v16238_v46 = vld [vmem:[#allocation39_spill] sm:$0xff] }
0x33fd   :  { %16228 = vst [vmem:[#allocation47_spill] sm:$0xff] %v13932_v26  ;;  %16229 = vst [vmem:[#allocation48_spill] sm:$0xff] %v13939_v35  ;;  %v16239_v3 = vld [vmem:[#allocation40_spill] sm:$0xff]  ;;  %v16240_v24 = vld [vmem:[#allocation41_spill] sm:$0xff] }
0x33fe   :  { %10095 = vmatpush1.bf16.msra.mxu1 %v13894_v13  ;;  %10159 = vmatpush1.bf16.msra.mxu0 %v13896_v45  ;;  %16230 = vst [vmem:[#allocation49_spill] sm:$0xff] %v13941_v2  ;;  %v3780_v45 = vld [vmem:[%s15970_s16 + $0x3e0] sm:$0xff]  ;;  %16232 = vst [vmem:[#allocation51_spill] sm:$0xff] %v13956_v25 }
0x33ff   :  { %10097 = vmatprep.subr.bf16.mxu1 %v13906_v60  ;;  %10161 = vmatprep.subr.bf16.mxu0 %v13908_v11  ;;  %v13954_v32 = vpack.c.bf16 %v3780_v45, %v3776_v31  ;;  %v16234_v31 = vld [vmem:[#allocation35_spill] sm:$0xff]  ;;  %v16235_v45 = vld [vmem:[#allocation36_spill] sm:$0xff] }
0x3401   :  { %16231 = vst [vmem:[#allocation50_spill] sm:$0xff] %v13954_v32 }
0x3402   :  { %10099 = vmatpush1.bf16.msra.mxu1 %v13930_v15  ;;  %10163 = vmatpush1.bf16.msra.mxu0 %v13932_v26 }
0x3403   :  { %10101 = vmatprep.subr.bf16.mxu1 %v13939_v35  ;;  %10165 = vmatprep.subr.bf16.mxu0 %v13941_v2 }
0x3406   :  { %10103 = vmatpush1.bf16.msra.mxu1 %v13954_v32  ;;  %10167 = vmatpush1.bf16.msra.mxu0 %v13956_v25 }
0x3407   :  { %10169 = vmatprep.subr.bf16.mxu1 %v13385_v5  ;;  %10233 = vmatprep.subr.bf16.mxu0 %v13387_v50 }
0x3409   :  { %4251 = vmatmul.mubr.f32.vlgmr.msra.gmra.mrb[54].mxu1 %v16233_v4  ;;  %4322 = vmatmul.mubr.f32.vlgmr.msra.gmra.mrb[62].mxu0 %v16233_v4  ;;  %v16241_v4 = vld [vmem:[#allocation43_spill] sm:$0xff] }
0x340a   :  { %10171 = vmatpush1.bf16.msra.mxu1 %v13410_v44  ;;  %10235 = vmatpush1.bf16.msra.mxu0 %v13412_v17 }
0x340b   :  { %10173 = vmatprep.subr.bf16.mxu1 %v13428_v19  ;;  %10237 = vmatprep.subr.bf16.mxu0 %v13430_v53 }
0x340e   :  { %10175 = vmatpush1.bf16.msra.mxu1 %v13448_v56  ;;  %10239 = vmatpush1.bf16.msra.mxu0 %v13450_v28 }
0x340f   :  { %10177 = vmatprep.subr.bf16.mxu1 %v13468_v16  ;;  %10241 = vmatprep.subr.bf16.mxu0 %v13470_v33 }
0x3412   :  { %10179 = vmatpush1.bf16.msra.mxu1 %v13488_v37  ;;  %10243 = vmatpush1.bf16.msra.mxu0 %v13490_v58 }
0x3413   :  { %10181 = vmatprep.subr.bf16.mxu1 %v13511_v61  ;;  %10245 = vmatprep.subr.bf16.mxu0 %v13513_v41 }
0x3416   :  { %10183 = vmatpush1.bf16.msra.mxu1 %v13528_v36  ;;  %10247 = vmatpush1.bf16.msra.mxu0 %v13530_v57 }
0x3417   :  { %10185 = vmatprep.subr.bf16.mxu1 %v13540_v29  ;;  %10249 = vmatprep.subr.bf16.mxu0 %v13542_v47 }
0x341a   :  { %10187 = vmatpush1.bf16.msra.mxu1 %v13568_v12  ;;  %10251 = vmatpush1.bf16.msra.mxu0 %v13570_v14 }
0x341b   :  { %10189 = vmatprep.subr.bf16.mxu1 %v13580_v43  ;;  %10253 = vmatprep.subr.bf16.mxu0 %v13582_v7 }
0x341e   :  { %10191 = vmatpush1.bf16.msra.mxu1 %v13606_v21  ;;  %10255 = vmatpush1.bf16.msra.mxu0 %v13608_v49 }
0x341f   :  { %10193 = vmatprep.subr.bf16.mxu1 %v13618_v1  ;;  %10257 = vmatprep.subr.bf16.mxu0 %v13620_v22 }
0x3422   :  { %10195 = vmatpush1.bf16.msra.mxu1 %v13642_v20  ;;  %10259 = vmatpush1.bf16.msra.mxu0 %v13644_v38 }
0x3423   :  { %10197 = vmatprep.subr.bf16.mxu1 %v13654_v63  ;;  %10261 = vmatprep.subr.bf16.mxu0 %v13656_v0 }
0x3426   :  { %10199 = vmatpush1.bf16.msra.mxu1 %v13678_v40  ;;  %10263 = vmatpush1.bf16.msra.mxu0 %v13680_v51 }
0x3427   :  { %10201 = vmatprep.subr.bf16.mxu1 %v13690_v48  ;;  %10265 = vmatprep.subr.bf16.mxu0 %v13692_v62 }
0x342a   :  { %10203 = vmatpush1.bf16.msra.mxu1 %v13714_v34  ;;  %10267 = vmatpush1.bf16.msra.mxu0 %v13716_v23 }
0x342b   :  { %10205 = vmatprep.subr.bf16.mxu1 %v13726_v42  ;;  %10269 = vmatprep.subr.bf16.mxu0 %v13728_v59 }
0x342e   :  { %10207 = vmatpush1.bf16.msra.mxu1 %v13750_v55  ;;  %10271 = vmatpush1.bf16.msra.mxu0 %v13752_v52 }
0x342f   :  { %10209 = vmatprep.subr.bf16.mxu1 %v13762_v18  ;;  %10273 = vmatprep.subr.bf16.mxu0 %v13764_v9 }
0x3432   :  { %10211 = vmatpush1.bf16.msra.mxu1 %v13786_v8  ;;  %10275 = vmatpush1.bf16.msra.mxu0 %v13788_v39 }
0x3433   :  { %10213 = vmatprep.subr.bf16.mxu1 %v13798_v6  ;;  %10277 = vmatprep.subr.bf16.mxu0 %v13800_v10 }
0x3436   :  { %10215 = vmatpush1.bf16.msra.mxu1 %v13822_v27  ;;  %10279 = vmatpush1.bf16.msra.mxu0 %v16234_v31 }
0x3437   :  { %10217 = vmatprep.subr.bf16.mxu1 %v16235_v45  ;;  %10281 = vmatprep.subr.bf16.mxu0 %v16236_v30 }
0x343a   :  { %10219 = vmatpush1.bf16.msra.mxu1 %v16237_v54  ;;  %10283 = vmatpush1.bf16.msra.mxu0 %v16238_v46 }
0x343b   :  { %10221 = vmatprep.subr.bf16.mxu1 %v16239_v3  ;;  %10285 = vmatprep.subr.bf16.mxu0 %v16240_v24 }
0x343e   :  { %10223 = vmatpush1.bf16.msra.mxu1 %v13894_v13  ;;  %10287 = vmatpush1.bf16.msra.mxu0 %v16241_v4  ;;  %v16242_v4 = vld [vmem:[#allocation2_spill] sm:$0xff] }
0x343f   :  { %10225 = vmatprep.subr.bf16.mxu1 %v13906_v60  ;;  %10289 = vmatprep.subr.bf16.mxu0 %v13908_v11  ;;  %v14031_v60 = vsub.s32 2, %v16242_v4  ;;  %v3804_v23 = vsub.s32 4, %v16242_v4  ;;  %v3816_v34 = vsub.s32 7, %v16242_v4 }
0x3441   :  { %16243 = vst [vmem:[#allocation52_spill] sm:$0xff] %v14031_v60 }
0x3442   :  { %10227 = vmatpush1.bf16.msra.mxu1 %v13930_v15  ;;  %10291 = vmatpush1.bf16.msra.mxu0 %v13932_v26  ;;  %v3784_v15 = vld [vmem:[%s15971_s17] sm:$0xff] }
0x3443   :  { %10229 = vmatprep.subr.bf16.mxu1 %v13939_v35  ;;  %10293 = vmatprep.subr.bf16.mxu0 %v13941_v2  ;;  %v16054_v35 = vsub.s32 3, %v16242_v4  ;;  %v14076_v48 = vrot.slane %v3784_v15, %v3816_v34 }
0x3446   :  { %10231 = vmatpush1.bf16.msra.mxu1 %v13954_v32  ;;  %10295 = vmatpush1.bf16.msra.mxu0 %v13956_v25  ;;  %v16244_v32 = vld [vmem:[#allocation4_spill] sm:$0xff]  ;;  %v3797_v25 = vrot.slane %v3784_v15, %v14031_v60 }
0x3447   :  { %10297 = vmatprep.subr.bf16.mxu1 %v13385_v5  ;;  %10361 = vmatprep.subr.bf16.mxu0 %v13387_v50  ;;  %v3789_v24 = vrot.slane %v3784_v15, %v16244_v32  ;;  %v16245_v5 = vld [vmem:[#allocation3_spill] sm:$0xff]  ;;  %v3801_v50 = vrot.slane %v3784_v15, %v16054_v35 }
0x3448   :  { %v3793_v3 = vrot.slane %v3784_v15, %v16245_v5 }
0x347c   :  { %v3892_v26 = vpop.f32.mrb[38].mxu1  ;;  %v3981_v11 = vpop.f32.mrb[46].mxu0 }
0x347d   :  { %v3894_v2 = vpop.f32.mrb[39].mxu1  ;;  %v3983_v13 = vpop.f32.mrb[47].mxu0 }
0x347e   :  { %v14066_v62 = vadd.f32 %v3894_v2, %v3793_v3 }
0x3480   :  { %v3898_v46 = vpop.f32.mrb[40].mxu1  ;;  %v3987_v54 = vpop.f32.mrb[48].mxu0 }
0x3481   :  { %v14042_v30 = vadd.f32 %v3898_v46, %v3789_v24  ;;  %v14044_v45 = vadd.f32 %v3987_v54, %v3797_v25  ;;  %v3900_v31 = vpop.f32.mrb[41].mxu1  ;;  %v3989_v27 = vpop.f32.mrb[49].mxu0 }
0x3482   :  { %v14046_v10 = vadd.f32 %v3900_v31, %v3793_v3  ;;  %v14048_v6 = vadd.f32 %v3989_v27, %v3801_v50 }
0x3484   :  { %v3904_v32 = vpop.f32.mrb[42].mxu1  ;;  %v3993_v39 = vpop.f32.mrb[50].mxu0 }
0x3485   :  { %v14050_v60 = vadd.f32 %v3904_v32, %v3789_v24  ;;  %v14052_v5 = vadd.f32 %v3993_v39, %v3797_v25  ;;  %v3906_v8 = vpop.f32.mrb[43].mxu1  ;;  %v3995_v35 = vpop.f32.mrb[51].mxu0  ;;  %v3812_v32 = vsub.s32 6, %v16242_v4  ;;  %v3808_v39 = vsub.s32 5, %v16242_v4 }
0x3486   :  { %v14054_v9 = vadd.f32 %v3906_v8, %v3793_v3  ;;  %v14056_v46 = vadd.f32 %v3995_v35, %v3801_v50  ;;  %v14062_v8 = vadd.f32 %v3892_v26, %v3789_v24  ;;  %v14064_v35 = vadd.f32 %v3981_v11, %v3797_v25 }
0x3487   :  { %v5116_v34 = vrot.slane %v14052_v5, 4 }
0x3488   :  { %v3910_v54 = vpop.f32.mrb[44].mxu1  ;;  %v3999_v18 = vpop.f32.mrb[52].mxu0 }
0x3489   :  { %v3911_v52 = vadd.f32 %v3910_v54, %v3789_v24  ;;  %v4000_v55 = vadd.f32 %v3999_v18, %v3797_v25  ;;  %v3912_v31 = vpop.f32.mrb[45].mxu1  ;;  %v4001_v59 = vpop.f32.mrb[53].mxu0  ;;  %v14068_v54 = vadd.f32 %v3983_v13, %v3801_v50  ;;  %v14070_v18 = vrot.slane %v3784_v15, %v3804_v23 }
0x348a   :  { %v3913_v27 = vadd.f32 %v3912_v31, %v3793_v3  ;;  %v4002_v42 = vadd.f32 %v4001_v59, %v3801_v50  ;;  %v14072_v31 = vrot.slane %v3784_v15, %v3812_v32  ;;  %v14074_v59 = vrot.slane %v3784_v15, %v3808_v39 }
0x348b   :  { %v5114_v25 = vrot.slane %v14050_v60, 4  ;;  %v5115_v15 = vrot.slane %v14054_v9, 4  ;;  %v5117_v3 = vrot.slane %v14056_v46, 4  ;;  %v5490_v39 = vrot.slane %v3911_v52, 4 }
0x348c   :  { %v5492_v11 = vrot.slane %v4000_v55, 4  ;;  %v5491_v50 = vrot.slane %v3913_v27, 4  ;;  %v5493_v13 = vrot.slane %v4002_v42, 4 }
0x349c   :  { %v4070_v24 = vpop.f32.mrb[46].mxu1  ;;  %v4159_v32 = vpop.f32.mrb[54].mxu0 }
0x349d   :  { %v4071_v26 = vadd.f32 %v4070_v24, %v14070_v18  ;;  %v4160_v4 = vadd.f32 %v4159_v32, %v14072_v31  ;;  %v4072_v51 = vpop.f32.mrb[47].mxu1  ;;  %v4161_v23 = vpop.f32.mrb[55].mxu0 }
0x349e   :  { %v4073_v2 = vadd.f32 %v4072_v51, %v14074_v59  ;;  %v4162_v40 = vadd.f32 %v4161_v23, %v14076_v48 }
0x349f   :  { %v5502_v0 = vrot.slane %v4071_v26, 4  ;;  %v5504_v63 = vrot.slane %v4160_v4, 4  ;;  %v14095_v38 = vsel %vm297_vm2, %v3911_v52, %v4071_v26  ;;  %v14098_v20 = vsel %vm297_vm2, %v4000_v55, %v4160_v4 }
0x34a0   :  { %16246 = vst [vmem:[#allocation53_spill] sm:$0xff] %v14095_v38  ;;  %16247 = vst [vmem:[#allocation54_spill] sm:$0xff] %v14098_v20  ;;  %v5503_v22 = vrot.slane %v4073_v2, 4  ;;  %v5505_v24 = vrot.slane %v4162_v40, 4  ;;  %v4076_v1 = vpop.f32.mrb[48].mxu1  ;;  %v4165_v32 = vpop.f32.mrb[56].mxu0  ;;  %v14101_v49 = vsel %vm297_vm2, %v3913_v27, %v4073_v2  ;;  %v14104_v21 = vsel %vm297_vm2, %v4002_v42, %v4162_v40 }
0x34a1   :  { %16248 = vst [vmem:[#allocation55_spill] sm:$0xff] %v14101_v49  ;;  %16249 = vst [vmem:[#allocation56_spill] sm:$0xff] %v14104_v21  ;;  %v4077_v51 = vadd.f32 %v4076_v1, %v14070_v18  ;;  %v4166_v23 = vadd.f32 %v4165_v32, %v14072_v31  ;;  %v4078_v7 = vpop.f32.mrb[49].mxu1  ;;  %v4167_v52 = vpop.f32.mrb[57].mxu0  ;;  %v14109_v26 = vsel %vm297_vm2, %v5490_v39, %v5502_v0  ;;  %v16300_v21 = vld [vmem:[#allocation27_spill] sm:$0xff]  ;;  %v16301_v49 = vld [vmem:[#allocation28_spill] sm:$0xff] }
0x34a2   :  { %16250 = vst [vmem:[#allocation57_spill] sm:$0xff] %v14109_v26  ;;  %v14112_v55 = vsel %vm297_vm2, %v5492_v11, %v5504_v63  ;;  %v4079_v4 = vadd.f32 %v4078_v7, %v14074_v59  ;;  %v4168_v27 = vadd.f32 %v4167_v52, %v14076_v48  ;;  %v14117_v2 = vsel %vm297_vm2, %v5491_v50, %v5503_v22  ;;  %v16302_v20 = vld [vmem:[#allocation29_spill] sm:$0xff]  ;;  %v16303_v38 = vld [vmem:[#allocation30_spill] sm:$0xff] }
0x34a3   :  { %16251 = vst [vmem:[#allocation58_spill] sm:$0xff] %v14112_v55  ;;  %16252 = vst [vmem:[#allocation59_spill] sm:$0xff] %v14117_v2  ;;  %v14120_v40 = vsel %vm297_vm2, %v5493_v13, %v5505_v24  ;;  %v5126_v1 = vrot.slane %v4077_v51, 4  ;;  %v5128_v42 = vrot.slane %v4166_v23, 4  ;;  %v14124_v32 = vsel %vm297_vm2, %v14050_v60, %v4077_v51 }
0x34a4   :  { %16253 = vst [vmem:[#allocation60_spill] sm:$0xff] %v14120_v40  ;;  %16254 = vst [vmem:[#allocation61_spill] sm:$0xff] %v14124_v32  ;;  %v14128_v63 = vsel %vm297_vm2, %v14052_v5, %v4166_v23  ;;  %v5127_v0 = vrot.slane %v4079_v4, 4  ;;  %v5129_v7 = vrot.slane %v4168_v27, 4  ;;  %v4082_v11 = vpop.f32.mrb[50].mxu1  ;;  %v4171_v39 = vpop.f32.mrb[58].mxu0  ;;  %v14132_v22 = vsel %vm297_vm2, %v14054_v9, %v4079_v4 }
0x34a5   :  { %16255 = vst [vmem:[#allocation62_spill] sm:$0xff] %v14128_v63  ;;  %16256 = vst [vmem:[#allocation63_spill] sm:$0xff] %v14132_v22  ;;  %v14136_v50 = vsel %vm297_vm2, %v14056_v46, %v4168_v27  ;;  %v4083_v13 = vadd.f32 %v4082_v11, %v14070_v18  ;;  %v4172_v60 = vadd.f32 %v4171_v39, %v14072_v31  ;;  %v4084_v24 = vpop.f32.mrb[51].mxu1  ;;  %v4173_v51 = vpop.f32.mrb[59].mxu0  ;;  %v16268_v2 = vrot.slane %v14044_v45, 4  ;;  %v16309_v22 = vld [vmem:[#allocation36_spill] sm:$0xff] }
0x34a6   :  { %16257 = vst [vmem:[#allocation64_spill] sm:$0xff] %v14136_v50  ;;  %v14141_v5 = vsel %vm297_vm2, %v5114_v25, %v5126_v1  ;;  %v14144_v23 = vsel %vm297_vm2, %v5116_v34, %v5128_v42  ;;  %v4085_v52 = vadd.f32 %v4084_v24, %v14074_v59  ;;  %v4174_v9 = vadd.f32 %v4173_v51, %v14076_v48  ;;  %v16308_v50 = vld [vmem:[#allocation35_spill] sm:$0xff]  ;;  %v16310_v63 = vld [vmem:[#allocation37_spill] sm:$0xff]  ;;  %v16311_v32 = vld [vmem:[#allocation38_spill] sm:$0xff] }
0x34a7   :  { %16258 = vst [vmem:[#allocation65_spill] sm:$0xff] %v14141_v5  ;;  %16259 = vst [vmem:[#allocation66_spill] sm:$0xff] %v14144_v23  ;;  %v14149_v4 = vsel %vm297_vm2, %v5115_v15, %v5127_v0  ;;  %v14152_v46 = vsel %vm297_vm2, %v5117_v3, %v5129_v7  ;;  %v4750_v27 = vrot.slane %v4083_v13, 4  ;;  %v4752_v11 = vrot.slane %v4172_v60, 4  ;;  %v16306_v23 = vld [vmem:[#allocation33_spill] sm:$0xff]  ;;  %v16307_v5 = vld [vmem:[#allocation34_spill] sm:$0xff] }
0x34a8   :  { %16260 = vst [vmem:[#allocation67_spill] sm:$0xff] %v14149_v4  ;;  %16261 = vst [vmem:[#allocation68_spill] sm:$0xff] %v14152_v46  ;;  %v14156_v39 = vsel %vm297_vm2, %v14042_v30, %v4083_v13  ;;  %v14160_v25 = vsel %vm297_vm2, %v14044_v45, %v4172_v60  ;;  %v4751_v34 = vrot.slane %v4085_v52, 4  ;;  %v4753_v1 = vrot.slane %v4174_v9, 4  ;;  %v4088_v42 = vpop.f32.mrb[52].mxu1  ;;  %v4177_v24 = vpop.f32.mrb[60].mxu0 }
0x34a9   :  { %16262 = vst [vmem:[#allocation69_spill] sm:$0xff] %v14156_v39  ;;  %16263 = vst [vmem:[#allocation70_spill] sm:$0xff] %v14160_v25  ;;  %v14164_v15 = vsel %vm297_vm2, %v14046_v10, %v4085_v52  ;;  %v14168_v3 = vsel %vm297_vm2, %v14048_v6, %v4174_v9  ;;  %v4089_v0 = vadd.f32 %v4088_v42, %v14070_v18  ;;  %v4090_v13 = vpop.f32.mrb[53].mxu1  ;;  %v4179_v51 = vpop.f32.mrb[61].mxu0  ;;  %v16266_v60 = vrot.slane %v14042_v30, 4  ;;  %v16304_v46 = vld [vmem:[#allocation31_spill] sm:$0xff] }
0x34aa   :  { %16264 = vst [vmem:[#allocation71_spill] sm:$0xff] %v14164_v15  ;;  %16265 = vst [vmem:[#allocation72_spill] sm:$0xff] %v14168_v3  ;;  %v4178_v7 = vadd.f32 %v4177_v24, %v14072_v31  ;;  %v14180_v52 = vsel %vm297_vm2, %v16268_v2, %v4752_v11  ;;  %v4091_v55 = vadd.f32 %v4090_v13, %v14074_v59  ;;  %v16270_v18 = vrot.slane %v14046_v10, 4  ;;  %v16305_v4 = vld [vmem:[#allocation32_spill] sm:$0xff]  ;;  %v16316_v3 = vld [vmem:[#allocation43_spill] sm:$0xff] }
0x34ab   :  { %v14175_v40 = vsel %vm297_vm2, %v16266_v60, %v4750_v27  ;;  %16269 = vst [vmem:[#allocation74_spill] sm:$0xff] %v14180_v52  ;;  %v4180_v9 = vadd.f32 %v4179_v51, %v14076_v48  ;;  %v16272_v42 = vrot.slane %v14048_v6, 4  ;;  %v4374_v27 = vrot.slane %v4089_v0, 4  ;;  %v16314_v52 = vld [vmem:[#allocation41_spill] sm:$0xff]  ;;  %v16317_v15 = vld [vmem:[#allocation44_spill] sm:$0xff]  ;;  %v16319_v39 = vld [vmem:[#allocation46_spill] sm:$0xff] }
0x34ac   :  { %16267 = vst [vmem:[#allocation73_spill] sm:$0xff] %v14175_v40  ;;  %v14187_v31 = vsel %vm297_vm2, %v16270_v18, %v4751_v34  ;;  %v4376_v24 = vrot.slane %v4178_v7, 4  ;;  %v4182_v45 = vsel %vm297_vm2, %v14062_v8, %v4089_v0  ;;  %v4184_v59 = vsel %vm297_vm2, %v14064_v35, %v4178_v7  ;;  %v16315_v40 = vld [vmem:[#allocation42_spill] sm:$0xff]  ;;  %v16318_v25 = vld [vmem:[#allocation45_spill] sm:$0xff] }
0x34ad   :  { %16271 = vst [vmem:[#allocation75_spill] sm:$0xff] %v14187_v31  ;;  %v14192_v30 = vsel %vm297_vm2, %v16272_v42, %v4753_v1  ;;  %v4375_v2 = vrot.slane %v4091_v55, 4  ;;  %v4377_v48 = vrot.slane %v4180_v9, 4  ;;  %v4183_v10 = vsel %vm297_vm2, %v14066_v62, %v4091_v55  ;;  %v16313_v31 = vld [vmem:[#allocation40_spill] sm:$0xff] }
0x34ae   :  { %16273 = vst [vmem:[#allocation76_spill] sm:$0xff] %v14192_v30  ;;  %v4185_v11 = vsel %vm297_vm2, %v14068_v54, %v4180_v9  ;;  %v16274_v6 = vrot.slane %v14062_v8, 4  ;;  %v16275_v1 = vrot.slane %v14064_v35, 4  ;;  %v16276_v7 = vrot.slane %v14066_v62, 4  ;;  %v16312_v30 = vld [vmem:[#allocation39_spill] sm:$0xff] }
0x34af   :  { %v16277_v55 = vrot.slane %v14068_v54, 4 }
0x34b0   :  { %v14205_v34 = vsel %vm297_vm2, %v16274_v6, %v4374_v27  ;;  %v14210_v0 = vsel %vm297_vm2, %v16275_v1, %v4376_v24  ;;  %v14215_v13 = vsel %vm297_vm2, %v16276_v7, %v4375_v2 }
0x34b1   :  { %v14220_v51 = vsel %vm297_vm2, %v16277_v55, %v4377_v48 }
0x34dc   :  { %v4252_v60 = vpop.f32.mrb[54].mxu1  ;;  %v4323_v8 = vpop.f32.mrb[62].mxu0 }
0x34dd   :  { %v4328_v9 = vadd.f32 %v4252_v60, %v4182_v45  ;;  %v4330_v18 = vadd.f32 %v4323_v8, %v4184_v59  ;;  %v4254_v42 = vpop.f32.mrb[55].mxu1  ;;  %v4325_v27 = vpop.f32.mrb[63].mxu0 }
0x34de   :  { %v4329_v35 = vadd.f32 %v4254_v42, %v4183_v10  ;;  %v4331_v6 = vadd.f32 %v4325_v27, %v4185_v11 }
0x34df   :  { %v8391_v24 = vmul.f32 -1.442695, %v4328_v9 }
0x34e0   :  { %v8392_v1 = vmul.f32 -1.442695, %v4329_v35  ;;  %v8393_v62 = vmul.f32 -1.442695, %v4331_v6  ;;  %v16278_v35 = vld [vmem:[#allocation6_spill] sm:$0xff] }
0x34e1   :  { %11781 = vpow2.f32 %v8391_v24  ;;  %v16282_v24 = vld [vmem:[#allocation9_spill] sm:$0xff] }
0x34e2   :  { %11783 = vpow2.f32 %v8392_v1  ;;  %v16283_v1 = vld [vmem:[#allocation10_spill] sm:$0xff] }
0x34e3   :  { %11785 = vpow2.f32 %v8393_v62  ;;  %v16284_v62 = vld [vmem:[#allocation11_spill] sm:$0xff] }
0x34e4   :  { %11787 = vtanh.f32 %v4330_v18 }
0x34eb   :  { %v11782_v2 = vpop.eup %11781 }
0x34ec   :  { %v11784_v7 = vpop.eup %11783  ;;  %v4335_v26 = vadd.f32 1.0, %v11782_v2  ;;  %v16285_v2 = vld [vmem:[#allocation12_spill] sm:$0xff] }
0x34ed   :  { %v4341_v54 = vadd.f32 1.0, %v11784_v7  ;;  %v11786_v48 = vpop.eup %11785  ;;  %v16286_v7 = vld [vmem:[#allocation13_spill] sm:$0xff] }
0x34ee   :  { %11789 = vrcp.f32 %v4335_v26  ;;  %v11788_v45 = vpop.eup %11787  ;;  %v4348_v10 = vadd.f32 1.0, %v11786_v48  ;;  %v16280_v26 = vld [vmem:[#allocation5_spill] sm:$0xff]  ;;  %v16288_v48 = vld [vmem:[#allocation15_spill] sm:$0xff] }
0x34ef   :  { %11791 = vrcp.f32 %v4341_v54  ;;  %v16287_v54 = vld [vmem:[#allocation14_spill] sm:$0xff] }
0x34f0   :  { %11793 = vrcp.f32 %v4348_v10  ;;  %v16293_v10 = vld [vmem:[#allocation20_spill] sm:$0xff] }
0x34f8   :  { %v11790_v59 = vpop.eup %11789 }
0x34f9   :  { %v11792_v55 = vpop.eup %11791  ;;  %v4352_v60 = vmul.f32 %v11790_v59, %v11788_v45  ;;  %v16289_v45 = vld [vmem:[#allocation16_spill] sm:$0xff]  ;;  %v16290_v59 = vld [vmem:[#allocation17_spill] sm:$0xff] }
0x34fa   :  { %v4351_v11 = vmul.f32 0.0, %v11792_v55  ;;  %v11794_v9 = vpop.eup %11793  ;;  %v16291_v55 = vld [vmem:[#allocation18_spill] sm:$0xff] }
0x34fc   :  { %v14222_v8 = vadd.f32 %v4352_v60, %v4351_v11  ;;  %v16292_v60 = vld [vmem:[#allocation19_spill] sm:$0xff]  ;;  %v16294_v11 = vld [vmem:[#allocation21_spill] sm:$0xff] }
0x34fe   :  { %11795 = vtanh.f32 %v14222_v8 }
0x3508   :  { %v11796_v42 = vpop.eup %11795 }
0x3509   :  { %v4355_v27 = vmul.f32 %v11796_v42, %v11794_v9  ;;  %v16295_v9 = vld [vmem:[#allocation22_spill] sm:$0xff]  ;;  %v16296_v42 = vld [vmem:[#allocation23_spill] sm:$0xff] }
0x350b   :  { %v14226_v18 = vmul.f32 %v4355_v27, %v16278_v35  ;;  %v14229_v6 = vmul.f32 %v16280_v26, %v4355_v27  ;;  %v16297_v27 = vld [vmem:[#allocation24_spill] sm:$0xff] }
0x350d   :  { %16279 = vst [vmem:[#allocation77_spill] sm:$0xff] %v14226_v18  ;;  %16281 = vst [vmem:[#allocation78_spill] sm:$0xff] %v14229_v6  ;;  %4450 = vmatprep.mubr.f32.mxu1 %v14226_v18  ;;  %4521 = vmatprep.mubr.f32.mxu0 %v14226_v18  ;;  %v16299_v18 = vld [vmem:[#allocation26_spill] sm:$0xff] }
0x350e   :  { %4451 = vmatmul.mubr.f32.vlgmr.msra.gmra.mrb[56].mxu1 %v14229_v6  ;;  %4522 = vmatmul.mubr.f32.vlgmr.msra.gmra.mrb[64].mxu0 %v14229_v6  ;;  %v16298_v6 = vld [vmem:[#allocation25_spill] sm:$0xff] }
0x350f   :  { %10299 = vmatpush1.bf16.msra.mxu1 %v13410_v44  ;;  %10363 = vmatpush1.bf16.msra.mxu0 %v13412_v17 }
0x3510   :  { %10301 = vmatprep.subr.bf16.mxu1 %v13428_v19  ;;  %10365 = vmatprep.subr.bf16.mxu0 %v13430_v53 }
0x3513   :  { %10303 = vmatpush1.bf16.msra.mxu1 %v13448_v56  ;;  %10367 = vmatpush1.bf16.msra.mxu0 %v13450_v28 }
0x3514   :  { %10305 = vmatprep.subr.bf16.mxu1 %v13468_v16  ;;  %10369 = vmatprep.subr.bf16.mxu0 %v13470_v33 }
0x3517   :  { %10307 = vmatpush1.bf16.msra.mxu1 %v13488_v37  ;;  %10371 = vmatpush1.bf16.msra.mxu0 %v13490_v58 }
0x3518   :  { %10309 = vmatprep.subr.bf16.mxu1 %v13511_v61  ;;  %10373 = vmatprep.subr.bf16.mxu0 %v13513_v41 }
0x351b   :  { %10311 = vmatpush1.bf16.msra.mxu1 %v13528_v36  ;;  %10375 = vmatpush1.bf16.msra.mxu0 %v13530_v57 }
0x351c   :  { %10313 = vmatprep.subr.bf16.mxu1 %v13540_v29  ;;  %10377 = vmatprep.subr.bf16.mxu0 %v13542_v47 }
0x351f   :  { %10315 = vmatpush1.bf16.msra.mxu1 %v13568_v12  ;;  %10379 = vmatpush1.bf16.msra.mxu0 %v13570_v14 }
0x3520   :  { %10317 = vmatprep.subr.bf16.mxu1 %v13580_v43  ;;  %10381 = vmatprep.subr.bf16.mxu0 %v16282_v24 }
0x3523   :  { %10319 = vmatpush1.bf16.msra.mxu1 %v16283_v1  ;;  %10383 = vmatpush1.bf16.msra.mxu0 %v16284_v62 }
0x3524   :  { %10321 = vmatprep.subr.bf16.mxu1 %v16285_v2  ;;  %10385 = vmatprep.subr.bf16.mxu0 %v16286_v7 }
0x3527   :  { %10323 = vmatpush1.bf16.msra.mxu1 %v16287_v54  ;;  %10387 = vmatpush1.bf16.msra.mxu0 %v16288_v48 }
0x3528   :  { %10325 = vmatprep.subr.bf16.mxu1 %v16289_v45  ;;  %10389 = vmatprep.subr.bf16.mxu0 %v16290_v59 }
0x352b   :  { %10327 = vmatpush1.bf16.msra.mxu1 %v16291_v55  ;;  %10391 = vmatpush1.bf16.msra.mxu0 %v16292_v60 }
0x352c   :  { %10329 = vmatprep.subr.bf16.mxu1 %v16293_v10  ;;  %10393 = vmatprep.subr.bf16.mxu0 %v16294_v11 }
0x352f   :  { %10331 = vmatpush1.bf16.msra.mxu1 %v16295_v9  ;;  %10395 = vmatpush1.bf16.msra.mxu0 %v16296_v42 }
0x3530   :  { %10333 = vmatprep.subr.bf16.mxu1 %v16297_v27  ;;  %10397 = vmatprep.subr.bf16.mxu0 %v16298_v6 }
0x3533   :  { %10335 = vmatpush1.bf16.msra.mxu1 %v16299_v18  ;;  %10399 = vmatpush1.bf16.msra.mxu0 %v16300_v21 }
0x3534   :  { %10337 = vmatprep.subr.bf16.mxu1 %v16301_v49  ;;  %10401 = vmatprep.subr.bf16.mxu0 %v16302_v20 }
0x3537   :  { %10339 = vmatpush1.bf16.msra.mxu1 %v16303_v38  ;;  %10403 = vmatpush1.bf16.msra.mxu0 %v16304_v46 }
0x3538   :  { %10341 = vmatprep.subr.bf16.mxu1 %v16305_v4  ;;  %10405 = vmatprep.subr.bf16.mxu0 %v16306_v23 }
0x353b   :  { %10343 = vmatpush1.bf16.msra.mxu1 %v16307_v5  ;;  %10407 = vmatpush1.bf16.msra.mxu0 %v16308_v50 }
0x353c   :  { %10345 = vmatprep.subr.bf16.mxu1 %v16309_v22  ;;  %10409 = vmatprep.subr.bf16.mxu0 %v16310_v63  ;;  %v16320_v22 = vld [vmem:[#allocation47_spill] sm:$0xff]  ;;  %v16321_v63 = vld [vmem:[#allocation48_spill] sm:$0xff] }
0x353f   :  { %10347 = vmatpush1.bf16.msra.mxu1 %v16311_v32  ;;  %10411 = vmatpush1.bf16.msra.mxu0 %v16312_v30  ;;  %v16322_v32 = vld [vmem:[#allocation49_spill] sm:$0xff]  ;;  %v16323_v30 = vld [vmem:[#allocation50_spill] sm:$0xff] }
0x3540   :  { %10349 = vmatprep.subr.bf16.mxu1 %v16313_v31  ;;  %10413 = vmatprep.subr.bf16.mxu0 %v16314_v52  ;;  %v16324_v31 = vld [vmem:[#allocation51_spill] sm:$0xff] }
0x3541   :  { %v16325_v52 = vld [vmem:[#allocation7_spill] sm:$0xff] }
0x3543   :  { %10351 = vmatpush1.bf16.msra.mxu1 %v16315_v40  ;;  %10415 = vmatpush1.bf16.msra.mxu0 %v16316_v3  ;;  %v16326_v40 = vld [vmem:[#allocation8_spill] sm:$0xff] }
0x3544   :  { %10353 = vmatprep.subr.bf16.mxu1 %v16317_v15  ;;  %10417 = vmatprep.subr.bf16.mxu0 %v16318_v25 }
0x3547   :  { %10355 = vmatpush1.bf16.msra.mxu1 %v16319_v39  ;;  %10419 = vmatpush1.bf16.msra.mxu0 %v16320_v22 }
0x3548   :  { %10357 = vmatprep.subr.bf16.mxu1 %v16321_v63  ;;  %10421 = vmatprep.subr.bf16.mxu0 %v16322_v32 }
0x354b   :  { %10359 = vmatpush1.bf16.msra.mxu1 %v16323_v30  ;;  %10423 = vmatpush1.bf16.msra.mxu0 %v16324_v31 }
0x354c   :  { %10425 = vmatprep.subr.bf16.mxu1 %v16325_v52  ;;  %10489 = vmatprep.subr.bf16.mxu0 %v16326_v40 }
0x35e1   :  { %v4452_v3 = vpop.f32.mrb[56].mxu1  ;;  %v4523_v15 = vpop.f32.mrb[64].mxu0 }
0x35e2   :  { %v4528_v25 = vadd.f32 %v4452_v3, %v14205_v34  ;;  %v4530_v39 = vadd.f32 %v4523_v15, %v14210_v0  ;;  %v4454_v50 = vpop.f32.mrb[57].mxu1  ;;  %v4525_v22 = vpop.f32.mrb[65].mxu0 }
0x35e3   :  { %v4529_v63 = vadd.f32 %v4454_v50, %v14215_v13  ;;  %v4531_v32 = vadd.f32 %v4525_v22, %v14220_v51  ;;  %v16334_v51 = vld [vmem:[#allocation37_spill] sm:$0xff] }
0x35e4   :  { %v8394_v5 = vmul.f32 -1.442695, %v4528_v25 }
0x35e5   :  { %v8395_v30 = vmul.f32 -1.442695, %v4529_v63  ;;  %v8396_v31 = vmul.f32 -1.442695, %v4531_v32 }
0x35e6   :  { %11797 = vpow2.f32 %v8394_v5 }
0x35e7   :  { %11799 = vpow2.f32 %v8395_v30  ;;  %v16333_v30 = vld [vmem:[#allocation36_spill] sm:$0xff] }
0x35e8   :  { %11801 = vpow2.f32 %v8396_v31  ;;  %v16332_v31 = vld [vmem:[#allocation35_spill] sm:$0xff] }
0x35e9   :  { %11803 = vtanh.f32 %v4530_v39  ;;  %v16330_v39 = vld [vmem:[#allocation33_spill] sm:$0xff] }
0x35f0   :  { %v11798_v52 = vpop.eup %11797 }
0x35f1   :  { %v11800_v23 = vpop.eup %11799  ;;  %v4535_v40 = vadd.f32 1.0, %v11798_v52  ;;  %v16331_v52 = vld [vmem:[#allocation34_spill] sm:$0xff] }
0x35f2   :  { %v4541_v4 = vadd.f32 1.0, %v11800_v23  ;;  %v11802_v15 = vpop.eup %11801 }
0x35f3   :  { %11805 = vrcp.f32 %v4535_v40  ;;  %v11804_v3 = vpop.eup %11803  ;;  %v4548_v13 = vadd.f32 1.0, %v11802_v15  ;;  %v16336_v15 = vld [vmem:[#allocation39_spill] sm:$0xff] }
0x35f4   :  { %11807 = vrcp.f32 %v4541_v4  ;;  %v16329_v4 = vld [vmem:[#allocation32_spill] sm:$0xff] }
0x35f5   :  { %11809 = vrcp.f32 %v4548_v13  ;;  %v16341_v13 = vld [vmem:[#allocation44_spill] sm:$0xff] }
0x35fd   :  { %v11806_v34 = vpop.eup %11805 }
0x35fe   :  { %v11808_v0 = vpop.eup %11807  ;;  %v4552_v50 = vmul.f32 %v11806_v34, %v11804_v3  ;;  %v16337_v3 = vld [vmem:[#allocation40_spill] sm:$0xff]  ;;  %v16338_v34 = vld [vmem:[#allocation41_spill] sm:$0xff] }
0x35ff   :  { %v4551_v22 = vmul.f32 %v11808_v0, %v14222_v8  ;;  %v11810_v32 = vpop.eup %11809  ;;  %v16335_v8 = vld [vmem:[#allocation38_spill] sm:$0xff] }
0x3600   :  { %v16339_v0 = vld [vmem:[#allocation42_spill] sm:$0xff] }
0x3601   :  { %v14304_v63 = vadd.f32 %v4552_v50, %v4551_v22  ;;  %v16340_v50 = vld [vmem:[#allocation43_spill] sm:$0xff]  ;;  %v16342_v22 = vld [vmem:[#allocation45_spill] sm:$0xff] }
0x3603   :  { %11811 = vtanh.f32 %v14304_v63 }
0x360d   :  { %v11812_v5 = vpop.eup %11811 }
0x360e   :  { %v4555_v25 = vmul.f32 %v11812_v5, %v11810_v32  ;;  %v16343_v32 = vld [vmem:[#allocation46_spill] sm:$0xff]  ;;  %v16344_v5 = vld [vmem:[#allocation47_spill] sm:$0xff] }
0x3610   :  { %v14308_v23 = vmul.f32 %v4555_v25, %v16278_v35  ;;  %v14311_v40 = vmul.f32 %v16280_v26, %v4555_v25  ;;  %v16345_v25 = vld [vmem:[#allocation48_spill] sm:$0xff] }
0x3612   :  { %16327 = vst [vmem:[#allocation9_spill] sm:$0xff] %v14308_v23  ;;  %16328 = vst [vmem:[#allocation10_spill] sm:$0xff] %v14311_v40  ;;  %4626 = vmatprep.mubr.f32.mxu1 %v14308_v23  ;;  %4697 = vmatprep.mubr.f32.mxu0 %v14308_v23  ;;  %v16347_v23 = vld [vmem:[#allocation50_spill] sm:$0xff] }
0x3613   :  { %4627 = vmatmul.mubr.f32.vlgmr.msra.gmra.mrb[58].mxu1 %v14311_v40  ;;  %4698 = vmatmul.mubr.f32.vlgmr.msra.gmra.mrb[66].mxu0 %v14311_v40  ;;  %v16346_v40 = vld [vmem:[#allocation49_spill] sm:$0xff] }
0x3614   :  { %10427 = vmatpush1.bf16.msra.mxu1 %v13410_v44  ;;  %10491 = vmatpush1.bf16.msra.mxu0 %v13412_v17 }
0x3615   :  { %10429 = vmatprep.subr.bf16.mxu1 %v13428_v19  ;;  %10493 = vmatprep.subr.bf16.mxu0 %v13430_v53 }
0x3618   :  { %10431 = vmatpush1.bf16.msra.mxu1 %v13448_v56  ;;  %10495 = vmatpush1.bf16.msra.mxu0 %v13450_v28 }
0x3619   :  { %10433 = vmatprep.subr.bf16.mxu1 %v13468_v16  ;;  %10497 = vmatprep.subr.bf16.mxu0 %v13470_v33 }
0x361c   :  { %10435 = vmatpush1.bf16.msra.mxu1 %v13488_v37  ;;  %10499 = vmatpush1.bf16.msra.mxu0 %v13490_v58 }
0x361d   :  { %10437 = vmatprep.subr.bf16.mxu1 %v13511_v61  ;;  %10501 = vmatprep.subr.bf16.mxu0 %v13513_v41 }
0x3620   :  { %10439 = vmatpush1.bf16.msra.mxu1 %v13528_v36  ;;  %10503 = vmatpush1.bf16.msra.mxu0 %v13530_v57 }
0x3621   :  { %10441 = vmatprep.subr.bf16.mxu1 %v13540_v29  ;;  %10505 = vmatprep.subr.bf16.mxu0 %v13542_v47 }
0x3624   :  { %10443 = vmatpush1.bf16.msra.mxu1 %v13568_v12  ;;  %10507 = vmatpush1.bf16.msra.mxu0 %v13570_v14 }
0x3625   :  { %10445 = vmatprep.subr.bf16.mxu1 %v13580_v43  ;;  %10509 = vmatprep.subr.bf16.mxu0 %v16282_v24 }
0x3628   :  { %10447 = vmatpush1.bf16.msra.mxu1 %v16283_v1  ;;  %10511 = vmatpush1.bf16.msra.mxu0 %v16284_v62 }
0x3629   :  { %10449 = vmatprep.subr.bf16.mxu1 %v16285_v2  ;;  %10513 = vmatprep.subr.bf16.mxu0 %v16286_v7 }
0x362c   :  { %10451 = vmatpush1.bf16.msra.mxu1 %v16287_v54  ;;  %10515 = vmatpush1.bf16.msra.mxu0 %v16288_v48 }
0x362d   :  { %10453 = vmatprep.subr.bf16.mxu1 %v16289_v45  ;;  %10517 = vmatprep.subr.bf16.mxu0 %v16290_v59 }
0x3630   :  { %10455 = vmatpush1.bf16.msra.mxu1 %v16291_v55  ;;  %10519 = vmatpush1.bf16.msra.mxu0 %v16292_v60 }
0x3631   :  { %10457 = vmatprep.subr.bf16.mxu1 %v16293_v10  ;;  %10521 = vmatprep.subr.bf16.mxu0 %v16294_v11 }
0x3634   :  { %10459 = vmatpush1.bf16.msra.mxu1 %v16295_v9  ;;  %10523 = vmatpush1.bf16.msra.mxu0 %v16296_v42 }
0x3635   :  { %10461 = vmatprep.subr.bf16.mxu1 %v16297_v27  ;;  %10525 = vmatprep.subr.bf16.mxu0 %v16298_v6 }
0x3638   :  { %10463 = vmatpush1.bf16.msra.mxu1 %v16299_v18  ;;  %10527 = vmatpush1.bf16.msra.mxu0 %v16300_v21 }
0x3639   :  { %10465 = vmatprep.subr.bf16.mxu1 %v16301_v49  ;;  %10529 = vmatprep.subr.bf16.mxu0 %v16302_v20 }
0x363c   :  { %10467 = vmatpush1.bf16.msra.mxu1 %v16303_v38  ;;  %10531 = vmatpush1.bf16.msra.mxu0 %v16304_v46 }
0x363d   :  { %10469 = vmatprep.subr.bf16.mxu1 %v16329_v4  ;;  %10533 = vmatprep.subr.bf16.mxu0 %v16330_v39 }
0x3640   :  { %10471 = vmatpush1.bf16.msra.mxu1 %v16331_v52  ;;  %10535 = vmatpush1.bf16.msra.mxu0 %v16332_v31  ;;  %v16354_v31 = vld [vmem:[#allocation72_spill] sm:$0xff] }
0x3641   :  { %10473 = vmatprep.subr.bf16.mxu1 %v16333_v30  ;;  %10537 = vmatprep.subr.bf16.mxu0 %v16334_v51  ;;  %v16353_v30 = vld [vmem:[#allocation71_spill] sm:$0xff] }
0x3644   :  { %10475 = vmatpush1.bf16.msra.mxu1 %v16335_v8  ;;  %10539 = vmatpush1.bf16.msra.mxu0 %v16336_v15  ;;  %v16351_v15 = vld [vmem:[#allocation69_spill] sm:$0xff]  ;;  %v16352_v8 = vld [vmem:[#allocation70_spill] sm:$0xff] }
0x3645   :  { %10477 = vmatprep.subr.bf16.mxu1 %v16337_v3  ;;  %10541 = vmatprep.subr.bf16.mxu0 %v16338_v34  ;;  %v16348_v3 = vld [vmem:[#allocation51_spill] sm:$0xff] }
0x3646   :  { %v16349_v34 = vld [vmem:[#allocation7_spill] sm:$0xff] }
0x3648   :  { %10479 = vmatpush1.bf16.msra.mxu1 %v16339_v0  ;;  %10543 = vmatpush1.bf16.msra.mxu0 %v16340_v50  ;;  %v16350_v0 = vld [vmem:[#allocation8_spill] sm:$0xff] }
0x3649   :  { %10481 = vmatprep.subr.bf16.mxu1 %v16341_v13  ;;  %10545 = vmatprep.subr.bf16.mxu0 %v16342_v22 }
0x364c   :  { %10483 = vmatpush1.bf16.msra.mxu1 %v16343_v32  ;;  %10547 = vmatpush1.bf16.msra.mxu0 %v16344_v5 }
0x364d   :  { %10485 = vmatprep.subr.bf16.mxu1 %v16345_v25  ;;  %10549 = vmatprep.subr.bf16.mxu0 %v16346_v40 }
0x3650   :  { %10487 = vmatpush1.bf16.msra.mxu1 %v16347_v23  ;;  %10551 = vmatpush1.bf16.msra.mxu0 %v16348_v3 }
0x3651   :  { %10553 = vmatprep.subr.bf16.mxu1 %v16349_v34  ;;  %10617 = vmatprep.subr.bf16.mxu0 %v16350_v0 }
0x36e6   :  { %v4628_v50 = vpop.f32.mrb[58].mxu1  ;;  %v4699_v13 = vpop.f32.mrb[66].mxu0 }
0x36e7   :  { %v4704_v22 = vadd.f32 %v4628_v50, %v16351_v15  ;;  %v4706_v32 = vadd.f32 %v4699_v13, %v16352_v8  ;;  %v4630_v51 = vpop.f32.mrb[59].mxu1  ;;  %v4701_v5 = vpop.f32.mrb[67].mxu0 }
0x36e8   :  { %v4705_v25 = vadd.f32 %v4630_v51, %v16353_v30  ;;  %v4707_v40 = vadd.f32 %v4701_v5, %v16354_v31  ;;  %v16362_v5 = vld [vmem:[#allocation37_spill] sm:$0xff] }
0x36e9   :  { %v8397_v52 = vmul.f32 -1.442695, %v4704_v22 }
0x36ea   :  { %v8398_v23 = vmul.f32 -1.442695, %v4705_v25  ;;  %v8399_v3 = vmul.f32 -1.442695, %v4707_v40  ;;  %v16363_v25 = vld [vmem:[#allocation38_spill] sm:$0xff] }
0x36eb   :  { %11813 = vpow2.f32 %v8397_v52 }
0x36ec   :  { %11815 = vpow2.f32 %v8398_v23 }
0x36ed   :  { %11817 = vpow2.f32 %v8399_v3  ;;  %v16358_v3 = vld [vmem:[#allocation33_spill] sm:$0xff] }
0x36ee   :  { %11819 = vtanh.f32 %v4706_v32  ;;  %v16361_v32 = vld [vmem:[#allocation36_spill] sm:$0xff] }
0x36f5   :  { %v11814_v34 = vpop.eup %11813 }
0x36f6   :  { %v11816_v39 = vpop.eup %11815  ;;  %v4711_v0 = vadd.f32 1.0, %v11814_v34  ;;  %v16359_v34 = vld [vmem:[#allocation34_spill] sm:$0xff] }
0x36f7   :  { %v4717_v4 = vadd.f32 1.0, %v11816_v39  ;;  %v11818_v8 = vpop.eup %11817 }
0x36f8   :  { %11821 = vrcp.f32 %v4711_v0  ;;  %v11820_v15 = vpop.eup %11819  ;;  %v4724_v51 = vadd.f32 1.0, %v11818_v8  ;;  %v16360_v0 = vld [vmem:[#allocation35_spill] sm:$0xff] }
0x36f9   :  { %11823 = vrcp.f32 %v4717_v4  ;;  %v16364_v8 = vld [vmem:[#allocation39_spill] sm:$0xff] }
0x36fa   :  { %11825 = vrcp.f32 %v4724_v51  ;;  %v16369_v51 = vld [vmem:[#allocation44_spill] sm:$0xff] }
0x3702   :  { %v11822_v50 = vpop.eup %11821 }
0x3703   :  { %v11824_v13 = vpop.eup %11823  ;;  %v4728_v30 = vmul.f32 %v11822_v50, %v11820_v15  ;;  %v16365_v15 = vld [vmem:[#allocation40_spill] sm:$0xff]  ;;  %v16366_v50 = vld [vmem:[#allocation41_spill] sm:$0xff] }
0x3704   :  { %v4727_v31 = vmul.f32 %v11824_v13, %v14304_v63  ;;  %v11826_v23 = vpop.eup %11825  ;;  %v16357_v63 = vld [vmem:[#allocation32_spill] sm:$0xff]  ;;  %v16367_v13 = vld [vmem:[#allocation42_spill] sm:$0xff] }
0x3706   :  { %v14386_v22 = vadd.f32 %v4728_v30, %v4727_v31  ;;  %v16368_v30 = vld [vmem:[#allocation43_spill] sm:$0xff]  ;;  %v16370_v31 = vld [vmem:[#allocation45_spill] sm:$0xff] }
0x3708   :  { %11827 = vtanh.f32 %v14386_v22 }
0x3712   :  { %v11828_v40 = vpop.eup %11827 }
0x3713   :  { %v4731_v52 = vmul.f32 %v11828_v40, %v11826_v23  ;;  %v16371_v23 = vld [vmem:[#allocation46_spill] sm:$0xff]  ;;  %v16372_v40 = vld [vmem:[#allocation47_spill] sm:$0xff] }
0x3715   :  { %v14390_v39 = vmul.f32 %v4731_v52, %v16278_v35  ;;  %v14393_v4 = vmul.f32 %v16280_v26, %v4731_v52  ;;  %v16373_v52 = vld [vmem:[#allocation48_spill] sm:$0xff] }
0x3717   :  { %16355 = vst [vmem:[#allocation11_spill] sm:$0xff] %v14390_v39  ;;  %16356 = vst [vmem:[#allocation12_spill] sm:$0xff] %v14393_v4  ;;  %4826 = vmatprep.mubr.f32.mxu1 %v14390_v39  ;;  %4897 = vmatprep.mubr.f32.mxu0 %v14390_v39  ;;  %v16375_v39 = vld [vmem:[#allocation50_spill] sm:$0xff] }
0x3718   :  { %4827 = vmatmul.mubr.f32.vlgmr.msra.gmra.mrb[60].mxu1 %v14393_v4  ;;  %4898 = vmatmul.mubr.f32.vlgmr.msra.gmra.mrb[68].mxu0 %v14393_v4  ;;  %v16374_v4 = vld [vmem:[#allocation49_spill] sm:$0xff] }
0x3719   :  { %10555 = vmatpush1.bf16.msra.mxu1 %v13410_v44  ;;  %10619 = vmatpush1.bf16.msra.mxu0 %v13412_v17 }
0x371a   :  { %10557 = vmatprep.subr.bf16.mxu1 %v13428_v19  ;;  %10621 = vmatprep.subr.bf16.mxu0 %v13430_v53 }
0x371d   :  { %10559 = vmatpush1.bf16.msra.mxu1 %v13448_v56  ;;  %10623 = vmatpush1.bf16.msra.mxu0 %v13450_v28 }
0x371e   :  { %10561 = vmatprep.subr.bf16.mxu1 %v13468_v16  ;;  %10625 = vmatprep.subr.bf16.mxu0 %v13470_v33 }
0x3721   :  { %10563 = vmatpush1.bf16.msra.mxu1 %v13488_v37  ;;  %10627 = vmatpush1.bf16.msra.mxu0 %v13490_v58 }
0x3722   :  { %10565 = vmatprep.subr.bf16.mxu1 %v13511_v61  ;;  %10629 = vmatprep.subr.bf16.mxu0 %v13513_v41 }
0x3725   :  { %10567 = vmatpush1.bf16.msra.mxu1 %v13528_v36  ;;  %10631 = vmatpush1.bf16.msra.mxu0 %v13530_v57 }
0x3726   :  { %10569 = vmatprep.subr.bf16.mxu1 %v13540_v29  ;;  %10633 = vmatprep.subr.bf16.mxu0 %v13542_v47 }
0x3729   :  { %10571 = vmatpush1.bf16.msra.mxu1 %v13568_v12  ;;  %10635 = vmatpush1.bf16.msra.mxu0 %v13570_v14 }
0x372a   :  { %10573 = vmatprep.subr.bf16.mxu1 %v13580_v43  ;;  %10637 = vmatprep.subr.bf16.mxu0 %v16282_v24 }
0x372d   :  { %10575 = vmatpush1.bf16.msra.mxu1 %v16283_v1  ;;  %10639 = vmatpush1.bf16.msra.mxu0 %v16284_v62 }
0x372e   :  { %10577 = vmatprep.subr.bf16.mxu1 %v16285_v2  ;;  %10641 = vmatprep.subr.bf16.mxu0 %v16286_v7 }
0x3731   :  { %10579 = vmatpush1.bf16.msra.mxu1 %v16287_v54  ;;  %10643 = vmatpush1.bf16.msra.mxu0 %v16288_v48 }
0x3732   :  { %10581 = vmatprep.subr.bf16.mxu1 %v16289_v45  ;;  %10645 = vmatprep.subr.bf16.mxu0 %v16290_v59 }
0x3735   :  { %10583 = vmatpush1.bf16.msra.mxu1 %v16291_v55  ;;  %10647 = vmatpush1.bf16.msra.mxu0 %v16292_v60 }
0x3736   :  { %10585 = vmatprep.subr.bf16.mxu1 %v16293_v10  ;;  %10649 = vmatprep.subr.bf16.mxu0 %v16294_v11 }
0x3739   :  { %10587 = vmatpush1.bf16.msra.mxu1 %v16295_v9  ;;  %10651 = vmatpush1.bf16.msra.mxu0 %v16296_v42 }
0x373a   :  { %10589 = vmatprep.subr.bf16.mxu1 %v16297_v27  ;;  %10653 = vmatprep.subr.bf16.mxu0 %v16298_v6 }
0x373d   :  { %10591 = vmatpush1.bf16.msra.mxu1 %v16299_v18  ;;  %10655 = vmatpush1.bf16.msra.mxu0 %v16300_v21 }
0x373e   :  { %10593 = vmatprep.subr.bf16.mxu1 %v16301_v49  ;;  %10657 = vmatprep.subr.bf16.mxu0 %v16302_v20 }
0x3741   :  { %10595 = vmatpush1.bf16.msra.mxu1 %v16303_v38  ;;  %10659 = vmatpush1.bf16.msra.mxu0 %v16304_v46 }
0x3742   :  { %10597 = vmatprep.subr.bf16.mxu1 %v16357_v63  ;;  %10661 = vmatprep.subr.bf16.mxu0 %v16358_v3 }
0x3745   :  { %10599 = vmatpush1.bf16.msra.mxu1 %v16359_v34  ;;  %10663 = vmatpush1.bf16.msra.mxu0 %v16360_v0  ;;  %v16382_v0 = vld [vmem:[#allocation76_spill] sm:$0xff] }
0x3746   :  { %10601 = vmatprep.subr.bf16.mxu1 %v16361_v32  ;;  %10665 = vmatprep.subr.bf16.mxu0 %v16362_v5  ;;  %v16381_v32 = vld [vmem:[#allocation75_spill] sm:$0xff] }
0x3749   :  { %10603 = vmatpush1.bf16.msra.mxu1 %v16363_v25  ;;  %10667 = vmatpush1.bf16.msra.mxu0 %v16364_v8  ;;  %v16379_v8 = vld [vmem:[#allocation73_spill] sm:$0xff]  ;;  %v16380_v25 = vld [vmem:[#allocation74_spill] sm:$0xff] }
0x374a   :  { %10605 = vmatprep.subr.bf16.mxu1 %v16365_v15  ;;  %10669 = vmatprep.subr.bf16.mxu0 %v16366_v50  ;;  %v16376_v15 = vld [vmem:[#allocation51_spill] sm:$0xff] }
0x374b   :  { %v16377_v50 = vld [vmem:[#allocation7_spill] sm:$0xff] }
0x374d   :  { %10607 = vmatpush1.bf16.msra.mxu1 %v16367_v13  ;;  %10671 = vmatpush1.bf16.msra.mxu0 %v16368_v30  ;;  %v16378_v13 = vld [vmem:[#allocation8_spill] sm:$0xff] }
0x374e   :  { %10609 = vmatprep.subr.bf16.mxu1 %v16369_v51  ;;  %10673 = vmatprep.subr.bf16.mxu0 %v16370_v31 }
0x3751   :  { %10611 = vmatpush1.bf16.msra.mxu1 %v16371_v23  ;;  %10675 = vmatpush1.bf16.msra.mxu0 %v16372_v40 }
0x3752   :  { %10613 = vmatprep.subr.bf16.mxu1 %v16373_v52  ;;  %10677 = vmatprep.subr.bf16.mxu0 %v16374_v4 }
0x3755   :  { %10615 = vmatpush1.bf16.msra.mxu1 %v16375_v39  ;;  %10679 = vmatpush1.bf16.msra.mxu0 %v16376_v15 }
0x3756   :  { %10681 = vmatprep.subr.bf16.mxu1 %v16377_v50  ;;  %10745 = vmatprep.subr.bf16.mxu0 %v16378_v13 }
0x37eb   :  { %v4828_v30 = vpop.f32.mrb[60].mxu1  ;;  %v4899_v51 = vpop.f32.mrb[68].mxu0 }
0x37ec   :  { %v4904_v31 = vadd.f32 %v4828_v30, %v16379_v8  ;;  %v4906_v23 = vadd.f32 %v4899_v51, %v16380_v25  ;;  %v4830_v5 = vpop.f32.mrb[61].mxu1  ;;  %v4901_v40 = vpop.f32.mrb[69].mxu0 }
0x37ed   :  { %v4905_v52 = vadd.f32 %v4830_v5, %v16381_v32  ;;  %v4907_v4 = vadd.f32 %v4901_v40, %v16382_v0  ;;  %v16390_v40 = vld [vmem:[#allocation37_spill] sm:$0xff] }
0x37ee   :  { %v8400_v34 = vmul.f32 -1.442695, %v4904_v31 }
0x37ef   :  { %v8401_v39 = vmul.f32 -1.442695, %v4905_v52  ;;  %v8402_v15 = vmul.f32 -1.442695, %v4907_v4  ;;  %v16391_v52 = vld [vmem:[#allocation38_spill] sm:$0xff] }
0x37f0   :  { %11829 = vpow2.f32 %v8400_v34 }
0x37f1   :  { %11831 = vpow2.f32 %v8401_v39 }
0x37f2   :  { %11833 = vpow2.f32 %v8402_v15  ;;  %v16386_v15 = vld [vmem:[#allocation33_spill] sm:$0xff] }
0x37f3   :  { %11835 = vtanh.f32 %v4906_v23  ;;  %v16389_v23 = vld [vmem:[#allocation36_spill] sm:$0xff] }
0x37fa   :  { %v11830_v50 = vpop.eup %11829 }
0x37fb   :  { %v11832_v3 = vpop.eup %11831  ;;  %v4911_v13 = vadd.f32 1.0, %v11830_v50  ;;  %v16387_v50 = vld [vmem:[#allocation34_spill] sm:$0xff] }
0x37fc   :  { %v4917_v63 = vadd.f32 1.0, %v11832_v3  ;;  %v11834_v25 = vpop.eup %11833 }
0x37fd   :  { %11837 = vrcp.f32 %v4911_v13  ;;  %v11836_v8 = vpop.eup %11835  ;;  %v4924_v5 = vadd.f32 1.0, %v11834_v25  ;;  %v16388_v13 = vld [vmem:[#allocation35_spill] sm:$0xff] }
0x37fe   :  { %11839 = vrcp.f32 %v4917_v63  ;;  %v16392_v25 = vld [vmem:[#allocation39_spill] sm:$0xff] }
0x37ff   :  { %11841 = vrcp.f32 %v4924_v5  ;;  %v16397_v5 = vld [vmem:[#allocation44_spill] sm:$0xff] }
0x3807   :  { %v11838_v30 = vpop.eup %11837 }
0x3808   :  { %v11840_v51 = vpop.eup %11839  ;;  %v4928_v32 = vmul.f32 %v11838_v30, %v11836_v8  ;;  %v16393_v8 = vld [vmem:[#allocation40_spill] sm:$0xff]  ;;  %v16394_v30 = vld [vmem:[#allocation41_spill] sm:$0xff] }
0x3809   :  { %v4927_v0 = vmul.f32 %v11840_v51, %v14386_v22  ;;  %v11842_v39 = vpop.eup %11841  ;;  %v16385_v22 = vld [vmem:[#allocation32_spill] sm:$0xff]  ;;  %v16395_v51 = vld [vmem:[#allocation42_spill] sm:$0xff] }
0x380b   :  { %v14468_v31 = vadd.f32 %v4928_v32, %v4927_v0  ;;  %v16396_v32 = vld [vmem:[#allocation43_spill] sm:$0xff]  ;;  %v16398_v0 = vld [vmem:[#allocation45_spill] sm:$0xff] }
0x380d   :  { %11843 = vtanh.f32 %v14468_v31 }
0x3817   :  { %v11844_v4 = vpop.eup %11843 }
0x3818   :  { %v4931_v34 = vmul.f32 %v11844_v4, %v11842_v39  ;;  %v16399_v39 = vld [vmem:[#allocation46_spill] sm:$0xff]  ;;  %v16400_v4 = vld [vmem:[#allocation47_spill] sm:$0xff] }
0x381a   :  { %v14472_v3 = vmul.f32 %v4931_v34, %v16278_v35  ;;  %v14475_v63 = vmul.f32 %v16280_v26, %v4931_v34  ;;  %v16401_v34 = vld [vmem:[#allocation48_spill] sm:$0xff] }
0x381c   :  { %16383 = vst [vmem:[#allocation13_spill] sm:$0xff] %v14472_v3  ;;  %16384 = vst [vmem:[#allocation14_spill] sm:$0xff] %v14475_v63  ;;  %5002 = vmatprep.mubr.f32.mxu1 %v14472_v3  ;;  %5073 = vmatprep.mubr.f32.mxu0 %v14472_v3  ;;  %v16403_v3 = vld [vmem:[#allocation50_spill] sm:$0xff] }
0x381d   :  { %5003 = vmatmul.mubr.f32.vlgmr.msra.gmra.mrb[62].mxu1 %v14475_v63  ;;  %5074 = vmatmul.mubr.f32.vlgmr.msra.gmra.mrb[70].mxu0 %v14475_v63  ;;  %v16402_v63 = vld [vmem:[#allocation49_spill] sm:$0xff] }
0x381e   :  { %10683 = vmatpush1.bf16.msra.mxu1 %v13410_v44  ;;  %10747 = vmatpush1.bf16.msra.mxu0 %v13412_v17 }
0x381f   :  { %10685 = vmatprep.subr.bf16.mxu1 %v13428_v19  ;;  %10749 = vmatprep.subr.bf16.mxu0 %v13430_v53 }
0x3822   :  { %10687 = vmatpush1.bf16.msra.mxu1 %v13448_v56  ;;  %10751 = vmatpush1.bf16.msra.mxu0 %v13450_v28 }
0x3823   :  { %10689 = vmatprep.subr.bf16.mxu1 %v13468_v16  ;;  %10753 = vmatprep.subr.bf16.mxu0 %v13470_v33 }
0x3826   :  { %10691 = vmatpush1.bf16.msra.mxu1 %v13488_v37  ;;  %10755 = vmatpush1.bf16.msra.mxu0 %v13490_v58 }
0x3827   :  { %10693 = vmatprep.subr.bf16.mxu1 %v13511_v61  ;;  %10757 = vmatprep.subr.bf16.mxu0 %v13513_v41 }
0x382a   :  { %10695 = vmatpush1.bf16.msra.mxu1 %v13528_v36  ;;  %10759 = vmatpush1.bf16.msra.mxu0 %v13530_v57 }
0x382b   :  { %10697 = vmatprep.subr.bf16.mxu1 %v13540_v29  ;;  %10761 = vmatprep.subr.bf16.mxu0 %v13542_v47 }
0x382e   :  { %10699 = vmatpush1.bf16.msra.mxu1 %v13568_v12  ;;  %10763 = vmatpush1.bf16.msra.mxu0 %v13570_v14 }
0x382f   :  { %10701 = vmatprep.subr.bf16.mxu1 %v13580_v43  ;;  %10765 = vmatprep.subr.bf16.mxu0 %v16282_v24 }
0x3832   :  { %10703 = vmatpush1.bf16.msra.mxu1 %v16283_v1  ;;  %10767 = vmatpush1.bf16.msra.mxu0 %v16284_v62 }
0x3833   :  { %10705 = vmatprep.subr.bf16.mxu1 %v16285_v2  ;;  %10769 = vmatprep.subr.bf16.mxu0 %v16286_v7 }
0x3836   :  { %10707 = vmatpush1.bf16.msra.mxu1 %v16287_v54  ;;  %10771 = vmatpush1.bf16.msra.mxu0 %v16288_v48 }
0x3837   :  { %10709 = vmatprep.subr.bf16.mxu1 %v16289_v45  ;;  %10773 = vmatprep.subr.bf16.mxu0 %v16290_v59 }
0x383a   :  { %10711 = vmatpush1.bf16.msra.mxu1 %v16291_v55  ;;  %10775 = vmatpush1.bf16.msra.mxu0 %v16292_v60 }
0x383b   :  { %10713 = vmatprep.subr.bf16.mxu1 %v16293_v10  ;;  %10777 = vmatprep.subr.bf16.mxu0 %v16294_v11 }
0x383e   :  { %10715 = vmatpush1.bf16.msra.mxu1 %v16295_v9  ;;  %10779 = vmatpush1.bf16.msra.mxu0 %v16296_v42 }
0x383f   :  { %10717 = vmatprep.subr.bf16.mxu1 %v16297_v27  ;;  %10781 = vmatprep.subr.bf16.mxu0 %v16298_v6 }
0x3842   :  { %10719 = vmatpush1.bf16.msra.mxu1 %v16299_v18  ;;  %10783 = vmatpush1.bf16.msra.mxu0 %v16300_v21 }
0x3843   :  { %10721 = vmatprep.subr.bf16.mxu1 %v16301_v49  ;;  %10785 = vmatprep.subr.bf16.mxu0 %v16302_v20 }
0x3846   :  { %10723 = vmatpush1.bf16.msra.mxu1 %v16303_v38  ;;  %10787 = vmatpush1.bf16.msra.mxu0 %v16304_v46 }
0x3847   :  { %10725 = vmatprep.subr.bf16.mxu1 %v16385_v22  ;;  %10789 = vmatprep.subr.bf16.mxu0 %v16386_v15 }
0x384a   :  { %10727 = vmatpush1.bf16.msra.mxu1 %v16387_v50  ;;  %10791 = vmatpush1.bf16.msra.mxu0 %v16388_v13  ;;  %v16410_v13 = vld [vmem:[#allocation64_spill] sm:$0xff] }
0x384b   :  { %10729 = vmatprep.subr.bf16.mxu1 %v16389_v23  ;;  %10793 = vmatprep.subr.bf16.mxu0 %v16390_v40  ;;  %v16409_v23 = vld [vmem:[#allocation63_spill] sm:$0xff] }
0x384e   :  { %10731 = vmatpush1.bf16.msra.mxu1 %v16391_v52  ;;  %10795 = vmatpush1.bf16.msra.mxu0 %v16392_v25  ;;  %v16407_v25 = vld [vmem:[#allocation61_spill] sm:$0xff]  ;;  %v16408_v52 = vld [vmem:[#allocation62_spill] sm:$0xff] }
0x384f   :  { %10733 = vmatprep.subr.bf16.mxu1 %v16393_v8  ;;  %10797 = vmatprep.subr.bf16.mxu0 %v16394_v30  ;;  %v16404_v8 = vld [vmem:[#allocation51_spill] sm:$0xff] }
0x3850   :  { %v16405_v30 = vld [vmem:[#allocation7_spill] sm:$0xff] }
0x3852   :  { %10735 = vmatpush1.bf16.msra.mxu1 %v16395_v51  ;;  %10799 = vmatpush1.bf16.msra.mxu0 %v16396_v32  ;;  %v16406_v51 = vld [vmem:[#allocation8_spill] sm:$0xff] }
0x3853   :  { %10737 = vmatprep.subr.bf16.mxu1 %v16397_v5  ;;  %10801 = vmatprep.subr.bf16.mxu0 %v16398_v0 }
0x3856   :  { %10739 = vmatpush1.bf16.msra.mxu1 %v16399_v39  ;;  %10803 = vmatpush1.bf16.msra.mxu0 %v16400_v4 }
0x3857   :  { %10741 = vmatprep.subr.bf16.mxu1 %v16401_v34  ;;  %10805 = vmatprep.subr.bf16.mxu0 %v16402_v63 }
0x385a   :  { %10743 = vmatpush1.bf16.msra.mxu1 %v16403_v3  ;;  %10807 = vmatpush1.bf16.msra.mxu0 %v16404_v8 }
0x385b   :  { %10809 = vmatprep.subr.bf16.mxu1 %v16405_v30  ;;  %10873 = vmatprep.subr.bf16.mxu0 %v16406_v51 }
0x38f0   :  { %v5004_v32 = vpop.f32.mrb[62].mxu1  ;;  %v5075_v5 = vpop.f32.mrb[70].mxu0 }
0x38f1   :  { %v5080_v0 = vadd.f32 %v5004_v32, %v16407_v25  ;;  %v5082_v39 = vadd.f32 %v5075_v5, %v16408_v52  ;;  %v5006_v40 = vpop.f32.mrb[63].mxu1  ;;  %v5077_v4 = vpop.f32.mrb[71].mxu0 }
0x38f2   :  { %v5081_v34 = vadd.f32 %v5006_v40, %v16409_v23  ;;  %v5083_v63 = vadd.f32 %v5077_v4, %v16410_v13  ;;  %v16416_v4 = vld [vmem:[#allocation37_spill] sm:$0xff] }
0x38f3   :  { %v8403_v50 = vmul.f32 -1.442695, %v5080_v0 }
0x38f4   :  { %v8404_v3 = vmul.f32 -1.442695, %v5081_v34  ;;  %v8405_v8 = vmul.f32 -1.442695, %v5083_v63  ;;  %v16417_v34 = vld [vmem:[#allocation38_spill] sm:$0xff] }
0x38f5   :  { %11845 = vpow2.f32 %v8403_v50 }
0x38f6   :  { %11847 = vpow2.f32 %v8404_v3 }
0x38f7   :  { %11849 = vpow2.f32 %v8405_v8  ;;  %v16412_v8 = vld [vmem:[#allocation33_spill] sm:$0xff] }
0x38f8   :  { %11851 = vtanh.f32 %v5082_v39  ;;  %v16415_v39 = vld [vmem:[#allocation36_spill] sm:$0xff] }
0x38ff   :  { %v11846_v30 = vpop.eup %11845 }
0x3900   :  { %v11848_v15 = vpop.eup %11847  ;;  %v5087_v51 = vadd.f32 1.0, %v11846_v30  ;;  %v16413_v30 = vld [vmem:[#allocation34_spill] sm:$0xff] }
0x3901   :  { %v5093_v22 = vadd.f32 1.0, %v11848_v15  ;;  %v11850_v52 = vpop.eup %11849 }
0x3902   :  { %11853 = vrcp.f32 %v5087_v51  ;;  %v11852_v25 = vpop.eup %11851  ;;  %v5100_v40 = vadd.f32 1.0, %v11850_v52  ;;  %v16414_v51 = vld [vmem:[#allocation35_spill] sm:$0xff] }
0x3903   :  { %11855 = vrcp.f32 %v5093_v22  ;;  %v16418_v52 = vld [vmem:[#allocation39_spill] sm:$0xff] }
0x3904   :  { %11857 = vrcp.f32 %v5100_v40  ;;  %v16423_v40 = vld [vmem:[#allocation44_spill] sm:$0xff] }
0x390c   :  { %v11854_v32 = vpop.eup %11853 }
0x390d   :  { %v11856_v5 = vpop.eup %11855  ;;  %v5104_v23 = vmul.f32 %v11854_v32, %v11852_v25  ;;  %v16419_v25 = vld [vmem:[#allocation40_spill] sm:$0xff]  ;;  %v16420_v32 = vld [vmem:[#allocation41_spill] sm:$0xff] }
0x390e   :  { %v5103_v13 = vmul.f32 %v11856_v5, %v14468_v31  ;;  %v11858_v3 = vpop.eup %11857  ;;  %v16411_v31 = vld [vmem:[#allocation32_spill] sm:$0xff]  ;;  %v16421_v5 = vld [vmem:[#allocation42_spill] sm:$0xff] }
0x3910   :  { %v14550_v0 = vadd.f32 %v5104_v23, %v5103_v13  ;;  %v16422_v23 = vld [vmem:[#allocation43_spill] sm:$0xff]  ;;  %v16424_v13 = vld [vmem:[#allocation45_spill] sm:$0xff] }
0x3912   :  { %11859 = vtanh.f32 %v14550_v0 }
0x391c   :  { %v11860_v63 = vpop.eup %11859 }
0x391d   :  { %v5107_v50 = vmul.f32 %v11860_v63, %v11858_v3  ;;  %v16425_v3 = vld [vmem:[#allocation46_spill] sm:$0xff]  ;;  %v16426_v63 = vld [vmem:[#allocation47_spill] sm:$0xff] }
0x391f   :  { %v14554_v15 = vmul.f32 %v5107_v50, %v16278_v35  ;;  %v14557_v22 = vmul.f32 %v16280_v26, %v5107_v50  ;;  %v16427_v50 = vld [vmem:[#allocation48_spill] sm:$0xff] }
0x3921   :  { %5202 = vmatprep.mubr.f32.mxu1 %v14554_v15  ;;  %5273 = vmatprep.mubr.f32.mxu0 %v14554_v15 }
0x3922   :  { %5203 = vmatmul.mubr.f32.vlgmr.msra.gmra.mrb[64].mxu1 %v14557_v22  ;;  %5274 = vmatmul.mubr.f32.vlgmr.msra.gmra.mrb[72].mxu0 %v14557_v22 }
0x3923   :  { %10811 = vmatpush1.bf16.msra.mxu1 %v13410_v44  ;;  %10875 = vmatpush1.bf16.msra.mxu0 %v13412_v17 }
0x3924   :  { %10813 = vmatprep.subr.bf16.mxu1 %v13428_v19  ;;  %10877 = vmatprep.subr.bf16.mxu0 %v13430_v53 }
0x3927   :  { %10815 = vmatpush1.bf16.msra.mxu1 %v13448_v56  ;;  %10879 = vmatpush1.bf16.msra.mxu0 %v13450_v28 }
0x3928   :  { %10817 = vmatprep.subr.bf16.mxu1 %v13468_v16  ;;  %10881 = vmatprep.subr.bf16.mxu0 %v13470_v33 }
0x392b   :  { %10819 = vmatpush1.bf16.msra.mxu1 %v13488_v37  ;;  %10883 = vmatpush1.bf16.msra.mxu0 %v13490_v58 }
0x392c   :  { %10821 = vmatprep.subr.bf16.mxu1 %v13511_v61  ;;  %10885 = vmatprep.subr.bf16.mxu0 %v13513_v41 }
0x392f   :  { %10823 = vmatpush1.bf16.msra.mxu1 %v13528_v36  ;;  %10887 = vmatpush1.bf16.msra.mxu0 %v13530_v57 }
0x3930   :  { %10825 = vmatprep.subr.bf16.mxu1 %v13540_v29  ;;  %10889 = vmatprep.subr.bf16.mxu0 %v13542_v47 }
0x3933   :  { %10827 = vmatpush1.bf16.msra.mxu1 %v13568_v12  ;;  %10891 = vmatpush1.bf16.msra.mxu0 %v13570_v14 }
0x3934   :  { %10829 = vmatprep.subr.bf16.mxu1 %v13580_v43  ;;  %10893 = vmatprep.subr.bf16.mxu0 %v16282_v24 }
0x3937   :  { %10831 = vmatpush1.bf16.msra.mxu1 %v16283_v1  ;;  %10895 = vmatpush1.bf16.msra.mxu0 %v16284_v62 }
0x3938   :  { %10833 = vmatprep.subr.bf16.mxu1 %v16285_v2  ;;  %10897 = vmatprep.subr.bf16.mxu0 %v16286_v7 }
0x393b   :  { %10835 = vmatpush1.bf16.msra.mxu1 %v16287_v54  ;;  %10899 = vmatpush1.bf16.msra.mxu0 %v16288_v48 }
0x393c   :  { %10837 = vmatprep.subr.bf16.mxu1 %v16289_v45  ;;  %10901 = vmatprep.subr.bf16.mxu0 %v16290_v59 }
0x393f   :  { %10839 = vmatpush1.bf16.msra.mxu1 %v16291_v55  ;;  %10903 = vmatpush1.bf16.msra.mxu0 %v16292_v60 }
0x3940   :  { %10841 = vmatprep.subr.bf16.mxu1 %v16293_v10  ;;  %10905 = vmatprep.subr.bf16.mxu0 %v16294_v11 }
0x3943   :  { %10843 = vmatpush1.bf16.msra.mxu1 %v16295_v9  ;;  %10907 = vmatpush1.bf16.msra.mxu0 %v16296_v42 }
0x3944   :  { %10845 = vmatprep.subr.bf16.mxu1 %v16297_v27  ;;  %10909 = vmatprep.subr.bf16.mxu0 %v16298_v6 }
0x3947   :  { %10847 = vmatpush1.bf16.msra.mxu1 %v16299_v18  ;;  %10911 = vmatpush1.bf16.msra.mxu0 %v16300_v21 }
0x3948   :  { %10849 = vmatprep.subr.bf16.mxu1 %v16301_v49  ;;  %10913 = vmatprep.subr.bf16.mxu0 %v16302_v20 }
0x394b   :  { %10851 = vmatpush1.bf16.msra.mxu1 %v16303_v38  ;;  %10915 = vmatpush1.bf16.msra.mxu0 %v16304_v46 }
0x394c   :  { %10853 = vmatprep.subr.bf16.mxu1 %v16411_v31  ;;  %10917 = vmatprep.subr.bf16.mxu0 %v16412_v8  ;;  %v16436_v8 = vld [vmem:[#allocation68_spill] sm:$0xff] }
0x394f   :  { %10855 = vmatpush1.bf16.msra.mxu1 %v16413_v30  ;;  %10919 = vmatpush1.bf16.msra.mxu0 %v16414_v51  ;;  %v16435_v30 = vld [vmem:[#allocation67_spill] sm:$0xff] }
0x3950   :  { %10857 = vmatprep.subr.bf16.mxu1 %v16415_v39  ;;  %10921 = vmatprep.subr.bf16.mxu0 %v16416_v4  ;;  %v16433_v4 = vld [vmem:[#allocation65_spill] sm:$0xff]  ;;  %v16434_v39 = vld [vmem:[#allocation66_spill] sm:$0xff] }
0x3953   :  { %10859 = vmatpush1.bf16.msra.mxu1 %v16417_v34  ;;  %10923 = vmatpush1.bf16.msra.mxu0 %v16418_v52  ;;  %v16428_v34 = vld [vmem:[#allocation49_spill] sm:$0xff]  ;;  %v16429_v52 = vld [vmem:[#allocation50_spill] sm:$0xff] }
0x3954   :  { %10861 = vmatprep.subr.bf16.mxu1 %v16419_v25  ;;  %10925 = vmatprep.subr.bf16.mxu0 %v16420_v32  ;;  %v16430_v25 = vld [vmem:[#allocation51_spill] sm:$0xff] }
0x3955   :  { %v16431_v32 = vld [vmem:[#allocation7_spill] sm:$0xff] }
0x3957   :  { %10863 = vmatpush1.bf16.msra.mxu1 %v16421_v5  ;;  %10927 = vmatpush1.bf16.msra.mxu0 %v16422_v23  ;;  %v16432_v5 = vld [vmem:[#allocation8_spill] sm:$0xff] }
0x3958   :  { %10865 = vmatprep.subr.bf16.mxu1 %v16423_v40  ;;  %10929 = vmatprep.subr.bf16.mxu0 %v16424_v13 }
0x395b   :  { %10867 = vmatpush1.bf16.msra.mxu1 %v16425_v3  ;;  %10931 = vmatpush1.bf16.msra.mxu0 %v16426_v63 }
0x395c   :  { %10869 = vmatprep.subr.bf16.mxu1 %v16427_v50  ;;  %10933 = vmatprep.subr.bf16.mxu0 %v16428_v34 }
0x395f   :  { %10871 = vmatpush1.bf16.msra.mxu1 %v16429_v52  ;;  %10935 = vmatpush1.bf16.msra.mxu0 %v16430_v25 }
0x3960   :  { %10937 = vmatprep.subr.bf16.mxu1 %v16431_v32  ;;  %11001 = vmatprep.subr.bf16.mxu0 %v16432_v5 }
0x39f5   :  { %v5204_v23 = vpop.f32.mrb[64].mxu1  ;;  %v5275_v40 = vpop.f32.mrb[72].mxu0 }
0x39f6   :  { %v5280_v13 = vadd.f32 %v5204_v23, %v16433_v4  ;;  %v5282_v3 = vadd.f32 %v5275_v40, %v16434_v39  ;;  %v5206_v51 = vpop.f32.mrb[65].mxu1  ;;  %v5277_v63 = vpop.f32.mrb[73].mxu0 }
0x39f7   :  { %v5281_v50 = vadd.f32 %v5206_v51, %v16435_v30  ;;  %v5283_v34 = vadd.f32 %v5277_v63, %v16436_v8  ;;  %v16439_v63 = vld [vmem:[#allocation14_spill] sm:$0xff] }
0x39f8   :  { %v8406_v31 = vmul.f32 -1.442695, %v5280_v13 }
0x39f9   :  { %v8407_v52 = vmul.f32 -1.442695, %v5281_v50  ;;  %v8408_v25 = vmul.f32 -1.442695, %v5283_v34  ;;  %v5712_v34 = vrot.slane %v14557_v22, 4 }
0x39fa   :  { %11861 = vpow2.f32 %v8406_v31  ;;  %v5713_v31 = vrot.slane %v14554_v15, 4 }
0x39fb   :  { %11863 = vpow2.f32 %v8407_v52  ;;  %v5716_v50 = vadd.f32 %v5712_v34, %v16439_v63 }
0x39fc   :  { %11865 = vpow2.f32 %v8408_v25  ;;  %v16438_v25 = vld [vmem:[#allocation13_spill] sm:$0xff] }
0x39fd   :  { %11867 = vtanh.f32 %v5282_v3  ;;  %v5717_v3 = vadd.f32 %v5713_v31, %v16438_v25 }
0x39ff   :  { %v5759_v34 = vrot.slane %v5717_v3, 4 }
0x3a04   :  { %v11862_v32 = vpop.eup %11861 }
0x3a05   :  { %v11864_v46 = vpop.eup %11863  ;;  %v5287_v5 = vadd.f32 1.0, %v11862_v32 }
0x3a06   :  { %v5293_v38 = vadd.f32 1.0, %v11864_v46  ;;  %v11866_v39 = vpop.eup %11865 }
0x3a07   :  { %11869 = vrcp.f32 %v5287_v5  ;;  %v11868_v4 = vpop.eup %11867  ;;  %v5300_v51 = vadd.f32 1.0, %v11866_v39  ;;  %v16440_v5 = vld [vmem:[#allocation11_spill] sm:$0xff] }
0x3a08   :  { %11871 = vrcp.f32 %v5293_v38  ;;  %v5729_v39 = vrot.slane %v16440_v5, 4 }
0x3a09   :  { %11873 = vrcp.f32 %v5300_v51 }
0x3a11   :  { %v11870_v23 = vpop.eup %11869 }
0x3a12   :  { %v11872_v40 = vpop.eup %11871  ;;  %v5304_v30 = vmul.f32 %v11870_v23, %v11868_v4  ;;  %v16441_v4 = vld [vmem:[#allocation12_spill] sm:$0xff] }
0x3a13   :  { %v5303_v8 = vmul.f32 %v11872_v40, %v14550_v0  ;;  %v11874_v46 = vpop.eup %11873  ;;  %v5728_v23 = vrot.slane %v16441_v4, 4  ;;  %v5721_v40 = vrot.slane %v16438_v25, 4 }
0x3a15   :  { %v14632_v13 = vadd.f32 %v5304_v30, %v5303_v8  ;;  %v5720_v30 = vrot.slane %v16439_v63, 4 }
0x3a17   :  { %16437 = vst [vmem:[#allocation15_spill] sm:$0xff] %v14632_v13  ;;  %11875 = vtanh.f32 %v14632_v13 }
0x3a21   :  { %v11876_v52 = vpop.eup %11875 }
0x3a22   :  { %v5307_v38 = vmul.f32 %v11876_v52, %v11874_v46  ;;  %v5758_v52 = vrot.slane %v5716_v50, 4 }
0x3a24   :  { %v5309_v32 = vmul.f32 %v5307_v38, %v16278_v35  ;;  %v5308_v0 = vmul.f32 %v16280_v26, %v5307_v38  ;;  %v5725_v38 = vadd.f32 %v5721_v40, %v14554_v15  ;;  %v5724_v26 = vadd.f32 %v5720_v30, %v14557_v22 }
0x3a26   :  { %5378 = vmatprep.mubr.f32.mxu1 %v5309_v32  ;;  %5449 = vmatprep.mubr.f32.mxu0 %v5309_v32  ;;  %v5705_v51 = vrot.slane %v5309_v32, 4  ;;  %v5704_v8 = vrot.slane %v5308_v0, 4  ;;  %v5733_v46 = vadd.f32 %v5729_v39, %v5309_v32  ;;  %v5732_v31 = vadd.f32 %v5728_v23, %v5308_v0 }
0x3a27   :  { %5379 = vmatmul.mubr.f32.vlgmr.msra.gmra.mrb[66].mxu1 %v5308_v0  ;;  %5450 = vmatmul.mubr.f32.vlgmr.msra.gmra.mrb[74].mxu0 %v5308_v0 }
0x3a28   :  { %10939 = vmatpush1.bf16.msra.mxu1 %v13410_v44  ;;  %11003 = vmatpush1.bf16.msra.mxu0 %v13412_v17  ;;  %v5709_v25 = vadd.f32 %v5705_v51, %v16440_v5  ;;  %v5708_v63 = vadd.f32 %v5704_v8, %v16441_v4  ;;  %v5765_v35 = vrot.slane %v5733_v46, 4  ;;  %v5764_v13 = vrot.slane %v5732_v31, 4  ;;  %v16468_v4 = vld [vmem:[#allocation15_spill] sm:$0xff]  ;;  %v16469_v46 = vld [vmem:[#allocation6_spill] sm:$0xff] }
0x3a29   :  { %10941 = vmatprep.subr.bf16.mxu1 %v13428_v19  ;;  %11005 = vmatprep.subr.bf16.mxu0 %v13430_v53  ;;  %v16442_v19 = vld [vmem:[#allocation30_spill] sm:$0xff]  ;;  %v16443_v53 = vld [vmem:[#allocation31_spill] sm:$0xff] }
0x3a2a   :  { %v14654_v3 = vsel %vm297_vm2, %v5709_v25, %v5759_v34  ;;  %v14657_v15 = vsel %vm297_vm2, %v5708_v63, %v5758_v52  ;;  %v14660_v44 = vsel %vm297_vm2, %v5725_v38, %v5765_v35  ;;  %v14663_v17 = vsel %vm297_vm2, %v5724_v26, %v5764_v13  ;;  %v16462_v35 = vld [vmem:[#allocation50_spill] sm:$0xff]  ;;  %v16470_v34 = vld [vmem:[#allocation5_spill] sm:$0xff]  ;;  %v120_v25 = vld [vmem:[%s15972_s7 + $0x88] sm:$0xff] }
0x3a2b   :  { %v119_v38 = vld [vmem:[%s15972_s7 + $0x80] sm:$0xff] }
0x3a2c   :  { %10943 = vmatpush1.bf16.msra.mxu1 %v13448_v56  ;;  %11007 = vmatpush1.bf16.msra.mxu0 %v13450_v28  ;;  %v16444_v56 = vld [vmem:[#allocation32_spill] sm:$0xff]  ;;  %v16445_v28 = vld [vmem:[#allocation33_spill] sm:$0xff]  ;;  %v151_v63 = vld [vmem:[%s15973_s8 + $0x80] sm:$0xff] }
0x3a2d   :  { %10945 = vmatprep.subr.bf16.mxu1 %v13468_v16  ;;  %11009 = vmatprep.subr.bf16.mxu0 %v13470_v33  ;;  %v16446_v16 = vld [vmem:[#allocation34_spill] sm:$0xff]  ;;  %v16447_v33 = vld [vmem:[#allocation35_spill] sm:$0xff] }
0x3a30   :  { %10947 = vmatpush1.bf16.msra.mxu1 %v13488_v37  ;;  %11011 = vmatpush1.bf16.msra.mxu0 %v13490_v58  ;;  %v16448_v37 = vld [vmem:[#allocation36_spill] sm:$0xff]  ;;  %v16449_v58 = vld [vmem:[#allocation37_spill] sm:$0xff] }
0x3a31   :  { %10949 = vmatprep.subr.bf16.mxu1 %v13511_v61  ;;  %11013 = vmatprep.subr.bf16.mxu0 %v13513_v41  ;;  %v16450_v61 = vld [vmem:[#allocation38_spill] sm:$0xff]  ;;  %v16451_v41 = vld [vmem:[#allocation39_spill] sm:$0xff] }
0x3a34   :  { %10951 = vmatpush1.bf16.msra.mxu1 %v13528_v36  ;;  %11015 = vmatpush1.bf16.msra.mxu0 %v13530_v57  ;;  %v16452_v36 = vld [vmem:[#allocation40_spill] sm:$0xff]  ;;  %v16453_v57 = vld [vmem:[#allocation41_spill] sm:$0xff] }
0x3a35   :  { %10953 = vmatprep.subr.bf16.mxu1 %v13540_v29  ;;  %11017 = vmatprep.subr.bf16.mxu0 %v13542_v47  ;;  %v16454_v29 = vld [vmem:[#allocation42_spill] sm:$0xff]  ;;  %v16455_v47 = vld [vmem:[#allocation43_spill] sm:$0xff] }
0x3a38   :  { %10955 = vmatpush1.bf16.msra.mxu1 %v13568_v12  ;;  %11019 = vmatpush1.bf16.msra.mxu0 %v13570_v14  ;;  %v16456_v12 = vld [vmem:[#allocation44_spill] sm:$0xff]  ;;  %v16457_v14 = vld [vmem:[#allocation45_spill] sm:$0xff] }
0x3a39   :  { %10957 = vmatprep.subr.bf16.mxu1 %v13580_v43  ;;  %11021 = vmatprep.subr.bf16.mxu0 %v16282_v24  ;;  %v16458_v43 = vld [vmem:[#allocation46_spill] sm:$0xff]  ;;  %v16464_v24 = vld [vmem:[#allocation53_spill] sm:$0xff] }
0x3a3c   :  { %10959 = vmatpush1.bf16.msra.mxu1 %v16283_v1  ;;  %11023 = vmatpush1.bf16.msra.mxu0 %v16284_v62  ;;  %v16465_v62 = vld [vmem:[#allocation54_spill] sm:$0xff] }
0x3a3d   :  { %10961 = vmatprep.subr.bf16.mxu1 %v16285_v2  ;;  %11025 = vmatprep.subr.bf16.mxu0 %v16286_v7 }
0x3a40   :  { %10963 = vmatpush1.bf16.msra.mxu1 %v16287_v54  ;;  %11027 = vmatpush1.bf16.msra.mxu0 %v16288_v48  ;;  %v16466_v48 = vld [vmem:[#allocation55_spill] sm:$0xff] }
0x3a41   :  { %10965 = vmatprep.subr.bf16.mxu1 %v16289_v45  ;;  %11029 = vmatprep.subr.bf16.mxu0 %v16290_v59  ;;  %v16467_v59 = vld [vmem:[#allocation56_spill] sm:$0xff] }
0x3a44   :  { %10967 = vmatpush1.bf16.msra.mxu1 %v16291_v55  ;;  %11031 = vmatpush1.bf16.msra.mxu0 %v16292_v60 }
0x3a45   :  { %10969 = vmatprep.subr.bf16.mxu1 %v16293_v10  ;;  %11033 = vmatprep.subr.bf16.mxu0 %v16294_v11 }
0x3a48   :  { %10971 = vmatpush1.bf16.msra.mxu1 %v16295_v9  ;;  %11035 = vmatpush1.bf16.msra.mxu0 %v16296_v42 }
0x3a49   :  { %10973 = vmatprep.subr.bf16.mxu1 %v16297_v27  ;;  %11037 = vmatprep.subr.bf16.mxu0 %v16298_v6 }
0x3a4c   :  { %10975 = vmatpush1.bf16.msra.mxu1 %v16299_v18  ;;  %11039 = vmatpush1.bf16.msra.mxu0 %v16300_v21  ;;  %v16459_v21 = vld [vmem:[#allocation47_spill] sm:$0xff] }
0x3a4d   :  { %10977 = vmatprep.subr.bf16.mxu1 %v16301_v49  ;;  %11041 = vmatprep.subr.bf16.mxu0 %v16302_v20  ;;  %v16460_v49 = vld [vmem:[#allocation48_spill] sm:$0xff]  ;;  %v16461_v20 = vld [vmem:[#allocation49_spill] sm:$0xff]  ;;  %v16463_v18 = vld [vmem:[#allocation51_spill] sm:$0xff] }
0x3a50   :  { %10979 = vmatpush1.bf16.msra.mxu1 %v16442_v19  ;;  %11043 = vmatpush1.bf16.msra.mxu0 %v16443_v53  ;;  %v11064_v19 = vpack.c.bf16 %v120_v25, %v119_v38  ;;  %v152_v53 = vld [vmem:[%s15973_s8 + $0x88] sm:$0xff]  ;;  %v143_v25 = vld [vmem:[%s15973_s8 + $0x40] sm:$0xff] }
0x3a51   :  { %10981 = vmatprep.subr.bf16.mxu1 %v16444_v56  ;;  %11045 = vmatprep.subr.bf16.mxu0 %v16445_v28  ;;  %v103_v56 = vld [vmem:[%s15972_s7] sm:$0xff]  ;;  %v104_v28 = vld [vmem:[%s15972_s7 + $0x8] sm:$0xff] }
0x3a52   :  { %v112_v38 = vld [vmem:[%s15972_s7 + $0x48] sm:$0xff] }
0x3a54   :  { %10983 = vmatpush1.bf16.msra.mxu1 %v16446_v16  ;;  %11047 = vmatpush1.bf16.msra.mxu0 %v16447_v33  ;;  %v11096_v16 = vpack.c.bf16 %v152_v53, %v151_v63  ;;  %v11066_v33 = vpack.c.bf16 %v104_v28, %v103_v56  ;;  %v129_v53 = vld [vmem:[%s15972_s7 + $0xd0] sm:$0xff]  ;;  %v130_v56 = vld [vmem:[%s15972_s7 + $0xd8] sm:$0xff] }
0x3a55   :  { %10985 = vmatprep.subr.bf16.mxu1 %v16448_v37  ;;  %11049 = vmatprep.subr.bf16.mxu0 %v16449_v58  ;;  %v135_v37 = vld [vmem:[%s15973_s8] sm:$0xff]  ;;  %v136_v58 = vld [vmem:[%s15973_s8 + $0x8] sm:$0xff] }
0x3a58   :  { %10987 = vmatpush1.bf16.msra.mxu1 %v16450_v61  ;;  %11051 = vmatpush1.bf16.msra.mxu0 %v16451_v41  ;;  %v11098_v61 = vpack.c.bf16 %v136_v58, %v135_v37  ;;  %v121_v41 = vld [vmem:[%s15972_s7 + $0x90] sm:$0xff]  ;;  %v162_v37 = vld [vmem:[%s15973_s8 + $0xd8] sm:$0xff] }
0x3a59   :  { %10989 = vmatprep.subr.bf16.mxu1 %v16452_v36  ;;  %11053 = vmatprep.subr.bf16.mxu0 %v16453_v57  ;;  %v122_v36 = vld [vmem:[%s15972_s7 + $0x98] sm:$0xff]  ;;  %v153_v57 = vld [vmem:[%s15973_s8 + $0x90] sm:$0xff] }
0x3a5a   :  { %v113_v58 = vld [vmem:[%s15972_s7 + $0x50] sm:$0xff] }
0x3a5c   :  { %10991 = vmatpush1.bf16.msra.mxu1 %v16454_v29  ;;  %11055 = vmatpush1.bf16.msra.mxu0 %v16455_v47  ;;  %v11068_v29 = vpack.c.bf16 %v122_v36, %v121_v41  ;;  %v154_v47 = vld [vmem:[%s15973_s8 + $0x98] sm:$0xff]  ;;  %v145_v36 = vld [vmem:[%s15973_s8 + $0x50] sm:$0xff] }
0x3a5d   :  { %10993 = vmatprep.subr.bf16.mxu1 %v16456_v12  ;;  %11057 = vmatprep.subr.bf16.mxu0 %v16457_v14  ;;  %v105_v12 = vld [vmem:[%s15972_s7 + $0x10] sm:$0xff]  ;;  %v106_v14 = vld [vmem:[%s15972_s7 + $0x18] sm:$0xff] }
0x3a5e   :  { %v114_v41 = vld [vmem:[%s15972_s7 + $0x58] sm:$0xff] }
0x3a60   :  { %10995 = vmatpush1.bf16.msra.mxu1 %v16458_v43  ;;  %11059 = vmatpush1.bf16.msra.mxu0 %v16459_v21  ;;  %v11100_v43 = vpack.c.bf16 %v154_v47, %v153_v57  ;;  %v11070_v21 = vpack.c.bf16 %v106_v14, %v105_v12  ;;  %v146_v57 = vld [vmem:[%s15973_s8 + $0x58] sm:$0xff]  ;;  %v131_v47 = vld [vmem:[%s15972_s7 + $0xe0] sm:$0xff]  ;;  %v132_v12 = vld [vmem:[%s15972_s7 + $0xe8] sm:$0xff] }
0x3a61   :  { %10997 = vmatprep.subr.bf16.mxu1 %v16460_v49  ;;  %11061 = vmatprep.subr.bf16.mxu0 %v16461_v20  ;;  %v137_v49 = vld [vmem:[%s15973_s8 + $0x10] sm:$0xff]  ;;  %v138_v20 = vld [vmem:[%s15973_s8 + $0x18] sm:$0xff]  ;;  %v163_v14 = vld [vmem:[%s15973_s8 + $0xe0] sm:$0xff] }
0x3a64   :  { %10999 = vmatpush1.bf16.msra.mxu1 %v16462_v35  ;;  %11063 = vmatpush1.bf16.msra.mxu0 %v16463_v18  ;;  %v11102_v35 = vpack.c.bf16 %v138_v20, %v137_v49  ;;  %v123_v18 = vld [vmem:[%s15972_s7 + $0xa0] sm:$0xff]  ;;  %v164_v49 = vld [vmem:[%s15973_s8 + $0xe8] sm:$0xff] }
0x3a65   :  { %11065 = vmatprep.subr.bf16.mxu1 %v11064_v19  ;;  %11097 = vmatprep.subr.bf16.mxu0 %v11096_v16  ;;  %v144_v19 = vld [vmem:[%s15973_s8 + $0x48] sm:$0xff]  ;;  %v11084_v16 = vpack.c.bf16 %v130_v56, %v129_v53  ;;  %v115_v20 = vld [vmem:[%s15972_s7 + $0x60] sm:$0xff] }
0x3a66   :  { %v11114_v28 = vpack.c.bf16 %v144_v19, %v143_v25 }
0x3afa   :  { %v5380_v26 = vpop.f32.mrb[66].mxu1  ;;  %v5451_v6 = vpop.f32.mrb[74].mxu0 }
0x3afb   :  { %v5456_v1 = vadd.f32 %v5380_v26, %v16464_v24  ;;  %v5458_v2 = vadd.f32 %v5451_v6, %v16465_v62  ;;  %v5382_v7 = vpop.f32.mrb[67].mxu1  ;;  %v5453_v54 = vpop.f32.mrb[75].mxu0  ;;  %v124_v26 = vld [vmem:[%s15972_s7 + $0xa8] sm:$0xff]  ;;  %v155_v6 = vld [vmem:[%s15973_s8 + $0xa0] sm:$0xff] }
0x3afc   :  { %v5457_v45 = vadd.f32 %v5382_v7, %v16466_v48  ;;  %v5459_v55 = vadd.f32 %v5453_v54, %v16467_v59  ;;  %v11072_v24 = vpack.c.bf16 %v124_v26, %v123_v18  ;;  %v107_v62 = vld [vmem:[%s15972_s7 + $0x20] sm:$0xff]  ;;  %v11120_v18 = vpack.c.bf16 %v164_v49, %v163_v14  ;;  %v16475_v14 = vld [vmem:[#allocation9_spill] sm:$0xff] }
0x3afd   :  { %v8409_v60 = vmul.f32 -1.442695, %v5456_v1  ;;  %v156_v1 = vld [vmem:[%s15973_s8 + $0xa8] sm:$0xff]  ;;  %v139_v48 = vld [vmem:[%s15973_s8 + $0x20] sm:$0xff] }
0x3afe   :  { %v8410_v10 = vmul.f32 -1.442695, %v5457_v45  ;;  %v8411_v11 = vmul.f32 -1.442695, %v5459_v55  ;;  %v11104_v7 = vpack.c.bf16 %v156_v1, %v155_v6  ;;  %v140_v45 = vld [vmem:[%s15973_s8 + $0x28] sm:$0xff]  ;;  %v125_v55 = vld [vmem:[%s15972_s7 + $0xb0] sm:$0xff] }
0x3aff   :  { %11877 = vpow2.f32 %v8409_v60  ;;  %v11106_v59 = vpack.c.bf16 %v140_v45, %v139_v48  ;;  %v126_v60 = vld [vmem:[%s15972_s7 + $0xb8] sm:$0xff]  ;;  %v147_v26 = vld [vmem:[%s15973_s8 + $0x60] sm:$0xff]  ;;  %v148_v6 = vld [vmem:[%s15973_s8 + $0x68] sm:$0xff] }
0x3b00   :  { %11879 = vpow2.f32 %v8410_v10  ;;  %v157_v10 = vld [vmem:[%s15973_s8 + $0xb0] sm:$0xff]  ;;  %v134_v1 = vld [vmem:[%s15972_s7 + $0xf8] sm:$0xff] }
0x3b01   :  { %11881 = vpow2.f32 %v8411_v11  ;;  %v11076_v11 = vpack.c.bf16 %v126_v60, %v125_v55  ;;  %v117_v45 = vld [vmem:[%s15972_s7 + $0x70] sm:$0xff] }
0x3b02   :  { %11883 = vtanh.f32 %v5458_v2  ;;  %v108_v2 = vld [vmem:[%s15972_s7 + $0x28] sm:$0xff]  ;;  %v149_v60 = vld [vmem:[%s15973_s8 + $0x70] sm:$0xff] }
0x3b03   :  { %v11074_v54 = vpack.c.bf16 %v108_v2, %v107_v62  ;;  %v165_v62 = vld [vmem:[%s15973_s8 + $0xf0] sm:$0xff]  ;;  %v166_v2 = vld [vmem:[%s15973_s8 + $0xf8] sm:$0xff] }
0x3b04   :  { %v11124_v55 = vpack.c.bf16 %v166_v2, %v165_v62 }
0x3b09   :  { %v11878_v9 = vpop.eup %11877 }
0x3b0a   :  { %v11880_v42 = vpop.eup %11879  ;;  %v5463_v27 = vadd.f32 1.0, %v11878_v9  ;;  %v158_v9 = vld [vmem:[%s15973_s8 + $0xb8] sm:$0xff] }
0x3b0b   :  { %v5469_v22 = vadd.f32 1.0, %v11880_v42  ;;  %v11882_v13 = vpop.eup %11881  ;;  %v109_v42 = vld [vmem:[%s15972_s7 + $0x30] sm:$0xff] }
0x3b0c   :  { %11885 = vrcp.f32 %v5463_v27  ;;  %v11884_v50 = vpop.eup %11883  ;;  %v5476_v39 = vadd.f32 1.0, %v11882_v13  ;;  %v110_v27 = vld [vmem:[%s15972_s7 + $0x38] sm:$0xff] }
0x3b0d   :  { %11887 = vrcp.f32 %v5469_v22  ;;  %v11108_v22 = vpack.c.bf16 %v158_v9, %v157_v10  ;;  %v11078_v13 = vpack.c.bf16 %v110_v27, %v109_v42  ;;  %v150_v10 = vld [vmem:[%s15973_s8 + $0x78] sm:$0xff] }
0x3b0e   :  { %11889 = vrcp.f32 %v5476_v39  ;;  %v128_v39 = vld [vmem:[%s15972_s7 + $0xc8] sm:$0xff]  ;;  %v11126_v9 = vpack.c.bf16 %v150_v10, %v149_v60 }
0x3b16   :  { %v11886_v32 = vpop.eup %11885 }
0x3b17   :  { %v11888_v0 = vpop.eup %11887  ;;  %v5480_v5 = vmul.f32 %v11886_v32, %v11884_v50  ;;  %v141_v50 = vld [vmem:[%s15973_s8 + $0x30] sm:$0xff]  ;;  %v142_v32 = vld [vmem:[%s15973_s8 + $0x38] sm:$0xff] }
0x3b18   :  { %v5479_v23 = vmul.f32 %v11888_v0, %v16468_v4  ;;  %v11890_v30 = vpop.eup %11889  ;;  %v127_v0 = vld [vmem:[%s15972_s7 + $0xc0] sm:$0xff] }
0x3b19   :  { %v159_v4 = vld [vmem:[%s15973_s8 + $0xc0] sm:$0xff] }
0x3b1a   :  { %v14728_v40 = vadd.f32 %v5480_v5, %v5479_v23  ;;  %v11110_v5 = vpack.c.bf16 %v142_v32, %v141_v50  ;;  %v160_v23 = vld [vmem:[%s15973_s8 + $0xc8] sm:$0xff]  ;;  %v16472_v50 = vld [vmem:[#allocation58_spill] sm:$0xff] }
0x3b1c   :  { %11891 = vtanh.f32 %v14728_v40 }
0x3b26   :  { %v11892_v51 = vpop.eup %11891 }
0x3b27   :  { %v5483_v8 = vmul.f32 %v11892_v51, %v11890_v30  ;;  %v11080_v30 = vpack.c.bf16 %v128_v39, %v127_v0  ;;  %v11112_v51 = vpack.c.bf16 %v160_v23, %v159_v4  ;;  %v16473_v39 = vld [vmem:[#allocation59_spill] sm:$0xff]  ;;  %v16474_v23 = vld [vmem:[#allocation60_spill] sm:$0xff] }
0x3b29   :  { %v14732_v31 = vmul.f32 %v5483_v8, %v16469_v46  ;;  %v14735_v52 = vmul.f32 %v16470_v34, %v5483_v8  ;;  %v111_v8 = vld [vmem:[%s15972_s7 + $0x40] sm:$0xff] }
0x3b2a   :  { %v11082_v63 = vpack.c.bf16 %v112_v38, %v111_v8 }
0x3b2b   :  { %5578 = vmatprep.mubr.f32.mxu1 %v14732_v31  ;;  %5649 = vmatprep.mubr.f32.mxu0 %v14732_v31 }
0x3b2c   :  { %5579 = vmatmul.mubr.f32.vlgmr.msra.gmra.mrb[68].mxu1 %v14735_v52  ;;  %5650 = vmatmul.mubr.f32.vlgmr.msra.gmra.mrb[76].mxu0 %v14735_v52 }
0x3b2d   :  { %11067 = vmatpush3.bf16.msra.mxu1 %v11066_v33  ;;  %11099 = vmatpush3.bf16.msra.mxu0 %v11098_v61  ;;  %v161_v33 = vld [vmem:[%s15973_s8 + $0xd0] sm:$0xff] }
0x3b2e   :  { %11069 = vmatprep.subr.bf16.mxu1 %v11068_v29  ;;  %11101 = vmatprep.subr.bf16.mxu0 %v11100_v43  ;;  %v11116_v61 = vpack.c.bf16 %v162_v37, %v161_v33  ;;  %v11086_v29 = vpack.c.bf16 %v114_v41, %v113_v58  ;;  %v11118_v43 = vpack.c.bf16 %v146_v57, %v145_v36  ;;  %v5697_v36 = vrot.slane %v14732_v31, 4 }
0x3b2f   :  { %v5696_v57 = vrot.slane %v14735_v52, 4 }
0x3b31   :  { %11071 = vmatpush3.bf16.msra.mxu1 %v11070_v21  ;;  %11103 = vmatpush3.bf16.msra.mxu0 %v11102_v35  ;;  %v11088_v21 = vpack.c.bf16 %v132_v12, %v131_v47  ;;  %v116_v35 = vld [vmem:[%s15972_s7 + $0x68] sm:$0xff] }
0x3b32   :  { %11073 = vmatprep.subr.bf16.mxu1 %v11072_v24  ;;  %11105 = vmatprep.subr.bf16.mxu0 %v11104_v7  ;;  %v133_v24 = vld [vmem:[%s15972_s7 + $0xf0] sm:$0xff]  ;;  %v11090_v7 = vpack.c.bf16 %v116_v35, %v115_v20 }
0x3b33   :  { %v11092_v48 = vpack.c.bf16 %v134_v1, %v133_v24  ;;  %v5737_v24 = vrot.slane %v16475_v14, 4 }
0x3b35   :  { %11075 = vmatpush3.bf16.msra.mxu1 %v11074_v54  ;;  %11107 = vmatpush3.bf16.msra.mxu0 %v11106_v59  ;;  %v11122_v54 = vpack.c.bf16 %v148_v6, %v147_v26  ;;  %v118_v59 = vld [vmem:[%s15972_s7 + $0x78] sm:$0xff]  ;;  %v16478_v26 = vld [vmem:[#allocation78_spill] sm:$0xff] }
0x3b36   :  { %11077 = vmatprep.subr.bf16.mxu1 %v11076_v11  ;;  %11109 = vmatprep.subr.bf16.mxu0 %v11108_v22  ;;  %v11094_v11 = vpack.c.bf16 %v118_v59, %v117_v45  ;;  %v16471_v22 = vld [vmem:[#allocation57_spill] sm:$0xff]  ;;  %v5744_v6 = vrot.slane %v16478_v26, 4  ;;  %v5741_v59 = vadd.f32 %v5737_v24, %v14732_v31  ;;  %v16479_v31 = vmov 0.0  }
0x3b39   :  { %11079 = vmatpush3.bf16.msra.mxu1 %v11078_v13  ;;  %11111 = vmatpush3.bf16.msra.mxu0 %v11110_v5 }
0x3b3a   :  { %11081 = vmatprep.subr.bf16.mxu1 %v11080_v30  ;;  %11113 = vmatprep.subr.bf16.mxu0 %v11112_v51 }
0x3b3d   :  { %11083 = vmatpush3.bf16.msra.mxu1 %v11082_v63  ;;  %11115 = vmatpush3.bf16.msra.mxu0 %v11114_v28 }
0x3b3e   :  { %11085 = vmatprep.subr.bf16.mxu1 %v11084_v16  ;;  %11117 = vmatprep.subr.bf16.mxu0 %v11116_v61 }
0x3b41   :  { %11087 = vmatpush3.bf16.msra.mxu1 %v11086_v29  ;;  %11119 = vmatpush3.bf16.msra.mxu0 %v11118_v43  ;;  %v5701_v43 = vadd.f32 %v5697_v36, %v16475_v14  ;;  %v8419_v14 = vld [vmem:[%s15974_s22] ss:$0 sm:$0xff] }
0x3b42   :  { %11089 = vmatprep.subr.bf16.mxu1 %v11088_v21  ;;  %11121 = vmatprep.subr.bf16.mxu0 %v11120_v18  ;;  %v16476_v21 = vld [vmem:[#allocation10_spill] sm:$0xff]  ;;  %v16477_v18 = vld [vmem:[#allocation77_spill] sm:$0xff] }
0x3b43   :  { %v5700_v49 = vadd.f32 %v5696_v57, %v16476_v21  ;;  %v5736_v1 = vrot.slane %v16476_v21, 4  ;;  %v16480_v57 = vmov 0.0|0.0  }
0x3b45   :  { %11091 = vmatpush3.bf16.msra.mxu1 %v11090_v7  ;;  %11123 = vmatpush3.bf16.msra.mxu0 %v11122_v54  ;;  %v5752_v45 = vrot.slane %v5700_v49, 4 }
0x3b46   :  { %11093 = vmatprep.subr.bf16.mxu1 %v11092_v48  ;;  %11125 = vmatprep.subr.bf16.mxu0 %v11124_v55  ;;  %v5753_v48 = vrot.slane %v5701_v43, 4 }
0x3b49   :  { %11095 = vmatpush3.bf16.msra.mxu1 %v11094_v11  ;;  %11127 = vmatpush3.bf16.msra.mxu0 %v11126_v9 }
0x3bff   :  { %v5580_v42 = vpop.f32.mrb[68].mxu1  ;;  %v5651_v27 = vpop.f32.mrb[76].mxu0 }
0x3c00   :  { %v5656_v13 = vadd.f32 %v5580_v42, %v16471_v22  ;;  %v5658_v32 = vadd.f32 %v5651_v27, %v16472_v50  ;;  %v5582_v0 = vpop.f32.mrb[69].mxu1  ;;  %v5653_v5 = vpop.f32.mrb[77].mxu0 }
0x3c01   :  { %v5657_v4 = vadd.f32 %v5582_v0, %v16473_v39  ;;  %v5659_v30 = vadd.f32 %v5653_v5, %v16474_v23 }
0x3c02   :  { %v8412_v51 = vmul.f32 -1.442695, %v5656_v13 }
0x3c03   :  { %v8413_v8 = vmul.f32 -1.442695, %v5657_v4  ;;  %v8414_v38 = vmul.f32 -1.442695, %v5659_v30 }
0x3c04   :  { %11893 = vpow2.f32 %v8412_v51 }
0x3c05   :  { %11895 = vpow2.f32 %v8413_v8 }
0x3c06   :  { %11897 = vpow2.f32 %v8414_v38 }
0x3c07   :  { %11899 = vtanh.f32 %v5658_v32 }
0x3c0e   :  { %v11894_v25 = vpop.eup %11893 }
0x3c0f   :  { %v11896_v63 = vpop.eup %11895  ;;  %v5663_v19 = vadd.f32 1.0, %v11894_v25 }
0x3c10   :  { %v5669_v53 = vadd.f32 1.0, %v11896_v63  ;;  %v11898_v56 = vpop.eup %11897 }
0x3c11   :  { %11901 = vrcp.f32 %v5663_v19  ;;  %v11900_v28 = vpop.eup %11899  ;;  %v5676_v58 = vadd.f32 1.0, %v11898_v56 }
0x3c12   :  { %11903 = vrcp.f32 %v5669_v53 }
0x3c13   :  { %11905 = vrcp.f32 %v5676_v58 }
0x3c1b   :  { %v11902_v16 = vpop.eup %11901 }
0x3c1c   :  { %v11904_v33 = vpop.eup %11903  ;;  %v5680_v37 = vmul.f32 %v11902_v16, %v11900_v28 }
0x3c1d   :  { %v5679_v61 = vmul.f32 %v11904_v33, %v14728_v40  ;;  %v11906_v29 = vpop.eup %11905  ;;  %v5745_v40 = vrot.slane %v16477_v18, 4 }
0x3c1f   :  { %v5681_v41 = vadd.f32 %v5680_v37, %v5679_v61 }
0x3c21   :  { %11907 = vtanh.f32 %v5681_v41 }
0x3c2b   :  { %v11908_v47 = vpop.eup %11907 }
0x3c2c   :  { %v5683_v12 = vmul.f32 %v11908_v47, %v11906_v29  ;;  %v11998_v29 = vld [vmem:[%s15965_s3 + $0x8] sm:$0xff]  ;;  %v11999_v47 = vld [vmem:[%s15965_s3 + $0x10] sm:$0xff] }
0x3c2e   :  { %v5685_v20 = vmul.f32 %v5683_v12, %v16469_v46  ;;  %v5684_v35 = vmul.f32 %v16470_v34, %v5683_v12  ;;  %v5740_v46 = vadd.f32 %v5736_v1, %v14735_v52  ;;  %v12000_v12 = vld [vmem:[%s15965_s3 + $0x18] sm:$0xff] }
0x3c30   :  { %v5689_v62 = vrot.slane %v5685_v20, 4  ;;  %v5688_v2 = vrot.slane %v5684_v35, 4  ;;  %v5749_v7 = vadd.f32 %v5745_v40, %v5685_v20  ;;  %v5748_v54 = vadd.f32 %v5744_v6, %v5684_v35  ;;  %v16482_v40 = vld [vmem:[#allocation2_spill] sm:$0xff] }
0x3c31   :  { %v16481_v35 = vlaneseq }
0x3c32   :  { %v5693_v34 = vadd.f32 %v5689_v62, %v16477_v18  ;;  %v5692_v55 = vadd.f32 %v5688_v2, %v16478_v26  ;;  %v5771_v60 = vrot.slane %v5749_v7, 4  ;;  %v5770_v10 = vrot.slane %v5748_v54, 4 }
0x3c33   :  { %v6156_v18 = vand.u32 127, %v16481_v35 }
0x3c34   :  { %v5775_v11 = vsel %vm297_vm2, %v5693_v34, %v5753_v48  ;;  %v5774_v9 = vsel %vm297_vm2, %v5692_v55, %v5752_v45  ;;  %v5781_v42 = vsel %vm297_vm2, %v5741_v59, %v5771_v60  ;;  %v5780_v27 = vsel %vm297_vm2, %v5740_v46, %v5770_v10  ;;  %v16484_v48 = vld [vmem:[#allocation4_spill] sm:$0xff]  ;;  %v16485_v59 = vld [vmem:[#allocation3_spill] sm:$0xff] }
0x3c35   :  { %5846 = vmatprep.mubr.f32.mxu1 %v5775_v11  ;;  %5931 = vmatprep.mubr.f32.mxu0 %v5775_v11  ;;  %v14989_v26 = vsub.s32 %v6156_v18, %v16482_v40 }
0x3c36   :  { %5847 = vmatmul.mubr.f32.vlgmr.msra.gmra.mrb[70].mxu1 %v5774_v9  ;;  %5932 = vmatmul.mubr.f32.vlgmr.msra.gmra.mrb[78].mxu0 %v5774_v9 }
0x3c37   :  { %5851 = vmatprep.mubr.f32.mxu1 %v14654_v3  ;;  %5936 = vmatprep.mubr.f32.mxu0 %v14654_v3  ;;  %v11997_v3 = vld [vmem:[%s15965_s3] sm:$0xff]  ;;  %16483 = vst [vmem:[#allocation16_spill] sm:$0xff] %v14989_v26 }
0x3c3a   :  { %5852 = vmatmul.mubr.f32.gmra.mrb[72].mxu1 %v14657_v15  ;;  %5937 = vmatmul.mubr.f32.gmra.mrb[80].mxu0 %v14657_v15 }
0x3c3b   :  { %5856 = vmatprep.mubr.f32.mxu1 %v14660_v44  ;;  %5941 = vmatprep.mubr.f32.mxu0 %v14660_v44 }
0x3c3e   :  { %5857 = vmatmul.mubr.f32.gmra.mrb[74].mxu1 %v14663_v17  ;;  %5942 = vmatmul.mubr.f32.gmra.mrb[82].mxu0 %v14663_v17 }
0x3c3f   :  { %5861 = vmatprep.mubr.f32.mxu1 %v5781_v42  ;;  %5946 = vmatprep.mubr.f32.mxu0 %v5781_v42 }
0x3c42   :  { %5862 = vmatmul.mubr.f32.gmra.mrb[76].mxu1 %v5780_v27  ;;  %5947 = vmatmul.mubr.f32.gmra.mrb[84].mxu0 %v5780_v27 }
0x3c43   :  { %9338 = vmatprep.mubr.msk.f32.mxu1 %vm195_vm1, %v11997_v3  ;;  %6483 = vmatprep.mubr.f32.mxu0 %v16479_v31 }
0x3d09   :  { %v8680_v15 = vpop.f32.mrb[70].mxu1  ;;  %v8724_v52 = vpop.f32.mrb[78].mxu0 }
0x3d0a   :  { %v8681_v22 = vpop.f32.mrb[71].mxu1  ;;  %v8725_v44 = vpop.f32.mrb[79].mxu0 }
0x3d0b   :  { %v8682_v13 = vadd.f32 %v8681_v22, %v8680_v15  ;;  %v8726_v50 = vadd.f32 %v8725_v44, %v8724_v52 }
0x3d0d   :  { %v5952_v32 = vmax.f32 %v8682_v13, %v8726_v50  ;;  %v8683_v17 = vpop.f32.mrb[72].mxu1  ;;  %v8727_v0 = vpop.f32.mrb[80].mxu0 }
0x3d0e   :  { %v8684_v5 = vpop.f32.mrb[73].mxu1  ;;  %v8728_v39 = vpop.f32.mrb[81].mxu0 }
0x3d0f   :  { %v8685_v4 = vadd.f32 %v8684_v5, %v8683_v17  ;;  %v8729_v23 = vadd.f32 %v8728_v39, %v8727_v0 }
0x3d11   :  { %v5953_v30 = vmax.f32 %v8685_v4, %v8729_v23  ;;  %v8686_v51 = vpop.f32.mrb[74].mxu1  ;;  %v8730_v8 = vpop.f32.mrb[82].mxu0 }
0x3d12   :  { %v8687_v38 = vpop.f32.mrb[75].mxu1  ;;  %v8731_v25 = vpop.f32.mrb[83].mxu0 }
0x3d13   :  { %v8688_v63 = vadd.f32 %v8687_v38, %v8686_v51  ;;  %v8732_v19 = vadd.f32 %v8731_v25, %v8730_v8  ;;  %v11128_v53 = vpack.c.bf16 %v5953_v30, %v5952_v32 }
0x3d15   :  { %v5954_v56 = vmax.f32 %v8688_v63, %v8732_v19  ;;  %v8689_v28 = vpop.f32.mrb[76].mxu1  ;;  %v8733_v16 = vpop.f32.mrb[84].mxu0  ;;  %11129 = vmatprep.subr.bf16.mxu1 %v11128_v53 }
0x3d16   :  { %v8690_v33 = vpop.f32.mrb[77].mxu1  ;;  %v8734_v37 = vpop.f32.mrb[85].mxu0  ;;  %11131 = vmatpush3.bf16.msra.mxu1 %v11128_v53 }
0x3d17   :  { %v8691_v58 = vadd.f32 %v8690_v33, %v8689_v28  ;;  %v8735_v61 = vadd.f32 %v8734_v37, %v8733_v16 }
0x3d19   :  { %v5955_v41 = vmax.f32 %v8691_v58, %v8735_v61 }
0x3d1b   :  { %v11132_v36 = vpack.c.bf16 %v5955_v41, %v5954_v56 }
0x3d1d   :  { %11133 = vmatprep.subr.bf16.mxu1 %v11132_v36 }
0x3d1e   :  { %11135 = vmatpush3.bf16.msra.mxu1 %v11132_v36 }
0x3d1f   :  { %11168 = vmatprep.subr.bf16.mxu1 %v16480_v57 }
0x3d21   :  { %9339 = vmatmul.mubr.msk.f32.vlgmr.msra.gmra.mrb[78].mxu1 %vm195_vm1, %v11998_v29 }
0x3d22   :  { %9341 = vmatprep.mubr.msk.f32.mxu1 %vm195_vm1, %v11999_v47 }
0x3d25   :  { %9342 = vmatmul.mubr.msk.f32.gmra.mrb[80].mxu1 %vm195_vm1, %v12000_v12 }
0x3d26   :  { %9376 = vmatprep.mubr.msk.f32.mxu1 %vm12003_vm0, %v16479_v31 }
0x3df4   :  { %v9340_v43 = vpop.f32.mrb[78].mxu1 }
0x3df5   :  { %v6022_v21 = vpop.f32.mrb[79].mxu1  ;;  %v6148_v49 = vmul.f32 %v9340_v43, %v8419_v14 }
0x3df6   :  { %v6147_v20 = vmul.f32 %v8419_v14, %v6022_v21 }
0x3df7   :  { %6151 = vadd.xlane.f32.xlu0 %v6148_v49 }
0x3df8   :  { %6149 = vadd.xlane.f32.xlu1 %v6147_v20  ;;  %v15003_v39 = vpop.f32.mrb[80].mxu1 }
0x3df9   :  { %v15005_v4 = vpop.f32.mrb[81].mxu1 }
0x3e84   :  { %v6152_v6 = vpop.xlane.xlu0 %6151 }
0x3e85   :  { %v6164_v24 = vrot.slane %v6152_v6, %v14989_v26  ;;  %v6150_v1 = vpop.xlane.xlu1 %6149 }
0x3e86   :  { %v6160_v62 = vrot.slane %v6150_v1, %v14989_v26 }
0x3e88   :  { %v6166_v2 = vsel %vm6165_vm8, %v6164_v24, %v6160_v62 }
0x3e89   :  { %v6169_v7 = vsel %vm6168_vm9, %v6166_v2, -inf }
0x3e8a   :  { %6170 = vmax.xlane.f32.xlu0 %v6169_v7 }
0x3f17   :  { %v6171_v54 = vpop.xlane.xlu0 %6170 }
0x3f18   :  { %v6176_v45 = vrot.slane %v6171_v54, %v16484_v48  ;;  %v6180_v46 = vrot.slane %v6171_v54, %v16485_v59 }
0x3f1a   :  { %v6183_v34 = vsub.f32 %v6150_v1, %v6176_v45  ;;  %v6184_v55 = vsub.f32 %v6152_v6, %v6180_v46 }
0x3f1c   :  { %v6185_v60 = vmul.f32 1.442695, %v6183_v34  ;;  %v6187_v10 = vmul.f32 1.442695, %v6184_v55 }
0x3f1e   :  { %11909 = vpow2.f32 %v6185_v60  ;;  %v6044_v60 = vld [vmem:[%s15975_s18 + $0x8] sm:$0xff] }
0x3f1f   :  { %11911 = vpow2.f32 %v6187_v10  ;;  %v6047_v10 = vld [vmem:[%s15975_s18 + $0x20] sm:$0xff] }
0x3f28   :  { %v11910_v11 = vpop.eup %11909 }
0x3f29   :  { %v11912_v9 = vpop.eup %11911  ;;  %6192 = vperm.xlu1 %11626, %v11910_v11  }
0x3f2a   :  { %6195 = vperm.xlu0 %11625, %v11912_v9  }
0x3fa8   :  { %v6193_v42 = vpop.permute.xlu1 %6192 }
0x3fa9   :  { %v6196_v27 = vpop.permute.xlu0 %6195  ;;  %v6200_v3 = vrot.slane %v6193_v42, %v14989_v26  ;;  %v6046_v42 = vld [vmem:[%s15975_s18 + $0x18] sm:$0xff] }
0x3faa   :  { %v6204_v15 = vrot.slane %v6196_v27, %v14989_v26  ;;  %v6045_v27 = vld [vmem:[%s15975_s18 + $0x10] sm:$0xff] }
0x3fac   :  { %v6205_v52 = vsel %vm6165_vm8, %v6204_v15, %v6200_v3  ;;  %v6048_v3 = vld [vmem:[%s15975_s18 + $0x28] sm:$0xff] }
0x3fad   :  { %v6207_v22 = vsel %vm6168_vm9, %v6205_v52, 0.0  ;;  %v15053_v52 = vpack.c.bf16 %v6048_v3, %v6045_v27  ;;  %v6078_v3 = vld [vmem:[%s15975_s18 + $0x118] sm:$0xff] }
0x3fae   :  { %6208 = vadd.xlane.f32.xlu1 %v6207_v22  ;;  %v6050_v22 = vld [vmem:[%s15975_s18 + $0x38] sm:$0xff] }
0x3faf   :  { %11170 = vmatpush3.bf16.msra.mxu1 %v15053_v52 }
0x3fb0   :  { %11171 = vmatprep.subr.bf16.mxu1 %v16480_v57 }
0x403b   :  { %v6209_v44 = vpop.xlane.xlu1 %6208 }
0x403c   :  { %v6214_v13 = vrot.slane %v6209_v44, %v16484_v48  ;;  %v6218_v50 = vrot.slane %v6209_v44, %v16485_v59  ;;  %v6053_v44 = vld [vmem:[%s15975_s18 + $0x50] sm:$0xff] }
0x403e   :  { %11913 = vrcp.f32 %v6214_v13  ;;  %v6049_v13 = vld [vmem:[%s15975_s18 + $0x30] sm:$0xff] }
0x403f   :  { %11915 = vrcp.f32 %v6218_v50  ;;  %v15065_v50 = vpack.c.bf16 %v6053_v44, %v6050_v22  ;;  %v6080_v44 = vld [vmem:[%s15975_s18 + $0x128] sm:$0xff] }
0x4048   :  { %v11914_v32 = vpop.eup %11913 }
0x4049   :  { %v6222_v17 = vmul.f32 %v11914_v32, %v11910_v11  ;;  %v11916_v0 = vpop.eup %11915  ;;  %v6043_v11 = vld [vmem:[%s15975_s18] sm:$0xff]  ;;  %v6052_v32 = vld [vmem:[%s15975_s18 + $0x48] sm:$0xff] }
0x404a   :  { %v6224_v5 = vmul.f32 %v11916_v0, %v11912_v9  ;;  %v15040_v9 = vpack.c.bf16 %v6047_v10, %v6044_v60  ;;  %v15051_v15 = vpack.c.bf16 %v6046_v42, %v6043_v11  ;;  %v6054_v0 = vld [vmem:[%s15975_s18 + $0x58] sm:$0xff]  ;;  %v6073_v10 = vld [vmem:[%s15975_s18 + $0xf0] sm:$0xff]  ;;  %v6076_v11 = vld [vmem:[%s15975_s18 + $0x108] sm:$0xff] }
0x404b   :  { %6227 = vperm.xlu0 %11625, %v6222_v17   ;;  %v6051_v17 = vld [vmem:[%s15975_s18 + $0x40] sm:$0xff]  ;;  %v15192_v27 = vpack.c.bf16 %v6076_v11, %v6073_v10 }
0x404c   :  { %11137 = vmatprep.subr.bf16.mxu0 %v15040_v9  ;;  %v6075_v42 = vld [vmem:[%s15975_s18 + $0x100] sm:$0xff] }
0x404d   :  { %11139 = vmatpush1.bf16.msra.mxu0 %v15051_v15  ;;  %16494 = vst [vmem:[#allocation25_spill] sm:$0xff] %v15192_v27  ;;  %v15198_v22 = vpack.c.bf16 %v6078_v3, %v6075_v42  ;;  %v6091_v3 = vld [vmem:[%s15976_s19] sm:$0xff] }
0x404e   :  { %11141 = vmatprep.subr.bf16.mxu0 %v15065_v50 }
0x404f   :  { %6232 = vperm.xlu0 %11625, %v6224_v5   ;;  %v15078_v5 = vpack.c.bf16 %v6052_v32, %v6049_v13  ;;  %16495 = vst [vmem:[#allocation26_spill] sm:$0xff] %v15198_v22  ;;  %v6083_v13 = vld [vmem:[%s15975_s18 + $0x140] sm:$0xff] }
0x4050   :  { %v15208_v32 = vpack.c.bf16 %v6083_v13, %v6080_v44 }
0x4051   :  { %11143 = vmatpush1.bf16.msra.mxu0 %v15078_v5 }
0x4052   :  { %16496 = vst [vmem:[#allocation27_spill] sm:$0xff] %v15208_v32 }
0x40ca   :  { %v6228_v23 = vpop.permute.xlu0 %6227 }
0x40cb   :  { %v6235_v30 = vmul.f32 %v6228_v23, %v6022_v21  ;;  %v15080_v23 = vpack.c.bf16 %v6054_v0, %v6051_v17  ;;  %v6079_v17 = vld [vmem:[%s15975_s18 + $0x120] sm:$0xff]  ;;  %v6082_v0 = vld [vmem:[%s15975_s18 + $0x138] sm:$0xff] }
0x40cd   :  { %v6237_v51 = vrot.slane %v6235_v30, 4  ;;  %11173 = vmatpush3.bf16.msra.mxu1 %v15080_v23 }
0x40ce   :  { %v6233_v8 = vpop.permute.xlu0 %6232  ;;  %11174 = vmatprep.subr.bf16.mxu1 %v16480_v57 }
0x40cf   :  { %v6238_v38 = vadd.f32 %v6237_v51, %v6235_v30  ;;  %v6236_v25 = vmul.f32 %v9340_v43, %v6233_v8  ;;  %v6056_v30 = vld [vmem:[%s15975_s18 + $0x68] sm:$0xff]  ;;  %v6059_v51 = vld [vmem:[%s15975_s18 + $0x80] sm:$0xff] }
0x40d0   :  { %v6055_v8 = vld [vmem:[%s15975_s18 + $0x60] sm:$0xff] }
0x40d1   :  { %v6239_v63 = vrot.slane %v6238_v38, 2  ;;  %v6243_v19 = vrot.slane %v6236_v25, 4 }
0x40d3   :  { %v6240_v53 = vadd.f32 %v6239_v63, %v6238_v38  ;;  %v6244_v56 = vadd.f32 %v6243_v19, %v6236_v25  ;;  %v15093_v38 = vpack.c.bf16 %v6059_v51, %v6056_v30  ;;  %v6058_v25 = vld [vmem:[%s15975_s18 + $0x78] sm:$0xff]  ;;  %v6057_v63 = vld [vmem:[%s15975_s18 + $0x70] sm:$0xff]  ;;  %v6060_v19 = vld [vmem:[%s15975_s18 + $0x88] sm:$0xff]  ;;  %v15220_v51 = vpack.c.bf16 %v6082_v0, %v6079_v17 }
0x40d4   :  { %v6081_v30 = vld [vmem:[%s15975_s18 + $0x130] sm:$0xff]  ;;  %v6094_v17 = vld [vmem:[%s15976_s19 + $0x18] sm:$0xff] }
0x40d5   :  { %v6241_v28 = vrot.slane %v6240_v53, 1  ;;  %v6245_v16 = vrot.slane %v6244_v56, 2  ;;  %11145 = vmatprep.subr.bf16.mxu0 %v15093_v38  ;;  %16497 = vst [vmem:[#allocation28_spill] sm:$0xff] %v15220_v51  ;;  %v6093_v0 = vld [vmem:[%s15976_s19 + $0x10] sm:$0xff] }
0x40d7   :  { %v15007_v33 = vadd.f32 %v6241_v28, %v6240_v53  ;;  %v6246_v37 = vadd.f32 %v6245_v16, %v6244_v56  ;;  %v6062_v53 = vld [vmem:[%s15975_s18 + $0x98] sm:$0xff]  ;;  %v6065_v56 = vld [vmem:[%s15975_s18 + $0xb0] sm:$0xff]  ;;  %v15112_v28 = vpack.c.bf16 %v6058_v25, %v6055_v8  ;;  %v15114_v16 = vpack.c.bf16 %v6060_v19, %v6057_v63  ;;  %v6084_v8 = vld [vmem:[%s15975_s18 + $0x148] sm:$0xff] }
0x40d8   :  { %v15226_v25 = vpack.c.bf16 %v6084_v8, %v6081_v30  ;;  %v6086_v63 = vld [vmem:[%s15975_s18 + $0x158] sm:$0xff]  ;;  %v6089_v19 = vld [vmem:[%s15975_s18 + $0x170] sm:$0xff]  ;;  %v6096_v30 = vld [vmem:[%s15976_s19 + $0x28] sm:$0xff] }
0x40d9   :  { %v6247_v58 = vrot.slane %v6246_v37, 1  ;;  %v6249_v61 = vmul.f32 %v15007_v33, %v15005_v4  ;;  %16486 = vst [vmem:[#allocation17_spill] sm:$0xff] %v15114_v16  ;;  %11147 = vmatpush1.bf16.msra.mxu0 %v15112_v28  ;;  %11176 = vmatpush3.bf16.msra.mxu1 %v15114_v16 }
0x40da   :  { %11177 = vmatprep.subr.bf16.mxu1 %v16480_v57  ;;  %16498 = vst [vmem:[#allocation29_spill] sm:$0xff] %v15226_v25 }
0x40db   :  { %v15011_v41 = vadd.f32 %v6247_v58, %v6246_v37  ;;  %6251 = vadd.xlane.f32.xlu0 %v6249_v61  ;;  %v6061_v37 = vld [vmem:[%s15975_s18 + $0x90] sm:$0xff]  ;;  %v15121_v58 = vpack.c.bf16 %v6065_v56, %v6062_v53  ;;  %v6064_v61 = vld [vmem:[%s15975_s18 + $0xa8] sm:$0xff]  ;;  %v15236_v53 = vpack.c.bf16 %v6089_v19, %v6086_v63  ;;  %v6098_v19 = vld [vmem:[%s15976_s19 + $0x38] sm:$0xff] }
0x40dc   :  { %v6085_v56 = vld [vmem:[%s15975_s18 + $0x150] sm:$0xff] }
0x40dd   :  { %v6250_v36 = vmul.f32 %v15003_v39, %v15011_v41  ;;  %16487 = vst [vmem:[#allocation18_spill] sm:$0xff] %v15121_v58  ;;  %11149 = vmatprep.subr.bf16.mxu0 %v15121_v58  ;;  %16499 = vst [vmem:[#allocation69_spill] sm:$0xff] %v15236_v53  ;;  %v15291_v8 = vsel %vm6165_vm8, %v15011_v41, %v15007_v33 }
0x40df   :  { %6253 = vadd.xlane.f32.xlu1 %v6250_v36  ;;  %v6063_v36 = vld [vmem:[%s15975_s18 + $0xa0] sm:$0xff] }
0x4168   :  { %v6252_v29 = vpop.xlane.xlu0 %6251 }
0x4169   :  { %v6260_v12 = vrot.slane %v6252_v29, %v14989_v26 }
0x416c   :  { %v6254_v47 = vpop.xlane.xlu1 %6253 }
0x416d   :  { %v6264_v14 = vrot.slane %v6254_v47, %v14989_v26 }
0x416f   :  { %v6265_v43 = vsel %vm6165_vm8, %v6264_v14, %v6260_v12 }
0x4170   :  { %v6267_v21 = vsel %vm6168_vm9, %v6265_v43, -inf }
0x4171   :  { %6268 = vmax.xlane.f32.xlu1 %v6267_v21 }
0x41fe   :  { %v6269_v49 = vpop.xlane.xlu1 %6268 }
0x41ff   :  { %v6274_v20 = vrot.slane %v6269_v49, %v16484_v48  ;;  %v6278_v35 = vrot.slane %v6269_v49, %v16485_v59 }
0x4201   :  { %v6281_v18 = vsub.f32 %v6252_v29, %v6274_v20  ;;  %v6282_v6 = vsub.f32 %v6254_v47, %v6278_v35  ;;  %v6066_v29 = vld [vmem:[%s15975_s18 + $0xb8] sm:$0xff]  ;;  %v15134_v47 = vpack.c.bf16 %v6064_v61, %v6061_v37  ;;  %v6088_v37 = vld [vmem:[%s15975_s18 + $0x168] sm:$0xff]  ;;  %v6087_v61 = vld [vmem:[%s15975_s18 + $0x160] sm:$0xff] }
0x4202   :  { %v15136_v12 = vpack.c.bf16 %v6066_v29, %v6063_v36  ;;  %v15248_v36 = vpack.c.bf16 %v6088_v37, %v6085_v56  ;;  %v6090_v29 = vld [vmem:[%s15975_s18 + $0x178] sm:$0xff]  ;;  %v6101_v56 = vld [vmem:[%s15976_s19 + $0x50] sm:$0xff] }
0x4203   :  { %v6283_v24 = vmul.f32 1.442695, %v6281_v18  ;;  %v6285_v1 = vmul.f32 1.442695, %v6282_v6  ;;  %16488 = vst [vmem:[#allocation19_spill] sm:$0xff] %v15134_v47  ;;  %11151 = vmatpush1.bf16.msra.mxu0 %v15134_v47  ;;  %v6068_v18 = vld [vmem:[%s15975_s18 + $0xc8] sm:$0xff] }
0x4204   :  { %16489 = vst [vmem:[#allocation20_spill] sm:$0xff] %v15136_v12  ;;  %11179 = vmatpush3.bf16.msra.mxu1 %v15136_v12  ;;  %v6071_v6 = vld [vmem:[%s15975_s18 + $0xe0] sm:$0xff]  ;;  %16500 = vst [vmem:[#allocation70_spill] sm:$0xff] %v15248_v36  ;;  %v16503_v37 = vld [vmem:[#allocation52_spill] sm:$0xff] }
0x4205   :  { %11917 = vpow2.f32 %v6283_v24  ;;  %11180 = vmatprep.subr.bf16.mxu1 %v16480_v57  ;;  %v15152_v24 = vpack.c.bf16 %v6071_v6, %v6068_v18 }
0x4206   :  { %11919 = vpow2.f32 %v6285_v1  ;;  %v6067_v1 = vld [vmem:[%s15975_s18 + $0xc0] sm:$0xff] }
0x4207   :  { %16490 = vst [vmem:[#allocation21_spill] sm:$0xff] %v15152_v24  ;;  %11153 = vmatprep.subr.bf16.mxu0 %v15152_v24 }
0x420f   :  { %v15021_v62 = vpop.eup %11917 }
0x4210   :  { %v15023_v2 = vpop.eup %11919  ;;  %6290 = vperm.xlu1 %11626, %v15021_v62  }
0x4211   :  { %6293 = vperm.xlu0 %11625, %v15023_v2  }
0x428f   :  { %v6291_v7 = vpop.permute.xlu1 %6290 }
0x4290   :  { %v6294_v54 = vpop.permute.xlu0 %6293  ;;  %v6298_v45 = vrot.slane %v6291_v7, %v14989_v26  ;;  %v6069_v7 = vld [vmem:[%s15975_s18 + $0xd0] sm:$0xff] }
0x4291   :  { %v6302_v46 = vrot.slane %v6294_v54, %v14989_v26 }
0x4293   :  { %v6303_v34 = vsel %vm6165_vm8, %v6302_v46, %v6298_v45  ;;  %v6072_v46 = vld [vmem:[%s15975_s18 + $0xe8] sm:$0xff] }
0x4294   :  { %v6305_v55 = vsel %vm6168_vm9, %v6303_v34, 0.0  ;;  %v15170_v34 = vpack.c.bf16 %v6072_v46, %v6069_v7 }
0x4295   :  { %6306 = vadd.xlane.f32.xlu1 %v6305_v55  ;;  %v6074_v55 = vld [vmem:[%s15975_s18 + $0xf8] sm:$0xff] }
0x4296   :  { %16492 = vst [vmem:[#allocation23_spill] sm:$0xff] %v15170_v34  ;;  %11182 = vmatpush3.bf16.msra.mxu1 %v15170_v34 }
0x4297   :  { %11183 = vmatprep.subr.bf16.mxu1 %v16480_v57 }
0x429a   :  { %11185 = vmatpush3.bf16.msra.mxu1 %v15198_v22 }
0x429b   :  { %11186 = vmatprep.subr.bf16.mxu1 %v16480_v57 }
0x429e   :  { %11188 = vmatpush3.bf16.msra.mxu1 %v15226_v25 }
0x429f   :  { %11189 = vmatprep.subr.bf16.mxu1 %v16480_v57 }
0x4322   :  { %v6307_v14 = vpop.xlane.xlu1 %6306 }
0x4323   :  { %v6312_v43 = vrot.slane %v6307_v14, %v16484_v48  ;;  %v6316_v21 = vrot.slane %v6307_v14, %v16485_v59  ;;  %v15254_v14 = vpack.c.bf16 %v6090_v29, %v6087_v61 }
0x4325   :  { %11921 = vrcp.f32 %v6312_v43  ;;  %16501 = vst [vmem:[#allocation71_spill] sm:$0xff] %v15254_v14  ;;  %v6092_v43 = vld [vmem:[%s15976_s19 + $0x8] sm:$0xff]  ;;  %11191 = vmatpush3.bf16.msra.mxu1 %v15254_v14 }
0x4326   :  { %11923 = vrcp.f32 %v6316_v21  ;;  %v6095_v21 = vld [vmem:[%s15976_s19 + $0x20] sm:$0xff]  ;;  %11224 = vmatprep.subr.bf16.mxu1 %v16480_v57 }
0x432f   :  { %v11922_v49 = vpop.eup %11921 }
0x4330   :  { %v6320_v20 = vmul.f32 %v11922_v49, %v15021_v62  ;;  %v11924_v35 = vpop.eup %11923  ;;  %v6070_v62 = vld [vmem:[%s15975_s18 + $0xd8] sm:$0xff]  ;;  %v15264_v49 = vpack.c.bf16 %v6095_v21, %v6092_v43  ;;  %v15305_v21 = vpack.c.bf16 %v6094_v17, %v6091_v3  ;;  %v6104_v3 = vld [vmem:[%s15976_s19 + $0x68] sm:$0xff]  ;;  %v6107_v17 = vld [vmem:[%s15976_s19 + $0x80] sm:$0xff] }
0x4331   :  { %v6322_v54 = vmul.f32 %v11924_v35, %v15023_v2  ;;  %v15164_v45 = vpack.c.bf16 %v6070_v62, %v6067_v1  ;;  %v6077_v2 = vld [vmem:[%s15975_s18 + $0x110] sm:$0xff] }
0x4332   :  { %6325 = vperm.xlu0 %11625, %v6320_v20   ;;  %v15180_v60 = vpack.c.bf16 %v6077_v2, %v6074_v55  ;;  %16502 = vst [vmem:[#allocation72_spill] sm:$0xff] %v15264_v49  ;;  %v6042_v2 = vld [vmem:[%s15977_s23] sm:$0xf] }
0x4333   :  { %16491 = vst [vmem:[#allocation22_spill] sm:$0xff] %v15164_v45  ;;  %11155 = vmatpush1.bf16.msra.mxu0 %v15164_v45  ;;  %v15277_v44 = vrot.slane %v6042_v2, %v16485_v59  ;;  %v15300_v61 = vrot.slane %v6042_v2, %v16503_v37  ;;  %v15303_v29 = vrot.slane %v6042_v2, %v16484_v48 }
0x4334   :  { %16493 = vst [vmem:[#allocation24_spill] sm:$0xff] %v15180_v60  ;;  %11157 = vmatprep.subr.bf16.mxu0 %v15180_v60 }
0x4336   :  { %6330 = vperm.xlu0 %11625, %v6322_v54  }
0x4337   :  { %11159 = vmatpush1.bf16.msra.mxu0 %v15192_v27 }
0x4338   :  { %11161 = vmatprep.subr.bf16.mxu0 %v15208_v32 }
0x433b   :  { %11163 = vmatpush1.bf16.msra.mxu0 %v15220_v51 }
0x433c   :  { %11165 = vmatprep.subr.bf16.mxu0 %v15236_v53 }
0x433f   :  { %11167 = vmatpush1.bf16.msra.mxu0 %v15248_v36 }
0x4340   :  { %11193 = vmatprep.subr.bf16.mxu0 %v15264_v49 }
0x43b1   :  { %v6326_v20 = vpop.permute.xlu0 %6325 }
0x43b2   :  { %v6333_v35 = vmul.f32 %v6326_v20, %v15005_v4  ;;  %v15307_v20 = vpack.c.bf16 %v6096_v30, %v6093_v0 }
0x43b4   :  { %v6335_v18 = vrot.slane %v6333_v35, 4 }
0x43b5   :  { %v6331_v6 = vpop.permute.xlu0 %6330 }
0x43b6   :  { %v6336_v1 = vadd.f32 %v6335_v18, %v6333_v35  ;;  %v6334_v62 = vmul.f32 %v15003_v39, %v6331_v6  ;;  %v6097_v35 = vld [vmem:[%s15976_s19 + $0x30] sm:$0xff]  ;;  %v6100_v18 = vld [vmem:[%s15976_s19 + $0x48] sm:$0xff]  ;;  %v6389_v6 = vmul.f32 %v15277_v44, %v15291_v8 }
0x43b7   :  { %v15341_v30 = vpack.c.bf16 %v6100_v18, %v6097_v35  ;;  %v6105_v35 = vld [vmem:[%s15976_s19 + $0x70] sm:$0xff]  ;;  %v6108_v18 = vld [vmem:[%s15976_s19 + $0x88] sm:$0xff] }
0x43b8   :  { %v6337_v7 = vrot.slane %v6336_v1, 2  ;;  %v6341_v54 = vrot.slane %v6334_v62, 4 }
0x43ba   :  { %v6338_v46 = vadd.f32 %v6337_v7, %v6336_v1  ;;  %v6342_v55 = vadd.f32 %v6341_v54, %v6334_v62  ;;  %v16504_v1 = vsub.s32 3, %v16482_v40  ;;  %v15322_v54 = vpack.c.bf16 %v6101_v56, %v6098_v19 }
0x43bb   :  { %v6394_v19 = vsel %vm6392_vm10, %v6389_v6, 0.0  ;;  %v15355_v56 = vpack.c.bf16 %v6107_v17, %v6104_v3  ;;  %v6109_v3 = vld [vmem:[%s15976_s19 + $0x90] sm:$0xff] }
0x43bc   :  { %v6339_v10 = vrot.slane %v6338_v46, 1  ;;  %v6343_v11 = vrot.slane %v6342_v55, 2  ;;  %v15319_v62 = vrot.slane %v6042_v2, %v16504_v1 }
0x43be   :  { %v6344_v42 = vadd.f32 %v6343_v11, %v6342_v55  ;;  %v6340_v13 = vadd.f32 %v6339_v10, %v6338_v46  ;;  %v6099_v46 = vld [vmem:[%s15976_s19 + $0x40] sm:$0xff]  ;;  %v6102_v55 = vld [vmem:[%s15976_s19 + $0x58] sm:$0xff] }
0x43c0   :  { %v6345_v63 = vrot.slane %v6344_v42, 1  ;;  %v6347_v7 = vsub.f32 %v6340_v13, %v15007_v33  ;;  %v6349_v10 = vmul.f32 %v6340_v13, %v15007_v33  ;;  %v15345_v33 = vpack.c.bf16 %v6102_v55, %v6099_v46  ;;  %v6110_v46 = vld [vmem:[%s15976_s19 + $0x98] sm:$0xff]  ;;  %v6113_v55 = vld [vmem:[%s15976_s19 + $0xb0] sm:$0xff] }
0x43c2   :  { %v6346_v43 = vadd.f32 %v6345_v63, %v6344_v42 }
0x43c4   :  { %v6348_v11 = vsub.f32 %v6346_v43, %v15011_v41  ;;  %v6350_v2 = vmul.f32 %v6346_v43, %v15011_v41  ;;  %v6353_v42 = vsel %vm6165_vm8, %v6346_v43, %v6340_v13  ;;  %v6103_v41 = vld [vmem:[%s15976_s19 + $0x60] sm:$0xff]  ;;  %v6106_v43 = vld [vmem:[%s15976_s19 + $0x78] sm:$0xff] }
0x43c5   :  { %v6388_v0 = vmul.f32 %v15303_v29, %v6353_v42  ;;  %6484 = vmatmul.mubr.f32.vlgmr.msra.gmra.mrb[86].mxu0 %v6353_v42  ;;  %9377 = vmatmul.mubr.f32.vlgmr.msra.gmra.mrb[82].mxu1 %v6353_v42  ;;  %v15383_v42 = vpack.c.bf16 %v6108_v18, %v6105_v35  ;;  %v6119_v35 = vld [vmem:[%s15976_s19 + $0xe0] sm:$0xff] }
0x43c6   :  { %11195 = vmatpush1.bf16.msra.mxu0 %v15305_v21  ;;  %11226 = vmatpush3.bf16.msra.mxu1 %v15307_v20  ;;  %v6361_v13 = vsel %vm6165_vm8, %v6348_v11, %v6347_v7  ;;  %v6365_v63 = vsel %vm6165_vm8, %v6350_v2, %v6349_v10  ;;  %v15381_v2 = vpack.c.bf16 %v6106_v43, %v6103_v41  ;;  %v6111_v41 = vld [vmem:[%s15976_s19 + $0xa0] sm:$0xff]  ;;  %v6116_v43 = vld [vmem:[%s15976_s19 + $0xc8] sm:$0xff] }
0x43c7   :  { %11197 = vmatprep.subr.bf16.mxu0 %v15322_v54  ;;  %11227 = vmatprep.subr.bf16.mxu1 %v16480_v57  ;;  %v6390_v6 = vmul.f32 %v15300_v61, %v6361_v13  ;;  %v6391_v1 = vmul.f32 %v15319_v62, %v6365_v63  ;;  %v6393_v7 = vsel %vm6392_vm10, %v6388_v0, 0.0  ;;  %v15390_v0 = vpack.c.bf16 %v6113_v55, %v6110_v46  ;;  %v6112_v13 = vld [vmem:[%s15976_s19 + $0xa8] sm:$0xff]  ;;  %v6114_v63 = vld [vmem:[%s15976_s19 + $0xb8] sm:$0xff] }
0x43c8   :  { %6640 = vmatprep.mubr.f32.mxu0 %v16479_v31  ;;  %9411 = vmatprep.mubr.msk.f32.mxu1 %vm12003_vm0, %v16479_v31  ;;  %v6395_v10 = vadd.f32 %v6394_v19, %v6393_v7  ;;  %v15414_v7 = vpack.c.bf16 %v6114_v63, %v6111_v41  ;;  %v15421_v46 = vpack.c.bf16 %v6119_v35, %v6116_v43  ;;  %v6118_v55 = vld [vmem:[%s15976_s19 + $0xd8] sm:$0xff]  ;;  %v6121_v63 = vld [vmem:[%s15976_s19 + $0xf0] sm:$0xff]  ;;  %v6124_v43 = vld [vmem:[%s15976_s19 + $0x108] sm:$0xff] }
0x43c9   :  { %v6396_v11 = vsel %vm6392_vm10, %v6390_v6, 0.0  ;;  %v6398_v19 = vsel %vm6392_vm10, %v6391_v1, 0.0  ;;  %v15412_v6 = vpack.c.bf16 %v6112_v13, %v6109_v3  ;;  %v6115_v1 = vld [vmem:[%s15976_s19 + $0xc0] sm:$0xff]  ;;  %v6122_v3 = vld [vmem:[%s15976_s19 + $0xf8] sm:$0xff] }
0x43ca   :  { %11199 = vmatpush1.bf16.msra.mxu0 %v15341_v30  ;;  %11229 = vmatpush3.bf16.msra.mxu1 %v15345_v33  ;;  %v6397_v17 = vadd.f32 %v6396_v11, %v6395_v10  ;;  %v6117_v10 = vld [vmem:[%s15976_s19 + $0xd0] sm:$0xff]  ;;  %v6120_v11 = vld [vmem:[%s15976_s19 + $0xe8] sm:$0xff]  ;;  %v15440_v13 = vpack.c.bf16 %v6118_v55, %v6115_v1  ;;  %v6123_v35 = vld [vmem:[%s15976_s19 + $0x100] sm:$0xff] }
0x43cb   :  { %11201 = vmatprep.subr.bf16.mxu0 %v15355_v56  ;;  %11230 = vmatprep.subr.bf16.mxu1 %v16480_v57  ;;  %v15442_v41 = vpack.c.bf16 %v6120_v11, %v6117_v10  ;;  %v6126_v1 = vld [vmem:[%s15976_s19 + $0x118] sm:$0xff]  ;;  %v6128_v55 = vld [vmem:[%s15976_s19 + $0x128] sm:$0xff]  ;;  %v6131_v10 = vld [vmem:[%s15976_s19 + $0x140] sm:$0xff]  ;;  %v15468_v11 = vpack.c.bf16 %v6124_v43, %v6121_v63 }
0x43cc   :  { %v15408_v18 = vadd.f32 %v6398_v19, %v6397_v17  ;;  %v6125_v17 = vld [vmem:[%s15976_s19 + $0x110] sm:$0xff]  ;;  %16506 = vst [vmem:[#allocation74_spill] sm:$0xff] %v15440_v13  ;;  %v6132_v43 = vld [vmem:[%s15976_s19 + $0x148] sm:$0xff] }
0x43cd   :  { %16507 = vst [vmem:[#allocation75_spill] sm:$0xff] %v15442_v41  ;;  %v15449_v19 = vpack.c.bf16 %v6125_v17, %v6122_v3  ;;  %16509 = vst [vmem:[#allocation61_spill] sm:$0xff] %v15468_v11  ;;  %v15470_v3 = vpack.c.bf16 %v6126_v1, %v6123_v35  ;;  %v6127_v17 = vld [vmem:[%s15976_s19 + $0x120] sm:$0xff]  ;;  %v6129_v63 = vld [vmem:[%s15976_s19 + $0x130] sm:$0xff] }
0x43ce   :  { %16505 = vst [vmem:[#allocation73_spill] sm:$0xff] %v15408_v18  ;;  %11203 = vmatpush1.bf16.msra.mxu0 %v15381_v2  ;;  %11232 = vmatpush3.bf16.msra.mxu1 %v15383_v42  ;;  %v15477_v18 = vpack.c.bf16 %v6131_v10, %v6128_v55  ;;  %v6134_v35 = vld [vmem:[%s15976_s19 + $0x158] sm:$0xff]  ;;  %v6137_v1 = vld [vmem:[%s15976_s19 + $0x170] sm:$0xff]  ;;  %v15498_v10 = vpack.c.bf16 %v6132_v43, %v6129_v63 }
0x43cf   :  { %11205 = vmatprep.subr.bf16.mxu0 %v15390_v0  ;;  %11233 = vmatprep.subr.bf16.mxu1 %v16480_v57  ;;  %16508 = vst [vmem:[#allocation76_spill] sm:$0xff] %v15449_v19 }
0x43d2   :  { %11207 = vmatpush1.bf16.msra.mxu0 %v15412_v6  ;;  %11235 = vmatpush3.bf16.msra.mxu1 %v15414_v7 }
0x43d3   :  { %11209 = vmatprep.subr.bf16.mxu0 %v15421_v46  ;;  %11236 = vmatprep.subr.bf16.mxu1 %v16480_v57 }
0x43d6   :  { %11211 = vmatpush1.bf16.msra.mxu0 %v15440_v13  ;;  %11238 = vmatpush3.bf16.msra.mxu1 %v15442_v41  ;;  %v6130_v13 = vld [vmem:[%s15976_s19 + $0x138] sm:$0xff]  ;;  %v15505_v41 = vpack.c.bf16 %v6137_v1, %v6134_v35  ;;  %v6140_v35 = vld [vmem:[%s15978_s21] sm:$0x7] }
0x43d7   :  { %11213 = vmatprep.subr.bf16.mxu0 %v15449_v19  ;;  %11239 = vmatprep.subr.bf16.mxu1 %v16480_v57  ;;  %v15496_v55 = vpack.c.bf16 %v6130_v13, %v6127_v17  ;;  %v6133_v19 = vld [vmem:[%s15976_s19 + $0x150] sm:$0xff]  ;;  %v6135_v13 = vld [vmem:[%s15976_s19 + $0x160] sm:$0xff]  ;;  %v6138_v17 = vld [vmem:[%s15976_s19 + $0x178] sm:$0xff] }
0x43d8   :  { %v15520_v43 = vpack.c.bf16 %v6138_v17, %v6135_v13  ;;  %v6139_v1 = vld [vmem:[%s15979_s20] sm:$0x7]  ;;  %v6564_v17 = vrot.slane %v6140_v35, %v16484_v48 }
0x43d9   :  { %v6407_v13 = vrot.slane %v6139_v1, %v16484_v48 }
0x43da   :  { %11215 = vmatpush1.bf16.msra.mxu0 %v15468_v11  ;;  %11241 = vmatpush3.bf16.msra.mxu1 %v15470_v3  ;;  %v6136_v11 = vld [vmem:[%s15976_s19 + $0x168] sm:$0xff] }
0x43db   :  { %11217 = vmatprep.subr.bf16.mxu0 %v15477_v18  ;;  %11242 = vmatprep.subr.bf16.mxu1 %v16480_v57  ;;  %v15518_v63 = vpack.c.bf16 %v6136_v11, %v6133_v19 }
0x43de   :  { %11219 = vmatpush1.bf16.msra.mxu0 %v15496_v55  ;;  %11244 = vmatpush3.bf16.msra.mxu1 %v15498_v10 }
0x43df   :  { %11221 = vmatprep.subr.bf16.mxu0 %v15505_v41  ;;  %11245 = vmatprep.subr.bf16.mxu1 %v16480_v57 }
0x43e2   :  { %11223 = vmatpush1.bf16.msra.mxu0 %v15518_v63  ;;  %11247 = vmatpush3.bf16.msra.mxu1 %v15520_v43 }
0x43e3   :  { %11249 = vmatprep.subr.bf16.mxu0 %v15040_v9  ;;  %11280 = vmatprep.subr.bf16.mxu1 %v16480_v57 }
0x43e5   :  { %6641 = vmatmul.mubr.f32.vlgmr.msra.gmra.mrb[86].mxu0 %v15291_v8  ;;  %9412 = vmatmul.mubr.f32.vlgmr.msra.gmra.mrb[84].mxu1 %v15291_v8 }
0x43e6   :  { %11251 = vmatpush1.bf16.msra.mxu0 %v15051_v15  ;;  %11282 = vmatpush3.bf16.msra.mxu1 %v15053_v52 }
0x43e7   :  { %11253 = vmatprep.subr.bf16.mxu0 %v15065_v50  ;;  %11283 = vmatprep.subr.bf16.mxu1 %v16480_v57 }
0x43e8   :  { %6968 = vmatprep.mubr.f32.mxu0 %v16479_v31  ;;  %9446 = vmatprep.mubr.msk.f32.mxu1 %vm12003_vm0, %v16479_v31 }
0x43ea   :  { %11255 = vmatpush1.bf16.msra.mxu0 %v15078_v5  ;;  %11285 = vmatpush3.bf16.msra.mxu1 %v15080_v23 }
0x43eb   :  { %11257 = vmatprep.subr.bf16.mxu0 %v15093_v38  ;;  %11286 = vmatprep.subr.bf16.mxu1 %v16480_v57 }
0x43ee   :  { %11259 = vmatpush1.bf16.msra.mxu0 %v15112_v28  ;;  %11288 = vmatpush3.bf16.msra.mxu1 %v15114_v16 }
0x43ef   :  { %11261 = vmatprep.subr.bf16.mxu0 %v15121_v58  ;;  %11289 = vmatprep.subr.bf16.mxu1 %v16480_v57 }
0x43f2   :  { %11263 = vmatpush1.bf16.msra.mxu0 %v15134_v47  ;;  %11291 = vmatpush3.bf16.msra.mxu1 %v15136_v12 }
0x43f3   :  { %11265 = vmatprep.subr.bf16.mxu0 %v15152_v24  ;;  %11292 = vmatprep.subr.bf16.mxu1 %v16480_v57 }
0x43f6   :  { %11267 = vmatpush1.bf16.msra.mxu0 %v15164_v45  ;;  %11294 = vmatpush3.bf16.msra.mxu1 %v15170_v34 }
0x43f7   :  { %11269 = vmatprep.subr.bf16.mxu0 %v15180_v60  ;;  %11295 = vmatprep.subr.bf16.mxu1 %v16480_v57 }
0x43fa   :  { %11271 = vmatpush1.bf16.msra.mxu0 %v15192_v27  ;;  %11297 = vmatpush3.bf16.msra.mxu1 %v15198_v22 }
0x43fb   :  { %11273 = vmatprep.subr.bf16.mxu0 %v15208_v32  ;;  %11298 = vmatprep.subr.bf16.mxu1 %v16480_v57 }
0x43fe   :  { %11275 = vmatpush1.bf16.msra.mxu0 %v15220_v51  ;;  %11300 = vmatpush3.bf16.msra.mxu1 %v15226_v25 }
0x43ff   :  { %11277 = vmatprep.subr.bf16.mxu0 %v15236_v53  ;;  %11301 = vmatprep.subr.bf16.mxu1 %v16480_v57 }
0x4402   :  { %11279 = vmatpush1.bf16.msra.mxu0 %v15248_v36  ;;  %11303 = vmatpush3.bf16.msra.mxu1 %v15254_v14  ;;  %v6411_v14 = vrot.slane %v6139_v1, %v16485_v59  ;;  %v15575_v36 = vadd.f32 %v6564_v17, %v6407_v13  ;;  %v15582_v13 = vrot.slane %v6140_v35, %v16503_v37 }
0x4403   :  { %11305 = vmatprep.subr.bf16.mxu0 %v15264_v49  ;;  %11336 = vmatprep.subr.bf16.mxu1 %v16480_v57  ;;  %v6568_v49 = vrot.slane %v6140_v35, %v16485_v59 }
0x4405   :  { %v15577_v25 = vadd.f32 %v6568_v49, %v6411_v14  ;;  %v15585_v14 = vrot.slane %v6139_v1, %v16503_v37 }
0x4407   :  { %16510 = vst [vmem:[#allocation62_spill] sm:$0xff] %v15577_v25 }
0x4498   :  { %v6556_v19 = vpop.f32.mrb[82].mxu1 }
0x4499   :  { %v9378_v11 = vpop.f32.mrb[83].mxu1 }
0x44b8   :  { %v6642_v53 = vpop.f32.mrb[86].mxu0  ;;  %v6713_v11 = vpop.f32.mrb[84].mxu1 }
0x44b9   :  { %v11585_v51 = vadd.f32 %v15575_v36, %v6642_v53  ;;  %v6644_v32 = vpop.f32.mrb[87].mxu0  ;;  %v9413_v22 = vpop.f32.mrb[85].mxu1  ;;  %v6714_v53 = vadd.f32 %v6713_v11, %v15582_v13 }
0x44ba   :  { %v11587_v60 = vadd.f32 %v15577_v25, %v6644_v32 }
0x44bb   :  { %v8420_v27 = vmul.f32 -1.442695, %v11585_v51  ;;  %v6557_v51 = vadd.f32 %v6556_v19, %v15585_v14 }
0x44bc   :  { %v8421_v34 = vmul.f32 -1.442695, %v11587_v60 }
0x44bd   :  { %11925 = vpow2.f32 %v8420_v27 }
0x44be   :  { %11927 = vpow2.f32 %v8421_v34  ;;  %v12007_v34 = vmov 1966171168  }
0x44c7   :  { %v11926_v45 = vpop.eup %11925 }
0x44c8   :  { %v6721_v24 = vadd.f32 1.0, %v11926_v45  ;;  %v11928_v12 = vpop.eup %11927  ;;  %v6740_v45 = vunpack.c.l.s4 %v12007_v34 }
0x44c9   :  { %v6728_v49 = vadd.f32 1.0, %v11928_v12 }
0x44ca   :  { %11929 = vrcp.f32 %v6721_v24  ;;  %v6741_v27 = vunpack.c.0.s8 %v6740_v45 }
0x44cb   :  { %11931 = vrcp.f32 %v6728_v49 }
0x44cc   :  { %v15591_v12 = vsub.s32 %v6741_v27, %v16482_v40 }
0x44d4   :  { %v11930_v22 = vpop.eup %11929 }
0x44d5   :  { %v6731_v32 = vmul.f32 %v11930_v22, %v6714_v53  ;;  %v11932_v24 = vpop.eup %11931 }
0x44d6   :  { %v6734_v17 = vsub.f32 1.0, %v11932_v24  ;;  %v6736_v37 = vmul.f32 %v11932_v24, %v15291_v8 }
0x44d7   :  { %v6732_v60 = vadd.f32 %v6731_v32, %v6557_v51 }
0x44d9   :  { %11933 = vtanh.f32 %v6732_v60 }
0x44e3   :  { %v11934_v35 = vpop.eup %11933 }
0x44e4   :  { %v6735_v25 = vmul.f32 %v11934_v35, %v6734_v17 }
0x44e6   :  { %v15593_v1 = vadd.f32 %v6736_v37, %v6735_v25 }
0x44e8   :  { %v6745_v19 = vrot.slane %v15593_v1, %v15591_v12 }
0x44ea   :  { %v6753_v11 = vrot.slane %v6745_v19, %v15591_v12  ;;  %v6746_v49 = vcombine.high %v6745_v19, %v6745_v19 }
0x44ec   :  { %v6764_v53 = vrot.slane %v6753_v11, %v16484_v48  ;;  %v6760_v22 = vrot.slane %v6746_v49, %v15591_v12 }
0x44ee   :  { %v6771_v51 = vmul.f32 %v6764_v53, %v15005_v4  ;;  %v6768_v32 = vrot.slane %v6760_v22, %v16484_v48 }
0x44f0   :  { %6773 = vadd.xlane.f32.xlu0 %v6771_v51  ;;  %v6772_v40 = vmul.f32 %v15003_v39, %v6768_v32 }
0x44f2   :  { %6775 = vadd.xlane.f32.xlu1 %v6772_v40 }
0x457d   :  { %v6774_v25 = vpop.xlane.xlu0 %6773 }
0x457e   :  { %v6782_v60 = vrot.slane %v6774_v25, %v14989_v26 }
0x457f   :  { %v6776_v8 = vpop.xlane.xlu1 %6775 }
0x4580   :  { %v6786_v34 = vrot.slane %v6776_v8, %v14989_v26 }
0x4582   :  { %v6787_v45 = vsel %vm6165_vm8, %v6786_v34, %v6782_v60 }
0x4583   :  { %v6789_v24 = vsel %vm6168_vm9, %v6787_v45, -inf }
0x4584   :  { %6790 = vmax.xlane.f32.xlu1 %v6789_v24 }
0x4611   :  { %v6791_v27 = vpop.xlane.xlu1 %6790 }
0x4612   :  { %v6796_v17 = vrot.slane %v6791_v27, %v16484_v48  ;;  %v6800_v35 = vrot.slane %v6791_v27, %v16485_v59 }
0x4614   :  { %v6803_v37 = vsub.f32 %v6774_v25, %v6796_v17  ;;  %v6804_v19 = vsub.f32 %v6776_v8, %v6800_v35 }
0x4616   :  { %v6805_v11 = vmul.f32 1.442695, %v6803_v37  ;;  %v6807_v49 = vmul.f32 1.442695, %v6804_v19 }
0x4618   :  { %11935 = vpow2.f32 %v6805_v11 }
0x4619   :  { %11937 = vpow2.f32 %v6807_v49 }
0x4622   :  { %v11936_v53 = vpop.eup %11935 }
0x4623   :  { %v11938_v22 = vpop.eup %11937  ;;  %6812 = vperm.xlu1 %11626, %v11936_v53  }
0x4624   :  { %6815 = vperm.xlu0 %11625, %v11938_v22  }
0x46a2   :  { %v6813_v51 = vpop.permute.xlu1 %6812 }
0x46a3   :  { %v6816_v32 = vpop.permute.xlu0 %6815  ;;  %v6820_v40 = vrot.slane %v6813_v51, %v14989_v26 }
0x46a4   :  { %v6824_v60 = vrot.slane %v6816_v32, %v14989_v26 }
0x46a6   :  { %v6825_v34 = vsel %vm6165_vm8, %v6824_v60, %v6820_v40 }
0x46a7   :  { %v6827_v45 = vsel %vm6168_vm9, %v6825_v34, 0.0 }
0x46a8   :  { %6828 = vadd.xlane.f32.xlu1 %v6827_v45 }
0x4735   :  { %v6829_v25 = vpop.xlane.xlu1 %6828 }
0x4736   :  { %v6834_v8 = vrot.slane %v6829_v25, %v16484_v48  ;;  %v6838_v24 = vrot.slane %v6829_v25, %v16485_v59 }
0x4738   :  { %11939 = vrcp.f32 %v6834_v8 }
0x4739   :  { %11941 = vrcp.f32 %v6838_v24 }
0x4742   :  { %v11940_v27 = vpop.eup %11939 }
0x4743   :  { %v6842_v17 = vmul.f32 %v11940_v27, %v11936_v53  ;;  %v11942_v35 = vpop.eup %11941 }
0x4744   :  { %v6844_v37 = vmul.f32 %v11942_v35, %v11938_v22  ;;  %v6869_v22 = vrot.slane %v15593_v1, 1 }
0x4745   :  { %6847 = vperm.xlu0 %11625, %v6842_v17  }
0x4749   :  { %6852 = vperm.xlu0 %11625, %v6844_v37  }
0x47c4   :  { %v6848_v19 = vpop.permute.xlu0 %6847 }
0x47c5   :  { %v6855_v11 = vmul.f32 %v6848_v19, %v15005_v4 }
0x47c7   :  { %v6857_v49 = vrot.slane %v6855_v11, 4 }
0x47c8   :  { %v6853_v51 = vpop.permute.xlu0 %6852 }
0x47c9   :  { %v6858_v32 = vadd.f32 %v6857_v49, %v6855_v11  ;;  %v6856_v40 = vmul.f32 %v15003_v39, %v6853_v51  ;;  %v6891_v49 = vmul.f32 %v15593_v1, %v15277_v44 }
0x47cb   :  { %v6859_v60 = vrot.slane %v6858_v32, 2  ;;  %v6863_v34 = vrot.slane %v6856_v40, 4 }
0x47cd   :  { %v6860_v45 = vadd.f32 %v6859_v60, %v6858_v32  ;;  %v6864_v25 = vadd.f32 %v6863_v34, %v6856_v40 }
0x47cf   :  { %v6865_v8 = vrot.slane %v6864_v25, 2  ;;  %v6861_v24 = vrot.slane %v6860_v45, 1 }
0x47d1   :  { %v6866_v59 = vadd.f32 %v6865_v8, %v6864_v25  ;;  %v6862_v27 = vadd.f32 %v6861_v24, %v6860_v45  ;;  %v6895_v24 = vsel %vm6392_vm10, %v6891_v49, 0.0  ;;  %v16515_v49 = vld [vmem:[#allocation61_spill] sm:$0xff] }
0x47d3   :  { %v6867_v53 = vrot.slane %v6866_v59, 1  ;;  %v6872_v51 = vsub.f32 %v6862_v27, %v15593_v1  ;;  %v6874_v32 = vmul.f32 %v6862_v27, %v15593_v1 }
0x47d5   :  { %v6868_v17 = vadd.f32 %v6867_v53, %v6866_v59 }
0x47d7   :  { %v6873_v35 = vsub.f32 %v6868_v17, %v6869_v22  ;;  %v6875_v37 = vmul.f32 %v6869_v22, %v6868_v17  ;;  %v6878_v19 = vsel %vm6165_vm8, %v6868_v17, %v6862_v27 }
0x47d8   :  { %v6890_v11 = vmul.f32 %v6878_v19, %v15303_v29  ;;  %6969 = vmatmul.mubr.f32.vlgmr.msra.gmra.mrb[88].mxu0 %v6878_v19  ;;  %9447 = vmatmul.mubr.f32.vlgmr.msra.gmra.mrb[86].mxu1 %v6878_v19  ;;  %v16513_v19 = vld [vmem:[#allocation75_spill] sm:$0xff] }
0x47d9   :  { %v6882_v40 = vrot.slane %v6873_v35, 7  ;;  %v6887_v60 = vrot.slane %v6875_v37, 7  ;;  %11307 = vmatpush1.bf16.msra.mxu0 %v15305_v21  ;;  %11338 = vmatpush3.bf16.msra.mxu1 %v15307_v20  ;;  %v16512_v37 = vld [vmem:[#allocation74_spill] sm:$0xff] }
0x47da   :  { %v6894_v59 = vsel %vm6392_vm10, %v6890_v11, 0.0  ;;  %11309 = vmatprep.subr.bf16.mxu0 %v15322_v54  ;;  %11339 = vmatprep.subr.bf16.mxu1 %v16480_v57  ;;  %v16514_v11 = vld [vmem:[#allocation76_spill] sm:$0xff] }
0x47db   :  { %7109 = vmatprep.mubr.f32.mxu0 %v16479_v31  ;;  %9481 = vmatprep.mubr.msk.f32.mxu1 %vm12003_vm0, %v16479_v31  ;;  %v6883_v34 = vsel %vm6165_vm8, %v6882_v40, %v6872_v51  ;;  %v6888_v45 = vsel %vm6165_vm8, %v6887_v60, %v6874_v32  ;;  %v6896_v53 = vadd.f32 %v6895_v24, %v6894_v59  ;;  %v16516_v51 = vld [vmem:[#allocation20_spill] sm:$0xff]  ;;  %v16517_v32 = vld [vmem:[#allocation21_spill] sm:$0xff]  ;;  %v16518_v40 = vld [vmem:[#allocation22_spill] sm:$0xff] }
0x47dc   :  { %v6892_v25 = vmul.f32 %v6883_v34, %v15300_v61  ;;  %v6893_v8 = vmul.f32 %v6888_v45, %v15319_v62  ;;  %v16519_v60 = vld [vmem:[#allocation23_spill] sm:$0xff]  ;;  %v16520_v59 = vld [vmem:[#allocation24_spill] sm:$0xff]  ;;  %v16521_v34 = vld [vmem:[#allocation25_spill] sm:$0xff] }
0x47dd   :  { %11311 = vmatpush1.bf16.msra.mxu0 %v15341_v30  ;;  %11341 = vmatpush3.bf16.msra.mxu1 %v15345_v33  ;;  %v16522_v45 = vld [vmem:[#allocation26_spill] sm:$0xff]  ;;  %v16525_v24 = vld [vmem:[#allocation29_spill] sm:$0xff] }
0x47de   :  { %11313 = vmatprep.subr.bf16.mxu0 %v15355_v56  ;;  %11342 = vmatprep.subr.bf16.mxu1 %v16480_v57  ;;  %v6897_v27 = vsel %vm6392_vm10, %v6892_v25, 0.0  ;;  %v6899_v17 = vsel %vm6392_vm10, %v6893_v8, 0.0  ;;  %v16523_v25 = vld [vmem:[#allocation27_spill] sm:$0xff]  ;;  %v16524_v8 = vld [vmem:[#allocation28_spill] sm:$0xff] }
0x47df   :  { %v6898_v22 = vadd.f32 %v6897_v27, %v6896_v53  ;;  %v16526_v53 = vld [vmem:[#allocation69_spill] sm:$0xff]  ;;  %v16527_v27 = vld [vmem:[#allocation70_spill] sm:$0xff] }
0x47e1   :  { %11315 = vmatpush1.bf16.msra.mxu0 %v15381_v2  ;;  %11344 = vmatpush3.bf16.msra.mxu1 %v15383_v42  ;;  %v15645_v35 = vadd.f32 %v6899_v17, %v6898_v22  ;;  %v16528_v22 = vld [vmem:[#allocation71_spill] sm:$0xff]  ;;  %v16529_v17 = vld [vmem:[#allocation72_spill] sm:$0xff] }
0x47e2   :  { %11317 = vmatprep.subr.bf16.mxu0 %v15390_v0  ;;  %11345 = vmatprep.subr.bf16.mxu1 %v16480_v57 }
0x47e3   :  { %16511 = vst [vmem:[#allocation63_spill] sm:$0xff] %v15645_v35 }
0x47e5   :  { %11319 = vmatpush1.bf16.msra.mxu0 %v15412_v6  ;;  %11347 = vmatpush3.bf16.msra.mxu1 %v15414_v7 }
0x47e6   :  { %11321 = vmatprep.subr.bf16.mxu0 %v15421_v46  ;;  %11348 = vmatprep.subr.bf16.mxu1 %v16480_v57 }
0x47e9   :  { %11323 = vmatpush1.bf16.msra.mxu0 %v16512_v37  ;;  %11350 = vmatpush3.bf16.msra.mxu1 %v16513_v19 }
0x47ea   :  { %11325 = vmatprep.subr.bf16.mxu0 %v16514_v11  ;;  %11351 = vmatprep.subr.bf16.mxu1 %v16480_v57 }
0x47ed   :  { %11327 = vmatpush1.bf16.msra.mxu0 %v16515_v49  ;;  %11353 = vmatpush3.bf16.msra.mxu1 %v15470_v3 }
0x47ee   :  { %11329 = vmatprep.subr.bf16.mxu0 %v15477_v18  ;;  %11354 = vmatprep.subr.bf16.mxu1 %v16480_v57 }
0x47f1   :  { %11331 = vmatpush1.bf16.msra.mxu0 %v15496_v55  ;;  %11356 = vmatpush3.bf16.msra.mxu1 %v15498_v10 }
0x47f2   :  { %11333 = vmatprep.subr.bf16.mxu0 %v15505_v41  ;;  %11357 = vmatprep.subr.bf16.mxu1 %v16480_v57 }
0x47f5   :  { %11335 = vmatpush1.bf16.msra.mxu0 %v15518_v63  ;;  %11359 = vmatpush3.bf16.msra.mxu1 %v15520_v43 }
0x47f6   :  { %11361 = vmatprep.subr.bf16.mxu0 %v15040_v9  ;;  %11392 = vmatprep.subr.bf16.mxu1 %v16480_v57 }
0x47f8   :  { %7110 = vmatmul.mubr.f32.vlgmr.msra.gmra.mrb[88].mxu0 %v15593_v1  ;;  %9482 = vmatmul.mubr.f32.vlgmr.msra.gmra.mrb[88].mxu1 %v15593_v1 }
0x47f9   :  { %11363 = vmatpush1.bf16.msra.mxu0 %v15051_v15  ;;  %11394 = vmatpush3.bf16.msra.mxu1 %v15053_v52 }
0x47fa   :  { %11365 = vmatprep.subr.bf16.mxu0 %v15065_v50  ;;  %11395 = vmatprep.subr.bf16.mxu1 %v16480_v57 }
0x47fb   :  { %7437 = vmatprep.mubr.f32.mxu0 %v16479_v31  ;;  %9516 = vmatprep.mubr.msk.f32.mxu1 %vm12003_vm0, %v16479_v31 }
0x47fd   :  { %11367 = vmatpush1.bf16.msra.mxu0 %v15078_v5  ;;  %11397 = vmatpush3.bf16.msra.mxu1 %v15080_v23 }
0x47fe   :  { %11369 = vmatprep.subr.bf16.mxu0 %v15093_v38  ;;  %11398 = vmatprep.subr.bf16.mxu1 %v16480_v57 }
0x4801   :  { %11371 = vmatpush1.bf16.msra.mxu0 %v15112_v28  ;;  %11400 = vmatpush3.bf16.msra.mxu1 %v15114_v16 }
0x4802   :  { %11373 = vmatprep.subr.bf16.mxu0 %v15121_v58  ;;  %11401 = vmatprep.subr.bf16.mxu1 %v16480_v57 }
0x4805   :  { %11375 = vmatpush1.bf16.msra.mxu0 %v15134_v47  ;;  %11403 = vmatpush3.bf16.msra.mxu1 %v16516_v51 }
0x4806   :  { %11377 = vmatprep.subr.bf16.mxu0 %v16517_v32  ;;  %11404 = vmatprep.subr.bf16.mxu1 %v16480_v57 }
0x4809   :  { %11379 = vmatpush1.bf16.msra.mxu0 %v16518_v40  ;;  %11406 = vmatpush3.bf16.msra.mxu1 %v16519_v60 }
0x480a   :  { %11381 = vmatprep.subr.bf16.mxu0 %v16520_v59  ;;  %11407 = vmatprep.subr.bf16.mxu1 %v16480_v57 }
0x480d   :  { %11383 = vmatpush1.bf16.msra.mxu0 %v16521_v34  ;;  %11409 = vmatpush3.bf16.msra.mxu1 %v16522_v45 }
0x480e   :  { %11385 = vmatprep.subr.bf16.mxu0 %v16523_v25  ;;  %11410 = vmatprep.subr.bf16.mxu1 %v16480_v57 }
0x4811   :  { %11387 = vmatpush1.bf16.msra.mxu0 %v16524_v8  ;;  %11412 = vmatpush3.bf16.msra.mxu1 %v16525_v24 }
0x4812   :  { %11389 = vmatprep.subr.bf16.mxu0 %v16526_v53  ;;  %11413 = vmatprep.subr.bf16.mxu1 %v16480_v57  ;;  %v16530_v53 = vld [vmem:[#allocation62_spill] sm:$0xff] }
0x4815   :  { %11391 = vmatpush1.bf16.msra.mxu0 %v16527_v27  ;;  %11415 = vmatpush3.bf16.msra.mxu1 %v16528_v22 }
0x4816   :  { %11417 = vmatprep.subr.bf16.mxu0 %v16529_v17  ;;  %11448 = vmatprep.subr.bf16.mxu1 %v16480_v57 }
0x48ab   :  { %v7041_v35 = vpop.f32.mrb[86].mxu1 }
0x48ac   :  { %v9448_v25 = vpop.f32.mrb[87].mxu1  ;;  %v7042_v58 = vadd.f32 %v7041_v35, %v15585_v14 }
0x48cb   :  { %v7111_v45 = vpop.f32.mrb[88].mxu0  ;;  %v7182_v34 = vpop.f32.mrb[88].mxu1 }
0x48cc   :  { %v11589_v8 = vadd.f32 %v15575_v36, %v7111_v45  ;;  %v7113_v59 = vpop.f32.mrb[89].mxu0  ;;  %v9483_v24 = vpop.f32.mrb[89].mxu1  ;;  %v7183_v47 = vadd.f32 %v7182_v34, %v15582_v13 }
0x48cd   :  { %v11591_v40 = vadd.f32 %v16530_v53, %v7113_v59 }
0x48ce   :  { %v8422_v60 = vmul.f32 -1.442695, %v11589_v8 }
0x48cf   :  { %v8423_v32 = vmul.f32 -1.442695, %v11591_v40 }
0x48d0   :  { %11943 = vpow2.f32 %v8422_v60 }
0x48d1   :  { %11945 = vpow2.f32 %v8423_v32 }
0x48da   :  { %v11944_v27 = vpop.eup %11943 }
0x48db   :  { %v7190_v22 = vadd.f32 1.0, %v11944_v27  ;;  %v11946_v17 = vpop.eup %11945 }
0x48dc   :  { %v7197_v51 = vadd.f32 1.0, %v11946_v17 }
0x48dd   :  { %11947 = vrcp.f32 %v7190_v22 }
0x48de   :  { %11949 = vrcp.f32 %v7197_v51 }
0x48e7   :  { %v11948_v25 = vpop.eup %11947 }
0x48e8   :  { %v7200_v16 = vmul.f32 %v11948_v25, %v7183_v47  ;;  %v11950_v8 = vpop.eup %11949 }
0x48e9   :  { %v7203_v24 = vsub.f32 1.0, %v11950_v8  ;;  %v7205_v32 = vmul.f32 %v11950_v8, %v15593_v1 }
0x48ea   :  { %v7201_v45 = vadd.f32 %v7200_v16, %v7042_v58 }
0x48ec   :  { %11951 = vtanh.f32 %v7201_v45 }
0x48f6   :  { %v11952_v59 = vpop.eup %11951 }
0x48f7   :  { %v7204_v60 = vmul.f32 %v11952_v59, %v7203_v24 }
0x48f9   :  { %v15711_v40 = vadd.f32 %v7205_v32, %v7204_v60  ;;  %v16531_v32 = vld [vmem:[#allocation3_spill] sm:$0xff] }
0x48fb   :  { %v7214_v27 = vrot.slane %v15711_v40, %v15591_v12 }
0x48fd   :  { %v7222_v34 = vrot.slane %v7214_v27, %v15591_v12  ;;  %v7215_v22 = vcombine.high %v7214_v27, %v7214_v27 }
0x48ff   :  { %v7233_v35 = vrot.slane %v7222_v34, %v16484_v48  ;;  %v7229_v47 = vrot.slane %v7215_v22, %v15591_v12 }
0x4901   :  { %v7240_v16 = vmul.f32 %v7233_v35, %v15005_v4  ;;  %v7237_v58 = vrot.slane %v7229_v47, %v16484_v48 }
0x4903   :  { %7242 = vadd.xlane.f32.xlu0 %v7240_v16  ;;  %v7241_v51 = vmul.f32 %v15003_v39, %v7237_v58 }
0x4905   :  { %7244 = vadd.xlane.f32.xlu1 %v7241_v51 }
0x4990   :  { %v7243_v1 = vpop.xlane.xlu0 %7242 }
0x4991   :  { %v7251_v25 = vrot.slane %v7243_v1, %v14989_v26 }
0x4992   :  { %v7245_v17 = vpop.xlane.xlu1 %7244 }
0x4993   :  { %v7255_v45 = vrot.slane %v7245_v17, %v14989_v26 }
0x4995   :  { %v7256_v8 = vsel %vm6165_vm8, %v7255_v45, %v7251_v25 }
0x4996   :  { %v7258_v24 = vsel %vm6168_vm9, %v7256_v8, -inf }
0x4997   :  { %7259 = vmax.xlane.f32.xlu1 %v7258_v24 }
0x4a24   :  { %v7260_v59 = vpop.xlane.xlu1 %7259 }
0x4a25   :  { %v7265_v60 = vrot.slane %v7260_v59, %v16484_v48  ;;  %v7269_v27 = vrot.slane %v7260_v59, %v16531_v32 }
0x4a27   :  { %v7272_v34 = vsub.f32 %v7243_v1, %v7265_v60  ;;  %v7273_v22 = vsub.f32 %v7245_v17, %v7269_v27 }
0x4a29   :  { %v7274_v35 = vmul.f32 1.442695, %v7272_v34  ;;  %v7276_v47 = vmul.f32 1.442695, %v7273_v22 }
0x4a2b   :  { %11953 = vpow2.f32 %v7274_v35 }
0x4a2c   :  { %11955 = vpow2.f32 %v7276_v47 }
0x4a35   :  { %v11954_v16 = vpop.eup %11953 }
0x4a36   :  { %v11956_v58 = vpop.eup %11955  ;;  %7281 = vperm.xlu1 %11626, %v11954_v16  }
0x4a37   :  { %7284 = vperm.xlu0 %11625, %v11956_v58  }
0x4ab5   :  { %v7282_v51 = vpop.permute.xlu1 %7281 }
0x4ab6   :  { %v7285_v25 = vpop.permute.xlu0 %7284  ;;  %v7289_v45 = vrot.slane %v7282_v51, %v14989_v26 }
0x4ab7   :  { %v7293_v8 = vrot.slane %v7285_v25, %v14989_v26 }
0x4ab9   :  { %v7294_v24 = vsel %vm6165_vm8, %v7293_v8, %v7289_v45 }
0x4aba   :  { %v7296_v59 = vsel %vm6168_vm9, %v7294_v24, 0.0 }
0x4abb   :  { %7297 = vadd.xlane.f32.xlu1 %v7296_v59 }
0x4b48   :  { %v7298_v1 = vpop.xlane.xlu1 %7297 }
0x4b49   :  { %v7303_v17 = vrot.slane %v7298_v1, %v16484_v48  ;;  %v7307_v60 = vrot.slane %v7298_v1, %v16531_v32 }
0x4b4b   :  { %11957 = vrcp.f32 %v7303_v17 }
0x4b4c   :  { %11959 = vrcp.f32 %v7307_v60 }
0x4b55   :  { %v11958_v27 = vpop.eup %11957 }
0x4b56   :  { %v7311_v34 = vmul.f32 %v11958_v27, %v11954_v16  ;;  %v11960_v22 = vpop.eup %11959 }
0x4b57   :  { %v7313_v35 = vmul.f32 %v11960_v22, %v11956_v58  ;;  %v7338_v58 = vrot.slane %v15711_v40, 1 }
0x4b58   :  { %7316 = vperm.xlu0 %11625, %v7311_v34  }
0x4b5c   :  { %7321 = vperm.xlu0 %11625, %v7313_v35  }
0x4bd7   :  { %v7317_v47 = vpop.permute.xlu0 %7316 }
0x4bd8   :  { %v7324_v51 = vmul.f32 %v7317_v47, %v15005_v4 }
0x4bda   :  { %v7326_v25 = vrot.slane %v7324_v51, 4 }
0x4bdb   :  { %v7322_v45 = vpop.permute.xlu0 %7321 }
0x4bdc   :  { %v7327_v8 = vadd.f32 %v7326_v25, %v7324_v51  ;;  %v7325_v24 = vmul.f32 %v15003_v39, %v7322_v45  ;;  %v7360_v25 = vmul.f32 %v15711_v40, %v15277_v44 }
0x4bde   :  { %v7328_v59 = vrot.slane %v7327_v8, 2  ;;  %v7332_v26 = vrot.slane %v7325_v24, 4 }
0x4be0   :  { %v7329_v48 = vadd.f32 %v7328_v59, %v7327_v8  ;;  %v7333_v1 = vadd.f32 %v7332_v26, %v7325_v24 }
0x4be2   :  { %v7334_v17 = vrot.slane %v7333_v1, 2  ;;  %v7330_v60 = vrot.slane %v7329_v48, 1 }
0x4be4   :  { %v7335_v32 = vadd.f32 %v7334_v17, %v7333_v1  ;;  %v7331_v27 = vadd.f32 %v7330_v60, %v7329_v48  ;;  %v7364_v60 = vsel %vm6392_vm10, %v7360_v25, 0.0  ;;  %v16543_v25 = vld [vmem:[#allocation28_spill] sm:$0xff] }
0x4be6   :  { %v7336_v16 = vrot.slane %v7335_v32, 1  ;;  %v7341_v26 = vsub.f32 %v7331_v27, %v15711_v40  ;;  %v7343_v45 = vmul.f32 %v7331_v27, %v15711_v40 }
0x4be8   :  { %v7337_v34 = vadd.f32 %v7336_v16, %v7335_v32 }
0x4bea   :  { %v7342_v22 = vsub.f32 %v7337_v34, %v7338_v58  ;;  %v7344_v35 = vmul.f32 %v7338_v58, %v7337_v34  ;;  %v7347_v47 = vsel %vm6165_vm8, %v7337_v34, %v7331_v27 }
0x4beb   :  { %v7359_v51 = vmul.f32 %v7347_v47, %v15303_v29  ;;  %7438 = vmatmul.mubr.f32.vlgmr.msra.gmra.mrb[90].mxu0 %v7347_v47  ;;  %9517 = vmatmul.mubr.f32.vlgmr.msra.gmra.mrb[90].mxu1 %v7347_v47  ;;  %v16541_v47 = vld [vmem:[#allocation26_spill] sm:$0xff] }
0x4bec   :  { %v7351_v8 = vrot.slane %v7342_v22, 7  ;;  %v7356_v48 = vrot.slane %v7344_v35, 7  ;;  %11419 = vmatpush1.bf16.msra.mxu0 %v15305_v21  ;;  %11450 = vmatpush3.bf16.msra.mxu1 %v15307_v20  ;;  %v16536_v35 = vld [vmem:[#allocation21_spill] sm:$0xff] }
0x4bed   :  { %v7363_v32 = vsel %vm6392_vm10, %v7359_v51, 0.0  ;;  %11421 = vmatprep.subr.bf16.mxu0 %v15322_v54  ;;  %11451 = vmatprep.subr.bf16.mxu1 %v16480_v57  ;;  %v16542_v51 = vld [vmem:[#allocation27_spill] sm:$0xff] }
0x4bee   :  { %7578 = vmatprep.mubr.f32.mxu0 %v16479_v31  ;;  %9551 = vmatprep.mubr.msk.f32.mxu1 %vm12003_vm0, %v16479_v31  ;;  %v7352_v24 = vsel %vm6165_vm8, %v7351_v8, %v7341_v26  ;;  %v7357_v59 = vsel %vm6165_vm8, %v7356_v48, %v7343_v45  ;;  %v7365_v16 = vadd.f32 %v7364_v60, %v7363_v32  ;;  %v16544_v26 = vld [vmem:[#allocation29_spill] sm:$0xff]  ;;  %v16546_v8 = vld [vmem:[#allocation70_spill] sm:$0xff]  ;;  %v16547_v48 = vld [vmem:[#allocation71_spill] sm:$0xff] }
0x4bef   :  { %v7361_v1 = vmul.f32 %v7352_v24, %v15300_v61  ;;  %v7362_v17 = vmul.f32 %v7357_v59, %v15319_v62  ;;  %v16545_v45 = vld [vmem:[#allocation69_spill] sm:$0xff]  ;;  %v16548_v32 = vld [vmem:[#allocation72_spill] sm:$0xff] }
0x4bf0   :  { %11423 = vmatpush1.bf16.msra.mxu0 %v15341_v30  ;;  %11453 = vmatpush3.bf16.msra.mxu1 %v15345_v33 }
0x4bf1   :  { %11425 = vmatprep.subr.bf16.mxu0 %v15355_v56  ;;  %11454 = vmatprep.subr.bf16.mxu1 %v16480_v57  ;;  %v7366_v27 = vsel %vm6392_vm10, %v7361_v1, 0.0  ;;  %v7368_v34 = vsel %vm6392_vm10, %v7362_v17, 0.0 }
0x4bf2   :  { %v7367_v58 = vadd.f32 %v7366_v27, %v7365_v16 }
0x4bf4   :  { %11427 = vmatpush1.bf16.msra.mxu0 %v15381_v2  ;;  %11456 = vmatpush3.bf16.msra.mxu1 %v15383_v42  ;;  %v15763_v22 = vadd.f32 %v7368_v34, %v7367_v58 }
0x4bf5   :  { %11429 = vmatprep.subr.bf16.mxu0 %v15390_v0  ;;  %11457 = vmatprep.subr.bf16.mxu1 %v16480_v57 }
0x4bf8   :  { %11431 = vmatpush1.bf16.msra.mxu0 %v15412_v6  ;;  %11459 = vmatpush3.bf16.msra.mxu1 %v15414_v7 }
0x4bf9   :  { %11433 = vmatprep.subr.bf16.mxu0 %v15421_v46  ;;  %11460 = vmatprep.subr.bf16.mxu1 %v16480_v57 }
0x4bfc   :  { %11435 = vmatpush1.bf16.msra.mxu0 %v16512_v37  ;;  %11462 = vmatpush3.bf16.msra.mxu1 %v16513_v19 }
0x4bfd   :  { %11437 = vmatprep.subr.bf16.mxu0 %v16514_v11  ;;  %11463 = vmatprep.subr.bf16.mxu1 %v16480_v57 }
0x4c00   :  { %11439 = vmatpush1.bf16.msra.mxu0 %v16515_v49  ;;  %11465 = vmatpush3.bf16.msra.mxu1 %v15470_v3 }
0x4c01   :  { %11441 = vmatprep.subr.bf16.mxu0 %v15477_v18  ;;  %11466 = vmatprep.subr.bf16.mxu1 %v16480_v57 }
0x4c04   :  { %11443 = vmatpush1.bf16.msra.mxu0 %v15496_v55  ;;  %11468 = vmatpush3.bf16.msra.mxu1 %v15498_v10 }
0x4c05   :  { %11445 = vmatprep.subr.bf16.mxu0 %v15505_v41  ;;  %11469 = vmatprep.subr.bf16.mxu1 %v16480_v57 }
0x4c08   :  { %11447 = vmatpush1.bf16.msra.mxu0 %v15518_v63  ;;  %11471 = vmatpush3.bf16.msra.mxu1 %v15520_v43 }
0x4c09   :  { %11473 = vmatprep.subr.bf16.mxu0 %v15040_v9  ;;  %11504 = vmatprep.subr.bf16.mxu1 %v16480_v57  ;;  %v16532_v9 = vld [vmem:[#allocation17_spill] sm:$0xff] }
0x4c0b   :  { %7579 = vmatmul.mubr.f32.vlgmr.msra.gmra.mrb[90].mxu0 %v15711_v40  ;;  %9552 = vmatmul.mubr.f32.vlgmr.msra.gmra.mrb[92].mxu1 %v15711_v40 }
0x4c0c   :  { %11475 = vmatpush1.bf16.msra.mxu0 %v15051_v15  ;;  %11506 = vmatpush3.bf16.msra.mxu1 %v15053_v52  ;;  %v16533_v15 = vld [vmem:[#allocation18_spill] sm:$0xff]  ;;  %v16534_v52 = vld [vmem:[#allocation19_spill] sm:$0xff] }
0x4c0d   :  { %11477 = vmatprep.subr.bf16.mxu0 %v15065_v50  ;;  %11507 = vmatprep.subr.bf16.mxu1 %v16480_v57  ;;  %v16535_v50 = vld [vmem:[#allocation20_spill] sm:$0xff] }
0x4c0e   :  { %7906 = vmatprep.mubr.f32.mxu0 %v16479_v31  ;;  %9586 = vmatprep.mubr.msk.f32.mxu1 %vm12003_vm0, %v16479_v31 }
0x4c10   :  { %11479 = vmatpush1.bf16.msra.mxu0 %v15078_v5  ;;  %11509 = vmatpush3.bf16.msra.mxu1 %v15080_v23  ;;  %v16537_v5 = vld [vmem:[#allocation22_spill] sm:$0xff]  ;;  %v16538_v23 = vld [vmem:[#allocation23_spill] sm:$0xff] }
0x4c11   :  { %11481 = vmatprep.subr.bf16.mxu0 %v15093_v38  ;;  %11510 = vmatprep.subr.bf16.mxu1 %v16480_v57  ;;  %v16539_v38 = vld [vmem:[#allocation24_spill] sm:$0xff] }
0x4c14   :  { %11483 = vmatpush1.bf16.msra.mxu0 %v15112_v28  ;;  %11512 = vmatpush3.bf16.msra.mxu1 %v16532_v9  ;;  %v16540_v28 = vld [vmem:[#allocation25_spill] sm:$0xff] }
0x4c15   :  { %11485 = vmatprep.subr.bf16.mxu0 %v16533_v15  ;;  %11513 = vmatprep.subr.bf16.mxu1 %v16480_v57 }
0x4c18   :  { %11487 = vmatpush1.bf16.msra.mxu0 %v16534_v52  ;;  %11515 = vmatpush3.bf16.msra.mxu1 %v16535_v50 }
0x4c19   :  { %11489 = vmatprep.subr.bf16.mxu0 %v16536_v35  ;;  %11516 = vmatprep.subr.bf16.mxu1 %v16480_v57 }
0x4c1c   :  { %11491 = vmatpush1.bf16.msra.mxu0 %v16537_v5  ;;  %11518 = vmatpush3.bf16.msra.mxu1 %v16538_v23 }
0x4c1d   :  { %11493 = vmatprep.subr.bf16.mxu0 %v16539_v38  ;;  %11519 = vmatprep.subr.bf16.mxu1 %v16480_v57 }
0x4c20   :  { %11495 = vmatpush1.bf16.msra.mxu0 %v16540_v28  ;;  %11521 = vmatpush3.bf16.msra.mxu1 %v16541_v47 }
0x4c21   :  { %11497 = vmatprep.subr.bf16.mxu0 %v16542_v51  ;;  %11522 = vmatprep.subr.bf16.mxu1 %v16480_v57 }
0x4c24   :  { %11499 = vmatpush1.bf16.msra.mxu0 %v16543_v25  ;;  %11524 = vmatpush3.bf16.msra.mxu1 %v16544_v26 }
0x4c25   :  { %11501 = vmatprep.subr.bf16.mxu0 %v16545_v45  ;;  %11525 = vmatprep.subr.bf16.mxu1 %v16480_v57 }
0x4c28   :  { %11503 = vmatpush1.bf16.msra.mxu0 %v16546_v8  ;;  %11527 = vmatpush3.bf16.msra.mxu1 %v16547_v48 }
0x4c29   :  { %11529 = vmatprep.subr.bf16.mxu0 %v16548_v32  ;;  %11560 = vmatprep.subr.bf16.mxu1 %v16480_v57 }
0x4cbe   :  { %v7510_v24 = vpop.f32.mrb[90].mxu1 }
0x4cbf   :  { %v9518_v59 = vpop.f32.mrb[91].mxu1  ;;  %v7511_v38 = vadd.f32 %v7510_v24, %v15585_v14 }
0x4cde   :  { %v7580_v1 = vpop.f32.mrb[90].mxu0  ;;  %v7651_v17 = vpop.f32.mrb[92].mxu1 }
0x4cdf   :  { %v11593_v60 = vadd.f32 %v15575_v36, %v7580_v1  ;;  %v7582_v16 = vpop.f32.mrb[91].mxu0  ;;  %v9553_v27 = vpop.f32.mrb[93].mxu1  ;;  %v7652_v5 = vadd.f32 %v7651_v17, %v15582_v13  ;;  %v16549_v17 = vld [vmem:[#allocation4_spill] sm:$0xff] }
0x4ce0   :  { %v11595_v34 = vadd.f32 %v16530_v53, %v7582_v16 }
0x4ce1   :  { %v8424_v58 = vmul.f32 -1.442695, %v11593_v60 }
0x4ce2   :  { %v8425_v9 = vmul.f32 -1.442695, %v11595_v34 }
0x4ce3   :  { %11961 = vpow2.f32 %v8424_v58 }
0x4ce4   :  { %11963 = vpow2.f32 %v8425_v9  ;;  %v16550_v9 = vld [vmem:[#allocation16_spill] sm:$0xff] }
0x4ced   :  { %v11962_v15 = vpop.eup %11961 }
0x4cee   :  { %v7659_v52 = vadd.f32 1.0, %v11962_v15  ;;  %v11964_v50 = vpop.eup %11963 }
0x4cef   :  { %v7666_v35 = vadd.f32 1.0, %v11964_v50 }
0x4cf0   :  { %11965 = vrcp.f32 %v7659_v52 }
0x4cf1   :  { %11967 = vrcp.f32 %v7666_v35 }
0x4cfa   :  { %v11966_v23 = vpop.eup %11965 }
0x4cfb   :  { %v7669_v28 = vmul.f32 %v11966_v23, %v7652_v5  ;;  %v11968_v51 = vpop.eup %11967 }
0x4cfc   :  { %v7672_v25 = vsub.f32 1.0, %v11968_v51  ;;  %v7674_v8 = vmul.f32 %v11968_v51, %v15711_v40 }
0x4cfd   :  { %v7670_v47 = vadd.f32 %v7669_v28, %v7511_v38  ;;  %v16551_v38 = vld [vmem:[#allocation3_spill] sm:$0xff] }
0x4cff   :  { %11969 = vtanh.f32 %v7670_v47 }
0x4d09   :  { %v11970_v26 = vpop.eup %11969 }
0x4d0a   :  { %v7673_v45 = vmul.f32 %v11970_v26, %v7672_v25 }
0x4d0c   :  { %v15829_v48 = vadd.f32 %v7674_v8, %v7673_v45 }
0x4d0e   :  { %v7683_v32 = vrot.slane %v15829_v48, %v15591_v12 }
0x4d10   :  { %v7691_v59 = vrot.slane %v7683_v32, %v15591_v12  ;;  %v7684_v1 = vcombine.high %v7683_v32, %v7683_v32 }
0x4d12   :  { %v7702_v24 = vrot.slane %v7691_v59, %v16549_v17  ;;  %v7698_v60 = vrot.slane %v7684_v1, %v15591_v12 }
0x4d14   :  { %v7709_v16 = vmul.f32 %v7702_v24, %v15005_v4  ;;  %v7706_v27 = vrot.slane %v7698_v60, %v16549_v17 }
0x4d16   :  { %7711 = vadd.xlane.f32.xlu0 %v7709_v16  ;;  %v7710_v58 = vmul.f32 %v15003_v39, %v7706_v27 }
0x4d18   :  { %7713 = vadd.xlane.f32.xlu1 %v7710_v58 }
0x4da3   :  { %v7712_v40 = vpop.xlane.xlu0 %7711 }
0x4da4   :  { %v7720_v15 = vrot.slane %v7712_v40, %v16550_v9 }
0x4da5   :  { %v7714_v34 = vpop.xlane.xlu1 %7713 }
0x4da6   :  { %v7724_v52 = vrot.slane %v7714_v34, %v16550_v9 }
0x4da8   :  { %v7725_v50 = vsel %vm6165_vm8, %v7724_v52, %v7720_v15 }
0x4da9   :  { %v7727_v35 = vsel %vm6168_vm9, %v7725_v50, -inf }
0x4daa   :  { %7728 = vmax.xlane.f32.xlu1 %v7727_v35 }
0x4e37   :  { %v7729_v5 = vpop.xlane.xlu1 %7728 }
0x4e38   :  { %v7734_v23 = vrot.slane %v7729_v5, %v16549_v17  ;;  %v7738_v28 = vrot.slane %v7729_v5, %v16551_v38 }
0x4e3a   :  { %v7741_v47 = vsub.f32 %v7712_v40, %v7734_v23  ;;  %v7742_v51 = vsub.f32 %v7714_v34, %v7738_v28 }
0x4e3c   :  { %v7743_v25 = vmul.f32 1.442695, %v7741_v47  ;;  %v7745_v26 = vmul.f32 1.442695, %v7742_v51 }
0x4e3e   :  { %11971 = vpow2.f32 %v7743_v25 }
0x4e3f   :  { %11973 = vpow2.f32 %v7745_v26 }
0x4e48   :  { %v11972_v45 = vpop.eup %11971 }
0x4e49   :  { %v11974_v8 = vpop.eup %11973  ;;  %7750 = vperm.xlu1 %11626, %v11972_v45  }
0x4e4a   :  { %7753 = vperm.xlu0 %11625, %v11974_v8  }
0x4ec8   :  { %v7751_v32 = vpop.permute.xlu1 %7750 }
0x4ec9   :  { %v7754_v59 = vpop.permute.xlu0 %7753  ;;  %v7758_v1 = vrot.slane %v7751_v32, %v16550_v9 }
0x4eca   :  { %v7762_v24 = vrot.slane %v7754_v59, %v16550_v9 }
0x4ecc   :  { %v7763_v60 = vsel %vm6165_vm8, %v7762_v24, %v7758_v1 }
0x4ecd   :  { %v7765_v16 = vsel %vm6168_vm9, %v7763_v60, 0.0 }
0x4ece   :  { %7766 = vadd.xlane.f32.xlu1 %v7765_v16 }
0x4f5b   :  { %v7767_v27 = vpop.xlane.xlu1 %7766 }
0x4f5c   :  { %v7772_v58 = vrot.slane %v7767_v27, %v16549_v17  ;;  %v7776_v40 = vrot.slane %v7767_v27, %v16551_v38 }
0x4f5e   :  { %11975 = vrcp.f32 %v7772_v58 }
0x4f5f   :  { %11977 = vrcp.f32 %v7776_v40 }
0x4f68   :  { %v11976_v34 = vpop.eup %11975 }
0x4f69   :  { %v7780_v15 = vmul.f32 %v11976_v34, %v11972_v45  ;;  %v11978_v52 = vpop.eup %11977 }
0x4f6a   :  { %v7782_v50 = vmul.f32 %v11978_v52, %v11974_v8  ;;  %v7807_v8 = vrot.slane %v15829_v48, 1  ;;  %v7829_v52 = vmul.f32 %v15829_v48, %v15277_v44 }
0x4f6b   :  { %7785 = vperm.xlu0 %11625, %v7780_v15  }
0x4f6f   :  { %7790 = vperm.xlu0 %11625, %v7782_v50  }
0x4fea   :  { %v7786_v35 = vpop.permute.xlu0 %7785 }
0x4feb   :  { %v7793_v5 = vmul.f32 %v7786_v35, %v15005_v4 }
0x4fed   :  { %v7795_v23 = vrot.slane %v7793_v5, 4 }
0x4fee   :  { %v7791_v28 = vpop.permute.xlu0 %7790 }
0x4fef   :  { %v7796_v47 = vadd.f32 %v7795_v23, %v7793_v5  ;;  %v7794_v51 = vmul.f32 %v15003_v39, %v7791_v28 }
0x4ff1   :  { %v7797_v25 = vrot.slane %v7796_v47, 2  ;;  %v7801_v26 = vrot.slane %v7794_v51, 4 }
0x4ff3   :  { %v7798_v32 = vadd.f32 %v7797_v25, %v7796_v47  ;;  %v7802_v59 = vadd.f32 %v7801_v26, %v7794_v51 }
0x4ff5   :  { %v7803_v1 = vrot.slane %v7802_v59, 2  ;;  %v7799_v24 = vrot.slane %v7798_v32, 1 }
0x4ff7   :  { %v7804_v60 = vadd.f32 %v7803_v1, %v7802_v59  ;;  %v7800_v16 = vadd.f32 %v7799_v24, %v7798_v32 }
0x4ff9   :  { %v7805_v45 = vrot.slane %v7804_v60, 1  ;;  %v7810_v50 = vsub.f32 %v7800_v16, %v15829_v48  ;;  %v7812_v35 = vmul.f32 %v7800_v16, %v15829_v48 }
0x4ffb   :  { %v7806_v27 = vadd.f32 %v7805_v45, %v7804_v60 }
0x4ffd   :  { %v7811_v58 = vsub.f32 %v7806_v27, %v7807_v8  ;;  %v7813_v40 = vmul.f32 %v7807_v8, %v7806_v27  ;;  %v7816_v34 = vsel %vm6165_vm8, %v7806_v27, %v7800_v16 }
0x4ffe   :  { %v7828_v15 = vmul.f32 %v7816_v34, %v15303_v29  ;;  %7907 = vmatmul.mubr.f32.vlgmr.msra.gmra.mrb[92].mxu0 %v7816_v34  ;;  %9587 = vmatmul.mubr.f32.vlgmr.msra.gmra.mrb[94].mxu1 %v7816_v34 }
0x4fff   :  { %v7820_v5 = vrot.slane %v7811_v58, 7  ;;  %v7825_v23 = vrot.slane %v7813_v40, 7  ;;  %11531 = vmatpush1.bf16.msra.mxu0 %v15305_v21  ;;  %11562 = vmatpush3.bf16.msra.mxu1 %v15307_v20  ;;  %v7833_v20 = vsel %vm6392_vm10, %v7829_v52, 0.0 }
0x5000   :  { %v7832_v28 = vsel %vm6392_vm10, %v7828_v15, 0.0  ;;  %11533 = vmatprep.subr.bf16.mxu0 %v15322_v54  ;;  %11563 = vmatprep.subr.bf16.mxu1 %v16480_v57 }
0x5001   :  { %8047 = vmatprep.mubr.f32.mxu0 %v16479_v31  ;;  %9621 = vmatprep.mubr.msk.f32.mxu1 %vm12003_vm0, %v16479_v31  ;;  %v7821_v47 = vsel %vm6165_vm8, %v7820_v5, %v7810_v50  ;;  %v7826_v51 = vsel %vm6165_vm8, %v7825_v23, %v7812_v35  ;;  %v7834_v54 = vadd.f32 %v7833_v20, %v7832_v28 }
0x5002   :  { %v7830_v25 = vmul.f32 %v7821_v47, %v15300_v61  ;;  %v7831_v21 = vmul.f32 %v7826_v51, %v15319_v62 }
0x5003   :  { %11535 = vmatpush1.bf16.msra.mxu0 %v15341_v30  ;;  %11565 = vmatpush3.bf16.msra.mxu1 %v15345_v33 }
0x5004   :  { %11537 = vmatprep.subr.bf16.mxu0 %v15355_v56  ;;  %11566 = vmatprep.subr.bf16.mxu1 %v16480_v57  ;;  %v7835_v31 = vsel %vm6392_vm10, %v7830_v25, 0.0  ;;  %v7837_v32 = vsel %vm6392_vm10, %v7831_v21, 0.0 }
0x5005   :  { %v7836_v26 = vadd.f32 %v7835_v31, %v7834_v54 }
0x5007   :  { %11539 = vmatpush1.bf16.msra.mxu0 %v15381_v2  ;;  %11568 = vmatpush3.bf16.msra.mxu1 %v15383_v42  ;;  %v15881_v59 = vadd.f32 %v7837_v32, %v7836_v26 }
0x5008   :  { %11541 = vmatprep.subr.bf16.mxu0 %v15390_v0  ;;  %11569 = vmatprep.subr.bf16.mxu1 %v16480_v57 }
0x500b   :  { %11543 = vmatpush1.bf16.msra.mxu0 %v15412_v6  ;;  %11571 = vmatpush3.bf16.msra.mxu1 %v15414_v7 }
0x500c   :  { %11545 = vmatprep.subr.bf16.mxu0 %v15421_v46  ;;  %11572 = vmatprep.subr.bf16.mxu1 %v16480_v57 }
0x500f   :  { %11547 = vmatpush1.bf16.msra.mxu0 %v16512_v37  ;;  %11574 = vmatpush3.bf16.msra.mxu1 %v16513_v19 }
0x5010   :  { %11549 = vmatprep.subr.bf16.mxu0 %v16514_v11  ;;  %11575 = vmatprep.subr.bf16.mxu1 %v16480_v57 }
0x5013   :  { %11551 = vmatpush1.bf16.msra.mxu0 %v16515_v49  ;;  %11577 = vmatpush3.bf16.msra.mxu1 %v15470_v3 }
0x5014   :  { %11553 = vmatprep.subr.bf16.mxu0 %v15477_v18  ;;  %11578 = vmatprep.subr.bf16.mxu1 %v16480_v57 }
0x5017   :  { %11555 = vmatpush1.bf16.msra.mxu0 %v15496_v55  ;;  %11580 = vmatpush3.bf16.msra.mxu1 %v15498_v10 }
0x5018   :  { %11557 = vmatprep.subr.bf16.mxu0 %v15505_v41  ;;  %11581 = vmatprep.subr.bf16.mxu1 %v16480_v57 }
0x501b   :  { %11559 = vmatpush1.bf16.msra.mxu0 %v15518_v63  ;;  %11583 = vmatpush3.bf16.msra.mxu1 %v15520_v43 }
0x501e   :  { %8048 = vmatmul.mubr.f32.vlgmr.msra.gmra.mrb[92].mxu0 %v15829_v48  ;;  %9622 = vmatmul.mubr.f32.vlgmr.msra.gmra.mrb[96].mxu1 %v15829_v48 }
0x50d1   :  { %v7979_v30 = vpop.f32.mrb[94].mxu1 }
0x50d2   :  { %v9588_v33 = vpop.f32.mrb[95].mxu1  ;;  %v7980_v43 = vadd.f32 %v7979_v30, %v15585_v14 }
0x50d3   :  { %v16552_v33 = vld [vmem:[#allocation63_spill] sm:$0xff] }
0x50f1   :  { %v8049_v56 = vpop.f32.mrb[92].mxu0  ;;  %v8120_v2 = vpop.f32.mrb[96].mxu1 }
0x50f2   :  { %v11597_v42 = vadd.f32 %v15575_v36, %v8049_v56  ;;  %v8051_v0 = vpop.f32.mrb[93].mxu0  ;;  %v9623_v18 = vpop.f32.mrb[97].mxu1  ;;  %v8121_v10 = vadd.f32 %v8120_v2, %v15582_v13 }
0x50f3   :  { %v11599_v7 = vadd.f32 %v16530_v53, %v8051_v0 }
0x50f4   :  { %v8426_v6 = vmul.f32 -1.442695, %v11597_v42 }
0x50f5   :  { %v8427_v57 = vmul.f32 -1.442695, %v11599_v7  ;;  %v16553_v7 = vld [vmem:[#allocation73_spill] sm:$0xff] }
0x50f6   :  { %11979 = vpow2.f32 %v8426_v6 }
0x50f7   :  { %11981 = vpow2.f32 %v8427_v57 }
0x5100   :  { %v11980_v46 = vpop.eup %11979 }
0x5101   :  { %v8128_v41 = vadd.f32 1.0, %v11980_v46  ;;  %v11982_v3 = vpop.eup %11981 }
0x5102   :  { %v8135_v55 = vadd.f32 1.0, %v11982_v3 }
0x5103   :  { %11983 = vrcp.f32 %v8128_v41 }
0x5104   :  { %11985 = vrcp.f32 %v8135_v55 }
0x510d   :  { %v11984_v63 = vpop.eup %11983 }
0x510e   :  { %v8138_v37 = vmul.f32 %v11984_v63, %v8121_v10  ;;  %v11986_v19 = vpop.eup %11985 }
0x510f   :  { %v8141_v11 = vsub.f32 1.0, %v11986_v19  ;;  %v8143_v1 = vmul.f32 %v11986_v19, %v15829_v48 }
0x5110   :  { %v8139_v36 = vadd.f32 %v8138_v37, %v7980_v43 }
0x5112   :  { %11987 = vtanh.f32 %v8139_v36 }
0x511c   :  { %v11988_v49 = vpop.eup %11987 }
0x511d   :  { %v8142_v53 = vmul.f32 %v11988_v49, %v8141_v11 }
0x511f   :  { %v15910_v24 = vadd.f32 %v8143_v1, %v8142_v53 }
0x5121   :  { %v8152_v60 = vrot.slane %v15910_v24, %v15591_v12  ;;  %v8276_v37 = vrot.slane %v15910_v24, 1 }
0x5123   :  { %v8160_v13 = vrot.slane %v8152_v60, %v15591_v12  ;;  %v8153_v45 = vcombine.high %v8152_v60, %v8152_v60  ;;  %v8298_v60 = vmul.f32 %v15910_v24, %v15277_v44 }
0x5125   :  { %v8171_v14 = vrot.slane %v8160_v13, %v16549_v17  ;;  %v8167_v16 = vrot.slane %v8153_v45, %v15591_v12  ;;  %v8302_v44 = vsel %vm6392_vm10, %v8298_v60, 0.0 }
0x5127   :  { %v8178_v8 = vmul.f32 %v8171_v14, %v15005_v4  ;;  %v8175_v27 = vrot.slane %v8167_v16, %v16549_v17 }
0x5129   :  { %8180 = vadd.xlane.f32.xlu0 %v8178_v8  ;;  %v8179_v58 = vmul.f32 %v15003_v39, %v8175_v27 }
0x512b   :  { %8182 = vadd.xlane.f32.xlu1 %v8179_v58 }
0x51b6   :  { %v8181_v48 = vpop.xlane.xlu0 %8180 }
0x51b7   :  { %v8189_v34 = vrot.slane %v8181_v48, %v16550_v9 }
0x51b8   :  { %v8183_v40 = vpop.xlane.xlu1 %8182 }
0x51b9   :  { %v8193_v15 = vrot.slane %v8183_v40, %v16550_v9 }
0x51bb   :  { %v8194_v52 = vsel %vm6165_vm8, %v8193_v15, %v8189_v34 }
0x51bc   :  { %v8196_v50 = vsel %vm6168_vm9, %v8194_v52, -inf }
0x51bd   :  { %8197 = vmax.xlane.f32.xlu1 %v8196_v50 }
0x524a   :  { %v8198_v12 = vpop.xlane.xlu1 %8197 }
0x524b   :  { %v8203_v35 = vrot.slane %v8198_v12, %v16549_v17  ;;  %v8207_v5 = vrot.slane %v8198_v12, %v16551_v38 }
0x524d   :  { %v8210_v23 = vsub.f32 %v8181_v48, %v8203_v35  ;;  %v8211_v28 = vsub.f32 %v8183_v40, %v8207_v5 }
0x524f   :  { %v8212_v47 = vmul.f32 1.442695, %v8210_v23  ;;  %v8214_v51 = vmul.f32 1.442695, %v8211_v28 }
0x5251   :  { %11989 = vpow2.f32 %v8212_v47 }
0x5252   :  { %11991 = vpow2.f32 %v8214_v51 }
0x525b   :  { %v11990_v25 = vpop.eup %11989 }
0x525c   :  { %v11992_v21 = vpop.eup %11991  ;;  %8219 = vperm.xlu1 %11626, %v11990_v25  }
0x525d   :  { %8222 = vperm.xlu0 %11625, %v11992_v21  }
0x52db   :  { %v8220_v20 = vpop.permute.xlu1 %8219 }
0x52dc   :  { %v8223_v54 = vpop.permute.xlu0 %8222  ;;  %v8227_v31 = vrot.slane %v8220_v20, %v16550_v9 }
0x52dd   :  { %v8231_v26 = vrot.slane %v8223_v54, %v16550_v9 }
0x52df   :  { %v8232_v32 = vsel %vm6165_vm8, %v8231_v26, %v8227_v31 }
0x52e0   :  { %v8234_v30 = vsel %vm6168_vm9, %v8232_v32, 0.0 }
0x52e1   :  { %8235 = vadd.xlane.f32.xlu1 %v8234_v30 }
0x52e5   :  { %6901 = vadd.xlane.f32.xlu1 %v16552_v33 }
0x52e9   :  { %7370 = vadd.xlane.f32.xlu1 %v15763_v22 }
0x52ed   :  { %7839 = vadd.xlane.f32.xlu1 %v15881_v59 }
0x536e   :  { %v8236_v56 = vpop.xlane.xlu1 %8235 }
0x536f   :  { %v8245_v2 = vrot.slane %v8236_v56, %v16551_v38  ;;  %v8241_v42 = vrot.slane %v8236_v56, %v16549_v17 }
0x5371   :  { %11993 = vrcp.f32 %v8245_v2 }
0x5372   :  { %11995 = vrcp.f32 %v8241_v42 }
0x537b   :  { %v11994_v0 = vpop.eup %11993 }
0x537c   :  { %v8251_v9 = vmul.f32 %v11994_v0, %v11992_v21  ;;  %v11996_v18 = vpop.eup %11995 }
0x537d   :  { %v8249_v6 = vmul.f32 %v11996_v18, %v11990_v25 }
0x537e   :  { %8259 = vperm.xlu0 %11625, %v8251_v9  }
0x5382   :  { %8254 = vperm.xlu0 %11625, %v8249_v6  }
0x53a1   :  { %6400 = vadd.xlane.f32.xlu0 %v16553_v7 }
0x53fd   :  { %v8260_v57 = vpop.permute.xlu0 %8259 }
0x53fe   :  { %v8263_v22 = vmul.f32 %v15003_v39, %v8260_v57 }
0x5400   :  { %v8270_v46 = vrot.slane %v8263_v22, 4 }
0x5401   :  { %v8255_v59 = vpop.permute.xlu0 %8254 }
0x5402   :  { %v8271_v41 = vadd.f32 %v8270_v46, %v8263_v22  ;;  %v8262_v38 = vmul.f32 %v8255_v59, %v15005_v4 }
0x5404   :  { %v8272_v3 = vrot.slane %v8271_v41, 2  ;;  %v8264_v17 = vrot.slane %v8262_v38, 4 }
0x5406   :  { %v8273_v55 = vadd.f32 %v8272_v3, %v8271_v41  ;;  %v8265_v10 = vadd.f32 %v8264_v17, %v8262_v38 }
0x5408   :  { %v8274_v63 = vrot.slane %v8273_v55, 1  ;;  %v8266_v43 = vrot.slane %v8265_v10, 2 }
0x540a   :  { %v8275_v36 = vadd.f32 %v8274_v63, %v8273_v55  ;;  %v8267_v19 = vadd.f32 %v8266_v43, %v8265_v10 }
0x540c   :  { %v8280_v11 = vsub.f32 %v8275_v36, %v8276_v37  ;;  %v8282_v49 = vmul.f32 %v8276_v37, %v8275_v36  ;;  %v8268_v53 = vrot.slane %v8267_v19, 1 }
0x540e   :  { %v8269_v1 = vadd.f32 %v8268_v53, %v8267_v19  ;;  %v8289_v39 = vrot.slane %v8280_v11, 7  ;;  %v8294_v13 = vrot.slane %v8282_v49, 7 }
0x5410   :  { %v8279_v4 = vsub.f32 %v8269_v1, %v15910_v24  ;;  %v8281_v45 = vmul.f32 %v8269_v1, %v15910_v24  ;;  %v8285_v14 = vsel %vm6165_vm8, %v8275_v36, %v8269_v1 }
0x5411   :  { %v8297_v16 = vmul.f32 %v8285_v14, %v15303_v29  ;;  %v6902_v29 = vpop.xlane.xlu1 %6901 }
0x5412   :  { %v8290_v8 = vsel %vm6165_vm8, %v8289_v39, %v8279_v4  ;;  %v8295_v27 = vsel %vm6165_vm8, %v8294_v13, %v8281_v45 }
0x5413   :  { %v8299_v58 = vmul.f32 %v8290_v8, %v15300_v61  ;;  %v8300_v48 = vmul.f32 %v8295_v27, %v15319_v62  ;;  %v8301_v40 = vsel %vm6392_vm10, %v8297_v16, 0.0 }
0x5414   :  { %v8303_v34 = vadd.f32 %v8302_v44, %v8301_v40 }
0x5415   :  { %v8304_v15 = vsel %vm6392_vm10, %v8299_v58, 0.0  ;;  %v8306_v52 = vsel %vm6392_vm10, %v8300_v48, 0.0  ;;  %v7371_v5 = vpop.xlane.xlu1 %7370 }
0x5416   :  { %v8305_v24 = vadd.f32 %v8304_v15, %v8303_v34 }
0x5418   :  { %v8307_v50 = vadd.f32 %v8306_v52, %v8305_v24 }
0x5419   :  { %v7840_v61 = vpop.xlane.xlu1 %7839 }
0x541a   :  { %8308 = vadd.xlane.f32.xlu0 %v8307_v50 }
0x542e   :  { %v6401_v12 = vpop.xlane.xlu0 %6400 }
0x542f   :  { %v6903_v35 = vadd.f32 %v6902_v29, %v6401_v12 }
0x5431   :  { %v7372_v23 = vadd.f32 %v7371_v5, %v6903_v35 }
0x5433   :  { %v7841_v28 = vadd.f32 %v7840_v61, %v7372_v23 }
0x54a7   :  { %v8309_v62 = vpop.xlane.xlu0 %8308 }
0x54a8   :  { %v8310_v47 = vadd.f32 %v8309_v62, %v7841_v28 }
0x54aa   :  { %v8311_v51 = vmul.f32 0.2, %v8310_v47 }
0x54ac   :  { %8313 = vst.msk [vmem:[%s15980_s24] sm:$0x3] %vm8312_vm11, %v8311_v51 }

</bundles_post_ra>
